<compile_context>
chip_gen: v7x
topology: tpu7x:2x2x1
jax: 0.10.0
libtpu: 0.0.40
codegen_flags: <defaults>
</compile_context>

<pallas_src>
import numpy as np
import jax
import jax.numpy as jnp
from jax.experimental import pallas as pl
from jax.experimental.pallas import tpu as pltpu


# ----------------------------------------------------------------------------
# small helpers
# ----------------------------------------------------------------------------
def _round_up(x, m):
    return (x + m - 1) // m * m


def _batch_tiling(bt, max_tile=128):
    """Pad the batch (sublane) axis and pick a tile so the grid has >= 2 steps
    (keeps both v7x TensorCores busy; harmless on v5e/v6e)."""
    bt_pad = _round_up(bt, 16)
    tile = min(max_tile, bt_pad // 2)          # multiple of 8, >= 8
    bt_pad = _round_up(bt_pad, tile)
    return bt_pad, tile


def _full_spec(a):
    return pl.BlockSpec(a.shape, lambda i: (0,) * a.ndim)


def _blockdiag(a, b):
    """blockdiag([H,4H],[H,4H]) -> [2H,8H]; halves MXU pushes on the serial path."""
    za = jnp.zeros((a.shape[0], b.shape[1]), a.dtype)
    zb = jnp.zeros((b.shape[0], a.shape[1]), b.dtype)
    return jnp.concatenate([jnp.concatenate([a, za], axis=1),
                            jnp.concatenate([zb, b], axis=1)], axis=0)


def _lstm_act(gates, c, H):
    # gate layout (i, f, o, g): one sigmoid over [.., :3H], one tanh over [.., 3H:]
    sig = jax.nn.sigmoid(gates[:, :3 * H])
    g = jnp.tanh(gates[:, 3 * H:])
    c_new = sig[:, H:2 * H] * c + sig[:, :H] * g
    h_new = sig[:, 2 * H:3 * H] * jnp.tanh(c_new)
    return h_new, c_new


_VMEM_LIMIT = 64 * 1024 * 1024   # explicit scoped-VMEM budget (fits v7x physical VMEM)


# ----------------------------------------------------------------------------
# Fused encoder: 2-layer bidirectional LSTM + latent heads in one kernel.
#   grid = (num_batch_tiles,)  "parallel".  Whole time recurrence in-kernel.
#   Only the [rows, 2Z+1] heads output is written to HBM.
# ----------------------------------------------------------------------------
def _enc_kernel(x_ref, wih0_ref, b0_ref, whh0_ref, wih1_ref, b1_ref, whh1_ref,
                w_heads_ref, heads_ref, gx_scr, seq0_scr):
    T, TB, _ = x_ref.shape
    H = whh0_ref.shape[1] // 8
    unroll = T if T <= 16 else 4
    zc = jnp.zeros((TB, H), jnp.float32)

    # ---- layer-0 input projection: I=2 -> two VPU broadcast FMAs (no matmul) ----
    x = x_ref[...]                                              # (T, TB, 2) f32
    w0 = wih0_ref[...]                                          # (2, 8H)  [fwd | bwd]
    gx_scr[...] = x[:, :, 0:1] * w0[0] + x[:, :, 1:2] * w0[1] + b0_ref[...]

    # ---- layer-0 recurrence (fwd + bwd fused via block-diagonal W_hh) ----
    def step0(t, carry):
        h_f, c_f, h_b, c_b = carry
        tb = T - 1 - t
        hcat = jnp.concatenate([h_f, h_b], axis=1).astype(jnp.bfloat16)   # (TB, 2H)
        rec = jnp.dot(hcat, whh0_ref[...], preferred_element_type=jnp.float32)
        g_f = gx_scr[t, :, :4 * H] + rec[:, :4 * H]
        g_b = gx_scr[tb, :, 4 * H:] + rec[:, 4 * H:]
        h_f, c_f = _lstm_act(g_f, c_f, H)
        h_b, c_b = _lstm_act(g_b, c_b, H)
        # combined [fwd | bwd] sequence kept in VMEM only (layer-1 input).
        seq0_scr[t, :, :H] = h_f
        seq0_scr[tb, :, H:] = h_b
        return h_f, c_f, h_b, c_b

    h0_f, c0_f, h0_b, c0_b = jax.lax.fori_loop(
        0, T, step0, (zc, zc, zc, zc), unroll=unroll)

    # ---- layer-1 input projection hoisted: one big matmul over the whole chunk ----
    seq0 = seq0_scr[...].reshape(T * TB, 2 * H).astype(jnp.bfloat16)
    gx_scr[...] = (jnp.dot(seq0, wih1_ref[...], preferred_element_type=jnp.float32)
                   + b1_ref[...]).reshape(T, TB, 8 * H)

    # ---- layer-1 recurrence (fwd + bwd fused); sequence never stored ----
    def step1(t, carry):
        h_f, c_f, h_b, c_b = carry
        tb = T - 1 - t
        hcat = jnp.concatenate([h_f, h_b], axis=1).astype(jnp.bfloat16)
        rec = jnp.dot(hcat, whh1_ref[...], preferred_element_type=jnp.float32)
        g_f = gx_scr[t, :, :4 * H] + rec[:, :4 * H]
        g_b = gx_scr[tb, :, 4 * H:] + rec[:, 4 * H:]
        h_f, c_f = _lstm_act(g_f, c_f, H)
        h_b, c_b = _lstm_act(g_b, c_b, H)
        return h_f, c_f, h_b, c_b

    h1_f, c1_f, h1_b, c1_b = jax.lax.fori_loop(
        0, T, step1, (zc, zc, zc, zc), unroll=unroll)

    # ---- fused latent heads on h_n = [l0_fwd | l0_bwd | l1_fwd | l1_bwd] ----
    h_flat = jnp.concatenate([h0_f, h0_b, h1_f, h1_b], axis=1)          # (TB, 4H)
    heads_ref[...] = jnp.dot(h_flat, w_heads_ref[...],
                             preferred_element_type=jnp.float32)


def encoder_heads(P, enc_packed, w_heads, max_tile_b=128):
    """P: [T, Bt, 2] pairwise series -> heads [Bt, 2Z+1] (mu | logvar | lambda)."""
    T, Bt, _ = P.shape
    wih0, b0, whh0, wih1, b1, whh1 = enc_packed
    H = whh0.shape[0] // 2
    C = w_heads.shape[1]
    Bt_pad, TB = _batch_tiling(Bt, max_tile_b)
    if Bt_pad != Bt:
        P = jnp.pad(P, ((0, 0), (0, Bt_pad - Bt), (0, 0)))
    # TODO(synk): whole-T-in-VMEM scratch scales linearly with T (~T*TB*(8H*4+2H*4)
    # bytes); for very long sequences chunk the time axis on an "arbitrary" grid axis.
    heads = pl.pallas_call(
        _enc_kernel,
        out_shape=jax.ShapeDtypeStruct((Bt_pad, C), jnp.float32),
        grid_spec=pltpu.PrefetchScalarGridSpec(
            num_scalar_prefetch=0,
            grid=(Bt_pad // TB,),
            in_specs=[pl.BlockSpec((T, TB, 2), lambda i: (0, i, 0)),
                      _full_spec(wih0), _full_spec(b0), _full_spec(whh0),
                      _full_spec(wih1), _full_spec(b1), _full_spec(whh1),
                      _full_spec(w_heads)],
            out_specs=pl.BlockSpec((TB, C), lambda i: (i, 0)),
            scratch_shapes=[pltpu.VMEM((T, TB, 8 * H), jnp.float32),
                            pltpu.VMEM((T, TB, 2 * H), jnp.float32)],
        ),
        compiler_params=pltpu.CompilerParams(
            dimension_semantics=("parallel",),
            vmem_limit_bytes=_VMEM_LIMIT),
    )(P, wih0, b0, whh0, wih1, b1, whh1, w_heads)
    return heads[:Bt]


# ----------------------------------------------------------------------------
# Fused 2-layer unidirectional LSTM (decoder).  Layer-0 input projection is a
# VPU broadcast FMA (I=1); layer-1 input+recurrent matmuls fused into one push.
# ----------------------------------------------------------------------------
def _dec_kernel(x_ref, wih0_ref, b0_ref, whh0_ref, w1_ref, b1_ref, out_ref, gx0_scr):
    T, TB, _ = x_ref.shape
    H = whh0_ref.shape[0]
    unroll = T if T <= 16 else 4

    w0 = wih0_ref[...]                                          # (1, 4H)
    gx0_scr[...] = x_ref[...] * w0[0] + b0_ref[...]             # VPU FMA, hoisted
    b1_full = jnp.broadcast_to(b1_ref[...], (TB, 4 * H))        # hoisted broadcast

    def step(t, carry):
        h0, c0, h1, c1 = carry
        g0 = gx0_scr[t] + jnp.dot(h0.astype(jnp.bfloat16), whh0_ref[...],
                                  preferred_element_type=jnp.float32)
        h0, c0 = _lstm_act(g0, c0, H)
        x1 = jnp.concatenate([h0, h1], axis=1).astype(jnp.bfloat16)      # (TB, 2H)
        g1 = jnp.dot(x1, w1_ref[...], preferred_element_type=jnp.float32) + b1_full
        h1, c1 = _lstm_act(g1, c1, H)
        out_ref[t] = h1
        return h0, c0, h1, c1

    z = jnp.zeros((TB, H), jnp.float32)
    jax.lax.fori_loop(0, T, step, (z, z, z, z), unroll=unroll)


def decoder_lstm(x, dec_packed, max_tile_b=128):
    """x: [T, Bt, 1] -> layer-1 hidden sequence [T, Bt, H]."""
    T, Bt, _ = x.shape
    wih0, b0, whh0, w1, b1 = dec_packed
    H = whh0.shape[0]
    Bt_pad, TB = _batch_tiling(Bt, max_tile_b)
    if Bt_pad != Bt:
        x = jnp.pad(x, ((0, 0), (0, Bt_pad - Bt), (0, 0)))
    out = pl.pallas_call(
        _dec_kernel,
        out_shape=jax.ShapeDtypeStruct((T, Bt_pad, H), jnp.float32),
        grid_spec=pltpu.PrefetchScalarGridSpec(
            num_scalar_prefetch=0,
            grid=(Bt_pad // TB,),
            in_specs=[pl.BlockSpec((T, TB, 1), lambda i: (0, i, 0)),
                      _full_spec(wih0), _full_spec(b0), _full_spec(whh0),
                      _full_spec(w1), _full_spec(b1)],
            out_specs=pl.BlockSpec((T, TB, H), lambda i: (0, i, 0)),
            scratch_shapes=[pltpu.VMEM((T, TB, 4 * H), jnp.float32)],
        ),
        compiler_params=pltpu.CompilerParams(
            dimension_semantics=("parallel",),
            vmem_limit_bytes=_VMEM_LIMIT),
    )(x, wih0, b0, whh0, w1, b1)
    return out if Bt_pad == Bt else out[:, :Bt]


# ----------------------------------------------------------------------------
# Prediction MLP on transposed [features, rows] slabs (lane-dense in/out),
# tiled & parallel over rows.  Weights stored as [out, in] bf16, biases [out, 1] f32.
# ----------------------------------------------------------------------------
def _mlp_kernel(x_ref, w1_ref, b1_ref, w2_ref, b2_ref, w3_ref, b3_ref, out_ref):
    h1 = jnp.maximum(
        jnp.dot(w1_ref[...], x_ref[...], preferred_element_type=jnp.float32)
        + b1_ref[...], 0.0)
    h2 = jnp.maximum(
        jnp.dot(w2_ref[...], h1.astype(jnp.bfloat16),
                preferred_element_type=jnp.float32) + b2_ref[...], 0.0)
    out_ref[...] = (jnp.dot(w3_ref[...], h2.astype(jnp.bfloat16),
                            preferred_element_type=jnp.float32) + b3_ref[...])


def pred_mlp(x_t, mlp_params, max_tile_r=2048):
    """x_t: [F, R] transposed (bf16) features -> [R] predictions (f32)."""
    w1, b1, w2, b2, w3, b3 = mlp_params
    F_in, R = x_t.shape
    R_pad = _round_up(R, 256)
    tile = min(max_tile_r, max(128, R_pad // 2))   # grid >= 2 for v7x
    tile = (tile // 128) * 128
    R_pad = _round_up(R_pad, tile)
    if R_pad != R:
        x_t = jnp.pad(x_t, ((0, 0), (0, R_pad - R)))
    out = pl.pallas_call(
        _mlp_kernel,
        out_shape=jax.ShapeDtypeStruct((1, R_pad), jnp.float32),
        grid_spec=pltpu.PrefetchScalarGridSpec(
            num_scalar_prefetch=0,
            grid=(R_pad // tile,),
            in_specs=[pl.BlockSpec((F_in, tile), lambda i: (0, i)),
                      _full_spec(w1), _full_spec(b1), _full_spec(w2),
                      _full_spec(b2), _full_spec(w3), _full_spec(b3)],
            out_specs=pl.BlockSpec((1, tile), lambda i: (0, i)),
        ),
        compiler_params=pltpu.CompilerParams(
            dimension_semantics=("parallel",)),
    )(x_t, w1, b1, w2, b2, w3, b3)
    return out[0, :R]


# ----------------------------------------------------------------------------
# Parameter init (PyTorch-style uniform(-1/sqrt(fan), 1/sqrt(fan))) and packing
# into kernel-ready (combined / block-diagonal / bf16) form.
# ----------------------------------------------------------------------------
def _lstm_dir_params(key, in_size, hidden):
    k1, k2, k3, k4 = jax.random.split(key, 4)
    s = 1.0 / np.sqrt(hidden)
    w_ih = jax.random.uniform(k1, (in_size, 4 * hidden), jnp.float32, -s, s)
    w_hh = jax.random.uniform(k2, (hidden, 4 * hidden), jnp.float32, -s, s)
    # b = b_ih + b_hh (two independent PyTorch-style uniform draws, summed).
    b = (jax.random.uniform(k3, (1, 4 * hidden), jnp.float32, -s, s)
         + jax.random.uniform(k4, (1, 4 * hidden), jnp.float32, -s, s))
    return (w_ih, w_hh, b)


def init_params(key, enc_hidden, latent_size, dec_hidden):
    ks = jax.random.split(key, 16)

    def uni(k, shape, fan):
        s = 1.0 / np.sqrt(fan)
        return jax.random.uniform(k, shape, jnp.float32, -s, s)

    enc = {
        "l0_f": _lstm_dir_params(ks[0], 2, enc_hidden),
        "l0_b": _lstm_dir_params(ks[1], 2, enc_hidden),
        "l1_f": _lstm_dir_params(ks[2], 2 * enc_hidden, enc_hidden),
        "l1_b": _lstm_dir_params(ks[3], 2 * enc_hidden, enc_hidden),
    }
    dec = {
        "l0": _lstm_dir_params(ks[4], 1, dec_hidden),
        "l1": _lstm_dir_params(ks[5], dec_hidden, dec_hidden),
    }
    # TODO(synk): reference __init__ declares Linear(enc_hidden, latent) heads but the
    # forward flattens h_n of a 2-layer bidirectional LSTM to 4*enc_hidden; we use
    # 4*enc_hidden (the shape the forward actually produces).
    enc_feat = 4 * enc_hidden
    w_mu = uni(ks[6], (enc_feat, latent_size), enc_feat)
    w_lv = uni(ks[7], (enc_feat, latent_size), enc_feat)
    # TODO(synk): lambda head output set to 1 so that .squeeze(2) yields the documented
    # [B, E] shape for how_much_sample.
    w_lam = uni(ks[8], (enc_feat, 1), enc_feat)
    in_mlp = dec_hidden + latent_size
    # Prediction MLP weights stored as [out, in] (biases [out, 1]).
    # TODO(synk): reference's last MLP layer is `nn.Linear(1, bias=True)` (invalid);
    # implemented as Linear(32, 1) per the docstring (output squeezed on last dim).
    mlp = (uni(ks[9], (64, in_mlp), in_mlp), uni(ks[10], (64, 1), in_mlp),
           uni(ks[11], (32, 64), 64),        uni(ks[12], (32, 1), 64),
           uni(ks[13], (1, 32), 32),         uni(ks[14], (1, 1), 32))
    return {"enc": enc, "dec": dec, "w_mu": w_mu, "w_lv": w_lv,
            "w_lam": w_lam, "mlp": mlp}


def pack_params(raw):
    """Pack raw per-direction params into kernel-ready combined/bf16 form."""
    bf = jnp.bfloat16
    enc = raw["enc"]
    wih0 = jnp.concatenate([enc["l0_f"][0], enc["l0_b"][0]], axis=1)             # (2,8H) f32 (VPU)
    b0 = jnp.concatenate([enc["l0_f"][2], enc["l0_b"][2]], axis=1)               # (1,8H)
    whh0 = _blockdiag(enc["l0_f"][1], enc["l0_b"][1]).astype(bf)                 # (2H,8H)
    wih1 = jnp.concatenate([enc["l1_f"][0], enc["l1_b"][0]], axis=1).astype(bf)  # (2H,8H)
    b1 = jnp.concatenate([enc["l1_f"][2], enc["l1_b"][2]], axis=1)               # (1,8H)
    whh1 = _blockdiag(enc["l1_f"][1], enc["l1_b"][1]).astype(bf)                 # (2H,8H)
    enc_packed = (wih0, b0, whh0, wih1, b1, whh1)

    d_wih0, d_whh0, d_b0 = raw["dec"]["l0"]
    d_wih1, d_whh1, d_b1 = raw["dec"]["l1"]
    dec_packed = (d_wih0, d_b0, d_whh0.astype(bf),
                  jnp.concatenate([d_wih1, d_whh1], axis=0).astype(bf), d_b1)

    w_heads = jnp.concatenate([raw["w_mu"], raw["w_lv"], raw["w_lam"]], axis=1)  # (4H,2Z+1)

    w1, b1m, w2, b2m, w3, b3m = raw["mlp"]
    mlp_packed = (w1.astype(bf), b1m, w2.astype(bf), b2m, w3.astype(bf), b3m)
    return {"enc": enc_packed, "dec": dec_packed, "w_heads": w_heads, "mlp": mlp_packed}


# ----------------------------------------------------------------------------
# Forward pass (matches Granger.forward).
# ----------------------------------------------------------------------------
def granger_forward(X, params, key, pairwise_row, pairwise_col, lstm_burnin):
    B, T, N = X.shape
    E = pairwise_row.shape[0]
    Xt = jnp.transpose(X, (0, 2, 1))                                      # [B, N, T]

    # Pairwise series [T, B*E, 2] -- no feature zero-padding (the encoder kernel does
    # the input projection with VPU FMAs).
    pair = jnp.stack([Xt[:, pairwise_row], Xt[:, pairwise_col]], axis=3)  # [B,E,T,2]
    P = jnp.transpose(pair.reshape(B * E, T, 2), (1, 0, 2))               # [T,B*E,2]

    # --- fused encoder (2-layer biLSTM + mu/logvar/lambda heads), one Pallas call ---
    heads = encoder_heads(P, params["enc"], params["w_heads"])            # [B*E,2Z+1]
    Z = (params["w_heads"].shape[1] - 1) // 2
    edge_mu = heads[:, :Z]
    edge_lv = heads[:, Z:2 * Z]
    how_lambda = heads[:, 2 * Z:]                                         # [B*E,1]

    k1, k2 = jax.random.split(key)
    eps = jax.random.normal(k1, edge_mu.shape, jnp.float32)
    edge_sample = edge_mu + jnp.exp(edge_lv * 0.5) * eps                  # [B*E,Z]

    # TODO(synk): reference samples eps ~ Normal (+1e-10) and takes log(eps) with no
    # positivity guard on eps or lambda; NaNs for negative draws are reproduced as written.
    eps2 = jax.random.normal(k2, how_lambda.shape, jnp.float32) + 1e-10
    how_much = jax.nn.sigmoid(-jnp.log(eps2) / how_lambda)
    how_much = how_much.reshape(B, E, -1)[..., 0]                         # [B,E]

    # --- decoder: fused 2-layer unidirectional LSTM over per-node series ---
    # TODO(synk): reference's .view on a non-contiguous transpose is invalid in PyTorch;
    # we build the documented time-major per-node series [T, B*N, 1].
    node = jnp.transpose(Xt, (2, 0, 1)).reshape(T, B * N, 1)              # [T,B*N,1]
    dec_out = decoder_lstm(node, params["dec"])                           # [T,B*N,Hd]
    Hd = dec_out.shape[-1]
    dec_out = jnp.transpose(dec_out.reshape(T, B, N, Hd), (1, 2, 0, 3))   # [B,N,T,Hd]
    # TODO(synk): reference slices [:, :, :burnin] but defines Tr = T - burnin;
    # we discard the first `burnin` steps (the documented intent).
    Tr = T - lstm_burnin
    dec_out = dec_out[:, :, lstm_burnin:]                                 # [B,N,Tr,Hd]
    pairwise_dec_out = dec_out[:, pairwise_row]                           # [B,E,Tr,Hd]

    # --- prediction MLP (Pallas, transposed lane-dense layout, bf16 inputs) ---
    # TODO(synk): the Z-wide edge block is constant over Tr; splitting w1 into edge/dec
    # column blocks would avoid materializing it over Tr (kept simple & Mosaic-safe here).
    edge_part = jnp.broadcast_to(
        jnp.transpose(edge_sample.reshape(B, E, Z), (2, 0, 1))[..., None],
        (Z, B, E, Tr))                                                    # [Z,B,E,Tr]
    dec_part = jnp.transpose(pairwise_dec_out, (3, 0, 1, 2))              # [Hd,B,E,Tr]
    feats_t = jnp.concatenate([edge_part, dec_part], axis=0)
    feats_t = feats_t.reshape(Z + Hd, B * E * Tr).astype(jnp.bfloat16)    # [Z+Hd,R]
    pred = pred_mlp(feats_t, params["mlp"])                               # [R]
    relation_prediction = pred.reshape(B, E, Tr)
    return relation_prediction, how_much


if __name__ == "__main__":
    # Small shapes consistent with forward: X [B, T, N]
    B, T, N = 2, 8, 4
    enc_hidden, latent_size, dec_hidden = 16, 8, 16
    lstm_burnin = 4

    pairwise = np.ones((N, N)) - np.diag(np.ones(N))
    rows, cols = pairwise.nonzero()
    pairwise_row = jnp.asarray(rows, jnp.int32)   # E = N*(N-1) = 12
    pairwise_col = jnp.asarray(cols, jnp.int32)

    key = jax.random.PRNGKey(0)
    kx, kp, ks = jax.random.split(key, 3)
    X = jax.random.normal(kx, (B, T, N), jnp.float32)
    params = pack_params(init_params(kp, enc_hidden, latent_size, dec_hidden))

    fwd = jax.jit(granger_forward, static_argnames=("lstm_burnin",))
    rel_pred, how_much = fwd(X, params, ks, pairwise_row, pairwise_col,
                             lstm_burnin=lstm_burnin)
    jax.block_until_ready((rel_pred, how_much))

    E = N * (N - 1)
    assert rel_pred.shape == (B, E, T - lstm_burnin), rel_pred.shape
    assert how_much.shape == (B, E), how_much.shape
    assert bool(jnp.all(jnp.isfinite(rel_pred))), "non-finite relation_prediction"
    print("KERNEL_OK")
</pallas_src>

<mosaic_0001>
module attributes {stable_mosaic.version = 11 : i64} {
  func.func @_enc_kernel(%arg0: i32, %arg1: memref<8x16x2xf32, #tpu.memory_space<vmem>>, %arg2: memref<2x128xf32, #tpu.memory_space<vmem>>, %arg3: memref<1x128xf32, #tpu.memory_space<vmem>>, %arg4: memref<32x128xbf16, #tpu.memory_space<vmem>>, %arg5: memref<32x128xbf16, #tpu.memory_space<vmem>>, %arg6: memref<1x128xf32, #tpu.memory_space<vmem>>, %arg7: memref<32x128xbf16, #tpu.memory_space<vmem>>, %arg8: memref<64x17xf32, #tpu.memory_space<vmem>>, %arg9: memref<16x17xf32, #tpu.memory_space<vmem>>, %arg10: memref<8x16x128xf32, #tpu.memory_space<vmem>>, %arg11: memref<8x16x32xf32, #tpu.memory_space<vmem>>) attributes {dimension_semantics = [#tpu.dimension_semantics<parallel>], iteration_bounds = array<i64: 2>, scalar_prefetch = 0 : i64, scratch_operands = 2 : i64, tpu.core_type = #tpu.core_type<tc>, window_params = [{transform_indices = @transform_0, window_bounds = array<i64: 8, 16, 2>}, {pipeline_mode = #tpu.pipeline_mode<synchronous>, transform_indices = @transform_1, window_bounds = array<i64: 2, 128>}, {pipeline_mode = #tpu.pipeline_mode<synchronous>, transform_indices = @transform_2, window_bounds = array<i64: 1, 128>}, {pipeline_mode = #tpu.pipeline_mode<synchronous>, transform_indices = @transform_3, window_bounds = array<i64: 32, 128>}, {pipeline_mode = #tpu.pipeline_mode<synchronous>, transform_indices = @transform_4, window_bounds = array<i64: 32, 128>}, {pipeline_mode = #tpu.pipeline_mode<synchronous>, transform_indices = @transform_5, window_bounds = array<i64: 1, 128>}, {pipeline_mode = #tpu.pipeline_mode<synchronous>, transform_indices = @transform_6, window_bounds = array<i64: 32, 128>}, {pipeline_mode = #tpu.pipeline_mode<synchronous>, transform_indices = @transform_7, window_bounds = array<i64: 64, 17>}, {transform_indices = @transform_8, window_bounds = array<i64: 16, 17>}]} {
    %cst = arith.constant 0.000000e+00 : f32
    %0 = vector.broadcast %cst : f32 to vector<16x16xf32>
    %c0 = arith.constant 0 : index
    %c0_0 = arith.constant 0 : index
    %c0_1 = arith.constant 0 : index
    %1 = vector.load %arg1[%c0, %c0_0, %c0_1] : memref<8x16x2xf32, #tpu.memory_space<vmem>>, vector<8x16x2xf32>
    %c0_2 = arith.constant 0 : index
    %c0_3 = arith.constant 0 : index
    %2 = vector.load %arg2[%c0_2, %c0_3] : memref<2x128xf32, #tpu.memory_space<vmem>>, vector<2x128xf32>
    %3 = vector.extract_strided_slice %1 {offsets = [0, 0, 0], sizes = [8, 16, 1], strides = [1, 1, 1]} : vector<8x16x2xf32> to vector<8x16x1xf32>
    %4 = vector.extract_strided_slice %2 {offsets = [0, 0], sizes = [1, 128], strides = [1, 1]} : vector<2x128xf32> to vector<1x128xf32>
    %5 = vector.shape_cast %4 : vector<1x128xf32> to vector<128xf32>
    %6 = vector.shape_cast %5 : vector<128xf32> to vector<1x1x128xf32>
    %7 = vector.broadcast %3 : vector<8x16x1xf32> to vector<8x16x128xf32>
    %8 = vector.broadcast %6 : vector<1x1x128xf32> to vector<8x16x128xf32>
    %9 = arith.mulf %7, %8 : vector<8x16x128xf32>
    %10 = vector.extract_strided_slice %1 {offsets = [0, 0, 1], sizes = [8, 16, 1], strides = [1, 1, 1]} : vector<8x16x2xf32> to vector<8x16x1xf32>
    %11 = vector.extract_strided_slice %2 {offsets = [1, 0], sizes = [1, 128], strides = [1, 1]} : vector<2x128xf32> to vector<1x128xf32>
    %12 = vector.shape_cast %11 : vector<1x128xf32> to vector<128xf32>
    %13 = vector.shape_cast %12 : vector<128xf32> to vector<1x1x128xf32>
    %14 = vector.broadcast %10 : vector<8x16x1xf32> to vector<8x16x128xf32>
    %15 = vector.broadcast %13 : vector<1x1x128xf32> to vector<8x16x128xf32>
    %16 = arith.mulf %14, %15 : vector<8x16x128xf32>
    %17 = arith.addf %9, %16 : vector<8x16x128xf32>
    %c0_4 = arith.constant 0 : index
    %c0_5 = arith.constant 0 : index
    %18 = vector.load %arg3[%c0_4, %c0_5] : memref<1x128xf32, #tpu.memory_space<vmem>>, vector<1x128xf32>
    %19 = vector.shape_cast %18 : vector<1x128xf32> to vector<1x1x128xf32>
    %20 = vector.broadcast %19 : vector<1x1x128xf32> to vector<8x16x128xf32>
    %21 = arith.addf %17, %20 : vector<8x16x128xf32>
    %c0_6 = arith.constant 0 : index
    %c0_7 = arith.constant 0 : index
    %c0_8 = arith.constant 0 : index
    %22 = vector.load %arg10[%c0_6, %c0_7, %c0_8] : memref<8x16x128xf32, #tpu.memory_space<vmem>>, vector<8x16x128xf32>
    tpu.vector_store %arg10[%c0_6, %c0_7, %c0_8], %21 {strides = array<i32>} : memref<8x16x128xf32, #tpu.memory_space<vmem>>, vector<8x16x128xf32>,
    %c0_i32 = arith.constant 0 : i32
    %c7_i32 = arith.constant 7 : i32
    %23 = arith.subi %c7_i32, %c0_i32 : i32
    %24 = tpu.concatenate %0, %0 in 1 : vector<16x16xf32>, vector<16x16xf32> -> vector<16x32xf32>
    %25 = arith.truncf %24 : vector<16x32xf32> to vector<16x32xbf16>
    %c0_9 = arith.constant 0 : index
    %c0_10 = arith.constant 0 : index
    %26 = vector.load %arg4[%c0_9, %c0_10] : memref<32x128xbf16, #tpu.memory_space<vmem>>, vector<32x128xbf16>
    %cst_11 = arith.constant dense<0.000000e+00> : vector<16x128xf32>
    %27 = tpu.matmul %25, %26, %cst_11 {dimension_numbers = #tpu.dot_dimension_numbers<[1], [0], [0], [1], [0, 0, 1, 1], [], []>} : vector<16x32xbf16>, vector<32x128xbf16>, vector<16x128xf32> -> vector<16x128xf32>
    %28 = arith.index_cast %c0_i32 : i32 to index
    %c0_12 = arith.constant 0 : index
    %c0_13 = arith.constant 0 : index
    %29 = vector.load %arg10[%28, %c0_12, %c0_13] : memref<8x16x128xf32, #tpu.memory_space<vmem>>, vector<1x16x64xf32>
    %30 = vector.shape_cast %29 : vector<1x16x64xf32> to vector<16x64xf32>
    %31 = vector.extract_strided_slice %27 {offsets = [0, 0], sizes = [16, 64], strides = [1, 1]} : vector<16x128xf32> to vector<16x64xf32>
    %32 = arith.addf %30, %31 : vector<16x64xf32>
    %33 = arith.index_cast %23 : i32 to index
    %c0_14 = arith.constant 0 : index
    %c64 = arith.constant 64 : index
    %34 = vector.load %arg10[%33, %c0_14, %c64] : memref<8x16x128xf32, #tpu.memory_space<vmem>>, vector<1x16x64xf32>
    %35 = vector.shape_cast %34 : vector<1x16x64xf32> to vector<16x64xf32>
    %36 = vector.extract_strided_slice %27 {offsets = [0, 64], sizes = [16, 64], strides = [1, 1]} : vector<16x128xf32> to vector<16x64xf32>
    %37 = arith.addf %35, %36 : vector<16x64xf32>
    %38 = vector.extract_strided_slice %32 {offsets = [0, 0], sizes = [16, 48], strides = [1, 1]} : vector<16x64xf32> to vector<16x48xf32>
    %39 = arith.negf %38 : vector<16x48xf32>
    %40 = math.exp %39 : vector<16x48xf32>
    %cst_15 = arith.constant 1.000000e+00 : f32
    %41 = vector.broadcast %cst_15 : f32 to vector<16x48xf32>
    %42 = arith.addf %41, %40 : vector<16x48xf32>
    %43 = arith.divf %41, %42 : vector<16x48xf32>
    %44 = vector.extract_strided_slice %32 {offsets = [0, 48], sizes = [16, 16], strides = [1, 1]} : vector<16x64xf32> to vector<16x16xf32>
    %45 = math.tanh %44 : vector<16x16xf32>
    %46 = vector.extract_strided_slice %43 {offsets = [0, 16], sizes = [16, 16], strides = [1, 1]} : vector<16x48xf32> to vector<16x16xf32>
    %47 = arith.mulf %46, %0 : vector<16x16xf32>
    %48 = vector.extract_strided_slice %43 {offsets = [0, 0], sizes = [16, 16], strides = [1, 1]} : vector<16x48xf32> to vector<16x16xf32>
    %49 = arith.mulf %48, %45 : vector<16x16xf32>
    %50 = arith.addf %47, %49 : vector<16x16xf32>
    %51 = vector.extract_strided_slice %43 {offsets = [0, 32], sizes = [16, 16], strides = [1, 1]} : vector<16x48xf32> to vector<16x16xf32>
    %52 = math.tanh %50 : vector<16x16xf32>
    %53 = arith.mulf %51, %52 : vector<16x16xf32>
    %54 = vector.extract_strided_slice %37 {offsets = [0, 0], sizes = [16, 48], strides = [1, 1]} : vector<16x64xf32> to vector<16x48xf32>
    %55 = arith.negf %54 : vector<16x48xf32>
    %56 = math.exp %55 : vector<16x48xf32>
    %cst_16 = arith.constant 1.000000e+00 : f32
    %57 = vector.broadcast %cst_16 : f32 to vector<16x48xf32>
    %58 = arith.addf %57, %56 : vector<16x48xf32>
    %59 = arith.divf %57, %58 : vector<16x48xf32>
    %60 = vector.extract_strided_slice %37 {offsets = [0, 48], sizes = [16, 16], strides = [1, 1]} : vector<16x64xf32> to vector<16x16xf32>
    %61 = math.tanh %60 : vector<16x16xf32>
    %62 = vector.extract_strided_slice %59 {offsets = [0, 16], sizes = [16, 16], strides = [1, 1]} : vector<16x48xf32> to vector<16x16xf32>
    %63 = arith.mulf %62, %0 : vector<16x16xf32>
    %64 = vector.extract_strided_slice %59 {offsets = [0, 0], sizes = [16, 16], strides = [1, 1]} : vector<16x48xf32> to vector<16x16xf32>
    %65 = arith.mulf %64, %61 : vector<16x16xf32>
    %66 = arith.addf %63, %65 : vector<16x16xf32>
    %67 = vector.extract_strided_slice %59 {offsets = [0, 32], sizes = [16, 16], strides = [1, 1]} : vector<16x48xf32> to vector<16x16xf32>
    %68 = math.tanh %66 : vector<16x16xf32>
    %69 = arith.mulf %67, %68 : vector<16x16xf32>
    %70 = arith.index_cast %c0_i32 : i32 to index
    %c0_17 = arith.constant 0 : index
    %c0_18 = arith.constant 0 : index
    %71 = vector.load %arg11[%70, %c0_17, %c0_18] : memref<8x16x32xf32, #tpu.memory_space<vmem>>, vector<1x16x16xf32>
    %72 = vector.shape_cast %71 : vector<1x16x16xf32> to vector<16x16xf32>
    %73 = vector.shape_cast %53 : vector<16x16xf32> to vector<1x16x16xf32>
    tpu.vector_store %arg11[%70, %c0_17, %c0_18], %73 {strides = array<i32>} : memref<8x16x32xf32, #tpu.memory_space<vmem>>, vector<1x16x16xf32>,
    %74 = arith.index_cast %23 : i32 to index
    %c0_19 = arith.constant 0 : index
    %c16 = arith.constant 16 : index
    %75 = vector.load %arg11[%74, %c0_19, %c16] : memref<8x16x32xf32, #tpu.memory_space<vmem>>, vector<1x16x16xf32>
    %76 = vector.shape_cast %75 : vector<1x16x16xf32> to vector<16x16xf32>
    %77 = vector.shape_cast %69 : vector<16x16xf32> to vector<1x16x16xf32>
    tpu.vector_store %arg11[%74, %c0_19, %c16], %77 {strides = array<i32>} : memref<8x16x32xf32, #tpu.memory_space<vmem>>, vector<1x16x16xf32>,
    %c1_i32 = arith.constant 1 : i32
    %c7_i32_20 = arith.constant 7 : i32
    %78 = arith.subi %c7_i32_20, %c1_i32 : i32
    %79 = tpu.concatenate %53, %69 in 1 : vector<16x16xf32>, vector<16x16xf32> -> vector<16x32xf32>
    %80 = arith.truncf %79 : vector<16x32xf32> to vector<16x32xbf16>
    %c0_21 = arith.constant 0 : index
    %c0_22 = arith.constant 0 : index
    %81 = vector.load %arg4[%c0_21, %c0_22] : memref<32x128xbf16, #tpu.memory_space<vmem>>, vector<32x128xbf16>
    %cst_23 = arith.constant dense<0.000000e+00> : vector<16x128xf32>
    %82 = tpu.matmul %80, %81, %cst_23 {dimension_numbers = #tpu.dot_dimension_numbers<[1], [0], [0], [1], [0, 0, 1, 1], [], []>} : vector<16x32xbf16>, vector<32x128xbf16>, vector<16x128xf32> -> vector<16x128xf32>
    %83 = arith.index_cast %c1_i32 : i32 to index
    %c0_24 = arith.constant 0 : index
    %c0_25 = arith.constant 0 : index
    %84 = vector.load %arg10[%83, %c0_24, %c0_25] : memref<8x16x128xf32, #tpu.memory_space<vmem>>, vector<1x16x64xf32>
    %85 = vector.shape_cast %84 : vector<1x16x64xf32> to vector<16x64xf32>
    %86 = vector.extract_strided_slice %82 {offsets = [0, 0], sizes = [16, 64], strides = [1, 1]} : vector<16x128xf32> to vector<16x64xf32>
    %87 = arith.addf %85, %86 : vector<16x64xf32>
    %88 = arith.index_cast %78 : i32 to index
    %c0_26 = arith.constant 0 : index
    %c64_27 = arith.constant 64 : index
    %89 = vector.load %arg10[%88, %c0_26, %c64_27] : memref<8x16x128xf32, #tpu.memory_space<vmem>>, vector<1x16x64xf32>
    %90 = vector.shape_cast %89 : vector<1x16x64xf32> to vector<16x64xf32>
    %91 = vector.extract_strided_slice %82 {offsets = [0, 64], sizes = [16, 64], strides = [1, 1]} : vector<16x128xf32> to vector<16x64xf32>
    %92 = arith.addf %90, %91 : vector<16x64xf32>
    %93 = vector.extract_strided_slice %87 {offsets = [0, 0], sizes = [16, 48], strides = [1, 1]} : vector<16x64xf32> to vector<16x48xf32>
    %94 = arith.negf %93 : vector<16x48xf32>
    %95 = math.exp %94 : vector<16x48xf32>
    %cst_28 = arith.constant 1.000000e+00 : f32
    %96 = vector.broadcast %cst_28 : f32 to vector<16x48xf32>
    %97 = arith.addf %96, %95 : vector<16x48xf32>
    %98 = arith.divf %96, %97 : vector<16x48xf32>
    %99 = vector.extract_strided_slice %87 {offsets = [0, 48], sizes = [16, 16], strides = [1, 1]} : vector<16x64xf32> to vector<16x16xf32>
    %100 = math.tanh %99 : vector<16x16xf32>
    %101 = vector.extract_strided_slice %98 {offsets = [0, 16], sizes = [16, 16], strides = [1, 1]} : vector<16x48xf32> to vector<16x16xf32>
    %102 = arith.mulf %101, %50 : vector<16x16xf32>
    %103 = vector.extract_strided_slice %98 {offsets = [0, 0], sizes = [16, 16], strides = [1, 1]} : vector<16x48xf32> to vector<16x16xf32>
    %104 = arith.mulf %103, %100 : vector<16x16xf32>
    %105 = arith.addf %102, %104 : vector<16x16xf32>
    %106 = vector.extract_strided_slice %98 {offsets = [0, 32], sizes = [16, 16], strides = [1, 1]} : vector<16x48xf32> to vector<16x16xf32>
    %107 = math.tanh %105 : vector<16x16xf32>
    %108 = arith.mulf %106, %107 : vector<16x16xf32>
    %109 = vector.extract_strided_slice %92 {offsets = [0, 0], sizes = [16, 48], strides = [1, 1]} : vector<16x64xf32> to vector<16x48xf32>
    %110 = arith.negf %109 : vector<16x48xf32>
    %111 = math.exp %110 : vector<16x48xf32>
    %cst_29 = arith.constant 1.000000e+00 : f32
    %112 = vector.broadcast %cst_29 : f32 to vector<16x48xf32>
    %113 = arith.addf %112, %111 : vector<16x48xf32>
    %114 = arith.divf %112, %113 : vector<16x48xf32>
    %115 = vector.extract_strided_slice %92 {offsets = [0, 48], sizes = [16, 16], strides = [1, 1]} : vector<16x64xf32> to vector<16x16xf32>
    %116 = math.tanh %115 : vector<16x16xf32>
    %117 = vector.extract_strided_slice %114 {offsets = [0, 16], sizes = [16, 16], strides = [1, 1]} : vector<16x48xf32> to vector<16x16xf32>
    %118 = arith.mulf %117, %66 : vector<16x16xf32>
    %119 = vector.extract_strided_slice %114 {offsets = [0, 0], sizes = [16, 16], strides = [1, 1]} : vector<16x48xf32> to vector<16x16xf32>
    %120 = arith.mulf %119, %116 : vector<16x16xf32>
    %121 = arith.addf %118, %120 : vector<16x16xf32>
    %122 = vector.extract_strided_slice %114 {offsets = [0, 32], sizes = [16, 16], strides = [1, 1]} : vector<16x48xf32> to vector<16x16xf32>
    %123 = math.tanh %121 : vector<16x16xf32>
    %124 = arith.mulf %122, %123 : vector<16x16xf32>
    %125 = arith.index_cast %c1_i32 : i32 to index
    %c0_30 = arith.constant 0 : index
    %c0_31 = arith.constant 0 : index
    %126 = vector.load %arg11[%125, %c0_30, %c0_31] : memref<8x16x32xf32, #tpu.memory_space<vmem>>, vector<1x16x16xf32>
    %127 = vector.shape_cast %126 : vector<1x16x16xf32> to vector<16x16xf32>
    %128 = vector.shape_cast %108 : vector<16x16xf32> to vector<1x16x16xf32>
    tpu.vector_store %arg11[%125, %c0_30, %c0_31], %128 {strides = array<i32>} : memref<8x16x32xf32, #tpu.memory_space<vmem>>, vector<1x16x16xf32>,
    %129 = arith.index_cast %78 : i32 to index
    %c0_32 = arith.constant 0 : index
    %c16_33 = arith.constant 16 : index
    %130 = vector.load %arg11[%129, %c0_32, %c16_33] : memref<8x16x32xf32, #tpu.memory_space<vmem>>, vector<1x16x16xf32>
    %131 = vector.shape_cast %130 : vector<1x16x16xf32> to vector<16x16xf32>
    %132 = vector.shape_cast %124 : vector<16x16xf32> to vector<1x16x16xf32>
    tpu.vector_store %arg11[%129, %c0_32, %c16_33], %132 {strides = array<i32>} : memref<8x16x32xf32, #tpu.memory_space<vmem>>, vector<1x16x16xf32>,
    %c2_i32 = arith.constant 2 : i32
    %c7_i32_34 = arith.constant 7 : i32
    %133 = arith.subi %c7_i32_34, %c2_i32 : i32
    %134 = tpu.concatenate %108, %124 in 1 : vector<16x16xf32>, vector<16x16xf32> -> vector<16x32xf32>
    %135 = arith.truncf %134 : vector<16x32xf32> to vector<16x32xbf16>
    %c0_35 = arith.constant 0 : index
    %c0_36 = arith.constant 0 : index
    %136 = vector.load %arg4[%c0_35, %c0_36] : memref<32x128xbf16, #tpu.memory_space<vmem>>, vector<32x128xbf16>
    %cst_37 = arith.constant dense<0.000000e+00> : vector<16x128xf32>
    %137 = tpu.matmul %135, %136, %cst_37 {dimension_numbers = #tpu.dot_dimension_numbers<[1], [0], [0], [1], [0, 0, 1, 1], [], []>} : vector<16x32xbf16>, vector<32x128xbf16>, vector<16x128xf32> -> vector<16x128xf32>
    %138 = arith.index_cast %c2_i32 : i32 to index
    %c0_38 = arith.constant 0 : index
    %c0_39 = arith.constant 0 : index
    %139 = vector.load %arg10[%138, %c0_38, %c0_39] : memref<8x16x128xf32, #tpu.memory_space<vmem>>, vector<1x16x64xf32>
    %140 = vector.shape_cast %139 : vector<1x16x64xf32> to vector<16x64xf32>
    %141 = vector.extract_strided_slice %137 {offsets = [0, 0], sizes = [16, 64], strides = [1, 1]} : vector<16x128xf32> to vector<16x64xf32>
    %142 = arith.addf %140, %141 : vector<16x64xf32>
    %143 = arith.index_cast %133 : i32 to index
    %c0_40 = arith.constant 0 : index
    %c64_41 = arith.constant 64 : index
    %144 = vector.load %arg10[%143, %c0_40, %c64_41] : memref<8x16x128xf32, #tpu.memory_space<vmem>>, vector<1x16x64xf32>
    %145 = vector.shape_cast %144 : vector<1x16x64xf32> to vector<16x64xf32>
    %146 = vector.extract_strided_slice %137 {offsets = [0, 64], sizes = [16, 64], strides = [1, 1]} : vector<16x128xf32> to vector<16x64xf32>
    %147 = arith.addf %145, %146 : vector<16x64xf32>
    %148 = vector.extract_strided_slice %142 {offsets = [0, 0], sizes = [16, 48], strides = [1, 1]} : vector<16x64xf32> to vector<16x48xf32>
    %149 = arith.negf %148 : vector<16x48xf32>
    %150 = math.exp %149 : vector<16x48xf32>
    %cst_42 = arith.constant 1.000000e+00 : f32
    %151 = vector.broadcast %cst_42 : f32 to vector<16x48xf32>
    %152 = arith.addf %151, %150 : vector<16x48xf32>
    %153 = arith.divf %151, %152 : vector<16x48xf32>
    %154 = vector.extract_strided_slice %142 {offsets = [0, 48], sizes = [16, 16], strides = [1, 1]} : vector<16x64xf32> to vector<16x16xf32>
    %155 = math.tanh %154 : vector<16x16xf32>
    %156 = vector.extract_strided_slice %153 {offsets = [0, 16], sizes = [16, 16], strides = [1, 1]} : vector<16x48xf32> to vector<16x16xf32>
    %157 = arith.mulf %156, %105 : vector<16x16xf32>
    %158 = vector.extract_strided_slice %153 {offsets = [0, 0], sizes = [16, 16], strides = [1, 1]} : vector<16x48xf32> to vector<16x16xf32>
    %159 = arith.mulf %158, %155 : vector<16x16xf32>
    %160 = arith.addf %157, %159 : vector<16x16xf32>
    %161 = vector.extract_strided_slice %153 {offsets = [0, 32], sizes = [16, 16], strides = [1, 1]} : vector<16x48xf32> to vector<16x16xf32>
    %162 = math.tanh %160 : vector<16x16xf32>
    %163 = arith.mulf %161, %162 : vector<16x16xf32>
    %164 = vector.extract_strided_slice %147 {offsets = [0, 0], sizes = [16, 48], strides = [1, 1]} : vector<16x64xf32> to vector<16x48xf32>
    %165 = arith.negf %164 : vector<16x48xf32>
    %166 = math.exp %165 : vector<16x48xf32>
    %cst_43 = arith.constant 1.000000e+00 : f32
    %167 = vector.broadcast %cst_43 : f32 to vector<16x48xf32>
    %168 = arith.addf %167, %166 : vector<16x48xf32>
    %169 = arith.divf %167, %168 : vector<16x48xf32>
    %170 = vector.extract_strided_slice %147 {offsets = [0, 48], sizes = [16, 16], strides = [1, 1]} : vector<16x64xf32> to vector<16x16xf32>
    %171 = math.tanh %170 : vector<16x16xf32>
    %172 = vector.extract_strided_slice %169 {offsets = [0, 16], sizes = [16, 16], strides = [1, 1]} : vector<16x48xf32> to vector<16x16xf32>
    %173 = arith.mulf %172, %121 : vector<16x16xf32>
    %174 = vector.extract_strided_slice %169 {offsets = [0, 0], sizes = [16, 16], strides = [1, 1]} : vector<16x48xf32> to vector<16x16xf32>
    %175 = arith.mulf %174, %171 : vector<16x16xf32>
    %176 = arith.addf %173, %175 : vector<16x16xf32>
    %177 = vector.extract_strided_slice %169 {offsets = [0, 32], sizes = [16, 16], strides = [1, 1]} : vector<16x48xf32> to vector<16x16xf32>
    %178 = math.tanh %176 : vector<16x16xf32>
    %179 = arith.mulf %177, %178 : vector<16x16xf32>
    %180 = arith.index_cast %c2_i32 : i32 to index
    %c0_44 = arith.constant 0 : index
    %c0_45 = arith.constant 0 : index
    %181 = vector.load %arg11[%180, %c0_44, %c0_45] : memref<8x16x32xf32, #tpu.memory_space<vmem>>, vector<1x16x16xf32>
    %182 = vector.shape_cast %181 : vector<1x16x16xf32> to vector<16x16xf32>
    %183 = vector.shape_cast %163 : vector<16x16xf32> to vector<1x16x16xf32>
    tpu.vector_store %arg11[%180, %c0_44, %c0_45], %183 {strides = array<i32>} : memref<8x16x32xf32, #tpu.memory_space<vmem>>, vector<1x16x16xf32>,
    %184 = arith.index_cast %133 : i32 to index
    %c0_46 = arith.constant 0 : index
    %c16_47 = arith.constant 16 : index
    %185 = vector.load %arg11[%184, %c0_46, %c16_47] : memref<8x16x32xf32, #tpu.memory_space<vmem>>, vector<1x16x16xf32>
    %186 = vector.shape_cast %185 : vector<1x16x16xf32> to vector<16x16xf32>
    %187 = vector.shape_cast %179 : vector<16x16xf32> to vector<1x16x16xf32>
    tpu.vector_store %arg11[%184, %c0_46, %c16_47], %187 {strides = array<i32>} : memref<8x16x32xf32, #tpu.memory_space<vmem>>, vector<1x16x16xf32>,
    %c3_i32 = arith.constant 3 : i32
    %c7_i32_48 = arith.constant 7 : i32
    %188 = arith.subi %c7_i32_48, %c3_i32 : i32
    %189 = tpu.concatenate %163, %179 in 1 : vector<16x16xf32>, vector<16x16xf32> -> vector<16x32xf32>
    %190 = arith.truncf %189 : vector<16x32xf32> to vector<16x32xbf16>
    %c0_49 = arith.constant 0 : index
    %c0_50 = arith.constant 0 : index
    %191 = vector.load %arg4[%c0_49, %c0_50] : memref<32x128xbf16, #tpu.memory_space<vmem>>, vector<32x128xbf16>
    %cst_51 = arith.constant dense<0.000000e+00> : vector<16x128xf32>
    %192 = tpu.matmul %190, %191, %cst_51 {dimension_numbers = #tpu.dot_dimension_numbers<[1], [0], [0], [1], [0, 0, 1, 1], [], []>} : vector<16x32xbf16>, vector<32x128xbf16>, vector<16x128xf32> -> vector<16x128xf32>
    %193 = arith.index_cast %c3_i32 : i32 to index
    %c0_52 = arith.constant 0 : index
    %c0_53 = arith.constant 0 : index
    %194 = vector.load %arg10[%193, %c0_52, %c0_53] : memref<8x16x128xf32, #tpu.memory_space<vmem>>, vector<1x16x64xf32>
    %195 = vector.shape_cast %194 : vector<1x16x64xf32> to vector<16x64xf32>
    %196 = vector.extract_strided_slice %192 {offsets = [0, 0], sizes = [16, 64], strides = [1, 1]} : vector<16x128xf32> to vector<16x64xf32>
    %197 = arith.addf %195, %196 : vector<16x64xf32>
    %198 = arith.index_cast %188 : i32 to index
    %c0_54 = arith.constant 0 : index
    %c64_55 = arith.constant 64 : index
    %199 = vector.load %arg10[%198, %c0_54, %c64_55] : memref<8x16x128xf32, #tpu.memory_space<vmem>>, vector<1x16x64xf32>
    %200 = vector.shape_cast %199 : vector<1x16x64xf32> to vector<16x64xf32>
    %201 = vector.extract_strided_slice %192 {offsets = [0, 64], sizes = [16, 64], strides = [1, 1]} : vector<16x128xf32> to vector<16x64xf32>
    %202 = arith.addf %200, %201 : vector<16x64xf32>
    %203 = vector.extract_strided_slice %197 {offsets = [0, 0], sizes = [16, 48], strides = [1, 1]} : vector<16x64xf32> to vector<16x48xf32>
    %204 = arith.negf %203 : vector<16x48xf32>
    %205 = math.exp %204 : vector<16x48xf32>
    %cst_56 = arith.constant 1.000000e+00 : f32
    %206 = vector.broadcast %cst_56 : f32 to vector<16x48xf32>
    %207 = arith.addf %206, %205 : vector<16x48xf32>
    %208 = arith.divf %206, %207 : vector<16x48xf32>
    %209 = vector.extract_strided_slice %197 {offsets = [0, 48], sizes = [16, 16], strides = [1, 1]} : vector<16x64xf32> to vector<16x16xf32>
    %210 = math.tanh %209 : vector<16x16xf32>
    %211 = vector.extract_strided_slice %208 {offsets = [0, 16], sizes = [16, 16], strides = [1, 1]} : vector<16x48xf32> to vector<16x16xf32>
    %212 = arith.mulf %211, %160 : vector<16x16xf32>
    %213 = vector.extract_strided_slice %208 {offsets = [0, 0], sizes = [16, 16], strides = [1, 1]} : vector<16x48xf32> to vector<16x16xf32>
    %214 = arith.mulf %213, %210 : vector<16x16xf32>
    %215 = arith.addf %212, %214 : vector<16x16xf32>
    %216 = vector.extract_strided_slice %208 {offsets = [0, 32], sizes = [16, 16], strides = [1, 1]} : vector<16x48xf32> to vector<16x16xf32>
    %217 = math.tanh %215 : vector<16x16xf32>
    %218 = arith.mulf %216, %217 : vector<16x16xf32>
    %219 = vector.extract_strided_slice %202 {offsets = [0, 0], sizes = [16, 48], strides = [1, 1]} : vector<16x64xf32> to vector<16x48xf32>
    %220 = arith.negf %219 : vector<16x48xf32>
    %221 = math.exp %220 : vector<16x48xf32>
    %cst_57 = arith.constant 1.000000e+00 : f32
    %222 = vector.broadcast %cst_57 : f32 to vector<16x48xf32>
    %223 = arith.addf %222, %221 : vector<16x48xf32>
    %224 = arith.divf %222, %223 : vector<16x48xf32>
    %225 = vector.extract_strided_slice %202 {offsets = [0, 48], sizes = [16, 16], strides = [1, 1]} : vector<16x64xf32> to vector<16x16xf32>
    %226 = math.tanh %225 : vector<16x16xf32>
    %227 = vector.extract_strided_slice %224 {offsets = [0, 16], sizes = [16, 16], strides = [1, 1]} : vector<16x48xf32> to vector<16x16xf32>
    %228 = arith.mulf %227, %176 : vector<16x16xf32>
    %229 = vector.extract_strided_slice %224 {offsets = [0, 0], sizes = [16, 16], strides = [1, 1]} : vector<16x48xf32> to vector<16x16xf32>
    %230 = arith.mulf %229, %226 : vector<16x16xf32>
    %231 = arith.addf %228, %230 : vector<16x16xf32>
    %232 = vector.extract_strided_slice %224 {offsets = [0, 32], sizes = [16, 16], strides = [1, 1]} : vector<16x48xf32> to vector<16x16xf32>
    %233 = math.tanh %231 : vector<16x16xf32>
    %234 = arith.mulf %232, %233 : vector<16x16xf32>
    %235 = arith.index_cast %c3_i32 : i32 to index
    %c0_58 = arith.constant 0 : index
    %c0_59 = arith.constant 0 : index
    %236 = vector.load %arg11[%235, %c0_58, %c0_59] : memref<8x16x32xf32, #tpu.memory_space<vmem>>, vector<1x16x16xf32>
    %237 = vector.shape_cast %236 : vector<1x16x16xf32> to vector<16x16xf32>
    %238 = vector.shape_cast %218 : vector<16x16xf32> to vector<1x16x16xf32>
    tpu.vector_store %arg11[%235, %c0_58, %c0_59], %238 {strides = array<i32>} : memref<8x16x32xf32, #tpu.memory_space<vmem>>, vector<1x16x16xf32>,
    %239 = arith.index_cast %188 : i32 to index
    %c0_60 = arith.constant 0 : index
    %c16_61 = arith.constant 16 : index
    %240 = vector.load %arg11[%239, %c0_60, %c16_61] : memref<8x16x32xf32, #tpu.memory_space<vmem>>, vector<1x16x16xf32>
    %241 = vector.shape_cast %240 : vector<1x16x16xf32> to vector<16x16xf32>
    %242 = vector.shape_cast %234 : vector<16x16xf32> to vector<1x16x16xf32>
    tpu.vector_store %arg11[%239, %c0_60, %c16_61], %242 {strides = array<i32>} : memref<8x16x32xf32, #tpu.memory_space<vmem>>, vector<1x16x16xf32>,
    %c4_i32 = arith.constant 4 : i32
    %c7_i32_62 = arith.constant 7 : i32
    %243 = arith.subi %c7_i32_62, %c4_i32 : i32
    %244 = tpu.concatenate %218, %234 in 1 : vector<16x16xf32>, vector<16x16xf32> -> vector<16x32xf32>
    %245 = arith.truncf %244 : vector<16x32xf32> to vector<16x32xbf16>
    %c0_63 = arith.constant 0 : index
    %c0_64 = arith.constant 0 : index
    %246 = vector.load %arg4[%c0_63, %c0_64] : memref<32x128xbf16, #tpu.memory_space<vmem>>, vector<32x128xbf16>
    %cst_65 = arith.constant dense<0.000000e+00> : vector<16x128xf32>
    %247 = tpu.matmul %245, %246, %cst_65 {dimension_numbers = #tpu.dot_dimension_numbers<[1], [0], [0], [1], [0, 0, 1, 1], [], []>} : vector<16x32xbf16>, vector<32x128xbf16>, vector<16x128xf32> -> vector<16x128xf32>
    %248 = arith.index_cast %c4_i32 : i32 to index
    %c0_66 = arith.constant 0 : index
    %c0_67 = arith.constant 0 : index
    %249 = vector.load %arg10[%248, %c0_66, %c0_67] : memref<8x16x128xf32, #tpu.memory_space<vmem>>, vector<1x16x64xf32>
    %250 = vector.shape_cast %249 : vector<1x16x64xf32> to vector<16x64xf32>
    %251 = vector.extract_strided_slice %247 {offsets = [0, 0], sizes = [16, 64], strides = [1, 1]} : vector<16x128xf32> to vector<16x64xf32>
    %252 = arith.addf %250, %251 : vector<16x64xf32>
    %253 = arith.index_cast %243 : i32 to index
    %c0_68 = arith.constant 0 : index
    %c64_69 = arith.constant 64 : index
    %254 = vector.load %arg10[%253, %c0_68, %c64_69] : memref<8x16x128xf32, #tpu.memory_space<vmem>>, vector<1x16x64xf32>
    %255 = vector.shape_cast %254 : vector<1x16x64xf32> to vector<16x64xf32>
    %256 = vector.extract_strided_slice %247 {offsets = [0, 64], sizes = [16, 64], strides = [1, 1]} : vector<16x128xf32> to vector<16x64xf32>
    %257 = arith.addf %255, %256 : vector<16x64xf32>
    %258 = vector.extract_strided_slice %252 {offsets = [0, 0], sizes = [16, 48], strides = [1, 1]} : vector<16x64xf32> to vector<16x48xf32>
    %259 = arith.negf %258 : vector<16x48xf32>
    %260 = math.exp %259 : vector<16x48xf32>
    %cst_70 = arith.constant 1.000000e+00 : f32
    %261 = vector.broadcast %cst_70 : f32 to vector<16x48xf32>
    %262 = arith.addf %261, %260 : vector<16x48xf32>
    %263 = arith.divf %261, %262 : vector<16x48xf32>
    %264 = vector.extract_strided_slice %252 {offsets = [0, 48], sizes = [16, 16], strides = [1, 1]} : vector<16x64xf32> to vector<16x16xf32>
    %265 = math.tanh %264 : vector<16x16xf32>
    %266 = vector.extract_strided_slice %263 {offsets = [0, 16], sizes = [16, 16], strides = [1, 1]} : vector<16x48xf32> to vector<16x16xf32>
    %267 = arith.mulf %266, %215 : vector<16x16xf32>
    %268 = vector.extract_strided_slice %263 {offsets = [0, 0], sizes = [16, 16], strides = [1, 1]} : vector<16x48xf32> to vector<16x16xf32>
    %269 = arith.mulf %268, %265 : vector<16x16xf32>
    %270 = arith.addf %267, %269 : vector<16x16xf32>
    %271 = vector.extract_strided_slice %263 {offsets = [0, 32], sizes = [16, 16], strides = [1, 1]} : vector<16x48xf32> to vector<16x16xf32>
    %272 = math.tanh %270 : vector<16x16xf32>
    %273 = arith.mulf %271, %272 : vector<16x16xf32>
    %274 = vector.extract_strided_slice %257 {offsets = [0, 0], sizes = [16, 48], strides = [1, 1]} : vector<16x64xf32> to vector<16x48xf32>
    %275 = arith.negf %274 : vector<16x48xf32>
    %276 = math.exp %275 : vector<16x48xf32>
    %cst_71 = arith.constant 1.000000e+00 : f32
    %277 = vector.broadcast %cst_71 : f32 to vector<16x48xf32>
    %278 = arith.addf %277, %276 : vector<16x48xf32>
    %279 = arith.divf %277, %278 : vector<16x48xf32>
    %280 = vector.extract_strided_slice %257 {offsets = [0, 48], sizes = [16, 16], strides = [1, 1]} : vector<16x64xf32> to vector<16x16xf32>
    %281 = math.tanh %280 : vector<16x16xf32>
    %282 = vector.extract_strided_slice %279 {offsets = [0, 16], sizes = [16, 16], strides = [1, 1]} : vector<16x48xf32> to vector<16x16xf32>
    %283 = arith.mulf %282, %231 : vector<16x16xf32>
    %284 = vector.extract_strided_slice %279 {offsets = [0, 0], sizes = [16, 16], strides = [1, 1]} : vector<16x48xf32> to vector<16x16xf32>
    %285 = arith.mulf %284, %281 : vector<16x16xf32>
    %286 = arith.addf %283, %285 : vector<16x16xf32>
    %287 = vector.extract_strided_slice %279 {offsets = [0, 32], sizes = [16, 16], strides = [1, 1]} : vector<16x48xf32> to vector<16x16xf32>
    %288 = math.tanh %286 : vector<16x16xf32>
    %289 = arith.mulf %287, %288 : vector<16x16xf32>
    %290 = arith.index_cast %c4_i32 : i32 to index
    %c0_72 = arith.constant 0 : index
    %c0_73 = arith.constant 0 : index
    %291 = vector.load %arg11[%290, %c0_72, %c0_73] : memref<8x16x32xf32, #tpu.memory_space<vmem>>, vector<1x16x16xf32>
    %292 = vector.shape_cast %291 : vector<1x16x16xf32> to vector<16x16xf32>
    %293 = vector.shape_cast %273 : vector<16x16xf32> to vector<1x16x16xf32>
    tpu.vector_store %arg11[%290, %c0_72, %c0_73], %293 {strides = array<i32>} : memref<8x16x32xf32, #tpu.memory_space<vmem>>, vector<1x16x16xf32>,
    %294 = arith.index_cast %243 : i32 to index
    %c0_74 = arith.constant 0 : index
    %c16_75 = arith.constant 16 : index
    %295 = vector.load %arg11[%294, %c0_74, %c16_75] : memref<8x16x32xf32, #tpu.memory_space<vmem>>, vector<1x16x16xf32>
    %296 = vector.shape_cast %295 : vector<1x16x16xf32> to vector<16x16xf32>
    %297 = vector.shape_cast %289 : vector<16x16xf32> to vector<1x16x16xf32>
    tpu.vector_store %arg11[%294, %c0_74, %c16_75], %297 {strides = array<i32>} : memref<8x16x32xf32, #tpu.memory_space<vmem>>, vector<1x16x16xf32>,
    %c5_i32 = arith.constant 5 : i32
    %c7_i32_76 = arith.constant 7 : i32
    %298 = arith.subi %c7_i32_76, %c5_i32 : i32
    %299 = tpu.concatenate %273, %289 in 1 : vector<16x16xf32>, vector<16x16xf32> -> vector<16x32xf32>
    %300 = arith.truncf %299 : vector<16x32xf32> to vector<16x32xbf16>
    %c0_77 = arith.constant 0 : index
    %c0_78 = arith.constant 0 : index
    %301 = vector.load %arg4[%c0_77, %c0_78] : memref<32x128xbf16, #tpu.memory_space<vmem>>, vector<32x128xbf16>
    %cst_79 = arith.constant dense<0.000000e+00> : vector<16x128xf32>
    %302 = tpu.matmul %300, %301, %cst_79 {dimension_numbers = #tpu.dot_dimension_numbers<[1], [0], [0], [1], [0, 0, 1, 1], [], []>} : vector<16x32xbf16>, vector<32x128xbf16>, vector<16x128xf32> -> vector<16x128xf32>
    %303 = arith.index_cast %c5_i32 : i32 to index
    %c0_80 = arith.constant 0 : index
    %c0_81 = arith.constant 0 : index
    %304 = vector.load %arg10[%303, %c0_80, %c0_81] : memref<8x16x128xf32, #tpu.memory_space<vmem>>, vector<1x16x64xf32>
    %305 = vector.shape_cast %304 : vector<1x16x64xf32> to vector<16x64xf32>
    %306 = vector.extract_strided_slice %302 {offsets = [0, 0], sizes = [16, 64], strides = [1, 1]} : vector<16x128xf32> to vector<16x64xf32>
    %307 = arith.addf %305, %306 : vector<16x64xf32>
    %308 = arith.index_cast %298 : i32 to index
    %c0_82 = arith.constant 0 : index
    %c64_83 = arith.constant 64 : index
    %309 = vector.load %arg10[%308, %c0_82, %c64_83] : memref<8x16x128xf32, #tpu.memory_space<vmem>>, vector<1x16x64xf32>
    %310 = vector.shape_cast %309 : vector<1x16x64xf32> to vector<16x64xf32>
    %311 = vector.extract_strided_slice %302 {offsets = [0, 64], sizes = [16, 64], strides = [1, 1]} : vector<16x128xf32> to vector<16x64xf32>
    %312 = arith.addf %310, %311 : vector<16x64xf32>
    %313 = vector.extract_strided_slice %307 {offsets = [0, 0], sizes = [16, 48], strides = [1, 1]} : vector<16x64xf32> to vector<16x48xf32>
    %314 = arith.negf %313 : vector<16x48xf32>
    %315 = math.exp %314 : vector<16x48xf32>
    %cst_84 = arith.constant 1.000000e+00 : f32
    %316 = vector.broadcast %cst_84 : f32 to vector<16x48xf32>
    %317 = arith.addf %316, %315 : vector<16x48xf32>
    %318 = arith.divf %316, %317 : vector<16x48xf32>
    %319 = vector.extract_strided_slice %307 {offsets = [0, 48], sizes = [16, 16], strides = [1, 1]} : vector<16x64xf32> to vector<16x16xf32>
    %320 = math.tanh %319 : vector<16x16xf32>
    %321 = vector.extract_strided_slice %318 {offsets = [0, 16], sizes = [16, 16], strides = [1, 1]} : vector<16x48xf32> to vector<16x16xf32>
    %322 = arith.mulf %321, %270 : vector<16x16xf32>
    %323 = vector.extract_strided_slice %318 {offsets = [0, 0], sizes = [16, 16], strides = [1, 1]} : vector<16x48xf32> to vector<16x16xf32>
    %324 = arith.mulf %323, %320 : vector<16x16xf32>
    %325 = arith.addf %322, %324 : vector<16x16xf32>
    %326 = vector.extract_strided_slice %318 {offsets = [0, 32], sizes = [16, 16], strides = [1, 1]} : vector<16x48xf32> to vector<16x16xf32>
    %327 = math.tanh %325 : vector<16x16xf32>
    %328 = arith.mulf %326, %327 : vector<16x16xf32>
    %329 = vector.extract_strided_slice %312 {offsets = [0, 0], sizes = [16, 48], strides = [1, 1]} : vector<16x64xf32> to vector<16x48xf32>
    %330 = arith.negf %329 : vector<16x48xf32>
    %331 = math.exp %330 : vector<16x48xf32>
    %cst_85 = arith.constant 1.000000e+00 : f32
    %332 = vector.broadcast %cst_85 : f32 to vector<16x48xf32>
    %333 = arith.addf %332, %331 : vector<16x48xf32>
    %334 = arith.divf %332, %333 : vector<16x48xf32>
    %335 = vector.extract_strided_slice %312 {offsets = [0, 48], sizes = [16, 16], strides = [1, 1]} : vector<16x64xf32> to vector<16x16xf32>
    %336 = math.tanh %335 : vector<16x16xf32>
    %337 = vector.extract_strided_slice %334 {offsets = [0, 16], sizes = [16, 16], strides = [1, 1]} : vector<16x48xf32> to vector<16x16xf32>
    %338 = arith.mulf %337, %286 : vector<16x16xf32>
    %339 = vector.extract_strided_slice %334 {offsets = [0, 0], sizes = [16, 16], strides = [1, 1]} : vector<16x48xf32> to vector<16x16xf32>
    %340 = arith.mulf %339, %336 : vector<16x16xf32>
    %341 = arith.addf %338, %340 : vector<16x16xf32>
    %342 = vector.extract_strided_slice %334 {offsets = [0, 32], sizes = [16, 16], strides = [1, 1]} : vector<16x48xf32> to vector<16x16xf32>
    %343 = math.tanh %341 : vector<16x16xf32>
    %344 = arith.mulf %342, %343 : vector<16x16xf32>
    %345 = arith.index_cast %c5_i32 : i32 to index
    %c0_86 = arith.constant 0 : index
    %c0_87 = arith.constant 0 : index
    %346 = vector.load %arg11[%345, %c0_86, %c0_87] : memref<8x16x32xf32, #tpu.memory_space<vmem>>, vector<1x16x16xf32>
    %347 = vector.shape_cast %346 : vector<1x16x16xf32> to vector<16x16xf32>
    %348 = vector.shape_cast %328 : vector<16x16xf32> to vector<1x16x16xf32>
    tpu.vector_store %arg11[%345, %c0_86, %c0_87], %348 {strides = array<i32>} : memref<8x16x32xf32, #tpu.memory_space<vmem>>, vector<1x16x16xf32>,
    %349 = arith.index_cast %298 : i32 to index
    %c0_88 = arith.constant 0 : index
    %c16_89 = arith.constant 16 : index
    %350 = vector.load %arg11[%349, %c0_88, %c16_89] : memref<8x16x32xf32, #tpu.memory_space<vmem>>, vector<1x16x16xf32>
    %351 = vector.shape_cast %350 : vector<1x16x16xf32> to vector<16x16xf32>
    %352 = vector.shape_cast %344 : vector<16x16xf32> to vector<1x16x16xf32>
    tpu.vector_store %arg11[%349, %c0_88, %c16_89], %352 {strides = array<i32>} : memref<8x16x32xf32, #tpu.memory_space<vmem>>, vector<1x16x16xf32>,
    %c6_i32 = arith.constant 6 : i32
    %c7_i32_90 = arith.constant 7 : i32
    %353 = arith.subi %c7_i32_90, %c6_i32 : i32
    %354 = tpu.concatenate %328, %344 in 1 : vector<16x16xf32>, vector<16x16xf32> -> vector<16x32xf32>
    %355 = arith.truncf %354 : vector<16x32xf32> to vector<16x32xbf16>
    %c0_91 = arith.constant 0 : index
    %c0_92 = arith.constant 0 : index
    %356 = vector.load %arg4[%c0_91, %c0_92] : memref<32x128xbf16, #tpu.memory_space<vmem>>, vector<32x128xbf16>
    %cst_93 = arith.constant dense<0.000000e+00> : vector<16x128xf32>
    %357 = tpu.matmul %355, %356, %cst_93 {dimension_numbers = #tpu.dot_dimension_numbers<[1], [0], [0], [1], [0, 0, 1, 1], [], []>} : vector<16x32xbf16>, vector<32x128xbf16>, vector<16x128xf32> -> vector<16x128xf32>
    %358 = arith.index_cast %c6_i32 : i32 to index
    %c0_94 = arith.constant 0 : index
    %c0_95 = arith.constant 0 : index
    %359 = vector.load %arg10[%358, %c0_94, %c0_95] : memref<8x16x128xf32, #tpu.memory_space<vmem>>, vector<1x16x64xf32>
    %360 = vector.shape_cast %359 : vector<1x16x64xf32> to vector<16x64xf32>
    %361 = vector.extract_strided_slice %357 {offsets = [0, 0], sizes = [16, 64], strides = [1, 1]} : vector<16x128xf32> to vector<16x64xf32>
    %362 = arith.addf %360, %361 : vector<16x64xf32>
    %363 = arith.index_cast %353 : i32 to index
    %c0_96 = arith.constant 0 : index
    %c64_97 = arith.constant 64 : index
    %364 = vector.load %arg10[%363, %c0_96, %c64_97] : memref<8x16x128xf32, #tpu.memory_space<vmem>>, vector<1x16x64xf32>
    %365 = vector.shape_cast %364 : vector<1x16x64xf32> to vector<16x64xf32>
    %366 = vector.extract_strided_slice %357 {offsets = [0, 64], sizes = [16, 64], strides = [1, 1]} : vector<16x128xf32> to vector<16x64xf32>
    %367 = arith.addf %365, %366 : vector<16x64xf32>
    %368 = vector.extract_strided_slice %362 {offsets = [0, 0], sizes = [16, 48], strides = [1, 1]} : vector<16x64xf32> to vector<16x48xf32>
    %369 = arith.negf %368 : vector<16x48xf32>
    %370 = math.exp %369 : vector<16x48xf32>
    %cst_98 = arith.constant 1.000000e+00 : f32
    %371 = vector.broadcast %cst_98 : f32 to vector<16x48xf32>
    %372 = arith.addf %371, %370 : vector<16x48xf32>
    %373 = arith.divf %371, %372 : vector<16x48xf32>
    %374 = vector.extract_strided_slice %362 {offsets = [0, 48], sizes = [16, 16], strides = [1, 1]} : vector<16x64xf32> to vector<16x16xf32>
    %375 = math.tanh %374 : vector<16x16xf32>
    %376 = vector.extract_strided_slice %373 {offsets = [0, 16], sizes = [16, 16], strides = [1, 1]} : vector<16x48xf32> to vector<16x16xf32>
    %377 = arith.mulf %376, %325 : vector<16x16xf32>
    %378 = vector.extract_strided_slice %373 {offsets = [0, 0], sizes = [16, 16], strides = [1, 1]} : vector<16x48xf32> to vector<16x16xf32>
    %379 = arith.mulf %378, %375 : vector<16x16xf32>
    %380 = arith.addf %377, %379 : vector<16x16xf32>
    %381 = vector.extract_strided_slice %373 {offsets = [0, 32], sizes = [16, 16], strides = [1, 1]} : vector<16x48xf32> to vector<16x16xf32>
    %382 = math.tanh %380 : vector<16x16xf32>
    %383 = arith.mulf %381, %382 : vector<16x16xf32>
    %384 = vector.extract_strided_slice %367 {offsets = [0, 0], sizes = [16, 48], strides = [1, 1]} : vector<16x64xf32> to vector<16x48xf32>
    %385 = arith.negf %384 : vector<16x48xf32>
    %386 = math.exp %385 : vector<16x48xf32>
    %cst_99 = arith.constant 1.000000e+00 : f32
    %387 = vector.broadcast %cst_99 : f32 to vector<16x48xf32>
    %388 = arith.addf %387, %386 : vector<16x48xf32>
    %389 = arith.divf %387, %388 : vector<16x48xf32>
    %390 = vector.extract_strided_slice %367 {offsets = [0, 48], sizes = [16, 16], strides = [1, 1]} : vector<16x64xf32> to vector<16x16xf32>
    %391 = math.tanh %390 : vector<16x16xf32>
    %392 = vector.extract_strided_slice %389 {offsets = [0, 16], sizes = [16, 16], strides = [1, 1]} : vector<16x48xf32> to vector<16x16xf32>
    %393 = arith.mulf %392, %341 : vector<16x16xf32>
    %394 = vector.extract_strided_slice %389 {offsets = [0, 0], sizes = [16, 16], strides = [1, 1]} : vector<16x48xf32> to vector<16x16xf32>
    %395 = arith.mulf %394, %391 : vector<16x16xf32>
    %396 = arith.addf %393, %395 : vector<16x16xf32>
    %397 = vector.extract_strided_slice %389 {offsets = [0, 32], sizes = [16, 16], strides = [1, 1]} : vector<16x48xf32> to vector<16x16xf32>
    %398 = math.tanh %396 : vector<16x16xf32>
    %399 = arith.mulf %397, %398 : vector<16x16xf32>
    %400 = arith.index_cast %c6_i32 : i32 to index
    %c0_100 = arith.constant 0 : index
    %c0_101 = arith.constant 0 : index
    %401 = vector.load %arg11[%400, %c0_100, %c0_101] : memref<8x16x32xf32, #tpu.memory_space<vmem>>, vector<1x16x16xf32>
    %402 = vector.shape_cast %401 : vector<1x16x16xf32> to vector<16x16xf32>
    %403 = vector.shape_cast %383 : vector<16x16xf32> to vector<1x16x16xf32>
    tpu.vector_store %arg11[%400, %c0_100, %c0_101], %403 {strides = array<i32>} : memref<8x16x32xf32, #tpu.memory_space<vmem>>, vector<1x16x16xf32>,
    %404 = arith.index_cast %353 : i32 to index
    %c0_102 = arith.constant 0 : index
    %c16_103 = arith.constant 16 : index
    %405 = vector.load %arg11[%404, %c0_102, %c16_103] : memref<8x16x32xf32, #tpu.memory_space<vmem>>, vector<1x16x16xf32>
    %406 = vector.shape_cast %405 : vector<1x16x16xf32> to vector<16x16xf32>
    %407 = vector.shape_cast %399 : vector<16x16xf32> to vector<1x16x16xf32>
    tpu.vector_store %arg11[%404, %c0_102, %c16_103], %407 {strides = array<i32>} : memref<8x16x32xf32, #tpu.memory_space<vmem>>, vector<1x16x16xf32>,
    %c7_i32_104 = arith.constant 7 : i32
    %c7_i32_105 = arith.constant 7 : i32
    %408 = arith.subi %c7_i32_105, %c7_i32_104 : i32
    %409 = tpu.concatenate %383, %399 in 1 : vector<16x16xf32>, vector<16x16xf32> -> vector<16x32xf32>
    %410 = arith.truncf %409 : vector<16x32xf32> to vector<16x32xbf16>
    %c0_106 = arith.constant 0 : index
    %c0_107 = arith.constant 0 : index
    %411 = vector.load %arg4[%c0_106, %c0_107] : memref<32x128xbf16, #tpu.memory_space<vmem>>, vector<32x128xbf16>
    %cst_108 = arith.constant dense<0.000000e+00> : vector<16x128xf32>
    %412 = tpu.matmul %410, %411, %cst_108 {dimension_numbers = #tpu.dot_dimension_numbers<[1], [0], [0], [1], [0, 0, 1, 1], [], []>} : vector<16x32xbf16>, vector<32x128xbf16>, vector<16x128xf32> -> vector<16x128xf32>
    %413 = arith.index_cast %c7_i32_104 : i32 to index
    %c0_109 = arith.constant 0 : index
    %c0_110 = arith.constant 0 : index
    %414 = vector.load %arg10[%413, %c0_109, %c0_110] : memref<8x16x128xf32, #tpu.memory_space<vmem>>, vector<1x16x64xf32>
    %415 = vector.shape_cast %414 : vector<1x16x64xf32> to vector<16x64xf32>
    %416 = vector.extract_strided_slice %412 {offsets = [0, 0], sizes = [16, 64], strides = [1, 1]} : vector<16x128xf32> to vector<16x64xf32>
    %417 = arith.addf %415, %416 : vector<16x64xf32>
    %418 = arith.index_cast %408 : i32 to index
    %c0_111 = arith.constant 0 : index
    %c64_112 = arith.constant 64 : index
    %419 = vector.load %arg10[%418, %c0_111, %c64_112] : memref<8x16x128xf32, #tpu.memory_space<vmem>>, vector<1x16x64xf32>
    %420 = vector.shape_cast %419 : vector<1x16x64xf32> to vector<16x64xf32>
    %421 = vector.extract_strided_slice %412 {offsets = [0, 64], sizes = [16, 64], strides = [1, 1]} : vector<16x128xf32> to vector<16x64xf32>
    %422 = arith.addf %420, %421 : vector<16x64xf32>
    %423 = vector.extract_strided_slice %417 {offsets = [0, 0], sizes = [16, 48], strides = [1, 1]} : vector<16x64xf32> to vector<16x48xf32>
    %424 = arith.negf %423 : vector<16x48xf32>
    %425 = math.exp %424 : vector<16x48xf32>
    %cst_113 = arith.constant 1.000000e+00 : f32
    %426 = vector.broadcast %cst_113 : f32 to vector<16x48xf32>
    %427 = arith.addf %426, %425 : vector<16x48xf32>
    %428 = arith.divf %426, %427 : vector<16x48xf32>
    %429 = vector.extract_strided_slice %417 {offsets = [0, 48], sizes = [16, 16], strides = [1, 1]} : vector<16x64xf32> to vector<16x16xf32>
    %430 = math.tanh %429 : vector<16x16xf32>
    %431 = vector.extract_strided_slice %428 {offsets = [0, 16], sizes = [16, 16], strides = [1, 1]} : vector<16x48xf32> to vector<16x16xf32>
    %432 = arith.mulf %431, %380 : vector<16x16xf32>
    %433 = vector.extract_strided_slice %428 {offsets = [0, 0], sizes = [16, 16], strides = [1, 1]} : vector<16x48xf32> to vector<16x16xf32>
    %434 = arith.mulf %433, %430 : vector<16x16xf32>
    %435 = arith.addf %432, %434 : vector<16x16xf32>
    %436 = vector.extract_strided_slice %428 {offsets = [0, 32], sizes = [16, 16], strides = [1, 1]} : vector<16x48xf32> to vector<16x16xf32>
    %437 = math.tanh %435 : vector<16x16xf32>
    %438 = arith.mulf %436, %437 : vector<16x16xf32>
    %439 = vector.extract_strided_slice %422 {offsets = [0, 0], sizes = [16, 48], strides = [1, 1]} : vector<16x64xf32> to vector<16x48xf32>
    %440 = arith.negf %439 : vector<16x48xf32>
    %441 = math.exp %440 : vector<16x48xf32>
    %cst_114 = arith.constant 1.000000e+00 : f32
    %442 = vector.broadcast %cst_114 : f32 to vector<16x48xf32>
    %443 = arith.addf %442, %441 : vector<16x48xf32>
    %444 = arith.divf %442, %443 : vector<16x48xf32>
    %445 = vector.extract_strided_slice %422 {offsets = [0, 48], sizes = [16, 16], strides = [1, 1]} : vector<16x64xf32> to vector<16x16xf32>
    %446 = math.tanh %445 : vector<16x16xf32>
    %447 = vector.extract_strided_slice %444 {offsets = [0, 16], sizes = [16, 16], strides = [1, 1]} : vector<16x48xf32> to vector<16x16xf32>
    %448 = arith.mulf %447, %396 : vector<16x16xf32>
    %449 = vector.extract_strided_slice %444 {offsets = [0, 0], sizes = [16, 16], strides = [1, 1]} : vector<16x48xf32> to vector<16x16xf32>
    %450 = arith.mulf %449, %446 : vector<16x16xf32>
    %451 = arith.addf %448, %450 : vector<16x16xf32>
    %452 = vector.extract_strided_slice %444 {offsets = [0, 32], sizes = [16, 16], strides = [1, 1]} : vector<16x48xf32> to vector<16x16xf32>
    %453 = math.tanh %451 : vector<16x16xf32>
    %454 = arith.mulf %452, %453 : vector<16x16xf32>
    %455 = arith.index_cast %c7_i32_104 : i32 to index
    %c0_115 = arith.constant 0 : index
    %c0_116 = arith.constant 0 : index
    %456 = vector.load %arg11[%455, %c0_115, %c0_116] : memref<8x16x32xf32, #tpu.memory_space<vmem>>, vector<1x16x16xf32>
    %457 = vector.shape_cast %456 : vector<1x16x16xf32> to vector<16x16xf32>
    %458 = vector.shape_cast %438 : vector<16x16xf32> to vector<1x16x16xf32>
    tpu.vector_store %arg11[%455, %c0_115, %c0_116], %458 {strides = array<i32>} : memref<8x16x32xf32, #tpu.memory_space<vmem>>, vector<1x16x16xf32>,
    %459 = arith.index_cast %408 : i32 to index
    %c0_117 = arith.constant 0 : index
    %c16_118 = arith.constant 16 : index
    %460 = vector.load %arg11[%459, %c0_117, %c16_118] : memref<8x16x32xf32, #tpu.memory_space<vmem>>, vector<1x16x16xf32>
    %461 = vector.shape_cast %460 : vector<1x16x16xf32> to vector<16x16xf32>
    %462 = vector.shape_cast %454 : vector<16x16xf32> to vector<1x16x16xf32>
    tpu.vector_store %arg11[%459, %c0_117, %c16_118], %462 {strides = array<i32>} : memref<8x16x32xf32, #tpu.memory_space<vmem>>, vector<1x16x16xf32>,
    %c8_i32 = arith.constant 8 : i32
    %c0_119 = arith.constant 0 : index
    %c0_120 = arith.constant 0 : index
    %c0_121 = arith.constant 0 : index
    %463 = vector.load %arg11[%c0_119, %c0_120, %c0_121] : memref<8x16x32xf32, #tpu.memory_space<vmem>>, vector<8x16x32xf32>
    %464 = vector.shape_cast %463 : vector<8x16x32xf32> to vector<128x32xf32>
    %465 = arith.truncf %464 : vector<128x32xf32> to vector<128x32xbf16>
    %c0_122 = arith.constant 0 : index
    %c0_123 = arith.constant 0 : index
    %466 = vector.load %arg5[%c0_122, %c0_123] : memref<32x128xbf16, #tpu.memory_space<vmem>>, vector<32x128xbf16>
    %cst_124 = arith.constant dense<0.000000e+00> : vector<128x128xf32>
    %467 = tpu.matmul %465, %466, %cst_124 {dimension_numbers = #tpu.dot_dimension_numbers<[1], [0], [0], [1], [0, 0, 1, 1], [], []>} : vector<128x32xbf16>, vector<32x128xbf16>, vector<128x128xf32> -> vector<128x128xf32>
    %c0_125 = arith.constant 0 : index
    %c0_126 = arith.constant 0 : index
    %468 = vector.load %arg6[%c0_125, %c0_126] : memref<1x128xf32, #tpu.memory_space<vmem>>, vector<1x128xf32>
    %469 = vector.broadcast %468 : vector<1x128xf32> to vector<128x128xf32>
    %470 = arith.addf %467, %469 : vector<128x128xf32>
    %471 = vector.shape_cast %470 : vector<128x128xf32> to vector<8x16x128xf32>
    %c0_127 = arith.constant 0 : index
    %c0_128 = arith.constant 0 : index
    %c0_129 = arith.constant 0 : index
    %472 = vector.load %arg10[%c0_127, %c0_128, %c0_129] : memref<8x16x128xf32, #tpu.memory_space<vmem>>, vector<8x16x128xf32>
    tpu.vector_store %arg10[%c0_127, %c0_128, %c0_129], %471 {strides = array<i32>} : memref<8x16x128xf32, #tpu.memory_space<vmem>>, vector<8x16x128xf32>,
    %c0_i32_130 = arith.constant 0 : i32
    %c7_i32_131 = arith.constant 7 : i32
    %473 = arith.subi %c7_i32_131, %c0_i32_130 : i32
    %474 = tpu.concatenate %0, %0 in 1 : vector<16x16xf32>, vector<16x16xf32> -> vector<16x32xf32>
    %475 = arith.truncf %474 : vector<16x32xf32> to vector<16x32xbf16>
    %c0_132 = arith.constant 0 : index
    %c0_133 = arith.constant 0 : index
    %476 = vector.load %arg7[%c0_132, %c0_133] : memref<32x128xbf16, #tpu.memory_space<vmem>>, vector<32x128xbf16>
    %cst_134 = arith.constant dense<0.000000e+00> : vector<16x128xf32>
    %477 = tpu.matmul %475, %476, %cst_134 {dimension_numbers = #tpu.dot_dimension_numbers<[1], [0], [0], [1], [0, 0, 1, 1], [], []>} : vector<16x32xbf16>, vector<32x128xbf16>, vector<16x128xf32> -> vector<16x128xf32>
    %478 = arith.index_cast %c0_i32_130 : i32 to index
    %c0_135 = arith.constant 0 : index
    %c0_136 = arith.constant 0 : index
    %479 = vector.load %arg10[%478, %c0_135, %c0_136] : memref<8x16x128xf32, #tpu.memory_space<vmem>>, vector<1x16x64xf32>
    %480 = vector.shape_cast %479 : vector<1x16x64xf32> to vector<16x64xf32>
    %481 = vector.extract_strided_slice %477 {offsets = [0, 0], sizes = [16, 64], strides = [1, 1]} : vector<16x128xf32> to vector<16x64xf32>
    %482 = arith.addf %480, %481 : vector<16x64xf32>
    %483 = arith.index_cast %473 : i32 to index
    %c0_137 = arith.constant 0 : index
    %c64_138 = arith.constant 64 : index
    %484 = vector.load %arg10[%483, %c0_137, %c64_138] : memref<8x16x128xf32, #tpu.memory_space<vmem>>, vector<1x16x64xf32>
    %485 = vector.shape_cast %484 : vector<1x16x64xf32> to vector<16x64xf32>
    %486 = vector.extract_strided_slice %477 {offsets = [0, 64], sizes = [16, 64], strides = [1, 1]} : vector<16x128xf32> to vector<16x64xf32>
    %487 = arith.addf %485, %486 : vector<16x64xf32>
    %488 = vector.extract_strided_slice %482 {offsets = [0, 0], sizes = [16, 48], strides = [1, 1]} : vector<16x64xf32> to vector<16x48xf32>
    %489 = arith.negf %488 : vector<16x48xf32>
    %490 = math.exp %489 : vector<16x48xf32>
    %cst_139 = arith.constant 1.000000e+00 : f32
    %491 = vector.broadcast %cst_139 : f32 to vector<16x48xf32>
    %492 = arith.addf %491, %490 : vector<16x48xf32>
    %493 = arith.divf %491, %492 : vector<16x48xf32>
    %494 = vector.extract_strided_slice %482 {offsets = [0, 48], sizes = [16, 16], strides = [1, 1]} : vector<16x64xf32> to vector<16x16xf32>
    %495 = math.tanh %494 : vector<16x16xf32>
    %496 = vector.extract_strided_slice %493 {offsets = [0, 16], sizes = [16, 16], strides = [1, 1]} : vector<16x48xf32> to vector<16x16xf32>
    %497 = arith.mulf %496, %0 : vector<16x16xf32>
    %498 = vector.extract_strided_slice %493 {offsets = [0, 0], sizes = [16, 16], strides = [1, 1]} : vector<16x48xf32> to vector<16x16xf32>
    %499 = arith.mulf %498, %495 : vector<16x16xf32>
    %500 = arith.addf %497, %499 : vector<16x16xf32>
    %501 = vector.extract_strided_slice %493 {offsets = [0, 32], sizes = [16, 16], strides = [1, 1]} : vector<16x48xf32> to vector<16x16xf32>
    %502 = math.tanh %500 : vector<16x16xf32>
    %503 = arith.mulf %501, %502 : vector<16x16xf32>
    %504 = vector.extract_strided_slice %487 {offsets = [0, 0], sizes = [16, 48], strides = [1, 1]} : vector<16x64xf32> to vector<16x48xf32>
    %505 = arith.negf %504 : vector<16x48xf32>
    %506 = math.exp %505 : vector<16x48xf32>
    %cst_140 = arith.constant 1.000000e+00 : f32
    %507 = vector.broadcast %cst_140 : f32 to vector<16x48xf32>
    %508 = arith.addf %507, %506 : vector<16x48xf32>
    %509 = arith.divf %507, %508 : vector<16x48xf32>
    %510 = vector.extract_strided_slice %487 {offsets = [0, 48], sizes = [16, 16], strides = [1, 1]} : vector<16x64xf32> to vector<16x16xf32>
    %511 = math.tanh %510 : vector<16x16xf32>
    %512 = vector.extract_strided_slice %509 {offsets = [0, 16], sizes = [16, 16], strides = [1, 1]} : vector<16x48xf32> to vector<16x16xf32>
    %513 = arith.mulf %512, %0 : vector<16x16xf32>
    %514 = vector.extract_strided_slice %509 {offsets = [0, 0], sizes = [16, 16], strides = [1, 1]} : vector<16x48xf32> to vector<16x16xf32>
    %515 = arith.mulf %514, %511 : vector<16x16xf32>
    %516 = arith.addf %513, %515 : vector<16x16xf32>
    %517 = vector.extract_strided_slice %509 {offsets = [0, 32], sizes = [16, 16], strides = [1, 1]} : vector<16x48xf32> to vector<16x16xf32>
    %518 = math.tanh %516 : vector<16x16xf32>
    %519 = arith.mulf %517, %518 : vector<16x16xf32>
    %c1_i32_141 = arith.constant 1 : i32
    %c7_i32_142 = arith.constant 7 : i32
    %520 = arith.subi %c7_i32_142, %c1_i32_141 : i32
    %521 = tpu.concatenate %503, %519 in 1 : vector<16x16xf32>, vector<16x16xf32> -> vector<16x32xf32>
    %522 = arith.truncf %521 : vector<16x32xf32> to vector<16x32xbf16>
    %c0_143 = arith.constant 0 : index
    %c0_144 = arith.constant 0 : index
    %523 = vector.load %arg7[%c0_143, %c0_144] : memref<32x128xbf16, #tpu.memory_space<vmem>>, vector<32x128xbf16>
    %cst_145 = arith.constant dense<0.000000e+00> : vector<16x128xf32>
    %524 = tpu.matmul %522, %523, %cst_145 {dimension_numbers = #tpu.dot_dimension_numbers<[1], [0], [0], [1], [0, 0, 1, 1], [], []>} : vector<16x32xbf16>, vector<32x128xbf16>, vector<16x128xf32> -> vector<16x128xf32>
    %525 = arith.index_cast %c1_i32_141 : i32 to index
    %c0_146 = arith.constant 0 : index
    %c0_147 = arith.constant 0 : index
    %526 = vector.load %arg10[%525, %c0_146, %c0_147] : memref<8x16x128xf32, #tpu.memory_space<vmem>>, vector<1x16x64xf32>
    %527 = vector.shape_cast %526 : vector<1x16x64xf32> to vector<16x64xf32>
    %528 = vector.extract_strided_slice %524 {offsets = [0, 0], sizes = [16, 64], strides = [1, 1]} : vector<16x128xf32> to vector<16x64xf32>
    %529 = arith.addf %527, %528 : vector<16x64xf32>
    %530 = arith.index_cast %520 : i32 to index
    %c0_148 = arith.constant 0 : index
    %c64_149 = arith.constant 64 : index
    %531 = vector.load %arg10[%530, %c0_148, %c64_149] : memref<8x16x128xf32, #tpu.memory_space<vmem>>, vector<1x16x64xf32>
    %532 = vector.shape_cast %531 : vector<1x16x64xf32> to vector<16x64xf32>
    %533 = vector.extract_strided_slice %524 {offsets = [0, 64], sizes = [16, 64], strides = [1, 1]} : vector<16x128xf32> to vector<16x64xf32>
    %534 = arith.addf %532, %533 : vector<16x64xf32>
    %535 = vector.extract_strided_slice %529 {offsets = [0, 0], sizes = [16, 48], strides = [1, 1]} : vector<16x64xf32> to vector<16x48xf32>
    %536 = arith.negf %535 : vector<16x48xf32>
    %537 = math.exp %536 : vector<16x48xf32>
    %cst_150 = arith.constant 1.000000e+00 : f32
    %538 = vector.broadcast %cst_150 : f32 to vector<16x48xf32>
    %539 = arith.addf %538, %537 : vector<16x48xf32>
    %540 = arith.divf %538, %539 : vector<16x48xf32>
    %541 = vector.extract_strided_slice %529 {offsets = [0, 48], sizes = [16, 16], strides = [1, 1]} : vector<16x64xf32> to vector<16x16xf32>
    %542 = math.tanh %541 : vector<16x16xf32>
    %543 = vector.extract_strided_slice %540 {offsets = [0, 16], sizes = [16, 16], strides = [1, 1]} : vector<16x48xf32> to vector<16x16xf32>
    %544 = arith.mulf %543, %500 : vector<16x16xf32>
    %545 = vector.extract_strided_slice %540 {offsets = [0, 0], sizes = [16, 16], strides = [1, 1]} : vector<16x48xf32> to vector<16x16xf32>
    %546 = arith.mulf %545, %542 : vector<16x16xf32>
    %547 = arith.addf %544, %546 : vector<16x16xf32>
    %548 = vector.extract_strided_slice %540 {offsets = [0, 32], sizes = [16, 16], strides = [1, 1]} : vector<16x48xf32> to vector<16x16xf32>
    %549 = math.tanh %547 : vector<16x16xf32>
    %550 = arith.mulf %548, %549 : vector<16x16xf32>
    %551 = vector.extract_strided_slice %534 {offsets = [0, 0], sizes = [16, 48], strides = [1, 1]} : vector<16x64xf32> to vector<16x48xf32>
    %552 = arith.negf %551 : vector<16x48xf32>
    %553 = math.exp %552 : vector<16x48xf32>
    %cst_151 = arith.constant 1.000000e+00 : f32
    %554 = vector.broadcast %cst_151 : f32 to vector<16x48xf32>
    %555 = arith.addf %554, %553 : vector<16x48xf32>
    %556 = arith.divf %554, %555 : vector<16x48xf32>
    %557 = vector.extract_strided_slice %534 {offsets = [0, 48], sizes = [16, 16], strides = [1, 1]} : vector<16x64xf32> to vector<16x16xf32>
    %558 = math.tanh %557 : vector<16x16xf32>
    %559 = vector.extract_strided_slice %556 {offsets = [0, 16], sizes = [16, 16], strides = [1, 1]} : vector<16x48xf32> to vector<16x16xf32>
    %560 = arith.mulf %559, %516 : vector<16x16xf32>
    %561 = vector.extract_strided_slice %556 {offsets = [0, 0], sizes = [16, 16], strides = [1, 1]} : vector<16x48xf32> to vector<16x16xf32>
    %562 = arith.mulf %561, %558 : vector<16x16xf32>
    %563 = arith.addf %560, %562 : vector<16x16xf32>
    %564 = vector.extract_strided_slice %556 {offsets = [0, 32], sizes = [16, 16], strides = [1, 1]} : vector<16x48xf32> to vector<16x16xf32>
    %565 = math.tanh %563 : vector<16x16xf32>
    %566 = arith.mulf %564, %565 : vector<16x16xf32>
    %c2_i32_152 = arith.constant 2 : i32
    %c7_i32_153 = arith.constant 7 : i32
    %567 = arith.subi %c7_i32_153, %c2_i32_152 : i32
    %568 = tpu.concatenate %550, %566 in 1 : vector<16x16xf32>, vector<16x16xf32> -> vector<16x32xf32>
    %569 = arith.truncf %568 : vector<16x32xf32> to vector<16x32xbf16>
    %c0_154 = arith.constant 0 : index
    %c0_155 = arith.constant 0 : index
    %570 = vector.load %arg7[%c0_154, %c0_155] : memref<32x128xbf16, #tpu.memory_space<vmem>>, vector<32x128xbf16>
    %cst_156 = arith.constant dense<0.000000e+00> : vector<16x128xf32>
    %571 = tpu.matmul %569, %570, %cst_156 {dimension_numbers = #tpu.dot_dimension_numbers<[1], [0], [0], [1], [0, 0, 1, 1], [], []>} : vector<16x32xbf16>, vector<32x128xbf16>, vector<16x128xf32> -> vector<16x128xf32>
    %572 = arith.index_cast %c2_i32_152 : i32 to index
    %c0_157 = arith.constant 0 : index
    %c0_158 = arith.constant 0 : index
    %573 = vector.load %arg10[%572, %c0_157, %c0_158] : memref<8x16x128xf32, #tpu.memory_space<vmem>>, vector<1x16x64xf32>
    %574 = vector.shape_cast %573 : vector<1x16x64xf32> to vector<16x64xf32>
    %575 = vector.extract_strided_slice %571 {offsets = [0, 0], sizes = [16, 64], strides = [1, 1]} : vector<16x128xf32> to vector<16x64xf32>
    %576 = arith.addf %574, %575 : vector<16x64xf32>
    %577 = arith.index_cast %567 : i32 to index
    %c0_159 = arith.constant 0 : index
    %c64_160 = arith.constant 64 : index
    %578 = vector.load %arg10[%577, %c0_159, %c64_160] : memref<8x16x128xf32, #tpu.memory_space<vmem>>, vector<1x16x64xf32>
    %579 = vector.shape_cast %578 : vector<1x16x64xf32> to vector<16x64xf32>
    %580 = vector.extract_strided_slice %571 {offsets = [0, 64], sizes = [16, 64], strides = [1, 1]} : vector<16x128xf32> to vector<16x64xf32>
    %581 = arith.addf %579, %580 : vector<16x64xf32>
    %582 = vector.extract_strided_slice %576 {offsets = [0, 0], sizes = [16, 48], strides = [1, 1]} : vector<16x64xf32> to vector<16x48xf32>
    %583 = arith.negf %582 : vector<16x48xf32>
    %584 = math.exp %583 : vector<16x48xf32>
    %cst_161 = arith.constant 1.000000e+00 : f32
    %585 = vector.broadcast %cst_161 : f32 to vector<16x48xf32>
    %586 = arith.addf %585, %584 : vector<16x48xf32>
    %587 = arith.divf %585, %586 : vector<16x48xf32>
    %588 = vector.extract_strided_slice %576 {offsets = [0, 48], sizes = [16, 16], strides = [1, 1]} : vector<16x64xf32> to vector<16x16xf32>
    %589 = math.tanh %588 : vector<16x16xf32>
    %590 = vector.extract_strided_slice %587 {offsets = [0, 16], sizes = [16, 16], strides = [1, 1]} : vector<16x48xf32> to vector<16x16xf32>
    %591 = arith.mulf %590, %547 : vector<16x16xf32>
    %592 = vector.extract_strided_slice %587 {offsets = [0, 0], sizes = [16, 16], strides = [1, 1]} : vector<16x48xf32> to vector<16x16xf32>
    %593 = arith.mulf %592, %589 : vector<16x16xf32>
    %594 = arith.addf %591, %593 : vector<16x16xf32>
    %595 = vector.extract_strided_slice %587 {offsets = [0, 32], sizes = [16, 16], strides = [1, 1]} : vector<16x48xf32> to vector<16x16xf32>
    %596 = math.tanh %594 : vector<16x16xf32>
    %597 = arith.mulf %595, %596 : vector<16x16xf32>
    %598 = vector.extract_strided_slice %581 {offsets = [0, 0], sizes = [16, 48], strides = [1, 1]} : vector<16x64xf32> to vector<16x48xf32>
    %599 = arith.negf %598 : vector<16x48xf32>
    %600 = math.exp %599 : vector<16x48xf32>
    %cst_162 = arith.constant 1.000000e+00 : f32
    %601 = vector.broadcast %cst_162 : f32 to vector<16x48xf32>
    %602 = arith.addf %601, %600 : vector<16x48xf32>
    %603 = arith.divf %601, %602 : vector<16x48xf32>
    %604 = vector.extract_strided_slice %581 {offsets = [0, 48], sizes = [16, 16], strides = [1, 1]} : vector<16x64xf32> to vector<16x16xf32>
    %605 = math.tanh %604 : vector<16x16xf32>
    %606 = vector.extract_strided_slice %603 {offsets = [0, 16], sizes = [16, 16], strides = [1, 1]} : vector<16x48xf32> to vector<16x16xf32>
    %607 = arith.mulf %606, %563 : vector<16x16xf32>
    %608 = vector.extract_strided_slice %603 {offsets = [0, 0], sizes = [16, 16], strides = [1, 1]} : vector<16x48xf32> to vector<16x16xf32>
    %609 = arith.mulf %608, %605 : vector<16x16xf32>
    %610 = arith.addf %607, %609 : vector<16x16xf32>
    %611 = vector.extract_strided_slice %603 {offsets = [0, 32], sizes = [16, 16], strides = [1, 1]} : vector<16x48xf32> to vector<16x16xf32>
    %612 = math.tanh %610 : vector<16x16xf32>
    %613 = arith.mulf %611, %612 : vector<16x16xf32>
    %c3_i32_163 = arith.constant 3 : i32
    %c7_i32_164 = arith.constant 7 : i32
    %614 = arith.subi %c7_i32_164, %c3_i32_163 : i32
    %615 = tpu.concatenate %597, %613 in 1 : vector<16x16xf32>, vector<16x16xf32> -> vector<16x32xf32>
    %616 = arith.truncf %615 : vector<16x32xf32> to vector<16x32xbf16>
    %c0_165 = arith.constant 0 : index
    %c0_166 = arith.constant 0 : index
    %617 = vector.load %arg7[%c0_165, %c0_166] : memref<32x128xbf16, #tpu.memory_space<vmem>>, vector<32x128xbf16>
    %cst_167 = arith.constant dense<0.000000e+00> : vector<16x128xf32>
    %618 = tpu.matmul %616, %617, %cst_167 {dimension_numbers = #tpu.dot_dimension_numbers<[1], [0], [0], [1], [0, 0, 1, 1], [], []>} : vector<16x32xbf16>, vector<32x128xbf16>, vector<16x128xf32> -> vector<16x128xf32>
    %619 = arith.index_cast %c3_i32_163 : i32 to index
    %c0_168 = arith.constant 0 : index
    %c0_169 = arith.constant 0 : index
    %620 = vector.load %arg10[%619, %c0_168, %c0_169] : memref<8x16x128xf32, #tpu.memory_space<vmem>>, vector<1x16x64xf32>
    %621 = vector.shape_cast %620 : vector<1x16x64xf32> to vector<16x64xf32>
    %622 = vector.extract_strided_slice %618 {offsets = [0, 0], sizes = [16, 64], strides = [1, 1]} : vector<16x128xf32> to vector<16x64xf32>
    %623 = arith.addf %621, %622 : vector<16x64xf32>
    %624 = arith.index_cast %614 : i32 to index
    %c0_170 = arith.constant 0 : index
    %c64_171 = arith.constant 64 : index
    %625 = vector.load %arg10[%624, %c0_170, %c64_171] : memref<8x16x128xf32, #tpu.memory_space<vmem>>, vector<1x16x64xf32>
    %626 = vector.shape_cast %625 : vector<1x16x64xf32> to vector<16x64xf32>
    %627 = vector.extract_strided_slice %618 {offsets = [0, 64], sizes = [16, 64], strides = [1, 1]} : vector<16x128xf32> to vector<16x64xf32>
    %628 = arith.addf %626, %627 : vector<16x64xf32>
    %629 = vector.extract_strided_slice %623 {offsets = [0, 0], sizes = [16, 48], strides = [1, 1]} : vector<16x64xf32> to vector<16x48xf32>
    %630 = arith.negf %629 : vector<16x48xf32>
    %631 = math.exp %630 : vector<16x48xf32>
    %cst_172 = arith.constant 1.000000e+00 : f32
    %632 = vector.broadcast %cst_172 : f32 to vector<16x48xf32>
    %633 = arith.addf %632, %631 : vector<16x48xf32>
    %634 = arith.divf %632, %633 : vector<16x48xf32>
    %635 = vector.extract_strided_slice %623 {offsets = [0, 48], sizes = [16, 16], strides = [1, 1]} : vector<16x64xf32> to vector<16x16xf32>
    %636 = math.tanh %635 : vector<16x16xf32>
    %637 = vector.extract_strided_slice %634 {offsets = [0, 16], sizes = [16, 16], strides = [1, 1]} : vector<16x48xf32> to vector<16x16xf32>
    %638 = arith.mulf %637, %594 : vector<16x16xf32>
    %639 = vector.extract_strided_slice %634 {offsets = [0, 0], sizes = [16, 16], strides = [1, 1]} : vector<16x48xf32> to vector<16x16xf32>
    %640 = arith.mulf %639, %636 : vector<16x16xf32>
    %641 = arith.addf %638, %640 : vector<16x16xf32>
    %642 = vector.extract_strided_slice %634 {offsets = [0, 32], sizes = [16, 16], strides = [1, 1]} : vector<16x48xf32> to vector<16x16xf32>
    %643 = math.tanh %641 : vector<16x16xf32>
    %644 = arith.mulf %642, %643 : vector<16x16xf32>
    %645 = vector.extract_strided_slice %628 {offsets = [0, 0], sizes = [16, 48], strides = [1, 1]} : vector<16x64xf32> to vector<16x48xf32>
    %646 = arith.negf %645 : vector<16x48xf32>
    %647 = math.exp %646 : vector<16x48xf32>
    %cst_173 = arith.constant 1.000000e+00 : f32
    %648 = vector.broadcast %cst_173 : f32 to vector<16x48xf32>
    %649 = arith.addf %648, %647 : vector<16x48xf32>
    %650 = arith.divf %648, %649 : vector<16x48xf32>
    %651 = vector.extract_strided_slice %628 {offsets = [0, 48], sizes = [16, 16], strides = [1, 1]} : vector<16x64xf32> to vector<16x16xf32>
    %652 = math.tanh %651 : vector<16x16xf32>
    %653 = vector.extract_strided_slice %650 {offsets = [0, 16], sizes = [16, 16], strides = [1, 1]} : vector<16x48xf32> to vector<16x16xf32>
    %654 = arith.mulf %653, %610 : vector<16x16xf32>
    %655 = vector.extract_strided_slice %650 {offsets = [0, 0], sizes = [16, 16], strides = [1, 1]} : vector<16x48xf32> to vector<16x16xf32>
    %656 = arith.mulf %655, %652 : vector<16x16xf32>
    %657 = arith.addf %654, %656 : vector<16x16xf32>
    %658 = vector.extract_strided_slice %650 {offsets = [0, 32], sizes = [16, 16], strides = [1, 1]} : vector<16x48xf32> to vector<16x16xf32>
    %659 = math.tanh %657 : vector<16x16xf32>
    %660 = arith.mulf %658, %659 : vector<16x16xf32>
    %c4_i32_174 = arith.constant 4 : i32
    %c7_i32_175 = arith.constant 7 : i32
    %661 = arith.subi %c7_i32_175, %c4_i32_174 : i32
    %662 = tpu.concatenate %644, %660 in 1 : vector<16x16xf32>, vector<16x16xf32> -> vector<16x32xf32>
    %663 = arith.truncf %662 : vector<16x32xf32> to vector<16x32xbf16>
    %c0_176 = arith.constant 0 : index
    %c0_177 = arith.constant 0 : index
    %664 = vector.load %arg7[%c0_176, %c0_177] : memref<32x128xbf16, #tpu.memory_space<vmem>>, vector<32x128xbf16>
    %cst_178 = arith.constant dense<0.000000e+00> : vector<16x128xf32>
    %665 = tpu.matmul %663, %664, %cst_178 {dimension_numbers = #tpu.dot_dimension_numbers<[1], [0], [0], [1], [0, 0, 1, 1], [], []>} : vector<16x32xbf16>, vector<32x128xbf16>, vector<16x128xf32> -> vector<16x128xf32>
    %666 = arith.index_cast %c4_i32_174 : i32 to index
    %c0_179 = arith.constant 0 : index
    %c0_180 = arith.constant 0 : index
    %667 = vector.load %arg10[%666, %c0_179, %c0_180] : memref<8x16x128xf32, #tpu.memory_space<vmem>>, vector<1x16x64xf32>
    %668 = vector.shape_cast %667 : vector<1x16x64xf32> to vector<16x64xf32>
    %669 = vector.extract_strided_slice %665 {offsets = [0, 0], sizes = [16, 64], strides = [1, 1]} : vector<16x128xf32> to vector<16x64xf32>
    %670 = arith.addf %668, %669 : vector<16x64xf32>
    %671 = arith.index_cast %661 : i32 to index
    %c0_181 = arith.constant 0 : index
    %c64_182 = arith.constant 64 : index
    %672 = vector.load %arg10[%671, %c0_181, %c64_182] : memref<8x16x128xf32, #tpu.memory_space<vmem>>, vector<1x16x64xf32>
    %673 = vector.shape_cast %672 : vector<1x16x64xf32> to vector<16x64xf32>
    %674 = vector.extract_strided_slice %665 {offsets = [0, 64], sizes = [16, 64], strides = [1, 1]} : vector<16x128xf32> to vector<16x64xf32>
    %675 = arith.addf %673, %674 : vector<16x64xf32>
    %676 = vector.extract_strided_slice %670 {offsets = [0, 0], sizes = [16, 48], strides = [1, 1]} : vector<16x64xf32> to vector<16x48xf32>
    %677 = arith.negf %676 : vector<16x48xf32>
    %678 = math.exp %677 : vector<16x48xf32>
    %cst_183 = arith.constant 1.000000e+00 : f32
    %679 = vector.broadcast %cst_183 : f32 to vector<16x48xf32>
    %680 = arith.addf %679, %678 : vector<16x48xf32>
    %681 = arith.divf %679, %680 : vector<16x48xf32>
    %682 = vector.extract_strided_slice %670 {offsets = [0, 48], sizes = [16, 16], strides = [1, 1]} : vector<16x64xf32> to vector<16x16xf32>
    %683 = math.tanh %682 : vector<16x16xf32>
    %684 = vector.extract_strided_slice %681 {offsets = [0, 16], sizes = [16, 16], strides = [1, 1]} : vector<16x48xf32> to vector<16x16xf32>
    %685 = arith.mulf %684, %641 : vector<16x16xf32>
    %686 = vector.extract_strided_slice %681 {offsets = [0, 0], sizes = [16, 16], strides = [1, 1]} : vector<16x48xf32> to vector<16x16xf32>
    %687 = arith.mulf %686, %683 : vector<16x16xf32>
    %688 = arith.addf %685, %687 : vector<16x16xf32>
    %689 = vector.extract_strided_slice %681 {offsets = [0, 32], sizes = [16, 16], strides = [1, 1]} : vector<16x48xf32> to vector<16x16xf32>
    %690 = math.tanh %688 : vector<16x16xf32>
    %691 = arith.mulf %689, %690 : vector<16x16xf32>
    %692 = vector.extract_strided_slice %675 {offsets = [0, 0], sizes = [16, 48], strides = [1, 1]} : vector<16x64xf32> to vector<16x48xf32>
    %693 = arith.negf %692 : vector<16x48xf32>
    %694 = math.exp %693 : vector<16x48xf32>
    %cst_184 = arith.constant 1.000000e+00 : f32
    %695 = vector.broadcast %cst_184 : f32 to vector<16x48xf32>
    %696 = arith.addf %695, %694 : vector<16x48xf32>
    %697 = arith.divf %695, %696 : vector<16x48xf32>
    %698 = vector.extract_strided_slice %675 {offsets = [0, 48], sizes = [16, 16], strides = [1, 1]} : vector<16x64xf32> to vector<16x16xf32>
    %699 = math.tanh %698 : vector<16x16xf32>
    %700 = vector.extract_strided_slice %697 {offsets = [0, 16], sizes = [16, 16], strides = [1, 1]} : vector<16x48xf32> to vector<16x16xf32>
    %701 = arith.mulf %700, %657 : vector<16x16xf32>
    %702 = vector.extract_strided_slice %697 {offsets = [0, 0], sizes = [16, 16], strides = [1, 1]} : vector<16x48xf32> to vector<16x16xf32>
    %703 = arith.mulf %702, %699 : vector<16x16xf32>
    %704 = arith.addf %701, %703 : vector<16x16xf32>
    %705 = vector.extract_strided_slice %697 {offsets = [0, 32], sizes = [16, 16], strides = [1, 1]} : vector<16x48xf32> to vector<16x16xf32>
    %706 = math.tanh %704 : vector<16x16xf32>
    %707 = arith.mulf %705, %706 : vector<16x16xf32>
    %c5_i32_185 = arith.constant 5 : i32
    %c7_i32_186 = arith.constant 7 : i32
    %708 = arith.subi %c7_i32_186, %c5_i32_185 : i32
    %709 = tpu.concatenate %691, %707 in 1 : vector<16x16xf32>, vector<16x16xf32> -> vector<16x32xf32>
    %710 = arith.truncf %709 : vector<16x32xf32> to vector<16x32xbf16>
    %c0_187 = arith.constant 0 : index
    %c0_188 = arith.constant 0 : index
    %711 = vector.load %arg7[%c0_187, %c0_188] : memref<32x128xbf16, #tpu.memory_space<vmem>>, vector<32x128xbf16>
    %cst_189 = arith.constant dense<0.000000e+00> : vector<16x128xf32>
    %712 = tpu.matmul %710, %711, %cst_189 {dimension_numbers = #tpu.dot_dimension_numbers<[1], [0], [0], [1], [0, 0, 1, 1], [], []>} : vector<16x32xbf16>, vector<32x128xbf16>, vector<16x128xf32> -> vector<16x128xf32>
    %713 = arith.index_cast %c5_i32_185 : i32 to index
    %c0_190 = arith.constant 0 : index
    %c0_191 = arith.constant 0 : index
    %714 = vector.load %arg10[%713, %c0_190, %c0_191] : memref<8x16x128xf32, #tpu.memory_space<vmem>>, vector<1x16x64xf32>
    %715 = vector.shape_cast %714 : vector<1x16x64xf32> to vector<16x64xf32>
    %716 = vector.extract_strided_slice %712 {offsets = [0, 0], sizes = [16, 64], strides = [1, 1]} : vector<16x128xf32> to vector<16x64xf32>
    %717 = arith.addf %715, %716 : vector<16x64xf32>
    %718 = arith.index_cast %708 : i32 to index
    %c0_192 = arith.constant 0 : index
    %c64_193 = arith.constant 64 : index
    %719 = vector.load %arg10[%718, %c0_192, %c64_193] : memref<8x16x128xf32, #tpu.memory_space<vmem>>, vector<1x16x64xf32>
    %720 = vector.shape_cast %719 : vector<1x16x64xf32> to vector<16x64xf32>
    %721 = vector.extract_strided_slice %712 {offsets = [0, 64], sizes = [16, 64], strides = [1, 1]} : vector<16x128xf32> to vector<16x64xf32>
    %722 = arith.addf %720, %721 : vector<16x64xf32>
    %723 = vector.extract_strided_slice %717 {offsets = [0, 0], sizes = [16, 48], strides = [1, 1]} : vector<16x64xf32> to vector<16x48xf32>
    %724 = arith.negf %723 : vector<16x48xf32>
    %725 = math.exp %724 : vector<16x48xf32>
    %cst_194 = arith.constant 1.000000e+00 : f32
    %726 = vector.broadcast %cst_194 : f32 to vector<16x48xf32>
    %727 = arith.addf %726, %725 : vector<16x48xf32>
    %728 = arith.divf %726, %727 : vector<16x48xf32>
    %729 = vector.extract_strided_slice %717 {offsets = [0, 48], sizes = [16, 16], strides = [1, 1]} : vector<16x64xf32> to vector<16x16xf32>
    %730 = math.tanh %729 : vector<16x16xf32>
    %731 = vector.extract_strided_slice %728 {offsets = [0, 16], sizes = [16, 16], strides = [1, 1]} : vector<16x48xf32> to vector<16x16xf32>
    %732 = arith.mulf %731, %688 : vector<16x16xf32>
    %733 = vector.extract_strided_slice %728 {offsets = [0, 0], sizes = [16, 16], strides = [1, 1]} : vector<16x48xf32> to vector<16x16xf32>
    %734 = arith.mulf %733, %730 : vector<16x16xf32>
    %735 = arith.addf %732, %734 : vector<16x16xf32>
    %736 = vector.extract_strided_slice %728 {offsets = [0, 32], sizes = [16, 16], strides = [1, 1]} : vector<16x48xf32> to vector<16x16xf32>
    %737 = math.tanh %735 : vector<16x16xf32>
    %738 = arith.mulf %736, %737 : vector<16x16xf32>
    %739 = vector.extract_strided_slice %722 {offsets = [0, 0], sizes = [16, 48], strides = [1, 1]} : vector<16x64xf32> to vector<16x48xf32>
    %740 = arith.negf %739 : vector<16x48xf32>
    %741 = math.exp %740 : vector<16x48xf32>
    %cst_195 = arith.constant 1.000000e+00 : f32
    %742 = vector.broadcast %cst_195 : f32 to vector<16x48xf32>
    %743 = arith.addf %742, %741 : vector<16x48xf32>
    %744 = arith.divf %742, %743 : vector<16x48xf32>
    %745 = vector.extract_strided_slice %722 {offsets = [0, 48], sizes = [16, 16], strides = [1, 1]} : vector<16x64xf32> to vector<16x16xf32>
    %746 = math.tanh %745 : vector<16x16xf32>
    %747 = vector.extract_strided_slice %744 {offsets = [0, 16], sizes = [16, 16], strides = [1, 1]} : vector<16x48xf32> to vector<16x16xf32>
    %748 = arith.mulf %747, %704 : vector<16x16xf32>
    %749 = vector.extract_strided_slice %744 {offsets = [0, 0], sizes = [16, 16], strides = [1, 1]} : vector<16x48xf32> to vector<16x16xf32>
    %750 = arith.mulf %749, %746 : vector<16x16xf32>
    %751 = arith.addf %748, %750 : vector<16x16xf32>
    %752 = vector.extract_strided_slice %744 {offsets = [0, 32], sizes = [16, 16], strides = [1, 1]} : vector<16x48xf32> to vector<16x16xf32>
    %753 = math.tanh %751 : vector<16x16xf32>
    %754 = arith.mulf %752, %753 : vector<16x16xf32>
    %c6_i32_196 = arith.constant 6 : i32
    %c7_i32_197 = arith.constant 7 : i32
    %755 = arith.subi %c7_i32_197, %c6_i32_196 : i32
    %756 = tpu.concatenate %738, %754 in 1 : vector<16x16xf32>, vector<16x16xf32> -> vector<16x32xf32>
    %757 = arith.truncf %756 : vector<16x32xf32> to vector<16x32xbf16>
    %c0_198 = arith.constant 0 : index
    %c0_199 = arith.constant 0 : index
    %758 = vector.load %arg7[%c0_198, %c0_199] : memref<32x128xbf16, #tpu.memory_space<vmem>>, vector<32x128xbf16>
    %cst_200 = arith.constant dense<0.000000e+00> : vector<16x128xf32>
    %759 = tpu.matmul %757, %758, %cst_200 {dimension_numbers = #tpu.dot_dimension_numbers<[1], [0], [0], [1], [0, 0, 1, 1], [], []>} : vector<16x32xbf16>, vector<32x128xbf16>, vector<16x128xf32> -> vector<16x128xf32>
    %760 = arith.index_cast %c6_i32_196 : i32 to index
    %c0_201 = arith.constant 0 : index
    %c0_202 = arith.constant 0 : index
    %761 = vector.load %arg10[%760, %c0_201, %c0_202] : memref<8x16x128xf32, #tpu.memory_space<vmem>>, vector<1x16x64xf32>
    %762 = vector.shape_cast %761 : vector<1x16x64xf32> to vector<16x64xf32>
    %763 = vector.extract_strided_slice %759 {offsets = [0, 0], sizes = [16, 64], strides = [1, 1]} : vector<16x128xf32> to vector<16x64xf32>
    %764 = arith.addf %762, %763 : vector<16x64xf32>
    %765 = arith.index_cast %755 : i32 to index
    %c0_203 = arith.constant 0 : index
    %c64_204 = arith.constant 64 : index
    %766 = vector.load %arg10[%765, %c0_203, %c64_204] : memref<8x16x128xf32, #tpu.memory_space<vmem>>, vector<1x16x64xf32>
    %767 = vector.shape_cast %766 : vector<1x16x64xf32> to vector<16x64xf32>
    %768 = vector.extract_strided_slice %759 {offsets = [0, 64], sizes = [16, 64], strides = [1, 1]} : vector<16x128xf32> to vector<16x64xf32>
    %769 = arith.addf %767, %768 : vector<16x64xf32>
    %770 = vector.extract_strided_slice %764 {offsets = [0, 0], sizes = [16, 48], strides = [1, 1]} : vector<16x64xf32> to vector<16x48xf32>
    %771 = arith.negf %770 : vector<16x48xf32>
    %772 = math.exp %771 : vector<16x48xf32>
    %cst_205 = arith.constant 1.000000e+00 : f32
    %773 = vector.broadcast %cst_205 : f32 to vector<16x48xf32>
    %774 = arith.addf %773, %772 : vector<16x48xf32>
    %775 = arith.divf %773, %774 : vector<16x48xf32>
    %776 = vector.extract_strided_slice %764 {offsets = [0, 48], sizes = [16, 16], strides = [1, 1]} : vector<16x64xf32> to vector<16x16xf32>
    %777 = math.tanh %776 : vector<16x16xf32>
    %778 = vector.extract_strided_slice %775 {offsets = [0, 16], sizes = [16, 16], strides = [1, 1]} : vector<16x48xf32> to vector<16x16xf32>
    %779 = arith.mulf %778, %735 : vector<16x16xf32>
    %780 = vector.extract_strided_slice %775 {offsets = [0, 0], sizes = [16, 16], strides = [1, 1]} : vector<16x48xf32> to vector<16x16xf32>
    %781 = arith.mulf %780, %777 : vector<16x16xf32>
    %782 = arith.addf %779, %781 : vector<16x16xf32>
    %783 = vector.extract_strided_slice %775 {offsets = [0, 32], sizes = [16, 16], strides = [1, 1]} : vector<16x48xf32> to vector<16x16xf32>
    %784 = math.tanh %782 : vector<16x16xf32>
    %785 = arith.mulf %783, %784 : vector<16x16xf32>
    %786 = vector.extract_strided_slice %769 {offsets = [0, 0], sizes = [16, 48], strides = [1, 1]} : vector<16x64xf32> to vector<16x48xf32>
    %787 = arith.negf %786 : vector<16x48xf32>
    %788 = math.exp %787 : vector<16x48xf32>
    %cst_206 = arith.constant 1.000000e+00 : f32
    %789 = vector.broadcast %cst_206 : f32 to vector<16x48xf32>
    %790 = arith.addf %789, %788 : vector<16x48xf32>
    %791 = arith.divf %789, %790 : vector<16x48xf32>
    %792 = vector.extract_strided_slice %769 {offsets = [0, 48], sizes = [16, 16], strides = [1, 1]} : vector<16x64xf32> to vector<16x16xf32>
    %793 = math.tanh %792 : vector<16x16xf32>
    %794 = vector.extract_strided_slice %791 {offsets = [0, 16], sizes = [16, 16], strides = [1, 1]} : vector<16x48xf32> to vector<16x16xf32>
    %795 = arith.mulf %794, %751 : vector<16x16xf32>
    %796 = vector.extract_strided_slice %791 {offsets = [0, 0], sizes = [16, 16], strides = [1, 1]} : vector<16x48xf32> to vector<16x16xf32>
    %797 = arith.mulf %796, %793 : vector<16x16xf32>
    %798 = arith.addf %795, %797 : vector<16x16xf32>
    %799 = vector.extract_strided_slice %791 {offsets = [0, 32], sizes = [16, 16], strides = [1, 1]} : vector<16x48xf32> to vector<16x16xf32>
    %800 = math.tanh %798 : vector<16x16xf32>
    %801 = arith.mulf %799, %800 : vector<16x16xf32>
    %c7_i32_207 = arith.constant 7 : i32
    %c7_i32_208 = arith.constant 7 : i32
    %802 = arith.subi %c7_i32_208, %c7_i32_207 : i32
    %803 = tpu.concatenate %785, %801 in 1 : vector<16x16xf32>, vector<16x16xf32> -> vector<16x32xf32>
    %804 = arith.truncf %803 : vector<16x32xf32> to vector<16x32xbf16>
    %c0_209 = arith.constant 0 : index
    %c0_210 = arith.constant 0 : index
    %805 = vector.load %arg7[%c0_209, %c0_210] : memref<32x128xbf16, #tpu.memory_space<vmem>>, vector<32x128xbf16>
    %cst_211 = arith.constant dense<0.000000e+00> : vector<16x128xf32>
    %806 = tpu.matmul %804, %805, %cst_211 {dimension_numbers = #tpu.dot_dimension_numbers<[1], [0], [0], [1], [0, 0, 1, 1], [], []>} : vector<16x32xbf16>, vector<32x128xbf16>, vector<16x128xf32> -> vector<16x128xf32>
    %807 = arith.index_cast %c7_i32_207 : i32 to index
    %c0_212 = arith.constant 0 : index
    %c0_213 = arith.constant 0 : index
    %808 = vector.load %arg10[%807, %c0_212, %c0_213] : memref<8x16x128xf32, #tpu.memory_space<vmem>>, vector<1x16x64xf32>
    %809 = vector.shape_cast %808 : vector<1x16x64xf32> to vector<16x64xf32>
    %810 = vector.extract_strided_slice %806 {offsets = [0, 0], sizes = [16, 64], strides = [1, 1]} : vector<16x128xf32> to vector<16x64xf32>
    %811 = arith.addf %809, %810 : vector<16x64xf32>
    %812 = arith.index_cast %802 : i32 to index
    %c0_214 = arith.constant 0 : index
    %c64_215 = arith.constant 64 : index
    %813 = vector.load %arg10[%812, %c0_214, %c64_215] : memref<8x16x128xf32, #tpu.memory_space<vmem>>, vector<1x16x64xf32>
    %814 = vector.shape_cast %813 : vector<1x16x64xf32> to vector<16x64xf32>
    %815 = vector.extract_strided_slice %806 {offsets = [0, 64], sizes = [16, 64], strides = [1, 1]} : vector<16x128xf32> to vector<16x64xf32>
    %816 = arith.addf %814, %815 : vector<16x64xf32>
    %817 = vector.extract_strided_slice %811 {offsets = [0, 0], sizes = [16, 48], strides = [1, 1]} : vector<16x64xf32> to vector<16x48xf32>
    %818 = arith.negf %817 : vector<16x48xf32>
    %819 = math.exp %818 : vector<16x48xf32>
    %cst_216 = arith.constant 1.000000e+00 : f32
    %820 = vector.broadcast %cst_216 : f32 to vector<16x48xf32>
    %821 = arith.addf %820, %819 : vector<16x48xf32>
    %822 = arith.divf %820, %821 : vector<16x48xf32>
    %823 = vector.extract_strided_slice %811 {offsets = [0, 48], sizes = [16, 16], strides = [1, 1]} : vector<16x64xf32> to vector<16x16xf32>
    %824 = math.tanh %823 : vector<16x16xf32>
    %825 = vector.extract_strided_slice %822 {offsets = [0, 16], sizes = [16, 16], strides = [1, 1]} : vector<16x48xf32> to vector<16x16xf32>
    %826 = arith.mulf %825, %782 : vector<16x16xf32>
    %827 = vector.extract_strided_slice %822 {offsets = [0, 0], sizes = [16, 16], strides = [1, 1]} : vector<16x48xf32> to vector<16x16xf32>
    %828 = arith.mulf %827, %824 : vector<16x16xf32>
    %829 = arith.addf %826, %828 : vector<16x16xf32>
    %830 = vector.extract_strided_slice %822 {offsets = [0, 32], sizes = [16, 16], strides = [1, 1]} : vector<16x48xf32> to vector<16x16xf32>
    %831 = math.tanh %829 : vector<16x16xf32>
    %832 = arith.mulf %830, %831 : vector<16x16xf32>
    %833 = vector.extract_strided_slice %816 {offsets = [0, 0], sizes = [16, 48], strides = [1, 1]} : vector<16x64xf32> to vector<16x48xf32>
    %834 = arith.negf %833 : vector<16x48xf32>
    %835 = math.exp %834 : vector<16x48xf32>
    %cst_217 = arith.constant 1.000000e+00 : f32
    %836 = vector.broadcast %cst_217 : f32 to vector<16x48xf32>
    %837 = arith.addf %836, %835 : vector<16x48xf32>
    %838 = arith.divf %836, %837 : vector<16x48xf32>
    %839 = vector.extract_strided_slice %816 {offsets = [0, 48], sizes = [16, 16], strides = [1, 1]} : vector<16x64xf32> to vector<16x16xf32>
    %840 = math.tanh %839 : vector<16x16xf32>
    %841 = vector.extract_strided_slice %838 {offsets = [0, 16], sizes = [16, 16], strides = [1, 1]} : vector<16x48xf32> to vector<16x16xf32>
    %842 = arith.mulf %841, %798 : vector<16x16xf32>
    %843 = vector.extract_strided_slice %838 {offsets = [0, 0], sizes = [16, 16], strides = [1, 1]} : vector<16x48xf32> to vector<16x16xf32>
    %844 = arith.mulf %843, %840 : vector<16x16xf32>
    %845 = arith.addf %842, %844 : vector<16x16xf32>
    %846 = vector.extract_strided_slice %838 {offsets = [0, 32], sizes = [16, 16], strides = [1, 1]} : vector<16x48xf32> to vector<16x16xf32>
    %847 = math.tanh %845 : vector<16x16xf32>
    %848 = arith.mulf %846, %847 : vector<16x16xf32>
    %c8_i32_218 = arith.constant 8 : i32
    %849 = tpu.concatenate %438, %454, %832, %848 in 1 : vector<16x16xf32>, vector<16x16xf32>, vector<16x16xf32>, vector<16x16xf32> -> vector<16x64xf32>
    %c0_219 = arith.constant 0 : index
    %c0_220 = arith.constant 0 : index
    %850 = vector.load %arg8[%c0_219, %c0_220] : memref<64x17xf32, #tpu.memory_space<vmem>>, vector<64x17xf32>
    %cst_221 = arith.constant dense<0.000000e+00> : vector<16x17xf32>
    %851 = tpu.matmul %849, %850, %cst_221 {dimension_numbers = #tpu.dot_dimension_numbers<[1], [0], [0], [1], [0, 0, 1, 1], [], []>} : vector<16x64xf32>, vector<64x17xf32>, vector<16x17xf32> -> vector<16x17xf32>
    %c0_222 = arith.constant 0 : index
    %c0_223 = arith.constant 0 : index
    %852 = vector.load %arg9[%c0_222, %c0_223] : memref<16x17xf32, #tpu.memory_space<vmem>>, vector<16x17xf32>
    tpu.vector_store %arg9[%c0_222, %c0_223], %851 {strides = array<i32>} : memref<16x17xf32, #tpu.memory_space<vmem>>, vector<16x17xf32>,
    return
  }
  func.func @transform_0(%arg0: i32) -> (i32, i32, i32) {
    %c0_i32 = arith.constant 0 : i32
    %c0_i32_0 = arith.constant 0 : i32
    %c0_i32_1 = arith.constant 0 : i32
    return %c0_i32, %arg0, %c0_i32_0 : i32, i32, i32
  }
  func.func @transform_1(%arg0: i32) -> (i32, i32) {
    %c0_i32 = arith.constant 0 : i32
    %c0_i32_0 = arith.constant 0 : i32
    %c0_i32_1 = arith.constant 0 : i32
    return %c0_i32, %c0_i32_0 : i32, i32
  }
  func.func @transform_2(%arg0: i32) -> (i32, i32) {
    %c0_i32 = arith.constant 0 : i32
    %c0_i32_0 = arith.constant 0 : i32
    %c0_i32_1 = arith.constant 0 : i32
    return %c0_i32, %c0_i32_0 : i32, i32
  }
  func.func @transform_3(%arg0: i32) -> (i32, i32) {
    %c0_i32 = arith.constant 0 : i32
    %c0_i32_0 = arith.constant 0 : i32
    %c0_i32_1 = arith.constant 0 : i32
    return %c0_i32, %c0_i32_0 : i32, i32
  }
  func.func @transform_4(%arg0: i32) -> (i32, i32) {
    %c0_i32 = arith.constant 0 : i32
    %c0_i32_0 = arith.constant 0 : i32
    %c0_i32_1 = arith.constant 0 : i32
    return %c0_i32, %c0_i32_0 : i32, i32
  }
  func.func @transform_5(%arg0: i32) -> (i32, i32) {
    %c0_i32 = arith.constant 0 : i32
    %c0_i32_0 = arith.constant 0 : i32
    %c0_i32_1 = arith.constant 0 : i32
    return %c0_i32, %c0_i32_0 : i32, i32
  }
  func.func @transform_6(%arg0: i32) -> (i32, i32) {
    %c0_i32 = arith.constant 0 : i32
    %c0_i32_0 = arith.constant 0 : i32
    %c0_i32_1 = arith.constant 0 : i32
    return %c0_i32, %c0_i32_0 : i32, i32
  }
  func.func @transform_7(%arg0: i32) -> (i32, i32) {
    %c0_i32 = arith.constant 0 : i32
    %c0_i32_0 = arith.constant 0 : i32
    %c0_i32_1 = arith.constant 0 : i32
    return %c0_i32, %c0_i32_0 : i32, i32
  }
  func.func @transform_8(%arg0: i32) -> (i32, i32) {
    %c0_i32 = arith.constant 0 : i32
    %c0_i32_0 = arith.constant 0 : i32
    return %arg0, %c0_i32 : i32, i32
  }
}

module attributes {stable_mosaic.version = 11 : i64} {
  func.func @_dec_kernel(%arg0: i32, %arg1: memref<8x8x1xf32, #tpu.memory_space<vmem>>, %arg2: memref<1x64xf32, #tpu.memory_space<vmem>>, %arg3: memref<1x64xf32, #tpu.memory_space<vmem>>, %arg4: memref<16x64xbf16, #tpu.memory_space<vmem>>, %arg5: memref<32x64xbf16, #tpu.memory_space<vmem>>, %arg6: memref<1x64xf32, #tpu.memory_space<vmem>>, %arg7: memref<8x8x16xf32, #tpu.memory_space<vmem>>, %arg8: memref<8x8x64xf32, #tpu.memory_space<vmem>>) attributes {dimension_semantics = [#tpu.dimension_semantics<parallel>], iteration_bounds = array<i64: 2>, scalar_prefetch = 0 : i64, scratch_operands = 1 : i64, tpu.core_type = #tpu.core_type<tc>, window_params = [{transform_indices = @transform_0, window_bounds = array<i64: 8, 8, 1>}, {pipeline_mode = #tpu.pipeline_mode<synchronous>, transform_indices = @transform_1, window_bounds = array<i64: 1, 64>}, {pipeline_mode = #tpu.pipeline_mode<synchronous>, transform_indices = @transform_2, window_bounds = array<i64: 1, 64>}, {pipeline_mode = #tpu.pipeline_mode<synchronous>, transform_indices = @transform_3, window_bounds = array<i64: 16, 64>}, {pipeline_mode = #tpu.pipeline_mode<synchronous>, transform_indices = @transform_4, window_bounds = array<i64: 32, 64>}, {pipeline_mode = #tpu.pipeline_mode<synchronous>, transform_indices = @transform_5, window_bounds = array<i64: 1, 64>}, {transform_indices = @transform_6, window_bounds = array<i64: 8, 8, 16>}]} {
    %c0 = arith.constant 0 : index
    %c0_0 = arith.constant 0 : index
    %0 = vector.load %arg2[%c0, %c0_0] : memref<1x64xf32, #tpu.memory_space<vmem>>, vector<1x64xf32>
    %c0_1 = arith.constant 0 : index
    %c0_2 = arith.constant 0 : index
    %c0_3 = arith.constant 0 : index
    %1 = vector.load %arg1[%c0_1, %c0_2, %c0_3] : memref<8x8x1xf32, #tpu.memory_space<vmem>>, vector<8x8x1xf32>
    %2 = vector.shape_cast %0 : vector<1x64xf32> to vector<64xf32>
    %3 = vector.shape_cast %2 : vector<64xf32> to vector<1x1x64xf32>
    %4 = vector.broadcast %1 : vector<8x8x1xf32> to vector<8x8x64xf32>
    %5 = vector.broadcast %3 : vector<1x1x64xf32> to vector<8x8x64xf32>
    %6 = arith.mulf %4, %5 : vector<8x8x64xf32>
    %c0_4 = arith.constant 0 : index
    %c0_5 = arith.constant 0 : index
    %7 = vector.load %arg3[%c0_4, %c0_5] : memref<1x64xf32, #tpu.memory_space<vmem>>, vector<1x64xf32>
    %8 = vector.shape_cast %7 : vector<1x64xf32> to vector<1x1x64xf32>
    %9 = vector.broadcast %8 : vector<1x1x64xf32> to vector<8x8x64xf32>
    %10 = arith.addf %6, %9 : vector<8x8x64xf32>
    %c0_6 = arith.constant 0 : index
    %c0_7 = arith.constant 0 : index
    %c0_8 = arith.constant 0 : index
    %11 = vector.load %arg8[%c0_6, %c0_7, %c0_8] : memref<8x8x64xf32, #tpu.memory_space<vmem>>, vector<8x8x64xf32>
    tpu.vector_store %arg8[%c0_6, %c0_7, %c0_8], %10 {strides = array<i32>} : memref<8x8x64xf32, #tpu.memory_space<vmem>>, vector<8x8x64xf32>,
    %c0_9 = arith.constant 0 : index
    %c0_10 = arith.constant 0 : index
    %12 = vector.load %arg6[%c0_9, %c0_10] : memref<1x64xf32, #tpu.memory_space<vmem>>, vector<1x64xf32>
    %13 = vector.shape_cast %12 : vector<1x64xf32> to vector<1x64xf32>
    %14 = vector.broadcast %13 : vector<1x64xf32> to vector<8x64xf32>
    %cst = arith.constant 0.000000e+00 : f32
    %15 = vector.broadcast %cst : f32 to vector<8x16xf32>
    %c0_i32 = arith.constant 0 : i32
    %16 = arith.index_cast %c0_i32 : i32 to index
    %c0_11 = arith.constant 0 : index
    %c0_12 = arith.constant 0 : index
    %17 = vector.load %arg8[%16, %c0_11, %c0_12] : memref<8x8x64xf32, #tpu.memory_space<vmem>>, vector<1x8x64xf32>
    %18 = vector.shape_cast %17 : vector<1x8x64xf32> to vector<8x64xf32>
    %19 = arith.truncf %15 : vector<8x16xf32> to vector<8x16xbf16>
    %c0_13 = arith.constant 0 : index
    %c0_14 = arith.constant 0 : index
    %20 = vector.load %arg4[%c0_13, %c0_14] : memref<16x64xbf16, #tpu.memory_space<vmem>>, vector<16x64xbf16>
    %cst_15 = arith.constant dense<0.000000e+00> : vector<8x64xf32>
    %21 = tpu.matmul %19, %20, %cst_15 {dimension_numbers = #tpu.dot_dimension_numbers<[1], [0], [0], [1], [0, 0, 1, 1], [], []>} : vector<8x16xbf16>, vector<16x64xbf16>, vector<8x64xf32> -> vector<8x64xf32>
    %22 = arith.addf %18, %21 : vector<8x64xf32>
    %23 = vector.extract_strided_slice %22 {offsets = [0, 0], sizes = [8, 48], strides = [1, 1]} : vector<8x64xf32> to vector<8x48xf32>
    %24 = arith.negf %23 : vector<8x48xf32>
    %25 = math.exp %24 : vector<8x48xf32>
    %cst_16 = arith.constant 1.000000e+00 : f32
    %26 = vector.broadcast %cst_16 : f32 to vector<8x48xf32>
    %27 = arith.addf %26, %25 : vector<8x48xf32>
    %28 = arith.divf %26, %27 : vector<8x48xf32>
    %29 = vector.extract_strided_slice %22 {offsets = [0, 48], sizes = [8, 16], strides = [1, 1]} : vector<8x64xf32> to vector<8x16xf32>
    %30 = math.tanh %29 : vector<8x16xf32>
    %31 = vector.extract_strided_slice %28 {offsets = [0, 16], sizes = [8, 16], strides = [1, 1]} : vector<8x48xf32> to vector<8x16xf32>
    %32 = arith.mulf %31, %15 : vector<8x16xf32>
    %33 = vector.extract_strided_slice %28 {offsets = [0, 0], sizes = [8, 16], strides = [1, 1]} : vector<8x48xf32> to vector<8x16xf32>
    %34 = arith.mulf %33, %30 : vector<8x16xf32>
    %35 = arith.addf %32, %34 : vector<8x16xf32>
    %36 = vector.extract_strided_slice %28 {offsets = [0, 32], sizes = [8, 16], strides = [1, 1]} : vector<8x48xf32> to vector<8x16xf32>
    %37 = math.tanh %35 : vector<8x16xf32>
    %38 = arith.mulf %36, %37 : vector<8x16xf32>
    %39 = tpu.concatenate %38, %15 in 1 : vector<8x16xf32>, vector<8x16xf32> -> vector<8x32xf32>
    %40 = arith.truncf %39 : vector<8x32xf32> to vector<8x32xbf16>
    %c0_17 = arith.constant 0 : index
    %c0_18 = arith.constant 0 : index
    %41 = vector.load %arg5[%c0_17, %c0_18] : memref<32x64xbf16, #tpu.memory_space<vmem>>, vector<32x64xbf16>
    %cst_19 = arith.constant dense<0.000000e+00> : vector<8x64xf32>
    %42 = tpu.matmul %40, %41, %cst_19 {dimension_numbers = #tpu.dot_dimension_numbers<[1], [0], [0], [1], [0, 0, 1, 1], [], []>} : vector<8x32xbf16>, vector<32x64xbf16>, vector<8x64xf32> -> vector<8x64xf32>
    %43 = arith.addf %42, %14 : vector<8x64xf32>
    %44 = vector.extract_strided_slice %43 {offsets = [0, 0], sizes = [8, 48], strides = [1, 1]} : vector<8x64xf32> to vector<8x48xf32>
    %45 = arith.negf %44 : vector<8x48xf32>
    %46 = math.exp %45 : vector<8x48xf32>
    %cst_20 = arith.constant 1.000000e+00 : f32
    %47 = vector.broadcast %cst_20 : f32 to vector<8x48xf32>
    %48 = arith.addf %47, %46 : vector<8x48xf32>
    %49 = arith.divf %47, %48 : vector<8x48xf32>
    %50 = vector.extract_strided_slice %43 {offsets = [0, 48], sizes = [8, 16], strides = [1, 1]} : vector<8x64xf32> to vector<8x16xf32>
    %51 = math.tanh %50 : vector<8x16xf32>
    %52 = vector.extract_strided_slice %49 {offsets = [0, 16], sizes = [8, 16], strides = [1, 1]} : vector<8x48xf32> to vector<8x16xf32>
    %53 = arith.mulf %52, %15 : vector<8x16xf32>
    %54 = vector.extract_strided_slice %49 {offsets = [0, 0], sizes = [8, 16], strides = [1, 1]} : vector<8x48xf32> to vector<8x16xf32>
    %55 = arith.mulf %54, %51 : vector<8x16xf32>
    %56 = arith.addf %53, %55 : vector<8x16xf32>
    %57 = vector.extract_strided_slice %49 {offsets = [0, 32], sizes = [8, 16], strides = [1, 1]} : vector<8x48xf32> to vector<8x16xf32>
    %58 = math.tanh %56 : vector<8x16xf32>
    %59 = arith.mulf %57, %58 : vector<8x16xf32>
    %60 = arith.index_cast %c0_i32 : i32 to index
    %c0_21 = arith.constant 0 : index
    %c0_22 = arith.constant 0 : index
    %61 = vector.load %arg7[%60, %c0_21, %c0_22] : memref<8x8x16xf32, #tpu.memory_space<vmem>>, vector<1x8x16xf32>
    %62 = vector.shape_cast %61 : vector<1x8x16xf32> to vector<8x16xf32>
    %63 = vector.shape_cast %59 : vector<8x16xf32> to vector<1x8x16xf32>
    tpu.vector_store %arg7[%60, %c0_21, %c0_22], %63 {strides = array<i32>} : memref<8x8x16xf32, #tpu.memory_space<vmem>>, vector<1x8x16xf32>,
    %c1_i32 = arith.constant 1 : i32
    %64 = arith.index_cast %c1_i32 : i32 to index
    %c0_23 = arith.constant 0 : index
    %c0_24 = arith.constant 0 : index
    %65 = vector.load %arg8[%64, %c0_23, %c0_24] : memref<8x8x64xf32, #tpu.memory_space<vmem>>, vector<1x8x64xf32>
    %66 = vector.shape_cast %65 : vector<1x8x64xf32> to vector<8x64xf32>
    %67 = arith.truncf %38 : vector<8x16xf32> to vector<8x16xbf16>
    %c0_25 = arith.constant 0 : index
    %c0_26 = arith.constant 0 : index
    %68 = vector.load %arg4[%c0_25, %c0_26] : memref<16x64xbf16, #tpu.memory_space<vmem>>, vector<16x64xbf16>
    %cst_27 = arith.constant dense<0.000000e+00> : vector<8x64xf32>
    %69 = tpu.matmul %67, %68, %cst_27 {dimension_numbers = #tpu.dot_dimension_numbers<[1], [0], [0], [1], [0, 0, 1, 1], [], []>} : vector<8x16xbf16>, vector<16x64xbf16>, vector<8x64xf32> -> vector<8x64xf32>
    %70 = arith.addf %66, %69 : vector<8x64xf32>
    %71 = vector.extract_strided_slice %70 {offsets = [0, 0], sizes = [8, 48], strides = [1, 1]} : vector<8x64xf32> to vector<8x48xf32>
    %72 = arith.negf %71 : vector<8x48xf32>
    %73 = math.exp %72 : vector<8x48xf32>
    %cst_28 = arith.constant 1.000000e+00 : f32
    %74 = vector.broadcast %cst_28 : f32 to vector<8x48xf32>
    %75 = arith.addf %74, %73 : vector<8x48xf32>
    %76 = arith.divf %74, %75 : vector<8x48xf32>
    %77 = vector.extract_strided_slice %70 {offsets = [0, 48], sizes = [8, 16], strides = [1, 1]} : vector<8x64xf32> to vector<8x16xf32>
    %78 = math.tanh %77 : vector<8x16xf32>
    %79 = vector.extract_strided_slice %76 {offsets = [0, 16], sizes = [8, 16], strides = [1, 1]} : vector<8x48xf32> to vector<8x16xf32>
    %80 = arith.mulf %79, %35 : vector<8x16xf32>
    %81 = vector.extract_strided_slice %76 {offsets = [0, 0], sizes = [8, 16], strides = [1, 1]} : vector<8x48xf32> to vector<8x16xf32>
    %82 = arith.mulf %81, %78 : vector<8x16xf32>
    %83 = arith.addf %80, %82 : vector<8x16xf32>
    %84 = vector.extract_strided_slice %76 {offsets = [0, 32], sizes = [8, 16], strides = [1, 1]} : vector<8x48xf32> to vector<8x16xf32>
    %85 = math.tanh %83 : vector<8x16xf32>
    %86 = arith.mulf %84, %85 : vector<8x16xf32>
    %87 = tpu.concatenate %86, %59 in 1 : vector<8x16xf32>, vector<8x16xf32> -> vector<8x32xf32>
    %88 = arith.truncf %87 : vector<8x32xf32> to vector<8x32xbf16>
    %c0_29 = arith.constant 0 : index
    %c0_30 = arith.constant 0 : index
    %89 = vector.load %arg5[%c0_29, %c0_30] : memref<32x64xbf16, #tpu.memory_space<vmem>>, vector<32x64xbf16>
    %cst_31 = arith.constant dense<0.000000e+00> : vector<8x64xf32>
    %90 = tpu.matmul %88, %89, %cst_31 {dimension_numbers = #tpu.dot_dimension_numbers<[1], [0], [0], [1], [0, 0, 1, 1], [], []>} : vector<8x32xbf16>, vector<32x64xbf16>, vector<8x64xf32> -> vector<8x64xf32>
    %91 = arith.addf %90, %14 : vector<8x64xf32>
    %92 = vector.extract_strided_slice %91 {offsets = [0, 0], sizes = [8, 48], strides = [1, 1]} : vector<8x64xf32> to vector<8x48xf32>
    %93 = arith.negf %92 : vector<8x48xf32>
    %94 = math.exp %93 : vector<8x48xf32>
    %cst_32 = arith.constant 1.000000e+00 : f32
    %95 = vector.broadcast %cst_32 : f32 to vector<8x48xf32>
    %96 = arith.addf %95, %94 : vector<8x48xf32>
    %97 = arith.divf %95, %96 : vector<8x48xf32>
    %98 = vector.extract_strided_slice %91 {offsets = [0, 48], sizes = [8, 16], strides = [1, 1]} : vector<8x64xf32> to vector<8x16xf32>
    %99 = math.tanh %98 : vector<8x16xf32>
    %100 = vector.extract_strided_slice %97 {offsets = [0, 16], sizes = [8, 16], strides = [1, 1]} : vector<8x48xf32> to vector<8x16xf32>
    %101 = arith.mulf %100, %56 : vector<8x16xf32>
    %102 = vector.extract_strided_slice %97 {offsets = [0, 0], sizes = [8, 16], strides = [1, 1]} : vector<8x48xf32> to vector<8x16xf32>
    %103 = arith.mulf %102, %99 : vector<8x16xf32>
    %104 = arith.addf %101, %103 : vector<8x16xf32>
    %105 = vector.extract_strided_slice %97 {offsets = [0, 32], sizes = [8, 16], strides = [1, 1]} : vector<8x48xf32> to vector<8x16xf32>
    %106 = math.tanh %104 : vector<8x16xf32>
    %107 = arith.mulf %105, %106 : vector<8x16xf32>
    %108 = arith.index_cast %c1_i32 : i32 to index
    %c0_33 = arith.constant 0 : index
    %c0_34 = arith.constant 0 : index
    %109 = vector.load %arg7[%108, %c0_33, %c0_34] : memref<8x8x16xf32, #tpu.memory_space<vmem>>, vector<1x8x16xf32>
    %110 = vector.shape_cast %109 : vector<1x8x16xf32> to vector<8x16xf32>
    %111 = vector.shape_cast %107 : vector<8x16xf32> to vector<1x8x16xf32>
    tpu.vector_store %arg7[%108, %c0_33, %c0_34], %111 {strides = array<i32>} : memref<8x8x16xf32, #tpu.memory_space<vmem>>, vector<1x8x16xf32>,
    %c2_i32 = arith.constant 2 : i32
    %112 = arith.index_cast %c2_i32 : i32 to index
    %c0_35 = arith.constant 0 : index
    %c0_36 = arith.constant 0 : index
    %113 = vector.load %arg8[%112, %c0_35, %c0_36] : memref<8x8x64xf32, #tpu.memory_space<vmem>>, vector<1x8x64xf32>
    %114 = vector.shape_cast %113 : vector<1x8x64xf32> to vector<8x64xf32>
    %115 = arith.truncf %86 : vector<8x16xf32> to vector<8x16xbf16>
    %c0_37 = arith.constant 0 : index
    %c0_38 = arith.constant 0 : index
    %116 = vector.load %arg4[%c0_37, %c0_38] : memref<16x64xbf16, #tpu.memory_space<vmem>>, vector<16x64xbf16>
    %cst_39 = arith.constant dense<0.000000e+00> : vector<8x64xf32>
    %117 = tpu.matmul %115, %116, %cst_39 {dimension_numbers = #tpu.dot_dimension_numbers<[1], [0], [0], [1], [0, 0, 1, 1], [], []>} : vector<8x16xbf16>, vector<16x64xbf16>, vector<8x64xf32> -> vector<8x64xf32>
    %118 = arith.addf %114, %117 : vector<8x64xf32>
    %119 = vector.extract_strided_slice %118 {offsets = [0, 0], sizes = [8, 48], strides = [1, 1]} : vector<8x64xf32> to vector<8x48xf32>
    %120 = arith.negf %119 : vector<8x48xf32>
    %121 = math.exp %120 : vector<8x48xf32>
    %cst_40 = arith.constant 1.000000e+00 : f32
    %122 = vector.broadcast %cst_40 : f32 to vector<8x48xf32>
    %123 = arith.addf %122, %121 : vector<8x48xf32>
    %124 = arith.divf %122, %123 : vector<8x48xf32>
    %125 = vector.extract_strided_slice %118 {offsets = [0, 48], sizes = [8, 16], strides = [1, 1]} : vector<8x64xf32> to vector<8x16xf32>
    %126 = math.tanh %125 : vector<8x16xf32>
    %127 = vector.extract_strided_slice %124 {offsets = [0, 16], sizes = [8, 16], strides = [1, 1]} : vector<8x48xf32> to vector<8x16xf32>
    %128 = arith.mulf %127, %83 : vector<8x16xf32>
    %129 = vector.extract_strided_slice %124 {offsets = [0, 0], sizes = [8, 16], strides = [1, 1]} : vector<8x48xf32> to vector<8x16xf32>
    %130 = arith.mulf %129, %126 : vector<8x16xf32>
    %131 = arith.addf %128, %130 : vector<8x16xf32>
    %132 = vector.extract_strided_slice %124 {offsets = [0, 32], sizes = [8, 16], strides = [1, 1]} : vector<8x48xf32> to vector<8x16xf32>
    %133 = math.tanh %131 : vector<8x16xf32>
    %134 = arith.mulf %132, %133 : vector<8x16xf32>
    %135 = tpu.concatenate %134, %107 in 1 : vector<8x16xf32>, vector<8x16xf32> -> vector<8x32xf32>
    %136 = arith.truncf %135 : vector<8x32xf32> to vector<8x32xbf16>
    %c0_41 = arith.constant 0 : index
    %c0_42 = arith.constant 0 : index
    %137 = vector.load %arg5[%c0_41, %c0_42] : memref<32x64xbf16, #tpu.memory_space<vmem>>, vector<32x64xbf16>
    %cst_43 = arith.constant dense<0.000000e+00> : vector<8x64xf32>
    %138 = tpu.matmul %136, %137, %cst_43 {dimension_numbers = #tpu.dot_dimension_numbers<[1], [0], [0], [1], [0, 0, 1, 1], [], []>} : vector<8x32xbf16>, vector<32x64xbf16>, vector<8x64xf32> -> vector<8x64xf32>
    %139 = arith.addf %138, %14 : vector<8x64xf32>
    %140 = vector.extract_strided_slice %139 {offsets = [0, 0], sizes = [8, 48], strides = [1, 1]} : vector<8x64xf32> to vector<8x48xf32>
    %141 = arith.negf %140 : vector<8x48xf32>
    %142 = math.exp %141 : vector<8x48xf32>
    %cst_44 = arith.constant 1.000000e+00 : f32
    %143 = vector.broadcast %cst_44 : f32 to vector<8x48xf32>
    %144 = arith.addf %143, %142 : vector<8x48xf32>
    %145 = arith.divf %143, %144 : vector<8x48xf32>
    %146 = vector.extract_strided_slice %139 {offsets = [0, 48], sizes = [8, 16], strides = [1, 1]} : vector<8x64xf32> to vector<8x16xf32>
    %147 = math.tanh %146 : vector<8x16xf32>
    %148 = vector.extract_strided_slice %145 {offsets = [0, 16], sizes = [8, 16], strides = [1, 1]} : vector<8x48xf32> to vector<8x16xf32>
    %149 = arith.mulf %148, %104 : vector<8x16xf32>
    %150 = vector.extract_strided_slice %145 {offsets = [0, 0], sizes = [8, 16], strides = [1, 1]} : vector<8x48xf32> to vector<8x16xf32>
    %151 = arith.mulf %150, %147 : vector<8x16xf32>
    %152 = arith.addf %149, %151 : vector<8x16xf32>
    %153 = vector.extract_strided_slice %145 {offsets = [0, 32], sizes = [8, 16], strides = [1, 1]} : vector<8x48xf32> to vector<8x16xf32>
    %154 = math.tanh %152 : vector<8x16xf32>
    %155 = arith.mulf %153, %154 : vector<8x16xf32>
    %156 = arith.index_cast %c2_i32 : i32 to index
    %c0_45 = arith.constant 0 : index
    %c0_46 = arith.constant 0 : index
    %157 = vector.load %arg7[%156, %c0_45, %c0_46] : memref<8x8x16xf32, #tpu.memory_space<vmem>>, vector<1x8x16xf32>
    %158 = vector.shape_cast %157 : vector<1x8x16xf32> to vector<8x16xf32>
    %159 = vector.shape_cast %155 : vector<8x16xf32> to vector<1x8x16xf32>
    tpu.vector_store %arg7[%156, %c0_45, %c0_46], %159 {strides = array<i32>} : memref<8x8x16xf32, #tpu.memory_space<vmem>>, vector<1x8x16xf32>,
    %c3_i32 = arith.constant 3 : i32
    %160 = arith.index_cast %c3_i32 : i32 to index
    %c0_47 = arith.constant 0 : index
    %c0_48 = arith.constant 0 : index
    %161 = vector.load %arg8[%160, %c0_47, %c0_48] : memref<8x8x64xf32, #tpu.memory_space<vmem>>, vector<1x8x64xf32>
    %162 = vector.shape_cast %161 : vector<1x8x64xf32> to vector<8x64xf32>
    %163 = arith.truncf %134 : vector<8x16xf32> to vector<8x16xbf16>
    %c0_49 = arith.constant 0 : index
    %c0_50 = arith.constant 0 : index
    %164 = vector.load %arg4[%c0_49, %c0_50] : memref<16x64xbf16, #tpu.memory_space<vmem>>, vector<16x64xbf16>
    %cst_51 = arith.constant dense<0.000000e+00> : vector<8x64xf32>
    %165 = tpu.matmul %163, %164, %cst_51 {dimension_numbers = #tpu.dot_dimension_numbers<[1], [0], [0], [1], [0, 0, 1, 1], [], []>} : vector<8x16xbf16>, vector<16x64xbf16>, vector<8x64xf32> -> vector<8x64xf32>
    %166 = arith.addf %162, %165 : vector<8x64xf32>
    %167 = vector.extract_strided_slice %166 {offsets = [0, 0], sizes = [8, 48], strides = [1, 1]} : vector<8x64xf32> to vector<8x48xf32>
    %168 = arith.negf %167 : vector<8x48xf32>
    %169 = math.exp %168 : vector<8x48xf32>
    %cst_52 = arith.constant 1.000000e+00 : f32
    %170 = vector.broadcast %cst_52 : f32 to vector<8x48xf32>
    %171 = arith.addf %170, %169 : vector<8x48xf32>
    %172 = arith.divf %170, %171 : vector<8x48xf32>
    %173 = vector.extract_strided_slice %166 {offsets = [0, 48], sizes = [8, 16], strides = [1, 1]} : vector<8x64xf32> to vector<8x16xf32>
    %174 = math.tanh %173 : vector<8x16xf32>
    %175 = vector.extract_strided_slice %172 {offsets = [0, 16], sizes = [8, 16], strides = [1, 1]} : vector<8x48xf32> to vector<8x16xf32>
    %176 = arith.mulf %175, %131 : vector<8x16xf32>
    %177 = vector.extract_strided_slice %172 {offsets = [0, 0], sizes = [8, 16], strides = [1, 1]} : vector<8x48xf32> to vector<8x16xf32>
    %178 = arith.mulf %177, %174 : vector<8x16xf32>
    %179 = arith.addf %176, %178 : vector<8x16xf32>
    %180 = vector.extract_strided_slice %172 {offsets = [0, 32], sizes = [8, 16], strides = [1, 1]} : vector<8x48xf32> to vector<8x16xf32>
    %181 = math.tanh %179 : vector<8x16xf32>
    %182 = arith.mulf %180, %181 : vector<8x16xf32>
    %183 = tpu.concatenate %182, %155 in 1 : vector<8x16xf32>, vector<8x16xf32> -> vector<8x32xf32>
    %184 = arith.truncf %183 : vector<8x32xf32> to vector<8x32xbf16>
    %c0_53 = arith.constant 0 : index
    %c0_54 = arith.constant 0 : index
    %185 = vector.load %arg5[%c0_53, %c0_54] : memref<32x64xbf16, #tpu.memory_space<vmem>>, vector<32x64xbf16>
    %cst_55 = arith.constant dense<0.000000e+00> : vector<8x64xf32>
    %186 = tpu.matmul %184, %185, %cst_55 {dimension_numbers = #tpu.dot_dimension_numbers<[1], [0], [0], [1], [0, 0, 1, 1], [], []>} : vector<8x32xbf16>, vector<32x64xbf16>, vector<8x64xf32> -> vector<8x64xf32>
    %187 = arith.addf %186, %14 : vector<8x64xf32>
    %188 = vector.extract_strided_slice %187 {offsets = [0, 0], sizes = [8, 48], strides = [1, 1]} : vector<8x64xf32> to vector<8x48xf32>
    %189 = arith.negf %188 : vector<8x48xf32>
    %190 = math.exp %189 : vector<8x48xf32>
    %cst_56 = arith.constant 1.000000e+00 : f32
    %191 = vector.broadcast %cst_56 : f32 to vector<8x48xf32>
    %192 = arith.addf %191, %190 : vector<8x48xf32>
    %193 = arith.divf %191, %192 : vector<8x48xf32>
    %194 = vector.extract_strided_slice %187 {offsets = [0, 48], sizes = [8, 16], strides = [1, 1]} : vector<8x64xf32> to vector<8x16xf32>
    %195 = math.tanh %194 : vector<8x16xf32>
    %196 = vector.extract_strided_slice %193 {offsets = [0, 16], sizes = [8, 16], strides = [1, 1]} : vector<8x48xf32> to vector<8x16xf32>
    %197 = arith.mulf %196, %152 : vector<8x16xf32>
    %198 = vector.extract_strided_slice %193 {offsets = [0, 0], sizes = [8, 16], strides = [1, 1]} : vector<8x48xf32> to vector<8x16xf32>
    %199 = arith.mulf %198, %195 : vector<8x16xf32>
    %200 = arith.addf %197, %199 : vector<8x16xf32>
    %201 = vector.extract_strided_slice %193 {offsets = [0, 32], sizes = [8, 16], strides = [1, 1]} : vector<8x48xf32> to vector<8x16xf32>
    %202 = math.tanh %200 : vector<8x16xf32>
    %203 = arith.mulf %201, %202 : vector<8x16xf32>
    %204 = arith.index_cast %c3_i32 : i32 to index
    %c0_57 = arith.constant 0 : index
    %c0_58 = arith.constant 0 : index
    %205 = vector.load %arg7[%204, %c0_57, %c0_58] : memref<8x8x16xf32, #tpu.memory_space<vmem>>, vector<1x8x16xf32>
    %206 = vector.shape_cast %205 : vector<1x8x16xf32> to vector<8x16xf32>
    %207 = vector.shape_cast %203 : vector<8x16xf32> to vector<1x8x16xf32>
    tpu.vector_store %arg7[%204, %c0_57, %c0_58], %207 {strides = array<i32>} : memref<8x8x16xf32, #tpu.memory_space<vmem>>, vector<1x8x16xf32>,
    %c4_i32 = arith.constant 4 : i32
    %208 = arith.index_cast %c4_i32 : i32 to index
    %c0_59 = arith.constant 0 : index
    %c0_60 = arith.constant 0 : index
    %209 = vector.load %arg8[%208, %c0_59, %c0_60] : memref<8x8x64xf32, #tpu.memory_space<vmem>>, vector<1x8x64xf32>
    %210 = vector.shape_cast %209 : vector<1x8x64xf32> to vector<8x64xf32>
    %211 = arith.truncf %182 : vector<8x16xf32> to vector<8x16xbf16>
    %c0_61 = arith.constant 0 : index
    %c0_62 = arith.constant 0 : index
    %212 = vector.load %arg4[%c0_61, %c0_62] : memref<16x64xbf16, #tpu.memory_space<vmem>>, vector<16x64xbf16>
    %cst_63 = arith.constant dense<0.000000e+00> : vector<8x64xf32>
    %213 = tpu.matmul %211, %212, %cst_63 {dimension_numbers = #tpu.dot_dimension_numbers<[1], [0], [0], [1], [0, 0, 1, 1], [], []>} : vector<8x16xbf16>, vector<16x64xbf16>, vector<8x64xf32> -> vector<8x64xf32>
    %214 = arith.addf %210, %213 : vector<8x64xf32>
    %215 = vector.extract_strided_slice %214 {offsets = [0, 0], sizes = [8, 48], strides = [1, 1]} : vector<8x64xf32> to vector<8x48xf32>
    %216 = arith.negf %215 : vector<8x48xf32>
    %217 = math.exp %216 : vector<8x48xf32>
    %cst_64 = arith.constant 1.000000e+00 : f32
    %218 = vector.broadcast %cst_64 : f32 to vector<8x48xf32>
    %219 = arith.addf %218, %217 : vector<8x48xf32>
    %220 = arith.divf %218, %219 : vector<8x48xf32>
    %221 = vector.extract_strided_slice %214 {offsets = [0, 48], sizes = [8, 16], strides = [1, 1]} : vector<8x64xf32> to vector<8x16xf32>
    %222 = math.tanh %221 : vector<8x16xf32>
    %223 = vector.extract_strided_slice %220 {offsets = [0, 16], sizes = [8, 16], strides = [1, 1]} : vector<8x48xf32> to vector<8x16xf32>
    %224 = arith.mulf %223, %179 : vector<8x16xf32>
    %225 = vector.extract_strided_slice %220 {offsets = [0, 0], sizes = [8, 16], strides = [1, 1]} : vector<8x48xf32> to vector<8x16xf32>
    %226 = arith.mulf %225, %222 : vector<8x16xf32>
    %227 = arith.addf %224, %226 : vector<8x16xf32>
    %228 = vector.extract_strided_slice %220 {offsets = [0, 32], sizes = [8, 16], strides = [1, 1]} : vector<8x48xf32> to vector<8x16xf32>
    %229 = math.tanh %227 : vector<8x16xf32>
    %230 = arith.mulf %228, %229 : vector<8x16xf32>
    %231 = tpu.concatenate %230, %203 in 1 : vector<8x16xf32>, vector<8x16xf32> -> vector<8x32xf32>
    %232 = arith.truncf %231 : vector<8x32xf32> to vector<8x32xbf16>
    %c0_65 = arith.constant 0 : index
    %c0_66 = arith.constant 0 : index
    %233 = vector.load %arg5[%c0_65, %c0_66] : memref<32x64xbf16, #tpu.memory_space<vmem>>, vector<32x64xbf16>
    %cst_67 = arith.constant dense<0.000000e+00> : vector<8x64xf32>
    %234 = tpu.matmul %232, %233, %cst_67 {dimension_numbers = #tpu.dot_dimension_numbers<[1], [0], [0], [1], [0, 0, 1, 1], [], []>} : vector<8x32xbf16>, vector<32x64xbf16>, vector<8x64xf32> -> vector<8x64xf32>
    %235 = arith.addf %234, %14 : vector<8x64xf32>
    %236 = vector.extract_strided_slice %235 {offsets = [0, 0], sizes = [8, 48], strides = [1, 1]} : vector<8x64xf32> to vector<8x48xf32>
    %237 = arith.negf %236 : vector<8x48xf32>
    %238 = math.exp %237 : vector<8x48xf32>
    %cst_68 = arith.constant 1.000000e+00 : f32
    %239 = vector.broadcast %cst_68 : f32 to vector<8x48xf32>
    %240 = arith.addf %239, %238 : vector<8x48xf32>
    %241 = arith.divf %239, %240 : vector<8x48xf32>
    %242 = vector.extract_strided_slice %235 {offsets = [0, 48], sizes = [8, 16], strides = [1, 1]} : vector<8x64xf32> to vector<8x16xf32>
    %243 = math.tanh %242 : vector<8x16xf32>
    %244 = vector.extract_strided_slice %241 {offsets = [0, 16], sizes = [8, 16], strides = [1, 1]} : vector<8x48xf32> to vector<8x16xf32>
    %245 = arith.mulf %244, %200 : vector<8x16xf32>
    %246 = vector.extract_strided_slice %241 {offsets = [0, 0], sizes = [8, 16], strides = [1, 1]} : vector<8x48xf32> to vector<8x16xf32>
    %247 = arith.mulf %246, %243 : vector<8x16xf32>
    %248 = arith.addf %245, %247 : vector<8x16xf32>
    %249 = vector.extract_strided_slice %241 {offsets = [0, 32], sizes = [8, 16], strides = [1, 1]} : vector<8x48xf32> to vector<8x16xf32>
    %250 = math.tanh %248 : vector<8x16xf32>
    %251 = arith.mulf %249, %250 : vector<8x16xf32>
    %252 = arith.index_cast %c4_i32 : i32 to index
    %c0_69 = arith.constant 0 : index
    %c0_70 = arith.constant 0 : index
    %253 = vector.load %arg7[%252, %c0_69, %c0_70] : memref<8x8x16xf32, #tpu.memory_space<vmem>>, vector<1x8x16xf32>
    %254 = vector.shape_cast %253 : vector<1x8x16xf32> to vector<8x16xf32>
    %255 = vector.shape_cast %251 : vector<8x16xf32> to vector<1x8x16xf32>
    tpu.vector_store %arg7[%252, %c0_69, %c0_70], %255 {strides = array<i32>} : memref<8x8x16xf32, #tpu.memory_space<vmem>>, vector<1x8x16xf32>,
    %c5_i32 = arith.constant 5 : i32
    %256 = arith.index_cast %c5_i32 : i32 to index
    %c0_71 = arith.constant 0 : index
    %c0_72 = arith.constant 0 : index
    %257 = vector.load %arg8[%256, %c0_71, %c0_72] : memref<8x8x64xf32, #tpu.memory_space<vmem>>, vector<1x8x64xf32>
    %258 = vector.shape_cast %257 : vector<1x8x64xf32> to vector<8x64xf32>
    %259 = arith.truncf %230 : vector<8x16xf32> to vector<8x16xbf16>
    %c0_73 = arith.constant 0 : index
    %c0_74 = arith.constant 0 : index
    %260 = vector.load %arg4[%c0_73, %c0_74] : memref<16x64xbf16, #tpu.memory_space<vmem>>, vector<16x64xbf16>
    %cst_75 = arith.constant dense<0.000000e+00> : vector<8x64xf32>
    %261 = tpu.matmul %259, %260, %cst_75 {dimension_numbers = #tpu.dot_dimension_numbers<[1], [0], [0], [1], [0, 0, 1, 1], [], []>} : vector<8x16xbf16>, vector<16x64xbf16>, vector<8x64xf32> -> vector<8x64xf32>
    %262 = arith.addf %258, %261 : vector<8x64xf32>
    %263 = vector.extract_strided_slice %262 {offsets = [0, 0], sizes = [8, 48], strides = [1, 1]} : vector<8x64xf32> to vector<8x48xf32>
    %264 = arith.negf %263 : vector<8x48xf32>
    %265 = math.exp %264 : vector<8x48xf32>
    %cst_76 = arith.constant 1.000000e+00 : f32
    %266 = vector.broadcast %cst_76 : f32 to vector<8x48xf32>
    %267 = arith.addf %266, %265 : vector<8x48xf32>
    %268 = arith.divf %266, %267 : vector<8x48xf32>
    %269 = vector.extract_strided_slice %262 {offsets = [0, 48], sizes = [8, 16], strides = [1, 1]} : vector<8x64xf32> to vector<8x16xf32>
    %270 = math.tanh %269 : vector<8x16xf32>
    %271 = vector.extract_strided_slice %268 {offsets = [0, 16], sizes = [8, 16], strides = [1, 1]} : vector<8x48xf32> to vector<8x16xf32>
    %272 = arith.mulf %271, %227 : vector<8x16xf32>
    %273 = vector.extract_strided_slice %268 {offsets = [0, 0], sizes = [8, 16], strides = [1, 1]} : vector<8x48xf32> to vector<8x16xf32>
    %274 = arith.mulf %273, %270 : vector<8x16xf32>
    %275 = arith.addf %272, %274 : vector<8x16xf32>
    %276 = vector.extract_strided_slice %268 {offsets = [0, 32], sizes = [8, 16], strides = [1, 1]} : vector<8x48xf32> to vector<8x16xf32>
    %277 = math.tanh %275 : vector<8x16xf32>
    %278 = arith.mulf %276, %277 : vector<8x16xf32>
    %279 = tpu.concatenate %278, %251 in 1 : vector<8x16xf32>, vector<8x16xf32> -> vector<8x32xf32>
    %280 = arith.truncf %279 : vector<8x32xf32> to vector<8x32xbf16>
    %c0_77 = arith.constant 0 : index
    %c0_78 = arith.constant 0 : index
    %281 = vector.load %arg5[%c0_77, %c0_78] : memref<32x64xbf16, #tpu.memory_space<vmem>>, vector<32x64xbf16>
    %cst_79 = arith.constant dense<0.000000e+00> : vector<8x64xf32>
    %282 = tpu.matmul %280, %281, %cst_79 {dimension_numbers = #tpu.dot_dimension_numbers<[1], [0], [0], [1], [0, 0, 1, 1], [], []>} : vector<8x32xbf16>, vector<32x64xbf16>, vector<8x64xf32> -> vector<8x64xf32>
    %283 = arith.addf %282, %14 : vector<8x64xf32>
    %284 = vector.extract_strided_slice %283 {offsets = [0, 0], sizes = [8, 48], strides = [1, 1]} : vector<8x64xf32> to vector<8x48xf32>
    %285 = arith.negf %284 : vector<8x48xf32>
    %286 = math.exp %285 : vector<8x48xf32>
    %cst_80 = arith.constant 1.000000e+00 : f32
    %287 = vector.broadcast %cst_80 : f32 to vector<8x48xf32>
    %288 = arith.addf %287, %286 : vector<8x48xf32>
    %289 = arith.divf %287, %288 : vector<8x48xf32>
    %290 = vector.extract_strided_slice %283 {offsets = [0, 48], sizes = [8, 16], strides = [1, 1]} : vector<8x64xf32> to vector<8x16xf32>
    %291 = math.tanh %290 : vector<8x16xf32>
    %292 = vector.extract_strided_slice %289 {offsets = [0, 16], sizes = [8, 16], strides = [1, 1]} : vector<8x48xf32> to vector<8x16xf32>
    %293 = arith.mulf %292, %248 : vector<8x16xf32>
    %294 = vector.extract_strided_slice %289 {offsets = [0, 0], sizes = [8, 16], strides = [1, 1]} : vector<8x48xf32> to vector<8x16xf32>
    %295 = arith.mulf %294, %291 : vector<8x16xf32>
    %296 = arith.addf %293, %295 : vector<8x16xf32>
    %297 = vector.extract_strided_slice %289 {offsets = [0, 32], sizes = [8, 16], strides = [1, 1]} : vector<8x48xf32> to vector<8x16xf32>
    %298 = math.tanh %296 : vector<8x16xf32>
    %299 = arith.mulf %297, %298 : vector<8x16xf32>
    %300 = arith.index_cast %c5_i32 : i32 to index
    %c0_81 = arith.constant 0 : index
    %c0_82 = arith.constant 0 : index
    %301 = vector.load %arg7[%300, %c0_81, %c0_82] : memref<8x8x16xf32, #tpu.memory_space<vmem>>, vector<1x8x16xf32>
    %302 = vector.shape_cast %301 : vector<1x8x16xf32> to vector<8x16xf32>
    %303 = vector.shape_cast %299 : vector<8x16xf32> to vector<1x8x16xf32>
    tpu.vector_store %arg7[%300, %c0_81, %c0_82], %303 {strides = array<i32>} : memref<8x8x16xf32, #tpu.memory_space<vmem>>, vector<1x8x16xf32>,
    %c6_i32 = arith.constant 6 : i32
    %304 = arith.index_cast %c6_i32 : i32 to index
    %c0_83 = arith.constant 0 : index
    %c0_84 = arith.constant 0 : index
    %305 = vector.load %arg8[%304, %c0_83, %c0_84] : memref<8x8x64xf32, #tpu.memory_space<vmem>>, vector<1x8x64xf32>
    %306 = vector.shape_cast %305 : vector<1x8x64xf32> to vector<8x64xf32>
    %307 = arith.truncf %278 : vector<8x16xf32> to vector<8x16xbf16>
    %c0_85 = arith.constant 0 : index
    %c0_86 = arith.constant 0 : index
    %308 = vector.load %arg4[%c0_85, %c0_86] : memref<16x64xbf16, #tpu.memory_space<vmem>>, vector<16x64xbf16>
    %cst_87 = arith.constant dense<0.000000e+00> : vector<8x64xf32>
    %309 = tpu.matmul %307, %308, %cst_87 {dimension_numbers = #tpu.dot_dimension_numbers<[1], [0], [0], [1], [0, 0, 1, 1], [], []>} : vector<8x16xbf16>, vector<16x64xbf16>, vector<8x64xf32> -> vector<8x64xf32>
    %310 = arith.addf %306, %309 : vector<8x64xf32>
    %311 = vector.extract_strided_slice %310 {offsets = [0, 0], sizes = [8, 48], strides = [1, 1]} : vector<8x64xf32> to vector<8x48xf32>
    %312 = arith.negf %311 : vector<8x48xf32>
    %313 = math.exp %312 : vector<8x48xf32>
    %cst_88 = arith.constant 1.000000e+00 : f32
    %314 = vector.broadcast %cst_88 : f32 to vector<8x48xf32>
    %315 = arith.addf %314, %313 : vector<8x48xf32>
    %316 = arith.divf %314, %315 : vector<8x48xf32>
    %317 = vector.extract_strided_slice %310 {offsets = [0, 48], sizes = [8, 16], strides = [1, 1]} : vector<8x64xf32> to vector<8x16xf32>
    %318 = math.tanh %317 : vector<8x16xf32>
    %319 = vector.extract_strided_slice %316 {offsets = [0, 16], sizes = [8, 16], strides = [1, 1]} : vector<8x48xf32> to vector<8x16xf32>
    %320 = arith.mulf %319, %275 : vector<8x16xf32>
    %321 = vector.extract_strided_slice %316 {offsets = [0, 0], sizes = [8, 16], strides = [1, 1]} : vector<8x48xf32> to vector<8x16xf32>
    %322 = arith.mulf %321, %318 : vector<8x16xf32>
    %323 = arith.addf %320, %322 : vector<8x16xf32>
    %324 = vector.extract_strided_slice %316 {offsets = [0, 32], sizes = [8, 16], strides = [1, 1]} : vector<8x48xf32> to vector<8x16xf32>
    %325 = math.tanh %323 : vector<8x16xf32>
    %326 = arith.mulf %324, %325 : vector<8x16xf32>
    %327 = tpu.concatenate %326, %299 in 1 : vector<8x16xf32>, vector<8x16xf32> -> vector<8x32xf32>
    %328 = arith.truncf %327 : vector<8x32xf32> to vector<8x32xbf16>
    %c0_89 = arith.constant 0 : index
    %c0_90 = arith.constant 0 : index
    %329 = vector.load %arg5[%c0_89, %c0_90] : memref<32x64xbf16, #tpu.memory_space<vmem>>, vector<32x64xbf16>
    %cst_91 = arith.constant dense<0.000000e+00> : vector<8x64xf32>
    %330 = tpu.matmul %328, %329, %cst_91 {dimension_numbers = #tpu.dot_dimension_numbers<[1], [0], [0], [1], [0, 0, 1, 1], [], []>} : vector<8x32xbf16>, vector<32x64xbf16>, vector<8x64xf32> -> vector<8x64xf32>
    %331 = arith.addf %330, %14 : vector<8x64xf32>
    %332 = vector.extract_strided_slice %331 {offsets = [0, 0], sizes = [8, 48], strides = [1, 1]} : vector<8x64xf32> to vector<8x48xf32>
    %333 = arith.negf %332 : vector<8x48xf32>
    %334 = math.exp %333 : vector<8x48xf32>
    %cst_92 = arith.constant 1.000000e+00 : f32
    %335 = vector.broadcast %cst_92 : f32 to vector<8x48xf32>
    %336 = arith.addf %335, %334 : vector<8x48xf32>
    %337 = arith.divf %335, %336 : vector<8x48xf32>
    %338 = vector.extract_strided_slice %331 {offsets = [0, 48], sizes = [8, 16], strides = [1, 1]} : vector<8x64xf32> to vector<8x16xf32>
    %339 = math.tanh %338 : vector<8x16xf32>
    %340 = vector.extract_strided_slice %337 {offsets = [0, 16], sizes = [8, 16], strides = [1, 1]} : vector<8x48xf32> to vector<8x16xf32>
    %341 = arith.mulf %340, %296 : vector<8x16xf32>
    %342 = vector.extract_strided_slice %337 {offsets = [0, 0], sizes = [8, 16], strides = [1, 1]} : vector<8x48xf32> to vector<8x16xf32>
    %343 = arith.mulf %342, %339 : vector<8x16xf32>
    %344 = arith.addf %341, %343 : vector<8x16xf32>
    %345 = vector.extract_strided_slice %337 {offsets = [0, 32], sizes = [8, 16], strides = [1, 1]} : vector<8x48xf32> to vector<8x16xf32>
    %346 = math.tanh %344 : vector<8x16xf32>
    %347 = arith.mulf %345, %346 : vector<8x16xf32>
    %348 = arith.index_cast %c6_i32 : i32 to index
    %c0_93 = arith.constant 0 : index
    %c0_94 = arith.constant 0 : index
    %349 = vector.load %arg7[%348, %c0_93, %c0_94] : memref<8x8x16xf32, #tpu.memory_space<vmem>>, vector<1x8x16xf32>
    %350 = vector.shape_cast %349 : vector<1x8x16xf32> to vector<8x16xf32>
    %351 = vector.shape_cast %347 : vector<8x16xf32> to vector<1x8x16xf32>
    tpu.vector_store %arg7[%348, %c0_93, %c0_94], %351 {strides = array<i32>} : memref<8x8x16xf32, #tpu.memory_space<vmem>>, vector<1x8x16xf32>,
    %c7_i32 = arith.constant 7 : i32
    %352 = arith.index_cast %c7_i32 : i32 to index
    %c0_95 = arith.constant 0 : index
    %c0_96 = arith.constant 0 : index
    %353 = vector.load %arg8[%352, %c0_95, %c0_96] : memref<8x8x64xf32, #tpu.memory_space<vmem>>, vector<1x8x64xf32>
    %354 = vector.shape_cast %353 : vector<1x8x64xf32> to vector<8x64xf32>
    %355 = arith.truncf %326 : vector<8x16xf32> to vector<8x16xbf16>
    %c0_97 = arith.constant 0 : index
    %c0_98 = arith.constant 0 : index
    %356 = vector.load %arg4[%c0_97, %c0_98] : memref<16x64xbf16, #tpu.memory_space<vmem>>, vector<16x64xbf16>
    %cst_99 = arith.constant dense<0.000000e+00> : vector<8x64xf32>
    %357 = tpu.matmul %355, %356, %cst_99 {dimension_numbers = #tpu.dot_dimension_numbers<[1], [0], [0], [1], [0, 0, 1, 1], [], []>} : vector<8x16xbf16>, vector<16x64xbf16>, vector<8x64xf32> -> vector<8x64xf32>
    %358 = arith.addf %354, %357 : vector<8x64xf32>
    %359 = vector.extract_strided_slice %358 {offsets = [0, 0], sizes = [8, 48], strides = [1, 1]} : vector<8x64xf32> to vector<8x48xf32>
    %360 = arith.negf %359 : vector<8x48xf32>
    %361 = math.exp %360 : vector<8x48xf32>
    %cst_100 = arith.constant 1.000000e+00 : f32
    %362 = vector.broadcast %cst_100 : f32 to vector<8x48xf32>
    %363 = arith.addf %362, %361 : vector<8x48xf32>
    %364 = arith.divf %362, %363 : vector<8x48xf32>
    %365 = vector.extract_strided_slice %358 {offsets = [0, 48], sizes = [8, 16], strides = [1, 1]} : vector<8x64xf32> to vector<8x16xf32>
    %366 = math.tanh %365 : vector<8x16xf32>
    %367 = vector.extract_strided_slice %364 {offsets = [0, 16], sizes = [8, 16], strides = [1, 1]} : vector<8x48xf32> to vector<8x16xf32>
    %368 = arith.mulf %367, %323 : vector<8x16xf32>
    %369 = vector.extract_strided_slice %364 {offsets = [0, 0], sizes = [8, 16], strides = [1, 1]} : vector<8x48xf32> to vector<8x16xf32>
    %370 = arith.mulf %369, %366 : vector<8x16xf32>
    %371 = arith.addf %368, %370 : vector<8x16xf32>
    %372 = vector.extract_strided_slice %364 {offsets = [0, 32], sizes = [8, 16], strides = [1, 1]} : vector<8x48xf32> to vector<8x16xf32>
    %373 = math.tanh %371 : vector<8x16xf32>
    %374 = arith.mulf %372, %373 : vector<8x16xf32>
    %375 = tpu.concatenate %374, %347 in 1 : vector<8x16xf32>, vector<8x16xf32> -> vector<8x32xf32>
    %376 = arith.truncf %375 : vector<8x32xf32> to vector<8x32xbf16>
    %c0_101 = arith.constant 0 : index
    %c0_102 = arith.constant 0 : index
    %377 = vector.load %arg5[%c0_101, %c0_102] : memref<32x64xbf16, #tpu.memory_space<vmem>>, vector<32x64xbf16>
    %cst_103 = arith.constant dense<0.000000e+00> : vector<8x64xf32>
    %378 = tpu.matmul %376, %377, %cst_103 {dimension_numbers = #tpu.dot_dimension_numbers<[1], [0], [0], [1], [0, 0, 1, 1], [], []>} : vector<8x32xbf16>, vector<32x64xbf16>, vector<8x64xf32> -> vector<8x64xf32>
    %379 = arith.addf %378, %14 : vector<8x64xf32>
    %380 = vector.extract_strided_slice %379 {offsets = [0, 0], sizes = [8, 48], strides = [1, 1]} : vector<8x64xf32> to vector<8x48xf32>
    %381 = arith.negf %380 : vector<8x48xf32>
    %382 = math.exp %381 : vector<8x48xf32>
    %cst_104 = arith.constant 1.000000e+00 : f32
    %383 = vector.broadcast %cst_104 : f32 to vector<8x48xf32>
    %384 = arith.addf %383, %382 : vector<8x48xf32>
    %385 = arith.divf %383, %384 : vector<8x48xf32>
    %386 = vector.extract_strided_slice %379 {offsets = [0, 48], sizes = [8, 16], strides = [1, 1]} : vector<8x64xf32> to vector<8x16xf32>
    %387 = math.tanh %386 : vector<8x16xf32>
    %388 = vector.extract_strided_slice %385 {offsets = [0, 16], sizes = [8, 16], strides = [1, 1]} : vector<8x48xf32> to vector<8x16xf32>
    %389 = arith.mulf %388, %344 : vector<8x16xf32>
    %390 = vector.extract_strided_slice %385 {offsets = [0, 0], sizes = [8, 16], strides = [1, 1]} : vector<8x48xf32> to vector<8x16xf32>
    %391 = arith.mulf %390, %387 : vector<8x16xf32>
    %392 = arith.addf %389, %391 : vector<8x16xf32>
    %393 = vector.extract_strided_slice %385 {offsets = [0, 32], sizes = [8, 16], strides = [1, 1]} : vector<8x48xf32> to vector<8x16xf32>
    %394 = math.tanh %392 : vector<8x16xf32>
    %395 = arith.mulf %393, %394 : vector<8x16xf32>
    %396 = arith.index_cast %c7_i32 : i32 to index
    %c0_105 = arith.constant 0 : index
    %c0_106 = arith.constant 0 : index
    %397 = vector.load %arg7[%396, %c0_105, %c0_106] : memref<8x8x16xf32, #tpu.memory_space<vmem>>, vector<1x8x16xf32>
    %398 = vector.shape_cast %397 : vector<1x8x16xf32> to vector<8x16xf32>
    %399 = vector.shape_cast %395 : vector<8x16xf32> to vector<1x8x16xf32>
    tpu.vector_store %arg7[%396, %c0_105, %c0_106], %399 {strides = array<i32>} : memref<8x8x16xf32, #tpu.memory_space<vmem>>, vector<1x8x16xf32>,
    %c8_i32 = arith.constant 8 : i32
    return
  }
  func.func @transform_0(%arg0: i32) -> (i32, i32, i32) {
    %c0_i32 = arith.constant 0 : i32
    %c0_i32_0 = arith.constant 0 : i32
    %c0_i32_1 = arith.constant 0 : i32
    return %c0_i32, %arg0, %c0_i32_0 : i32, i32, i32
  }
  func.func @transform_1(%arg0: i32) -> (i32, i32) {
    %c0_i32 = arith.constant 0 : i32
    %c0_i32_0 = arith.constant 0 : i32
    %c0_i32_1 = arith.constant 0 : i32
    return %c0_i32, %c0_i32_0 : i32, i32
  }
  func.func @transform_2(%arg0: i32) -> (i32, i32) {
    %c0_i32 = arith.constant 0 : i32
    %c0_i32_0 = arith.constant 0 : i32
    %c0_i32_1 = arith.constant 0 : i32
    return %c0_i32, %c0_i32_0 : i32, i32
  }
  func.func @transform_3(%arg0: i32) -> (i32, i32) {
    %c0_i32 = arith.constant 0 : i32
    %c0_i32_0 = arith.constant 0 : i32
    %c0_i32_1 = arith.constant 0 : i32
    return %c0_i32, %c0_i32_0 : i32, i32
  }
  func.func @transform_4(%arg0: i32) -> (i32, i32) {
    %c0_i32 = arith.constant 0 : i32
    %c0_i32_0 = arith.constant 0 : i32
    %c0_i32_1 = arith.constant 0 : i32
    return %c0_i32, %c0_i32_0 : i32, i32
  }
  func.func @transform_5(%arg0: i32) -> (i32, i32) {
    %c0_i32 = arith.constant 0 : i32
    %c0_i32_0 = arith.constant 0 : i32
    %c0_i32_1 = arith.constant 0 : i32
    return %c0_i32, %c0_i32_0 : i32, i32
  }
  func.func @transform_6(%arg0: i32) -> (i32, i32, i32) {
    %c0_i32 = arith.constant 0 : i32
    %c0_i32_0 = arith.constant 0 : i32
    %c0_i32_1 = arith.constant 0 : i32
    return %c0_i32, %arg0, %c0_i32_0 : i32, i32, i32
  }
}

module attributes {stable_mosaic.version = 11 : i64} {
  func.func @_mlp_kernel(%arg0: i32, %arg1: memref<24x128xbf16, #tpu.memory_space<vmem>>, %arg2: memref<64x24xbf16, #tpu.memory_space<vmem>>, %arg3: memref<64x1xf32, #tpu.memory_space<vmem>>, %arg4: memref<32x64xbf16, #tpu.memory_space<vmem>>, %arg5: memref<32x1xf32, #tpu.memory_space<vmem>>, %arg6: memref<1x32xbf16, #tpu.memory_space<vmem>>, %arg7: memref<1x1xf32, #tpu.memory_space<vmem>>, %arg8: memref<1x128xf32, #tpu.memory_space<vmem>>) attributes {dimension_semantics = [#tpu.dimension_semantics<parallel>], iteration_bounds = array<i64: 2>, scalar_prefetch = 0 : i64, scratch_operands = 0 : i64, tpu.core_type = #tpu.core_type<tc>, window_params = [{transform_indices = @transform_0, window_bounds = array<i64: 24, 128>}, {pipeline_mode = #tpu.pipeline_mode<synchronous>, transform_indices = @transform_1, window_bounds = array<i64: 64, 24>}, {pipeline_mode = #tpu.pipeline_mode<synchronous>, transform_indices = @transform_2, window_bounds = array<i64: 64, 1>}, {pipeline_mode = #tpu.pipeline_mode<synchronous>, transform_indices = @transform_3, window_bounds = array<i64: 32, 64>}, {pipeline_mode = #tpu.pipeline_mode<synchronous>, transform_indices = @transform_4, window_bounds = array<i64: 32, 1>}, {pipeline_mode = #tpu.pipeline_mode<synchronous>, transform_indices = @transform_5, window_bounds = array<i64: 1, 32>}, {pipeline_mode = #tpu.pipeline_mode<synchronous>, transform_indices = @transform_6, window_bounds = array<i64: 1, 1>}, {transform_indices = @transform_7, window_bounds = array<i64: 1, 128>}]} {
    %c0 = arith.constant 0 : index
    %c0_0 = arith.constant 0 : index
    %0 = vector.load %arg2[%c0, %c0_0] : memref<64x24xbf16, #tpu.memory_space<vmem>>, vector<64x24xbf16>
    %c0_1 = arith.constant 0 : index
    %c0_2 = arith.constant 0 : index
    %1 = vector.load %arg1[%c0_1, %c0_2] : memref<24x128xbf16, #tpu.memory_space<vmem>>, vector<24x128xbf16>
    %cst = arith.constant dense<0.000000e+00> : vector<64x128xf32>
    %2 = tpu.matmul %0, %1, %cst {dimension_numbers = #tpu.dot_dimension_numbers<[1], [0], [0], [1], [0, 0, 1, 1], [], []>} : vector<64x24xbf16>, vector<24x128xbf16>, vector<64x128xf32> -> vector<64x128xf32>
    %c0_3 = arith.constant 0 : index
    %c0_4 = arith.constant 0 : index
    %3 = vector.load %arg3[%c0_3, %c0_4] : memref<64x1xf32, #tpu.memory_space<vmem>>, vector<64x1xf32>
    %4 = vector.broadcast %3 : vector<64x1xf32> to vector<64x128xf32>
    %5 = arith.addf %2, %4 : vector<64x128xf32>
    %cst_5 = arith.constant 0.000000e+00 : f32
    %6 = vector.broadcast %cst_5 : f32 to vector<64x128xf32>
    %7 = arith.maximumf %5, %6 : vector<64x128xf32>
    %c0_6 = arith.constant 0 : index
    %c0_7 = arith.constant 0 : index
    %8 = vector.load %arg4[%c0_6, %c0_7] : memref<32x64xbf16, #tpu.memory_space<vmem>>, vector<32x64xbf16>
    %9 = arith.truncf %7 : vector<64x128xf32> to vector<64x128xbf16>
    %cst_8 = arith.constant dense<0.000000e+00> : vector<32x128xf32>
    %10 = tpu.matmul %8, %9, %cst_8 {dimension_numbers = #tpu.dot_dimension_numbers<[1], [0], [0], [1], [0, 0, 1, 1], [], []>} : vector<32x64xbf16>, vector<64x128xbf16>, vector<32x128xf32> -> vector<32x128xf32>
    %c0_9 = arith.constant 0 : index
    %c0_10 = arith.constant 0 : index
    %11 = vector.load %arg5[%c0_9, %c0_10] : memref<32x1xf32, #tpu.memory_space<vmem>>, vector<32x1xf32>
    %12 = vector.broadcast %11 : vector<32x1xf32> to vector<32x128xf32>
    %13 = arith.addf %10, %12 : vector<32x128xf32>
    %cst_11 = arith.constant 0.000000e+00 : f32
    %14 = vector.broadcast %cst_11 : f32 to vector<32x128xf32>
    %15 = arith.maximumf %13, %14 : vector<32x128xf32>
    %c0_12 = arith.constant 0 : index
    %c0_13 = arith.constant 0 : index
    %16 = vector.load %arg6[%c0_12, %c0_13] : memref<1x32xbf16, #tpu.memory_space<vmem>>, vector<1x32xbf16>
    %17 = arith.truncf %15 : vector<32x128xf32> to vector<32x128xbf16>
    %cst_14 = arith.constant dense<0.000000e+00> : vector<1x128xf32>
    %18 = tpu.matmul %16, %17, %cst_14 {dimension_numbers = #tpu.dot_dimension_numbers<[1], [0], [0], [1], [0, 0, 1, 1], [], []>} : vector<1x32xbf16>, vector<32x128xbf16>, vector<1x128xf32> -> vector<1x128xf32>
    %c0_15 = arith.constant 0 : index
    %c0_16 = arith.constant 0 : index
    %19 = vector.load %arg7[%c0_15, %c0_16] : memref<1x1xf32, #tpu.memory_space<vmem>>, vector<1x1xf32>
    %20 = vector.broadcast %19 : vector<1x1xf32> to vector<1x128xf32>
    %21 = arith.addf %18, %20 : vector<1x128xf32>
    %c0_17 = arith.constant 0 : index
    %c0_18 = arith.constant 0 : index
    %22 = vector.load %arg8[%c0_17, %c0_18] : memref<1x128xf32, #tpu.memory_space<vmem>>, vector<1x128xf32>
    tpu.vector_store %arg8[%c0_17, %c0_18], %21 {strides = array<i32>} : memref<1x128xf32, #tpu.memory_space<vmem>>, vector<1x128xf32>,
    return
  }
  func.func @transform_0(%arg0: i32) -> (i32, i32) {
    %c0_i32 = arith.constant 0 : i32
    %c0_i32_0 = arith.constant 0 : i32
    return %c0_i32, %arg0 : i32, i32
  }
  func.func @transform_1(%arg0: i32) -> (i32, i32) {
    %c0_i32 = arith.constant 0 : i32
    %c0_i32_0 = arith.constant 0 : i32
    %c0_i32_1 = arith.constant 0 : i32
    return %c0_i32, %c0_i32_0 : i32, i32
  }
  func.func @transform_2(%arg0: i32) -> (i32, i32) {
    %c0_i32 = arith.constant 0 : i32
    %c0_i32_0 = arith.constant 0 : i32
    %c0_i32_1 = arith.constant 0 : i32
    return %c0_i32, %c0_i32_0 : i32, i32
  }
  func.func @transform_3(%arg0: i32) -> (i32, i32) {
    %c0_i32 = arith.constant 0 : i32
    %c0_i32_0 = arith.constant 0 : i32
    %c0_i32_1 = arith.constant 0 : i32
    return %c0_i32, %c0_i32_0 : i32, i32
  }
  func.func @transform_4(%arg0: i32) -> (i32, i32) {
    %c0_i32 = arith.constant 0 : i32
    %c0_i32_0 = arith.constant 0 : i32
    %c0_i32_1 = arith.constant 0 : i32
    return %c0_i32, %c0_i32_0 : i32, i32
  }
  func.func @transform_5(%arg0: i32) -> (i32, i32) {
    %c0_i32 = arith.constant 0 : i32
    %c0_i32_0 = arith.constant 0 : i32
    %c0_i32_1 = arith.constant 0 : i32
    return %c0_i32, %c0_i32_0 : i32, i32
  }
  func.func @transform_6(%arg0: i32) -> (i32, i32) {
    %c0_i32 = arith.constant 0 : i32
    %c0_i32_0 = arith.constant 0 : i32
    %c0_i32_1 = arith.constant 0 : i32
    return %c0_i32, %c0_i32_0 : i32, i32
  }
  func.func @transform_7(%arg0: i32) -> (i32, i32) {
    %c0_i32 = arith.constant 0 : i32
    %c0_i32_0 = arith.constant 0 : i32
    return %c0_i32, %arg0 : i32, i32
  }
}

</mosaic_0001>

<bundles_post_ra>
// kernel: squeeze.17
= control target key start
LH: loop header
LB: loop body
LE: loop exit
PB: predicated region body
PF: predicated region fallthrough
CT: control target
= control target key end

     0   :  { %s194_s8 = smov 116   ;;  %s195_s9 = smov 120   ;;  %vm7_vm0 = vcmask 31744   ;;  %s325_s0 = inlined_call_operand.vmem [shape: f32[96], index: 0, kind: input, shape index: {}]   ;;  %s326_s1 = inlined_call_operand.vmem [shape: f32[2,12,4], index: 1, kind: output, shape index: {}]  }
   0x1   :  { %v4_v0 = vld [vmem:[%s325_s0] sm:$0x1]  ;;  %s193_s0 = smov 124   ;;  %s196_s10 = smov 112  }
   0x2   :  { %5 = vst [vmem:[#allocation0] sm:$0x1] %v4_v0  ;;  %s197_s11 = smov 108   ;;  %s198_s12 = smov 104  }
   0x3   :  { %s199_s13 = smov 100   ;;  %s200_s14 = smov 96  }
   0x4   :  { %s201_s15 = smov 92   ;;  %s202_s16 = smov 88  }
   0x5   :  { %s203_s17 = smov 84   ;;  %s204_s18 = smov 80  }
   0x6   :  { %s205_s19 = smov 76   ;;  %s206_s20 = smov 72  }
   0x7   :  { %s207_s21 = smov 68   ;;  %s208_s22 = smov 64  }
   0x8   :  { %s209_s25 = smov 60   ;;  %s210_s26 = smov 56  }
   0x9   :  { %v9_v1 = vld [vmem:[#allocation0] sm:$0x1]   ;;  %s211_s27 = smov 52   ;;  %s212_s28 = smov 48  }
   0xa   :  { %v21_v2 = vld [vmem:[#allocation0] sm:$0x1]   ;;  %10 = vrot.lane.b32.xlu0 %v9_v1, %s193_s0  ;;  %s213_s29 = smov 44   ;;  %s214_s30 = smov 40  }
   0xb   :  { %22 = vrot.lane.b32.xlu1 %v21_v2, %s194_s8  ;;  %v15_v3 = vld [vmem:[#allocation0] sm:$0x1]   ;;  %s215_s2 = smov 36  }
   0xc   :  { %v27_v4 = vld [vmem:[#allocation0] sm:$0x1]  }
   0xd   :  { %v33_v5 = vld [vmem:[#allocation0] sm:$0x1]  }
   0xe   :  { %16 = vrot.lane.b32.xlu0 %v15_v3, %s195_s9  ;;  %v39_v6 = vld [vmem:[#allocation0] sm:$0x1]  }
   0xf   :  { %28 = vrot.lane.b32.xlu1 %v27_v4, %s196_s10  ;;  %v45_v7 = vld [vmem:[#allocation0] sm:$0x1]  }
  0x10   :  { %v51_v8 = vld [vmem:[#allocation0] sm:$0x1]  }
  0x11   :  { %v57_v9 = vld [vmem:[#allocation0] sm:$0x1]  }
  0x12   :  { %34 = vrot.lane.b32.xlu0 %v33_v5, %s197_s11  ;;  %v63_v10 = vld [vmem:[#allocation0] sm:$0x1]  }
  0x13   :  { %40 = vrot.lane.b32.xlu1 %v39_v6, %s198_s12  ;;  %v69_v11 = vld [vmem:[#allocation0] sm:$0x1]  }
  0x14   :  { %v75_v12 = vld [vmem:[#allocation0] sm:$0x1]  }
  0x15   :  { %v81_v13 = vld [vmem:[#allocation0] sm:$0x1]  }
  0x16   :  { %46 = vrot.lane.b32.xlu0 %v45_v7, %s199_s13  ;;  %v87_v14 = vld [vmem:[#allocation0] sm:$0x1]  }
  0x17   :  { %52 = vrot.lane.b32.xlu1 %v51_v8, %s200_s14  ;;  %v93_v15 = vld [vmem:[#allocation0] sm:$0x1]  }
  0x18   :  { %v99_v16 = vld [vmem:[#allocation0] sm:$0x1]  }
  0x19   :  { %v105_v17 = vld [vmem:[#allocation0] sm:$0x1]  }
  0x1a   :  { %58 = vrot.lane.b32.xlu0 %v57_v9, %s201_s15  ;;  %v111_v18 = vld [vmem:[#allocation0] sm:$0x1]  }
  0x1b   :  { %64 = vrot.lane.b32.xlu1 %v63_v10, %s202_s16  ;;  %v6_v19 = vld [vmem:[#allocation0] sm:$0x1]  }
  0x1c   :  { %8 = vst.msk [vmem:[%s326_s1] sm:$0x1] %vm7_vm0, %v6_v19   ;;  %v117_v20 = vld [vmem:[#allocation0] sm:$0x1]  }
  0x1d   :  { %v123_v21 = vld [vmem:[#allocation0] sm:$0x1]  }
  0x1e   :  { %70 = vrot.lane.b32.xlu0 %v69_v11, %s203_s17  ;;  %v129_v22 = vld [vmem:[#allocation0] sm:$0x1]  }
  0x1f   :  { %76 = vrot.lane.b32.xlu1 %v75_v12, %s204_s18  ;;  %v135_v23 = vld [vmem:[#allocation0] sm:$0x1]  }
  0x20   :  { %v141_v24 = vld [vmem:[#allocation0] sm:$0x1]  }
  0x22   :  { %82 = vrot.lane.b32.xlu0 %v81_v13, %s205_s19 }
  0x23   :  { %88 = vrot.lane.b32.xlu1 %v87_v14, %s206_s20 }
  0x26   :  { %94 = vrot.lane.b32.xlu0 %v93_v15, %s207_s21 }
  0x27   :  { %100 = vrot.lane.b32.xlu1 %v99_v16, %s208_s22 }
  0x2a   :  { %106 = vrot.lane.b32.xlu0 %v105_v17, %s209_s25 }
  0x2b   :  { %112 = vrot.lane.b32.xlu1 %v111_v18, %s210_s26 }
  0x2e   :  { %118 = vrot.lane.b32.xlu0 %v117_v20, %s211_s27 }
  0x2f   :  { %124 = vrot.lane.b32.xlu1 %v123_v21, %s212_s28 }
  0x32   :  { %130 = vrot.lane.b32.xlu0 %v129_v22, %s213_s29 }
  0x33   :  { %136 = vrot.lane.b32.xlu1 %v135_v23, %s214_s30 }
  0x36   :  { %142 = vrot.lane.b32.xlu0 %v141_v24, %s215_s2 }
  0x7c   :  { %v11_v25 = vpop.permute.xlu0 %10  }
  0x7d   :  { %v23_v26 = vpop.permute.xlu1 %22   ;;  %147 = vst.msk [vmem:[%s326_s1 + $0x1] sm:$0x1] %vm7_vm0, %v11_v25  }
  0x7e   :  { %149 = vst.msk [vmem:[%s326_s1 + $0x3] sm:$0x1] %vm7_vm0, %v23_v26  }
  0x80   :  { %v17_v27 = vpop.permute.xlu0 %16  }
  0x81   :  { %v29_v28 = vpop.permute.xlu1 %28   ;;  %148 = vst.msk [vmem:[%s326_s1 + $0x2] sm:$0x1] %vm7_vm0, %v17_v27  }
  0x82   :  { %150 = vst.msk [vmem:[%s326_s1 + $0x4] sm:$0x1] %vm7_vm0, %v29_v28  }
  0x84   :  { %v35_v29 = vpop.permute.xlu0 %34  }
  0x85   :  { %v41_v30 = vpop.permute.xlu1 %40   ;;  %151 = vst.msk [vmem:[%s326_s1 + $0x5] sm:$0x1] %vm7_vm0, %v35_v29  }
  0x86   :  { %152 = vst.msk [vmem:[%s326_s1 + $0x6] sm:$0x1] %vm7_vm0, %v41_v30  }
  0x88   :  { %v47_v31 = vpop.permute.xlu0 %46  }
  0x89   :  { %v53_v32 = vpop.permute.xlu1 %52   ;;  %153 = vst.msk [vmem:[%s326_s1 + $0x7] sm:$0x1] %vm7_vm0, %v47_v31  }
  0x8a   :  { %154 = vst.msk [vmem:[%s326_s1 + $0x8] sm:$0x1] %vm7_vm0, %v53_v32  }
  0x8c   :  { %v59_v33 = vpop.permute.xlu0 %58  }
  0x8d   :  { %v65_v34 = vpop.permute.xlu1 %64   ;;  %155 = vst.msk [vmem:[%s326_s1 + $0x9] sm:$0x1] %vm7_vm0, %v59_v33  }
  0x8e   :  { %156 = vst.msk [vmem:[%s326_s1 + $0xa] sm:$0x1] %vm7_vm0, %v65_v34  }
  0x90   :  { %v71_v35 = vpop.permute.xlu0 %70  }
  0x91   :  { %v77_v36 = vpop.permute.xlu1 %76   ;;  %157 = vst.msk [vmem:[%s326_s1 + $0xb] sm:$0x1] %vm7_vm0, %v71_v35  }
  0x92   :  { %158 = vst.msk [vmem:[%s326_s1 + $0x10] sm:$0x1] %vm7_vm0, %v77_v36  }
  0x94   :  { %v83_v37 = vpop.permute.xlu0 %82  }
  0x95   :  { %v89_v38 = vpop.permute.xlu1 %88   ;;  %159 = vst.msk [vmem:[%s326_s1 + $0x11] sm:$0x1] %vm7_vm0, %v83_v37  }
  0x96   :  { %160 = vst.msk [vmem:[%s326_s1 + $0x12] sm:$0x1] %vm7_vm0, %v89_v38  }
  0x98   :  { %v95_v39 = vpop.permute.xlu0 %94  }
  0x99   :  { %v101_v40 = vpop.permute.xlu1 %100   ;;  %161 = vst.msk [vmem:[%s326_s1 + $0x13] sm:$0x1] %vm7_vm0, %v95_v39  }
  0x9a   :  { %162 = vst.msk [vmem:[%s326_s1 + $0x14] sm:$0x1] %vm7_vm0, %v101_v40  }
  0x9c   :  { %v107_v41 = vpop.permute.xlu0 %106  }
  0x9d   :  { %v113_v42 = vpop.permute.xlu1 %112   ;;  %163 = vst.msk [vmem:[%s326_s1 + $0x15] sm:$0x1] %vm7_vm0, %v107_v41  }
  0x9e   :  { %164 = vst.msk [vmem:[%s326_s1 + $0x16] sm:$0x1] %vm7_vm0, %v113_v42  }
  0xa0   :  { %v119_v43 = vpop.permute.xlu0 %118  }
  0xa1   :  { %v125_v44 = vpop.permute.xlu1 %124   ;;  %165 = vst.msk [vmem:[%s326_s1 + $0x17] sm:$0x1] %vm7_vm0, %v119_v43  }
  0xa2   :  { %166 = vst.msk [vmem:[%s326_s1 + $0x18] sm:$0x1] %vm7_vm0, %v125_v44  }
  0xa4   :  { %v131_v45 = vpop.permute.xlu0 %130  }
  0xa5   :  { %v137_v46 = vpop.permute.xlu1 %136   ;;  %167 = vst.msk [vmem:[%s326_s1 + $0x19] sm:$0x1] %vm7_vm0, %v131_v45  }
  0xa6   :  { %168 = vst.msk [vmem:[%s326_s1 + $0x1a] sm:$0x1] %vm7_vm0, %v137_v46  }
  0xa8   :  { %v143_v47 = vpop.permute.xlu0 %142  }
  0xa9   :  { %169 = vst.msk [vmem:[%s326_s1 + $0x1b] sm:$0x1] %vm7_vm0, %v143_v47  }

// kernel: granger_forward.7
= control target key start
LH: loop header
LB: loop body
LE: loop exit
PB: predicated region body
PF: predicated region fallthrough
CT: control target
= control target key end

     0   :  { %s1015_s0 = inlined_call_operand.vmem [shape: bf16[24,256], index: 0, kind: input, shape index: {}]   ;;  %s1016_s1 = inlined_call_operand.vmem [shape: bf16[64,24], index: 1, kind: input, shape index: {}]   ;;  %s1017_s2 = inlined_call_operand.vmem [shape: f32[64,1], index: 2, kind: input, shape index: {}]   ;;  %s1018_s3 = inlined_call_operand.vmem [shape: bf16[32,64], index: 3, kind: input, shape index: {}]   ;;  %s1019_s4 = inlined_call_operand.vmem [shape: f32[32,1], index: 4, kind: input, shape index: {}]   ;;  %s1020_s5 = inlined_call_operand.vmem [shape: bf16[1,32], index: 5, kind: input, shape index: {}]   ;;  %s1021_s6 = inlined_call_operand.<no memory space> [shape: f32[1,1], index: 6, kind: input, shape index: {}]   ;;  %s1022_s7 = inlined_call_operand.vmem [shape: f32[1,256], index: 7, kind: output, shape index: {}]  }
   0x1   :  { %v12_v0 = vstv %s1021_s6 }
   0x2   :  { %13 = vst [vmem:[#allocation2] sm:$0x1] %v12_v0 }
   0x3   :  { %s898_s26 = smov 0   ;;  %s900_s27 = smov 0  }
   0x4   :  { %s902_s28 = smov 0  }
   0x5 LB: > { %s718_s6 = sadd.s32 4294967295, %s850_s28   ;;  %s915_s29 = sadd.s32 1, %s850_s28   ;;  %s850_s28 = sphi %s902_s28, %s1025_s28   ;;  %s846_s27 = sphi %s900_s27, %s1024_s27   ;;  %s842_s26 = sphi %s898_s26, %s1023_s26  }
   0x6   : > { %s23_s30 = ssub.s32 %s850_s28, %s915_s29  ;;  %s26_s8 = sadd.s32 1, %s846_s27 }
   0x7   : > { %p24_p0 = scmp.eq.s32.totalorder %s23_s30, 0  ;;  %p33_p1 = scmp.ne.s32.totalorder %s846_s27, %s842_s26 }
   0x8   : > { %p34_p2 = scmp.eq.s32.totalorder %s850_s28, 0  ;;  %p721_p4 = scmp.ge.s32.totalorder %s850_s28, 2 }
   0x9   : > { %s924_s9 = scalar_select %p24_p0, %s846_s27, %s26_s8  }
   0xa   : > { %p35_p3 = por %p34_p2, %p33_p1  ;;  %229 = sbr.rel (%p721_p4) target bundleno = 24 (0x18), region = 40 }
  0x11   : > { %232 = sbr.rel (!%p35_p3) target bundleno = 24 (0x18), region = 44  ;;  %s234_s10 = sand.u32 (%p35_p3), 1, %s846_s27  }
  0x12   : > { %s722_s11 = sshll.u32 (%p35_p3), %s850_s28, 2  ;;  %s789_s12 = smul.u32 (%p35_p3), 12, %s234_s10 }
  0x13   : > { %s238_s15 = scalar_lea.vmem (%p35_p3), %s1015_s0, %s722_s11 }
  0x14   : > { %v254_v1 = vld [vmem:[%s238_s15] sm:$0xf] (%p35_p3)  ;;  %v256_v2 = vld [vmem:[%s238_s15 + $0x8] sm:$0xf] (%p35_p3)  ;;  %v258_v3 = vld [vmem:[%s238_s15 + $0x10] sm:$0xf] (%p35_p3) }
  0x15   : > { %s236_s16 = scalar_lea.vmem (%p35_p3), [#allocation3], %s789_s12 }
  0x16   : > { %255 = vst [vmem:[%s236_s16] sm:$0xf] (%p35_p3), %v254_v1  ;;  %257 = vst [vmem:[%s236_s16 + $0x4] sm:$0xf] (%p35_p3), %v256_v2 }
  0x17   : > { %259 = vst [vmem:[%s236_s16 + $0x8] sm:$0xf] (%p35_p3), %v258_v3 }
  0x18 PF: > { %p723_p5 = scmp.ge.s32.totalorder %s850_s28, 1  ;;  %p287_p6 = scmp.lt.s32.totalorder %s850_s28, 3 }
  0x1a   : > { %p288_p7 = pnand %p723_p5, %p287_p6 }
  0x1b   : > { %s294_s17 = sand.u32 (!%p288_p7), 1, %s842_s26   ;;  %v822_v4 = vld [vmem:[%s1016_s1] sm:$0xff] (!%p288_p7)   ;;  %vm415_vm0 = vcmask (!%p288_p7), 195584   ;;  %vm428_vm1 = vcmask (!%p288_p7), 1043456   ;;  %v852_v7 = vmov (!%p288_p7), 0   ;;  %v340_v9 = vld [vmem:[%s1017_s2 + $0x10] sm:$0xff] (!%p288_p7) }
  0x1c   : > { %291 = sbr.rel (%p288_p7) target bundleno = 721 (0x2d1), region = 85  ;;  %760 = vmatprep.mubr.msk.bf16.mxu0 (!%p288_p7), %vm415_vm0, %v822_v4  ;;  %818 = vset.pattern.permute.xlu0 (!%p288_p7), %v852_v7  ;;  %v338_v8 = vld [vmem:[%s1017_s2] sm:$0xff] (!%p288_p7)  ;;  %v339_v10 = vld [vmem:[%s1017_s2 + $0x8] sm:$0xff] (!%p288_p7)  ;;  %v341_v12 = vld [vmem:[%s1017_s2 + $0x18] sm:$0xff] (!%p288_p7)  ;;  %vm547_vm2 = vcmask (!%p288_p7), 523264   ;;  %v853_v63 = vmov (!%p288_p7), 0.0  }
  0x1d   : > { %s790_s18 = smul.u32 (!%p288_p7), 12, %s294_s17  ;;  %819 = vset.pattern.permute.xlu1 (!%p288_p7), %v852_v7  ;;  %348 = vperm.xlu0 (!%p288_p7), %818, %v338_v8   ;;  %v823_v13 = vld [vmem:[%s1016_s1 + $0x8] sm:$0xff] (!%p288_p7)   ;;  %v824_v14 = vld [vmem:[%s1016_s1 + $0x10] sm:$0xff] (!%p288_p7)   ;;  %v342_v15 = vld [vmem:[%s1017_s2 + $0x20] sm:$0xff] (!%p288_p7)  ;;  %vm854_vm3 = vmmov (!%p288_p7), 0   ;;  %vm620_vm4 = vcmask (!%p288_p7), 261120  }
  0x1e   : > { %358 = vperm.xlu1 (!%p288_p7), %819, %v340_v9   ;;  %v343_v16 = vld [vmem:[%s1017_s2 + $0x28] sm:$0xff] (!%p288_p7)  ;;  %v344_v17 = vld [vmem:[%s1017_s2 + $0x30] sm:$0xff] (!%p288_p7)  ;;  %v345_v18 = vld [vmem:[%s1017_s2 + $0x38] sm:$0xff] (!%p288_p7)  ;;  %p323_p8 = scmp.lt.s32.totalorder (!%p288_p7), %s718_s6, 1 }
  0x1f   : > { %s296_s21 = scalar_lea.vmem (!%p288_p7), [#allocation3], %s790_s18  ;;  %v825_v19 = vld [vmem:[%s1016_s1 + $0x18] sm:$0xff] (!%p288_p7)   ;;  %v513_v20 = vld [vmem:[%s1019_s4] sm:$0xff] (!%p288_p7)  ;;  %v514_v21 = vld [vmem:[%s1019_s4 + $0x8] sm:$0xff] (!%p288_p7) }
  0x20   : > { %v820_v5 = vld [vmem:[%s296_s21] sm:$0xff] (!%p288_p7)   ;;  %v821_v6 = vld [vmem:[%s296_s21 + $0x8] ss:$0 sps:$4 sm:$0xff] (!%p288_p7)   ;;  %v516_v23 = vld [vmem:[%s1019_s4 + $0x18] sm:$0xff] (!%p288_p7) }
  0x21   : > { %756 = vmatprep.subr.bf16.mxu0 (!%p288_p7), %v820_v5  ;;  %v430_v11 = vsel (!%p288_p7), %vm428_vm1, %v821_v6, 0  ;;  %353 = vperm.xlu0 (!%p288_p7), %818, %v339_v10   ;;  %v515_v22 = vld [vmem:[%s1019_s4 + $0x10] sm:$0xff] (!%p288_p7)  ;;  %v610_v24 = vld [vmem:[#allocation2] sm:$0x1] (!%p288_p7)  ;;  %v827_v62 = vld [vmem:[%s1018_s3 + $0x8] sm:$0xff] (!%p288_p7)  }
  0x22   : > { %757 = vmatpush3.bf16.msra.mxu0 (!%p288_p7), %v820_v5  ;;  %363 = vperm.xlu1 (!%p288_p7), %819, %v341_v12   ;;  %v826_v25 = vld [vmem:[%s1018_s3] sm:$0xff] (!%p288_p7)  }
  0x23   : > { %788 = vmatprep.subr.msk.bf16.mxu0 %vm428_vm1, %v821_v6  ;;  %776 = vmatprep.mubr.msk.bf16.mxu1 %vm547_vm2, %v826_v25  ;;  %s1027_s6 = smov (!%p323_p8, %s718_s6), 1 }
  0x24   : > { %s325_s22 = scalar_lea.vmem %s1022_s7, %s1027_s6 }
  0x25   : > { %368 = vperm.xlu0 %818, %v342_v15  }
  0x26   : > { %759 = vmatpush3.bf16.msra.mxu0 %v430_v11  ;;  %373 = vperm.xlu1 %819, %v343_v16  }
  0x27   : > { %780 = vmatprep.subr.bf16.mxu0 %v853_v63 }
  0x29   : > { %761 = vmatmul.mubr.msk.bf16.vlgmr.msra.gmra.mrb[0].mxu0 %vm415_vm0, %v823_v13  ;;  %378 = vperm.xlu0 %818, %v344_v17  }
  0x2a   : > { %764 = vmatprep.mubr.msk.bf16.mxu0 %vm415_vm0, %v824_v14  ;;  %383 = vperm.xlu1 %819, %v345_v18   ;;  %v607_v18 = vld [vmem:[%s1020_s5] sm:$0x1] }
  0x2d   : > { %519 = vperm.xlu0 %818, %v513_v20  }
  0x2e   : > { %524 = vperm.xlu1 %819, %v514_v21  }
  0x31   : > { %765 = vmatmul.mubr.msk.bf16.gmra.mrb[4].mxu0 %vm415_vm0, %v825_v19  ;;  %529 = vperm.xlu0 %818, %v515_v22   ;;  %v616_v19 = vlaneseq }
  0x32   : > { %534 = vperm.xlu1 %819, %v516_v23   ;;  %784 = vmatprep.mubr.msk.bf16.mxu0 %vm854_vm3, %v853_v63 }
  0x33   : > { %v617_v20 = vshrl.u32 %v616_v19, 7 }
  0x35   : > { %613 = vperm.xlu0 %818, %v610_v24   ;;  %v618_v21 = vsub.s32 0, %v617_v20 }
  0x9c   : > { %v349_v26 = vpop.permute.xlu0 %348 }
  0x9d   : > { %v359_v27 = vpop.permute.xlu1 %358 }
  0xa0   : > { %v354_v28 = vpop.permute.xlu0 %353 }
  0xa1   : > { %v364_v29 = vpop.permute.xlu1 %363 }
  0xa4   : > { %v369_v33 = vpop.permute.xlu0 %368 }
  0xa5   : > { %v374_v38 = vpop.permute.xlu1 %373 }
  0xa8   : > { %v379_v45 = vpop.permute.xlu0 %378 }
  0xa9   : > { %v384_v50 = vpop.permute.xlu1 %383 }
  0xac   : > { %v520_v0 = vpop.permute.xlu0 %519 }
  0xad   : > { %v525_v1 = vpop.permute.xlu1 %524 }
  0xb0   : > { %v530_v2 = vpop.permute.xlu0 %529 }
  0xb1   : > { %v535_v6 = vpop.permute.xlu1 %534 }
  0xb4   : > { %v614_v22 = vpop.permute.xlu0 %613 }
  0xb5   : > { %v619_v23 = vrot.slane %v614_v22, %v618_v21 }
  0xfc   : > { %v762_v30 = vpop.f32.mrb[0].mxu0 }
  0xfd   : > { %v475_v31 = vadd.f32 %v762_v30, %v359_v27  ;;  %v466_v32 = vpop.f32.mrb[1].mxu0 }
  0xfe   : > { %v467_v34 = vadd.f32 %v466_v32, %v349_v26  ;;  %v763_v35 = vpop.f32.mrb[2].mxu0 }
  0xff   : > { %v478_v36 = vadd.f32 %v763_v35, %v364_v29  ;;  %v469_v37 = vpop.f32.mrb[3].mxu0  ;;  %v499_v40 = vmax.f32 %v475_v31, 0.0 }
 0x100   : > { %v470_v39 = vadd.f32 %v469_v37, %v354_v28  ;;  %v497_v42 = vmax.f32 %v467_v34, 0.0 }
 0x101   : > { %v500_v41 = vmax.f32 %v478_v36, 0.0 }
 0x102   : > { %v498_v43 = vmax.f32 %v470_v39, 0.0 }
 0x103   : > { %v510_v44 = vpack.c.bf16 %v500_v41, %v499_v40 }
 0x104   : > { %v766_v46 = vpop.f32.mrb[4].mxu0  ;;  %v509_v47 = vpack.c.bf16 %v498_v43, %v497_v42 }
 0x105   : > { %v491_v48 = vadd.f32 %v766_v46, %v379_v45  ;;  %v482_v49 = vpop.f32.mrb[5].mxu0 }
 0x106   : > { %v483_v51 = vadd.f32 %v482_v49, %v369_v33  ;;  %v767_v52 = vpop.f32.mrb[6].mxu0  ;;  %768 = vmatprep.subr.bf16.mxu1 %v509_v47 }
 0x107   : > { %v494_v53 = vadd.f32 %v767_v52, %v384_v50  ;;  %v485_v54 = vpop.f32.mrb[7].mxu0  ;;  %769 = vmatpush3.bf16.msra.mxu1 %v509_v47  ;;  %v503_v56 = vmax.f32 %v491_v48, 0.0 }
 0x108   : > { %v486_v55 = vadd.f32 %v485_v54, %v374_v38  ;;  %770 = vmatprep.subr.bf16.mxu1 %v510_v44  ;;  %v501_v58 = vmax.f32 %v483_v51, 0.0 }
 0x109   : > { %v504_v57 = vmax.f32 %v494_v53, 0.0 }
 0x10a   : > { %v502_v59 = vmax.f32 %v486_v55, 0.0 }
 0x10b   : > { %v512_v60 = vpack.c.bf16 %v504_v57, %v503_v56  ;;  %771 = vmatpush3.bf16.msra.mxu1 %v510_v44 }
 0x10c   : > { %v511_v61 = vpack.c.bf16 %v502_v59, %v501_v58 }
 0x10e   : > { %772 = vmatprep.subr.bf16.mxu1 %v511_v61 }
 0x10f   : > { %773 = vmatpush3.bf16.msra.mxu1 %v511_v61 }
 0x110   : > { %774 = vmatprep.subr.bf16.mxu1 %v512_v60 }
 0x113   : > { %775 = vmatpush3.bf16.msra.mxu1 %v512_v60 }
 0x116   : > { %777 = vmatmul.mubr.msk.bf16.vlgmr.msra.gmra.mrb[0].mxu1 %vm547_vm2, %v827_v62 }
 0x1e9   : > { %v778_v3 = vpop.f32.mrb[0].mxu1 }
 0x1ea   : > { %v597_v4 = vadd.f32 %v778_v3, %v530_v2  ;;  %v588_v5 = vpop.f32.mrb[1].mxu1 }
 0x1eb   : > { %v589_v7 = vadd.f32 %v588_v5, %v520_v0  ;;  %v779_v8 = vpop.f32.mrb[2].mxu1 }
 0x1ec   : > { %v600_v9 = vadd.f32 %v779_v8, %v535_v6  ;;  %v591_v10 = vpop.f32.mrb[3].mxu1  ;;  %v605_v12 = vmax.f32 %v597_v4, 0.0 }
 0x1ed   : > { %v592_v11 = vadd.f32 %v591_v10, %v525_v1  ;;  %v603_v14 = vmax.f32 %v589_v7, 0.0 }
 0x1ee   : > { %v606_v13 = vmax.f32 %v600_v9, 0.0 }
 0x1ef   : > { %v604_v15 = vmax.f32 %v592_v11, 0.0 }
 0x1f0   : > { %v609_v16 = vpack.c.bf16 %v606_v13, %v605_v12 }
 0x1f1   : > { %v608_v17 = vpack.c.bf16 %v604_v15, %v603_v14 }
 0x1f3   : > { %781 = vmatpush3.bf16.msra.mxu0 %v608_v17 }
 0x1f4   : > { %782 = vmatprep.subr.bf16.mxu0 %v853_v63 }
 0x1f7   : > { %783 = vmatpush3.bf16.msra.mxu0 %v609_v16 }
 0x1fa   : > { %785 = vmatmul.mubr.msk.bf16.vlgmr.msra.gmra.mrb[8].mxu0 %vm620_vm4, %v607_v18 }
 0x2cd   : > { %v658_v24 = vpop.f32.mrb[8].mxu0 }
 0x2ce   : > { %v659_v25 = vadd.f32 %v658_v24, %v619_v23  ;;  %v786_v26 = vpop.f32.mrb[9].mxu0 }
 0x2cf   : > { %v661_v27 = vpop.f32.mrb[10].mxu0 }
 0x2d0   : > { %664 = vst [vmem:[%s325_s22] sm:$0x1] %v659_v25  ;;  %v787_v28 = vpop.f32.mrb[11].mxu0 }
 0x2d1 PF: > { %p16_p9 = scmp.ge.s32.totalorder %s915_s29, 4   ;;  %s1023_s26 = smov %s846_s27 }
 0x2d2   : > { %s1024_s27 = smov %s924_s9  ;;  %s1025_s28 = smov %s915_s29 }
 0x2d3   :  { %18 = sbr.rel (!%p16_p9) target bundleno = 5 (0x5), region = 124 }

// kernel: granger_forward.6
= control target key start
LH: loop header
LB: loop body
LE: loop exit
PB: predicated region body
PF: predicated region fallthrough
CT: control target
= control target key end

     0   :  { %11 = vsyncpa [#allocation4], 0  ;;  %s3400_s0 = inlined_call_operand.hbm [shape: f32[8,16,1], index: 0, kind: input, shape index: {}]   ;;  %s3401_s1 = inlined_call_operand.hbm [shape: f32[1,64], index: 1, kind: input, shape index: {}]   ;;  %s3402_s2 = inlined_call_operand.hbm [shape: f32[1,64], index: 2, kind: input, shape index: {}]   ;;  %s3403_s3 = inlined_call_operand.hbm [shape: bf16[16,64], index: 3, kind: input, shape index: {}]   ;;  %s3404_s4 = inlined_call_operand.hbm [shape: bf16[32,64], index: 4, kind: input, shape index: {}]   ;;  %s3405_s5 = inlined_call_operand.hbm [shape: f32[1,64], index: 5, kind: input, shape index: {}]   ;;  %s3406_s6 = inlined_call_operand.hbm [shape: f32[8,16,16], index: 6, kind: output, shape index: {}]  }
   0x1   :  { %13 = vsyncpa [#allocation4 + $0x1], 0 }
   0x2   :  { %14 = vsyncpa [#allocation7], 0 }
   0x3   :  { %15 = vsyncpa [#allocation10], 0 }
   0x4   :  { %16 = vsyncpa [#allocation13], 0 }
   0x5   :  { %17 = vsyncpa [#allocation5], 0 }
   0x6   :  { %19 = vsyncpa [#allocation5 + $0x1], 0  ;;  %s2812_s21 = smov 0   ;;  %s2814_s22 = smov 0  }
   0x7   :  { %s2816_s23 = smov 0   ;;  %s2818_s24 = smov 0  }
   0x8 LB: > { %s2833_s25 = sadd.s32 4294967295, %s2753_s24   ;;  %s1998_s26 = sadd.s32 4294967294, %s2753_s24   ;;  %s2753_s24 = sphi %s2818_s24, %s3433_s24   ;;  %s2749_s23 = sphi %s2816_s23, %s3432_s23   ;;  %s2745_s22 = sphi %s2814_s22, %s3431_s22   ;;  %s2741_s21 = sphi %s2812_s21, %s3430_s21  }
   0x9   : > { %p45_p0 = scmp.ne.s32.totalorder %s2745_s22, %s2741_s21  ;;  %p3407_p1 = scmp.eq.s32.totalorder %s2833_s25, 0 }
   0xa   : > { %p180_p3 = scmp.eq.s32.totalorder %s1998_s26, 1  ;;  %p1999_p5 = scmp.ge.s32.totalorder %s2753_s24, 1 }
   0xb   : > { %p2842_p4 = por %p3407_p1, %p45_p0  ;;  %p187_p7 = scmp.lt.s32.totalorder %s2753_s24, 3 }
   0xc   : > { %p2847_p6 = por %p180_p3, %p45_p0  ;;  %s2755_s30 = smov [#allocation6]  }
   0xd   : > { %s3411_s27 = scalar_select %p2842_p4, 1, 0 }
   0xe   : > { %s3412_s28 = scalar_select %p2847_p6, 1, 0 }
   0xf   : > { %p2852_p8 = pnand %p1999_p5, %p187_p7  ;;  %s200_s7 = sshll.u32 %s2755_s30, 4  ;;  %s201_s7 = int_to_ptr.vmem [resolvable:$true] %s200_s7 }
  0x10   : > { %s2756_s8 = smov [#allocation9]   ;;  %s2757_s11 = smov [#allocation8]  }
  0x11   : > { %s3413_s29 = scalar_select %p2852_p8, 1, 0 }
  0x12   : > { %p2261_p10 = pneg %p2852_p8  ;;  %s221_s9 = sshll.u32 %s2756_s8, 4  ;;  %s2865_s9 = int_to_ptr.vmem [resolvable:$true] %s221_s9 }
  0x13   : > { %s2867_s12 = sshll.u32 %s2757_s11, 4  ;;  %s2505_s15 = scalar_lea.hbm %s3401_s1, 16  ;;  %s212_s12 = int_to_ptr.vmem [resolvable:$true] %s2867_s12 }
  0x14   : > { %p2861_p11 = pnand %p2261_p10, %p3407_p1  ;;  %p2506_p12 = scmp.ne.s32.totalorder %s3401_s1, %s2505_s15 }
  0x15   : > { %p2512_p5 = scmp.lt.u32.totalorder %s2505_s15, %s3401_s1 }
  0x16   : > { %p2877_p13 = pneg %p2861_p11 }
  0x18   : > { %p2508_p0 = pnand %p2877_p13, %p2506_p12 }
  0x1a   : > { %p2509_p3 = pneg %p2508_p0 }
  0x1c   : > { %p2514_p7 = pnand %p2512_p5, %p2509_p3 }
  0x1e   : > { %2517 = shalt.err (!%p2514_p7)
}
  0x1f   : > { %s2518_s26 = scalar_lea.vmem %s201_s7, 16  ;;  %s2525_s30 = scalar_lea.vmem %s201_s7, 32 }
  0x20   : > { %p2519_p10 = scmp.ne.s32.totalorder %s201_s7, %s2518_s26  ;;  %p2526_p2 = scmp.lt.s32.totalorder %s201_s7, %s201_s7 }
  0x21   : > { %p2527_p6 = scmp.lt.s32.totalorder %s2525_s30, %s2518_s26 }
  0x22   : > { %p2521_p9 = pnand %p2519_p10, %p2877_p13 }
  0x23   : > { %p2528_p4 = por %p2527_p6, %p2526_p2 }
  0x24   : > { %p2522_p1 = pneg %p2521_p9 }
  0x26   : > { %p2529_p8 = pnand %p2528_p4, %p2522_p1 }
  0x28   : > { %2532 = shalt.err (!%p2529_p8)
}
  0x29   : > { %2264 = dma.hbm_to_vmem [thread:$0]  (!%p2861_p11), %s3401_s1, 16, %s201_s7, [#allocation7]  }
  0x2a   : > { %s2533_s15 = scalar_lea.hbm %s3403_s3, 128 }
  0x2b   : > { %p2534_p9 = scmp.ne.s32.totalorder %s3403_s3, %s2533_s15  ;;  %p2540_p1 = scmp.lt.u32.totalorder %s2533_s15, %s3403_s3 }
  0x2d   : > { %p2536_p12 = pnand %p2534_p9, %p2877_p13 }
  0x2f   : > { %p2537_p2 = pneg %p2536_p12 }
  0x31   : > { %p2542_p4 = pnand %p2540_p1, %p2537_p2 }
  0x33   : > { %2545 = shalt.err (!%p2542_p4)
}
  0x34   : > { %s2546_s7 = scalar_lea.vmem %s2865_s9, 128  ;;  %p2554_p3 = scmp.lt.s32.totalorder %s2865_s9, %s2865_s9 }
  0x35   : > { %p2547_p6 = scmp.ne.s32.totalorder %s2865_s9, %s2546_s7  ;;  %p2555_p5 = scmp.lt.s32.totalorder %s2546_s7, %s2546_s7 }
  0x37   : > { %p2549_p8 = pnand %p2547_p6, %p2877_p13  ;;  %p2556_p7 = por %p2555_p5, %p2554_p3 }
  0x39   : > { %p2550_p0 = pneg %p2549_p8 }
  0x3b   : > { %p2557_p10 = pnand %p2556_p7, %p2550_p0 }
  0x3d   : > { %2560 = shalt.err (!%p2557_p10)
}
  0x3e   : > { %s3410_s26 = smov 64   ;;  %s2759_s30 = smov 4  }
  0x3f   : > { %2270 = dma.hbm_to_vmem [thread:$0]  (!%p2861_p11), %s3403_s3, 128, %s2865_s9, [#allocation10], %s3410_s26, %s3410_s26, %s2759_s30  }
  0x40   : > { %s2561_s15 = scalar_lea.hbm %s3402_s2, 16 }
  0x41   : > { %p2562_p9 = scmp.ne.s32.totalorder %s3402_s2, %s2561_s15  ;;  %p2568_p1 = scmp.lt.u32.totalorder %s2561_s15, %s3402_s2 }
  0x43   : > { %p2564_p12 = pnand %p2562_p9, %p2877_p13 }
  0x45   : > { %p2565_p2 = pneg %p2564_p12 }
  0x47   : > { %p2570_p4 = pnand %p2568_p1, %p2565_p2 }
  0x49   : > { %2573 = shalt.err (!%p2570_p4)
}
  0x4a   : > { %s2574_s7 = scalar_lea.vmem %s212_s12, 16  ;;  %s2581_s9 = scalar_lea.vmem %s212_s12, 32 }
  0x4b   : > { %p2575_p6 = scmp.ne.s32.totalorder %s212_s12, %s2574_s7  ;;  %p2582_p3 = scmp.lt.s32.totalorder %s212_s12, %s212_s12 }
  0x4c   : > { %p2583_p5 = scmp.lt.s32.totalorder %s2581_s9, %s2574_s7 }
  0x4d   : > { %p2577_p8 = pnand %p2575_p6, %p2877_p13 }
  0x4e   : > { %p2584_p7 = por %p2583_p5, %p2582_p3 }
  0x4f   : > { %p2578_p0 = pneg %p2577_p8 }
  0x51   : > { %p2585_p10 = pnand %p2584_p7, %p2578_p0 }
  0x53   : > { %2588 = shalt.err (!%p2585_p10)
}
  0x54   : > { %2267 = dma.hbm_to_vmem [thread:$0]  (!%p2861_p11), %s3402_s2, 16, %s212_s12, [#allocation7]  }
  0x55   : > { %s2760_s13 = smov [#allocation11]   ;;  %s2761_s15 = smov [#allocation12]  }
  0x56   : > { %s234_s14 = sshll.u32 %s2760_s13, 4  ;;  %s248_s16 = sshll.u32 %s2761_s15, 4  ;;  %s235_s14 = int_to_ptr.vmem [resolvable:$true] %s234_s14  ;;  %s249_s16 = int_to_ptr.vmem [resolvable:$true] %s248_s16 }
  0x57   : > { %s2589_s20 = scalar_lea.hbm %s3404_s4, 256 }
  0x58   : > { %p2590_p9 = scmp.ne.s32.totalorder %s3404_s4, %s2589_s20  ;;  %p2596_p1 = scmp.lt.u32.totalorder %s2589_s20, %s3404_s4 }
  0x5a   : > { %p2592_p12 = pnand %p2590_p9, %p2877_p13 }
  0x5c   : > { %p2593_p2 = pneg %p2592_p12 }
  0x5e   : > { %p2598_p4 = pnand %p2596_p1, %p2593_p2 }
  0x60   : > { %2601 = shalt.err (!%p2598_p4)
}
  0x61   : > { %s2602_s12 = scalar_lea.vmem %s235_s14, 256  ;;  %p2610_p3 = scmp.lt.s32.totalorder %s235_s14, %s235_s14 }
  0x62   : > { %p2603_p6 = scmp.ne.s32.totalorder %s235_s14, %s2602_s12  ;;  %p2611_p5 = scmp.lt.s32.totalorder %s2602_s12, %s2602_s12 }
  0x64   : > { %p2605_p8 = pnand %p2603_p6, %p2877_p13  ;;  %p2612_p7 = por %p2611_p5, %p2610_p3 }
  0x66   : > { %p2606_p0 = pneg %p2605_p8 }
  0x68   : > { %p2613_p10 = pnand %p2612_p7, %p2606_p0 }
  0x6a   : > { %2616 = shalt.err (!%p2613_p10)
}
  0x6b   : > { %s3416_s11 = smov 64   ;;  %s2617_s19 = scalar_lea.hbm %s3405_s5, 16 }
  0x6c   : > { %2273 = dma.hbm_to_vmem [thread:$0]  (!%p2861_p11), %s3404_s4, 256, %s235_s14, [#allocation10], %s3416_s11, %s3416_s11, %s2759_s30  }
  0x6d   : > { %p2618_p9 = scmp.ne.s32.totalorder %s3405_s5, %s2617_s19  ;;  %p2624_p1 = scmp.lt.u32.totalorder %s2617_s19, %s3405_s5 }
  0x6f   : > { %p2620_p12 = pnand %p2618_p9, %p2877_p13 }
  0x71   : > { %p2621_p2 = pneg %p2620_p12 }
  0x73   : > { %p2626_p4 = pnand %p2624_p1, %p2621_p2 }
  0x75   : > { %2629 = shalt.err (!%p2626_p4)
}
  0x76   : > { %s2630_s12 = scalar_lea.vmem %s249_s16, 16  ;;  %s2637_s30 = scalar_lea.vmem %s249_s16, 32 }
  0x77   : > { %p2631_p6 = scmp.ne.s32.totalorder %s249_s16, %s2630_s12  ;;  %p2638_p3 = scmp.lt.s32.totalorder %s249_s16, %s249_s16 }
  0x78   : > { %p2639_p5 = scmp.lt.s32.totalorder %s2637_s30, %s2630_s12 }
  0x79   : > { %p2633_p8 = pnand %p2631_p6, %p2877_p13 }
  0x7a   : > { %p2640_p7 = por %p2639_p5, %p2638_p3 }
  0x7b   : > { %p2634_p0 = pneg %p2633_p8 }
  0x7d   : > { %p2641_p10 = pnand %p2640_p7, %p2634_p0 }
  0x7f   : > { %2644 = shalt.err (!%p2641_p10)
}
  0x80   : > { %2276 = dma.hbm_to_vmem [thread:$0]  (!%p2861_p11), %s3405_s5, 16, %s249_s16, [#allocation13]  }
  0x81   : > { %s2978_s18 = sadd.s32 1, %s2753_s24   ;;  %s32_s10 = sadd.s32 1, %s2749_s23 }
  0x82   : > { %s29_s26 = ssub.s32 %s2753_s24, %s2978_s18  ;;  %p39_p9 = scmp.ne.s32.totalorder %s2749_s23, %s2745_s22 }
  0x83   : > { %p30_p13 = scmp.eq.s32.totalorder %s29_s26, 0  ;;  %p40_p12 = scmp.eq.s32.totalorder %s2753_s24, 0 }
  0x84   : > { %p2290_p2 = scmp.lt.s32.totalorder %s2753_s24, 2  ;;  %p3417_p4 = scmp.eq.s32.totalorder %s2833_s25, 1 }
  0x85   : > { %s2988_s13 = scalar_select %p30_p13, %s2749_s23, %s32_s10  }
  0x86   : > { %p41_p1 = por %p40_p12, %p39_p9  ;;  %p2992_p6 = por %p3417_p4, %p39_p9 }
  0x87   : > { %s259_s17 = sand.u32 1, %s2749_s23   ;;  %s2007_s19 = sshll.u32 %s2753_s24, 7 }
  0x88   : > { %s2006_s16 = sshll.u32 %s259_s17, 6  ;;  %s3001_s9 = scalar_lea.hbm %s3400_s0, %s2007_s19 }
  0x89   : > { %s263_s8 = scalar_lea.vmem [#allocation3], %s2006_s16  ;;  %p3003_p11 = pnand %p2290_p2, %p41_p1 }
  0x8a   : > { %s269_s12 = sshll.u32 %s263_s8, 4  ;;  %s3009_s14 = scalar_lea.sflag [#allocation4], %s259_s17  ;;  %s3007_s12 = int_to_ptr.vmem [resolvable:$true] %s269_s12 }
  0x8b   : > { %s2645_s11 = scalar_lea.hbm %s3001_s9, 1024  ;;  %p2647_p0 = pneg %p3003_p11 }
  0x8c   : > { %p2646_p8 = scmp.ne.s32.totalorder %s3001_s9, %s2645_s11  ;;  %s2650_s19 = scalar_lea.hbm %s3400_s0, 2048 }
  0x8d   : > { %p2651_p7 = scmp.lt.u32.totalorder %s3001_s9, %s3400_s0  ;;  %p2652_p10 = scmp.lt.u32.totalorder %s2650_s19, %s2645_s11 }
  0x8e   : > { %p2648_p3 = pnand %p2647_p0, %p2646_p8  ;;  %p2654_p9 = scmp.lt.u32.totalorder %s2645_s11, %s3001_s9 }
  0x8f   : > { %p2653_p13 = por %p2652_p10, %p2651_p7 }
  0x90   : > { %p2649_p5 = pneg %p2648_p3 }
  0x91   : > { %p2655_p12 = por %p2654_p9, %p2653_p13 }
  0x93   : > { %p2656_p2 = pnand %p2655_p12, %p2649_p5 }
  0x95   : > { %2659 = shalt.err (!%p2656_p2)
}
  0x96   : > { %s2660_s17 = scalar_lea.vmem %s3007_s12, 1024  ;;  %s2762_s7 = smov [#allocation3]  }
  0x97   : > { %p2661_p1 = scmp.ne.s32.totalorder %s3007_s12, %s2660_s17  ;;  %s2665_s8 = sshll.u32 %s2762_s7, 4  ;;  %s2666_s8 = int_to_ptr.vmem [resolvable:$false] %s2665_s8 }
  0x98   : > { %s2667_s26 = scalar_lea.vmem %s2666_s8, 2048  ;;  %p2668_p3 = scmp.lt.s32.totalorder %s3007_s12, %s2666_s8 }
  0x99   : > { %p2663_p4 = pnand %p2661_p1, %p2647_p0  ;;  %p2669_p7 = scmp.lt.s32.totalorder %s2667_s26, %s2660_s17 }
  0x9b   : > { %p2664_p8 = pneg %p2663_p4  ;;  %p2670_p10 = por %p2669_p7, %p2668_p3 }
  0x9d   : > { %p2671_p13 = pnand %p2670_p10, %p2664_p8 }
  0x9f   : > { %2674 = shalt.err (!%p2671_p13)
}
  0xa0   : > { %s2763_s11 = smov 256   ;;  %s2764_s10 = smov 128  }
  0xa1   : > { %s2765_s19 = smov 8   ;;  %p3420_p0 = scmp.ne.s32.totalorder %s3413_s29, 0 }
  0xa2   : > { %2280 = dma.hbm_to_vmem [thread:$0]  (!%p3003_p11), %s3001_s9, 1024, %s3007_s12, %s3009_s14, %s2763_s11, %s2764_s10, %s2765_s19  }
  0xa3   : > { %281 = sbr.rel (%p3420_p0) target bundleno = 6551 (0x1997), region = 44  ;;  %s3040_s16 = sand.u32 (!%p3420_p0), 1, %s2745_s22  }
  0xa4   : > { %s2009_s20 = sshll.u32 (!%p3420_p0), %s3040_s16, 6  ;;  %s284_s17 = scalar_lea.sflag (!%p3420_p0), [#allocation4], %s3040_s16 }
  0xa5   : > { %s3046_s7 = scalar_lea.vmem (!%p3420_p0), [#allocation3], %s2009_s20  ;;  %p3421_p5 = scmp.ne.s32.totalorder (!%p3420_p0), %s3411_s27, 0 }
  0xaa   : > { %2720 = dma.done.wait (%p3421_p5), %s284_s17, 1024  }
  0xab   : > { %2722 = vsyncadd (%p3421_p5), %s284_s17, 4294966272  ;;  %p3422_p11 = scmp.eq.s32.totalorder %s2833_s25, 0 }
  0xad   : > { %2724 = dma.done.wait (%p3422_p11), [#allocation7], 32   ;;  %p3423_p9 = pmov %p3422_p11 }
  0xaf   : > { %2726 = vsyncadd (%p3423_p9), [#allocation7], 4294967264  ;;  %p3424_p12 = pmov %p3423_p9 }
  0xb0   : > { %p3425_p2 = pmov %p3423_p9 }
  0xb1   : > { %2728 = dma.done.wait (%p3424_p12), [#allocation10], 384  }
  0xb2   : > { %2730 = vsyncadd (%p3425_p2), [#allocation10], 4294966912  ;;  %p3426_p1 = pmov %p3425_p2 }
  0xb4   : > { %2732 = dma.done.wait (%p3426_p1), [#allocation13], 16   ;;  %p3427_p4 = pmov %p3426_p1 }
  0xb5   : > { %v2766_v0 = vmov 0.0   ;;  %vm2767_vm0 = vmmov 0   ;;  %v2768_v1 = vmov 0   ;;  %v2350_v2 = vld [vmem:[#allocation9] sm:$0xff]   ;;  %v3074_v4 = vld [vmem:[#allocation6] ss:$0 sm:$0xff] }
  0xb6   : > { %2734 = vsyncadd (%p3427_p4), [#allocation13], 4294967280  ;;  %2125 = vmatprep.subr.bf16.mxu0 %v2766_v0  ;;  %2127 = vmatprep.mubr.msk.bf16.mxu0 %vm2767_vm0, %v2766_v0  ;;  %v338_v3 = vld [vmem:[%s3046_s7] sm:$0xff]  ;;  %vm415_vm1 = vcmask 523264   ;;  %s2769_s27 = smov 80   ;;  %s2770_s29 = smov 16  }
  0xb7   : > { %2349 = vset.pattern.permute.xlu0 %v2768_v1  ;;  %2131 = vmatprep.subr.bf16.mxu1 %v2766_v0  ;;  %v3076_v5 = vld [vmem:[#allocation8] ss:$0 sm:$0xff]  ;;  %v2351_v25 = vld [vmem:[#allocation9] sm:$0xff]   ;;  %v2352_v26 = vld [vmem:[#allocation11] sm:$0xff]   ;;  %s2771_s9 = smov 96   ;;  %vm440_vm2 = vcmask 130048  }
  0xb8   : > { %2135 = vmatprep.mubr.msk.bf16.mxu1 %vm2767_vm0, %v2766_v0  ;;  %2126 = vmatpush3.bf16.msra.mxu0 %v2350_v2  ;;  %v2353_v28 = vld [vmem:[#allocation11 + $0x8] sm:$0xff]   ;;  %v339_v32 = vld [vmem:[%s3046_s7 + $0x8] sm:$0xff]  ;;  %vm531_vm3 = vcmask 261120   ;;  %v3103_v40 = vld [vmem:[#allocation12] ss:$0 sm:$0xff]  ;;  %s2772_s12 = smov 112  }
  0xb9   : > { %348 = vperm.xlu0 %2349, %v338_v3   ;;  %2139 = vmatprep.subr.bf16.mxu0 %v2766_v0  ;;  %s335_s30 = scalar_lea.vmem [#allocation14], %s2009_s20  ;;  %s2082_s8 = sshll.u32 %s2833_s25, 7 }
  0xba   : > { %2132 = vmatpush3.bf16.msra.mxu1 %v2352_v26  ;;  %s1877_s14 = sshll.u32 %s335_s30, 4  ;;  %s3355_s10 = scalar_lea.hbm %s3406_s6, %s2082_s8  ;;  %s3350_s14 = int_to_ptr.vmem [resolvable:$true] %s1877_s14 }
  0xbb   : > { %2128 = vmatmul.mubr.bf16.vlgmr.msra.gmra.mrb[0].mxu0 %v2768_v1  ;;  %2133 = vmatprep.subr.bf16.mxu1 %v2766_v0  ;;  %s1865_s19 = scalar_lea.sflag [#allocation5], %s3040_s16  ;;  %s2675_s20 = scalar_lea.vmem %s3350_s14, 1024 }
  0xbc   : > { %2141 = vmatprep.mubr.msk.bf16.mxu0 %vm2767_vm0, %v2766_v0  ;;  %2140 = vmatpush3.bf16.msra.mxu0 %v2351_v25  ;;  %p2676_p8 = scmp.ne.s32.totalorder %s3350_s14, %s2675_s20  ;;  %s2773_s25 = smov [#allocation14]  }
  0xbd   : > { %2153 = vmatprep.subr.bf16.mxu0 %v2766_v0  ;;  %s2679_s17 = sshll.u32 %s2773_s25, 4  ;;  %s2680_s17 = int_to_ptr.vmem [resolvable:$false] %s2679_s17 }
  0xbe   : > { %2134 = vmatpush3.bf16.msra.mxu1 %v2353_v28  ;;  %p2677_p3 = pnand %p2676_p8, %p2992_p6  ;;  %p2682_p10 = scmp.lt.s32.totalorder %s3350_s14, %s2680_s17 }
  0xbf   : > { %2145 = vmatprep.subr.bf16.mxu1 %v2766_v0 }
  0xc0   : > { %p2678_p7 = pneg %p2677_p3 }
 0x138   : > { %v349_v6 = vpop.permute.xlu0 %348 }
 0x139   : > { %v392_v7 = vmul.f32 %v3074_v4, %v349_v6 }
 0x13b   : > { %v407_v8 = vadd.f32 %v3076_v5, %v392_v7 }
 0x13d   : > { %416 = vst.msk [vmem:[#allocation2] sm:$0xff] %vm415_vm1, %v407_v8 }
 0x144   : > { %v431_v9 = vld [vmem:[#allocation2] sm:$0xff] }
 0x18e   : > { %v478_v10 = vpop.f32.mrb[0].mxu0 }
 0x18f   : > { %v484_v11 = vadd.f32 %v478_v10, %v431_v9  ;;  %v2129_v12 = vpop.f32.mrb[1].mxu0 }
 0x190   : > { %v481_v13 = vpop.f32.mrb[2].mxu0  ;;  %v2355_v12 = vld [vmem:[#allocation11] sm:$0xff]  }
 0x191   : > { %2374 = vtanh.f32 %v484_v11  ;;  %v2130_v14 = vpop.f32.mrb[3].mxu0  ;;  %v2020_v16 = vmul.f32 -1.442695, %v484_v11  ;;  %v2354_v11 = vld [vmem:[#allocation9] sm:$0xff]  }
 0x193   : > { %2376 = vpow2.f32 %v2020_v16 }
 0x19b   : > { %v2375_v15 = vpop.eup %2374 }
 0x19c   : > { %494 = vrot.lane.b32.xlu0 %v2375_v15, %s2769_s27  ;;  %v2356_v15 = vld [vmem:[#allocation11 + $0x8] sm:$0xff]  }
 0x19d   : > { %v2377_v17 = vpop.eup %2376 }
 0x19e   : > { %v488_v18 = vadd.f32 1.0, %v2377_v17 }
 0x1a0   : > { %2378 = vrcp.f32 %v488_v18 }
 0x1aa   : > { %v2379_v19 = vpop.eup %2378 }
 0x1ab   : > { %v492_v22 = vmul.f32 0.0, %v2379_v19 }
 0x20e   : > { %v495_v20 = vpop.permute.xlu0 %494 }
 0x20f   : > { %v497_v21 = vmul.f32 %v2379_v19, %v495_v20 }
 0x211   : > { %499 = vrot.lane.b32.xlu1 %v497_v21, %s2770_s29  ;;  %v340_v21 = vld [vmem:[%s3046_s7 + $0x10] sm:$0xff] }
 0x283   : > { %v500_v23 = vpop.permute.xlu1 %499 }
 0x284   : > { %v3083_v24 = vadd.f32 %v500_v23, %v492_v22 }
 0x286   : > { %2380 = vtanh.f32 %v3083_v24 }
 0x290   : > { %v2381_v27 = vpop.eup %2380 }
 0x291   : > { %505 = vrot.lane.b32.xlu1 %v2381_v27, %s2770_s29 }
 0x303   : > { %v506_v29 = vpop.permute.xlu1 %505 }
 0x304   : > { %v508_v30 = vmul.f32 %v2379_v19, %v506_v29 }
 0x306   : > { %v606_v31 = vpack.c.bf16 %v508_v30, %v508_v30  ;;  %510 = vrot.lane.b32.xlu0 %v508_v30, %s2771_s9 }
 0x308   : > { %610 = vrot.lane.b32.xlu1 %v606_v31, %s2771_s9 }
 0x30a   : > { %353 = vperm.xlu0 %2349, %v339_v32  }
 0x378   : > { %v511_v33 = vpop.permute.xlu0 %510 }
 0x379   : > { %v513_v34 = vsel %vm440_vm2, %v511_v33, 0.0 }
 0x37a   : > { %v514_v35 = vpack.c.bf16 %v513_v34, %v513_v34  ;;  %v611_v36 = vpop.permute.xlu1 %610 }
 0x37b   : > { %2142 = vmatmul.mubr.msk.bf16.vlgmr.msra.gmra.mrb[4].mxu0 %vm440_vm2, %v611_v36 }
 0x37c   : > { %2136 = vmatmul.mubr.msk.bf16.vlgmr.msra.gmra.mrb[0].mxu1 %vm531_vm3, %v514_v35  ;;  %2155 = vmatprep.mubr.msk.bf16.mxu0 %vm2767_vm0, %v2766_v0 }
 0x37d   : > { %2149 = vmatprep.mubr.msk.bf16.mxu1 %vm2767_vm0, %v2766_v0  ;;  %2154 = vmatpush3.bf16.msra.mxu0 %v2354_v11 }
 0x37e   : > { %2146 = vmatpush3.bf16.msra.mxu1 %v2355_v12  ;;  %2167 = vmatprep.subr.bf16.mxu0 %v2766_v0 }
 0x37f   : > { %2147 = vmatprep.subr.bf16.mxu1 %v2766_v0 }
 0x382   : > { %2148 = vmatpush3.bf16.msra.mxu1 %v2356_v15 }
 0x383   : > { %2159 = vmatprep.subr.bf16.mxu1 %v2766_v0 }
 0x389   : > { %v354_v37 = vpop.permute.xlu0 %353 }
 0x38a   : > { %v393_v38 = vmul.f32 %v3074_v4, %v354_v37 }
 0x38c   : > { %v408_v39 = vadd.f32 %v3076_v5, %v393_v38 }
 0x38e   : > { %417 = vst.msk [vmem:[#allocation2 + $0x8] sm:$0xff] %vm415_vm1, %v408_v39 }
 0x395   : > { %v605_v41 = vld [vmem:[#allocation2 + $0x8] sm:$0xff] }
 0x44e   : > { %v655_v42 = vpop.f32.mrb[4].mxu0 }
 0x44f   : > { %v661_v43 = vadd.f32 %v655_v42, %v605_v41  ;;  %v569_v44 = vpop.f32.mrb[0].mxu1  ;;  %v2143_v45 = vpop.f32.mrb[5].mxu0 }
 0x450   : > { %v570_v46 = vadd.f32 %v3103_v40, %v569_v44  ;;  %v2137_v47 = vpop.f32.mrb[1].mxu1  ;;  %v658_v48 = vpop.f32.mrb[6].mxu0 }
 0x451   : > { %2382 = vtanh.f32 %v661_v43  ;;  %v572_v49 = vpop.f32.mrb[2].mxu1  ;;  %v2144_v50 = vpop.f32.mrb[7].mxu0  ;;  %v2027_v54 = vmul.f32 -1.442695, %v661_v43 }
 0x452   : > { %2384 = vtanh.f32 %v570_v46  ;;  %v2138_v51 = vpop.f32.mrb[3].mxu1  ;;  %v2024_v55 = vmul.f32 -1.442695, %v570_v46 }
 0x453   : > { %2386 = vpow2.f32 %v2027_v54 }
 0x454   : > { %2388 = vpow2.f32 %v2024_v55 }
 0x45b   : > { %v2383_v52 = vpop.eup %2382 }
 0x45c   : > { %v2385_v53 = vpop.eup %2384  ;;  %671 = vrot.lane.b32.xlu0 %v2383_v52, %s2769_s27 }
 0x45d   : > { %584 = vrot.lane.b32.xlu1 %v2385_v53, %s2769_s27  ;;  %v2387_v56 = vpop.eup %2386 }
 0x45e   : > { %v2389_v57 = vpop.eup %2388  ;;  %v665_v58 = vadd.f32 1.0, %v2387_v56 }
 0x45f   : > { %v578_v59 = vadd.f32 1.0, %v2389_v57 }
 0x460   : > { %2390 = vrcp.f32 %v665_v58 }
 0x461   : > { %2392 = vrcp.f32 %v578_v59 }
 0x46a   : > { %v2391_v60 = vpop.eup %2390 }
 0x46b   : > { %v2393_v62 = vpop.eup %2392  ;;  %v669_v3 = vmul.f32 %v2391_v60, %v3083_v24 }
 0x46c   : > { %v582_v7 = vmul.f32 0.0, %v2393_v62 }
 0x4ce   : > { %v672_v61 = vpop.permute.xlu0 %671 }
 0x4cf   : > { %v674_v63 = vmul.f32 %v2391_v60, %v672_v61  ;;  %v585_v1 = vpop.permute.xlu1 %584 }
 0x4d0   : > { %v587_v2 = vmul.f32 %v2393_v62, %v585_v1 }
 0x4d1   : > { %676 = vrot.lane.b32.xlu0 %v674_v63, %s2770_s29  ;;  %v2358_v63 = vld [vmem:[#allocation9] sm:$0xff]  }
 0x4d2   : > { %589 = vrot.lane.b32.xlu1 %v587_v2, %s2770_s29 }
 0x543   : > { %v677_v6 = vpop.permute.xlu0 %676 }
 0x544   : > { %v3111_v8 = vadd.f32 %v677_v6, %v669_v3  ;;  %v590_v9 = vpop.permute.xlu1 %589  ;;  %v2359_v3 = vld [vmem:[#allocation11 + $0x8] sm:$0xff]  }
 0x545   : > { %v3113_v10 = vadd.f32 %v590_v9, %v582_v7 }
 0x546   : > { %2394 = vtanh.f32 %v3111_v8 }
 0x547   : > { %2396 = vtanh.f32 %v3113_v10 }
 0x550   : > { %v2395_v13 = vpop.eup %2394 }
 0x551   : > { %v2397_v14 = vpop.eup %2396  ;;  %682 = vrot.lane.b32.xlu0 %v2395_v13, %s2770_s29 }
 0x552   : > { %595 = vrot.lane.b32.xlu1 %v2397_v14, %s2770_s29 }
 0x5c3   : > { %v683_v16 = vpop.permute.xlu0 %682 }
 0x5c4   : > { %v685_v17 = vmul.f32 %v2391_v60, %v683_v16  ;;  %v596_v18 = vpop.permute.xlu1 %595 }
 0x5c5   : > { %v3122_v19 = vmul.f32 %v2393_v62, %v596_v18  ;;  %v2357_v62 = vld [vmem:[#allocation11] sm:$0xff]  }
 0x5c6   : > { %687 = vrot.lane.b32.xlu1 %v685_v17, %s2771_s9  ;;  %v786_v20 = vpack.c.bf16 %v685_v17, %v685_v17 }
 0x5c7   : > { %690 = vrot.lane.b32.xlu0 %v3122_v19, %s2772_s12 }
 0x5ca   : > { %790 = vrot.lane.b32.xlu1 %v786_v20, %s2771_s9 }
 0x5cb   : > { %358 = vperm.xlu0 %2349, %v340_v21  }
 0x638   : > { %v688_v22 = vpop.permute.xlu1 %687 }
 0x639   : > { %v691_v23 = vpop.permute.xlu0 %690 }
 0x63a   : > { %v693_v24 = vsel %vm440_vm2, %v688_v22, %v691_v23 }
 0x63b   : > { %v694_v25 = vpack.c.bf16 %v693_v24, %v693_v24 }
 0x63c   : > { %v791_v26 = vpop.permute.xlu1 %790 }
 0x63d   : > { %2150 = vmatmul.mubr.msk.bf16.vlgmr.msra.gmra.mrb[4].mxu1 %vm531_vm3, %v694_v25  ;;  %2156 = vmatmul.mubr.msk.bf16.vlgmr.msra.gmra.mrb[8].mxu0 %vm440_vm2, %v791_v26 }
 0x63e   : > { %2163 = vmatprep.mubr.msk.bf16.mxu1 %vm2767_vm0, %v2766_v0  ;;  %2169 = vmatprep.mubr.msk.bf16.mxu0 %vm2767_vm0, %v2766_v0 }
 0x63f   : > { %2160 = vmatpush3.bf16.msra.mxu1 %v2357_v62  ;;  %2168 = vmatpush3.bf16.msra.mxu0 %v2358_v63  ;;  %v342_v62 = vld [vmem:[%s3046_s7 + $0x20] sm:$0xff] }
 0x640   : > { %2161 = vmatprep.subr.bf16.mxu1 %v2766_v0  ;;  %2181 = vmatprep.subr.bf16.mxu0 %v2766_v0 }
 0x643   : > { %2162 = vmatpush3.bf16.msra.mxu1 %v2359_v3 }
 0x644   : > { %2173 = vmatprep.subr.bf16.mxu1 %v2766_v0 }
 0x64a   : > { %v359_v27 = vpop.permute.xlu0 %358 }
 0x64b   : > { %v394_v28 = vmul.f32 %v3074_v4, %v359_v27 }
 0x64d   : > { %v409_v29 = vadd.f32 %v3076_v5, %v394_v28 }
 0x64f   : > { %418 = vst.msk [vmem:[#allocation2 + $0x10] sm:$0xff] %vm415_vm1, %v409_v29 }
 0x656   : > { %v785_v31 = vld [vmem:[#allocation2 + $0x10] sm:$0xff] }
 0x710   : > { %v748_v30 = vpop.f32.mrb[4].mxu1  ;;  %v835_v32 = vpop.f32.mrb[8].mxu0 }
 0x711   : > { %v749_v33 = vadd.f32 %v3103_v40, %v748_v30  ;;  %v841_v34 = vadd.f32 %v835_v32, %v785_v31  ;;  %v2151_v35 = vpop.f32.mrb[5].mxu1  ;;  %v2157_v36 = vpop.f32.mrb[9].mxu0 }
 0x712   : > { %v751_v37 = vpop.f32.mrb[6].mxu1  ;;  %v838_v38 = vpop.f32.mrb[10].mxu0 }
 0x713   : > { %2398 = vtanh.f32 %v749_v33  ;;  %v2152_v39 = vpop.f32.mrb[7].mxu1  ;;  %v2158_v41 = vpop.f32.mrb[11].mxu0  ;;  %v2031_v44 = vmul.f32 -1.442695, %v749_v33  ;;  %v2035_v45 = vmul.f32 -1.442695, %v841_v34 }
 0x714   : > { %2400 = vtanh.f32 %v841_v34 }
 0x715   : > { %2402 = vpow2.f32 %v2031_v44 }
 0x716   : > { %2404 = vpow2.f32 %v2035_v45 }
 0x71d   : > { %v2399_v42 = vpop.eup %2398 }
 0x71e   : > { %v2401_v43 = vpop.eup %2400  ;;  %763 = vrot.lane.b32.xlu1 %v2399_v42, %s2769_s27 }
 0x71f   : > { %851 = vrot.lane.b32.xlu0 %v2401_v43, %s2769_s27  ;;  %v2403_v46 = vpop.eup %2402 }
 0x720   : > { %v2405_v47 = vpop.eup %2404  ;;  %v757_v48 = vadd.f32 1.0, %v2403_v46 }
 0x721   : > { %v845_v49 = vadd.f32 1.0, %v2405_v47 }
 0x722   : > { %2406 = vrcp.f32 %v757_v48 }
 0x723   : > { %2408 = vrcp.f32 %v845_v49 }
 0x72c   : > { %v2407_v50 = vpop.eup %2406 }
 0x72d   : > { %v2409_v52 = vpop.eup %2408  ;;  %v761_v56 = vmul.f32 %v2407_v50, %v3113_v10  ;;  %v341_v10 = vld [vmem:[%s3046_s7 + $0x18] sm:$0xff] }
 0x72e   : > { %v849_v57 = vmul.f32 %v2409_v52, %v3111_v8 }
 0x790   : > { %v764_v51 = vpop.permute.xlu1 %763 }
 0x791   : > { %v852_v53 = vpop.permute.xlu0 %851  ;;  %v766_v54 = vmul.f32 %v2407_v50, %v764_v51 }
 0x792   : > { %v854_v55 = vmul.f32 %v2409_v52, %v852_v53  ;;  %v2360_v53 = vld [vmem:[#allocation11] sm:$0xff]  }
 0x793   : > { %768 = vrot.lane.b32.xlu1 %v766_v54, %s2770_s29  ;;  %v2361_v54 = vld [vmem:[#allocation9] sm:$0xff]  }
 0x794   : > { %856 = vrot.lane.b32.xlu0 %v854_v55, %s2770_s29 }
 0x805   : > { %v769_v58 = vpop.permute.xlu1 %768 }
 0x806   : > { %v857_v59 = vpop.permute.xlu0 %856  ;;  %v3146_v60 = vadd.f32 %v769_v58, %v761_v56 }
 0x807   : > { %v3148_v61 = vadd.f32 %v857_v59, %v849_v57  ;;  %v2362_v57 = vld [vmem:[#allocation11 + $0x8] sm:$0xff]  }
 0x808   : > { %2410 = vtanh.f32 %v3146_v60 }
 0x809   : > { %2412 = vtanh.f32 %v3148_v61 }
 0x812   : > { %v2411_v1 = vpop.eup %2410 }
 0x813   : > { %v2413_v2 = vpop.eup %2412  ;;  %774 = vrot.lane.b32.xlu1 %v2411_v1, %s2770_s29 }
 0x814   : > { %862 = vrot.lane.b32.xlu0 %v2413_v2, %s2770_s29 }
 0x885   : > { %v775_v6 = vpop.permute.xlu1 %774 }
 0x886   : > { %v863_v7 = vpop.permute.xlu0 %862  ;;  %v3157_v8 = vmul.f32 %v2407_v50, %v775_v6 }
 0x887   : > { %v865_v9 = vmul.f32 %v2409_v52, %v863_v7 }
 0x888   : > { %870 = vrot.lane.b32.xlu0 %v3157_v8, %s2772_s12 }
 0x889   : > { %867 = vrot.lane.b32.xlu1 %v865_v9, %s2771_s9  ;;  %v966_v11 = vpack.c.bf16 %v865_v9, %v865_v9 }
 0x88c   : > { %363 = vperm.xlu0 %2349, %v341_v10  }
 0x88d   : > { %970 = vrot.lane.b32.xlu1 %v966_v11, %s2771_s9 }
 0x8fa   : > { %v871_v12 = vpop.permute.xlu0 %870 }
 0x8fb   : > { %v868_v13 = vpop.permute.xlu1 %867 }
 0x8fc   : > { %v873_v14 = vsel %vm440_vm2, %v868_v13, %v871_v12 }
 0x8fd   : > { %v874_v15 = vpack.c.bf16 %v873_v14, %v873_v14 }
 0x8ff   : > { %2164 = vmatmul.mubr.msk.bf16.vlgmr.msra.gmra.mrb[8].mxu1 %vm531_vm3, %v874_v15  ;;  %v971_v16 = vpop.permute.xlu1 %970 }
 0x900   : > { %2170 = vmatmul.mubr.msk.bf16.vlgmr.msra.gmra.mrb[12].mxu0 %vm440_vm2, %v971_v16  ;;  %2177 = vmatprep.mubr.msk.bf16.mxu1 %vm2767_vm0, %v2766_v0 }
 0x901   : > { %2183 = vmatprep.mubr.msk.bf16.mxu0 %vm2767_vm0, %v2766_v0  ;;  %2174 = vmatpush3.bf16.msra.mxu1 %v2360_v53 }
 0x902   : > { %2182 = vmatpush3.bf16.msra.mxu0 %v2361_v54  ;;  %2175 = vmatprep.subr.bf16.mxu1 %v2766_v0  ;;  %v343_v54 = vld [vmem:[%s3046_s7 + $0x28] sm:$0xff] }
 0x903   : > { %2195 = vmatprep.subr.bf16.mxu0 %v2766_v0 }
 0x905   : > { %2176 = vmatpush3.bf16.msra.mxu1 %v2362_v57 }
 0x906   : > { %2187 = vmatprep.subr.bf16.mxu1 %v2766_v0 }
 0x90b   : > { %v364_v17 = vpop.permute.xlu0 %363 }
 0x90c   : > { %v395_v18 = vmul.f32 %v3074_v4, %v364_v17 }
 0x90e   : > { %v410_v20 = vadd.f32 %v3076_v5, %v395_v18 }
 0x910   : > { %419 = vst.msk [vmem:[#allocation2 + $0x18] sm:$0xff] %vm415_vm1, %v410_v20 }
 0x917   : > { %v965_v24 = vld [vmem:[#allocation2 + $0x18] sm:$0xff] }
 0x9d2   : > { %v928_v21 = vpop.f32.mrb[8].mxu1 }
 0x9d3   : > { %v929_v22 = vadd.f32 %v3103_v40, %v928_v21  ;;  %v2165_v23 = vpop.f32.mrb[9].mxu1  ;;  %v1015_v25 = vpop.f32.mrb[12].mxu0 }
 0x9d4   : > { %v1021_v26 = vadd.f32 %v1015_v25, %v965_v24  ;;  %v931_v27 = vpop.f32.mrb[10].mxu1  ;;  %v2171_v28 = vpop.f32.mrb[13].mxu0 }
 0x9d5   : > { %2414 = vtanh.f32 %v929_v22  ;;  %v2166_v29 = vpop.f32.mrb[11].mxu1  ;;  %v1018_v30 = vpop.f32.mrb[14].mxu0  ;;  %v2039_v34 = vmul.f32 -1.442695, %v929_v22 }
 0x9d6   : > { %2416 = vtanh.f32 %v1021_v26  ;;  %v2172_v31 = vpop.f32.mrb[15].mxu0  ;;  %v2043_v35 = vmul.f32 -1.442695, %v1021_v26 }
 0x9d7   : > { %2418 = vpow2.f32 %v2039_v34 }
 0x9d8   : > { %2420 = vpow2.f32 %v2043_v35 }
 0x9df   : > { %v2415_v32 = vpop.eup %2414 }
 0x9e0   : > { %v2417_v33 = vpop.eup %2416  ;;  %943 = vrot.lane.b32.xlu1 %v2415_v32, %s2769_s27 }
 0x9e1   : > { %1031 = vrot.lane.b32.xlu0 %v2417_v33, %s2769_s27  ;;  %v2419_v36 = vpop.eup %2418 }
 0x9e2   : > { %v2421_v37 = vpop.eup %2420  ;;  %v937_v38 = vadd.f32 1.0, %v2419_v36 }
 0x9e3   : > { %v1025_v39 = vadd.f32 1.0, %v2421_v37 }
 0x9e4   : > { %2422 = vrcp.f32 %v937_v38 }
 0x9e5   : > { %2424 = vrcp.f32 %v1025_v39 }
 0x9ee   : > { %v2423_v41 = vpop.eup %2422 }
 0x9ef   : > { %v2425_v43 = vpop.eup %2424  ;;  %v941_v47 = vmul.f32 %v2423_v41, %v3146_v60 }
 0x9f0   : > { %v1029_v49 = vmul.f32 %v2425_v43, %v3148_v61 }
 0xa52   : > { %v944_v42 = vpop.permute.xlu1 %943 }
 0xa53   : > { %v946_v44 = vmul.f32 %v2423_v41, %v944_v42  ;;  %v1032_v45 = vpop.permute.xlu0 %1031 }
 0xa54   : > { %v1034_v46 = vmul.f32 %v2425_v43, %v1032_v45  ;;  %v2363_v45 = vld [vmem:[#allocation11] sm:$0xff]  }
 0xa55   : > { %948 = vrot.lane.b32.xlu1 %v946_v44, %s2770_s29 }
 0xa56   : > { %1036 = vrot.lane.b32.xlu0 %v1034_v46, %s2770_s29  ;;  %v2364_v46 = vld [vmem:[#allocation9] sm:$0xff]  }
 0xac7   : > { %v949_v48 = vpop.permute.xlu1 %948 }
 0xac8   : > { %v3181_v50 = vadd.f32 %v949_v48, %v941_v47  ;;  %v1037_v51 = vpop.permute.xlu0 %1036 }
 0xac9   : > { %v3183_v52 = vadd.f32 %v1037_v51, %v1029_v49  ;;  %v2365_v49 = vld [vmem:[#allocation11 + $0x8] sm:$0xff]  }
 0xaca   : > { %2426 = vtanh.f32 %v3181_v50 }
 0xacb   : > { %2428 = vtanh.f32 %v3183_v52 }
 0xad4   : > { %v2427_v55 = vpop.eup %2426 }
 0xad5   : > { %v2429_v56 = vpop.eup %2428  ;;  %954 = vrot.lane.b32.xlu1 %v2427_v55, %s2770_s29 }
 0xad6   : > { %1042 = vrot.lane.b32.xlu0 %v2429_v56, %s2770_s29 }
 0xb47   : > { %v955_v58 = vpop.permute.xlu1 %954 }
 0xb48   : > { %v3192_v59 = vmul.f32 %v2423_v41, %v955_v58  ;;  %v1043_v60 = vpop.permute.xlu0 %1042 }
 0xb49   : > { %v1045_v61 = vmul.f32 %v2425_v43, %v1043_v60 }
 0xb4a   : > { %1050 = vrot.lane.b32.xlu0 %v3192_v59, %s2772_s12 }
 0xb4b   : > { %1047 = vrot.lane.b32.xlu1 %v1045_v61, %s2771_s9  ;;  %v1146_v63 = vpack.c.bf16 %v1045_v61, %v1045_v61 }
 0xb4e   : > { %368 = vperm.xlu0 %2349, %v342_v62  }
 0xb4f   : > { %1150 = vrot.lane.b32.xlu1 %v1146_v63, %s2771_s9 }
 0xbbc   : > { %v1051_v1 = vpop.permute.xlu0 %1050 }
 0xbbd   : > { %v1048_v2 = vpop.permute.xlu1 %1047 }
 0xbbe   : > { %v1053_v3 = vsel %vm440_vm2, %v1048_v2, %v1051_v1 }
 0xbbf   : > { %v1054_v6 = vpack.c.bf16 %v1053_v3, %v1053_v3 }
 0xbc1   : > { %2178 = vmatmul.mubr.msk.bf16.vlgmr.msra.gmra.mrb[12].mxu1 %vm531_vm3, %v1054_v6  ;;  %v1151_v7 = vpop.permute.xlu1 %1150 }
 0xbc2   : > { %2184 = vmatmul.mubr.msk.bf16.vlgmr.msra.gmra.mrb[16].mxu0 %vm440_vm2, %v1151_v7  ;;  %2191 = vmatprep.mubr.msk.bf16.mxu1 %vm2767_vm0, %v2766_v0 }
 0xbc3   : > { %2197 = vmatprep.mubr.msk.bf16.mxu0 %vm2767_vm0, %v2766_v0  ;;  %2188 = vmatpush3.bf16.msra.mxu1 %v2363_v45 }
 0xbc4   : > { %2196 = vmatpush3.bf16.msra.mxu0 %v2364_v46  ;;  %2189 = vmatprep.subr.bf16.mxu1 %v2766_v0 }
 0xbc5   : > { %2209 = vmatprep.subr.bf16.mxu0 %v2766_v0 }
 0xbc7   : > { %2190 = vmatpush3.bf16.msra.mxu1 %v2365_v49 }
 0xbc8   : > { %2201 = vmatprep.subr.bf16.mxu1 %v2766_v0 }
 0xbcd   : > { %v369_v9 = vpop.permute.xlu0 %368 }
 0xbce   : > { %v396_v10 = vmul.f32 %v3074_v4, %v369_v9 }
 0xbd0   : > { %v411_v11 = vadd.f32 %v3076_v5, %v396_v10 }
 0xbd2   : > { %420 = vst.msk [vmem:[#allocation2 + $0x20] sm:$0xff] %vm415_vm1, %v411_v11 }
 0xbd9   : > { %v1145_v15 = vld [vmem:[#allocation2 + $0x20] sm:$0xff] }
 0xc94   : > { %v1108_v12 = vpop.f32.mrb[12].mxu1 }
 0xc95   : > { %v1109_v13 = vadd.f32 %v3103_v40, %v1108_v12  ;;  %v2179_v14 = vpop.f32.mrb[13].mxu1  ;;  %v1195_v16 = vpop.f32.mrb[16].mxu0 }
 0xc96   : > { %v1201_v17 = vadd.f32 %v1195_v16, %v1145_v15  ;;  %v1111_v18 = vpop.f32.mrb[14].mxu1  ;;  %v2185_v20 = vpop.f32.mrb[17].mxu0 }
 0xc97   : > { %2430 = vtanh.f32 %v1109_v13  ;;  %v2180_v21 = vpop.f32.mrb[15].mxu1  ;;  %v1198_v22 = vpop.f32.mrb[18].mxu0  ;;  %v2047_v26 = vmul.f32 -1.442695, %v1109_v13 }
 0xc98   : > { %2432 = vtanh.f32 %v1201_v17  ;;  %v2186_v23 = vpop.f32.mrb[19].mxu0  ;;  %v2051_v27 = vmul.f32 -1.442695, %v1201_v17 }
 0xc99   : > { %2434 = vpow2.f32 %v2047_v26 }
 0xc9a   : > { %2436 = vpow2.f32 %v2051_v27 }
 0xca1   : > { %v2431_v24 = vpop.eup %2430 }
 0xca2   : > { %v2433_v25 = vpop.eup %2432  ;;  %1123 = vrot.lane.b32.xlu1 %v2431_v24, %s2769_s27 }
 0xca3   : > { %1211 = vrot.lane.b32.xlu0 %v2433_v25, %s2769_s27  ;;  %v2435_v28 = vpop.eup %2434 }
 0xca4   : > { %v2437_v29 = vpop.eup %2436  ;;  %v1117_v30 = vadd.f32 1.0, %v2435_v28 }
 0xca5   : > { %v1205_v31 = vadd.f32 1.0, %v2437_v29 }
 0xca6   : > { %2438 = vrcp.f32 %v1117_v30 }
 0xca7   : > { %2440 = vrcp.f32 %v1205_v31 }
 0xcb0   : > { %v2439_v32 = vpop.eup %2438 }
 0xcb1   : > { %v2441_v34 = vpop.eup %2440  ;;  %v1121_v38 = vmul.f32 %v2439_v32, %v3181_v50 }
 0xcb2   : > { %v1209_v41 = vmul.f32 %v2441_v34, %v3183_v52 }
 0xd14   : > { %v1124_v33 = vpop.permute.xlu1 %1123 }
 0xd15   : > { %v1126_v35 = vmul.f32 %v2439_v32, %v1124_v33  ;;  %v1212_v36 = vpop.permute.xlu0 %1211 }
 0xd16   : > { %v1214_v37 = vmul.f32 %v2441_v34, %v1212_v36 }
 0xd17   : > { %1128 = vrot.lane.b32.xlu1 %v1126_v35, %s2770_s29 }
 0xd18   : > { %1216 = vrot.lane.b32.xlu0 %v1214_v37, %s2770_s29  ;;  %v2366_v37 = vld [vmem:[#allocation11] sm:$0xff]  }
 0xd89   : > { %v1129_v39 = vpop.permute.xlu1 %1128 }
 0xd8a   : > { %v3216_v42 = vadd.f32 %v1129_v39, %v1121_v38  ;;  %v1217_v43 = vpop.permute.xlu0 %1216  ;;  %v2367_v38 = vld [vmem:[#allocation9] sm:$0xff]  }
 0xd8b   : > { %v3218_v44 = vadd.f32 %v1217_v43, %v1209_v41 }
 0xd8c   : > { %2442 = vtanh.f32 %v3216_v42 }
 0xd8d   : > { %2444 = vtanh.f32 %v3218_v44 }
 0xd96   : > { %v2443_v47 = vpop.eup %2442 }
 0xd97   : > { %v2445_v48 = vpop.eup %2444  ;;  %1134 = vrot.lane.b32.xlu1 %v2443_v47, %s2770_s29  ;;  %v344_v47 = vld [vmem:[%s3046_s7 + $0x30] sm:$0xff] }
 0xd98   : > { %1222 = vrot.lane.b32.xlu0 %v2445_v48, %s2770_s29 }
 0xe09   : > { %v1135_v50 = vpop.permute.xlu1 %1134 }
 0xe0a   : > { %v3227_v51 = vmul.f32 %v2439_v32, %v1135_v50  ;;  %v1223_v52 = vpop.permute.xlu0 %1222 }
 0xe0b   : > { %v1225_v53 = vmul.f32 %v2441_v34, %v1223_v52 }
 0xe0c   : > { %1230 = vrot.lane.b32.xlu0 %v3227_v51, %s2772_s12 }
 0xe0d   : > { %1227 = vrot.lane.b32.xlu1 %v1225_v53, %s2771_s9  ;;  %v1326_v55 = vpack.c.bf16 %v1225_v53, %v1225_v53 }
 0xe10   : > { %373 = vperm.xlu0 %2349, %v343_v54  }
 0xe11   : > { %1330 = vrot.lane.b32.xlu1 %v1326_v55, %s2771_s9 }
 0xe7e   : > { %v1231_v56 = vpop.permute.xlu0 %1230 }
 0xe7f   : > { %v1228_v57 = vpop.permute.xlu1 %1227 }
 0xe80   : > { %v1233_v58 = vsel %vm440_vm2, %v1228_v57, %v1231_v56 }
 0xe81   : > { %v1234_v60 = vpack.c.bf16 %v1233_v58, %v1233_v58 }
 0xe83   : > { %2192 = vmatmul.mubr.msk.bf16.vlgmr.msra.gmra.mrb[16].mxu1 %vm531_vm3, %v1234_v60  ;;  %v1331_v61 = vpop.permute.xlu1 %1330 }
 0xe84   : > { %2198 = vmatmul.mubr.msk.bf16.vlgmr.msra.gmra.mrb[20].mxu0 %vm440_vm2, %v1331_v61  ;;  %2205 = vmatprep.mubr.msk.bf16.mxu1 %vm2767_vm0, %v2766_v0 }
 0xe85   : > { %2211 = vmatprep.mubr.msk.bf16.mxu0 %vm2767_vm0, %v2766_v0  ;;  %2202 = vmatpush3.bf16.msra.mxu1 %v2366_v37 }
 0xe86   : > { %2210 = vmatpush3.bf16.msra.mxu0 %v2367_v38  ;;  %2203 = vmatprep.subr.bf16.mxu1 %v2766_v0  ;;  %v345_v38 = vld [vmem:[%s3046_s7 + $0x38] sm:$0xff]  ;;  %s2681_s7 = scalar_lea.vmem %s2680_s17, 2048 }
 0xe87   : > { %2223 = vmatprep.subr.bf16.mxu0 %v2766_v0  ;;  %p2683_p13 = scmp.lt.s32.totalorder %s2681_s7, %s2675_s20 }
 0xe89   : > { %p2684_p0 = por %p2683_p13, %p2682_p10 }
 0xe8b   : > { %p2685_p5 = pnand %p2684_p0, %p2678_p7 }
 0xe8f   : > { %v374_v62 = vpop.permute.xlu0 %373 }
 0xe90   : > { %v397_v63 = vmul.f32 %v3074_v4, %v374_v62 }
 0xe92   : > { %v412_v1 = vadd.f32 %v3076_v5, %v397_v63 }
 0xe94   : > { %421 = vst.msk [vmem:[#allocation2 + $0x28] sm:$0xff] %vm415_vm1, %v412_v1 }
 0xe9b   : > { %v1325_v7 = vld [vmem:[#allocation2 + $0x28] sm:$0xff] }
 0xf56   : > { %v1288_v2 = vpop.f32.mrb[16].mxu1 }
 0xf57   : > { %v1289_v3 = vadd.f32 %v3103_v40, %v1288_v2  ;;  %v2193_v6 = vpop.f32.mrb[17].mxu1  ;;  %v1375_v9 = vpop.f32.mrb[20].mxu0 }
 0xf58   : > { %v1381_v10 = vadd.f32 %v1375_v9, %v1325_v7  ;;  %v1291_v11 = vpop.f32.mrb[18].mxu1  ;;  %v2199_v12 = vpop.f32.mrb[21].mxu0 }
 0xf59   : > { %2446 = vtanh.f32 %v1289_v3  ;;  %v2194_v13 = vpop.f32.mrb[19].mxu1  ;;  %v1378_v14 = vpop.f32.mrb[22].mxu0  ;;  %v2055_v18 = vmul.f32 -1.442695, %v1289_v3 }
 0xf5a   : > { %2448 = vtanh.f32 %v1381_v10  ;;  %v2200_v15 = vpop.f32.mrb[23].mxu0  ;;  %v2059_v20 = vmul.f32 -1.442695, %v1381_v10 }
 0xf5b   : > { %2450 = vpow2.f32 %v2055_v18 }
 0xf5c   : > { %2452 = vpow2.f32 %v2059_v20 }
 0xf63   : > { %v2447_v16 = vpop.eup %2446 }
 0xf64   : > { %v2449_v17 = vpop.eup %2448  ;;  %1303 = vrot.lane.b32.xlu1 %v2447_v16, %s2769_s27 }
 0xf65   : > { %1391 = vrot.lane.b32.xlu0 %v2449_v17, %s2769_s27  ;;  %v2451_v21 = vpop.eup %2450 }
 0xf66   : > { %v2453_v22 = vpop.eup %2452  ;;  %v1297_v23 = vadd.f32 1.0, %v2451_v21 }
 0xf67   : > { %v1385_v24 = vadd.f32 1.0, %v2453_v22 }
 0xf68   : > { %2454 = vrcp.f32 %v1297_v23 }
 0xf69   : > { %2456 = vrcp.f32 %v1385_v24 }
 0xf72   : > { %v2455_v25 = vpop.eup %2454 }
 0xf73   : > { %v2457_v27 = vpop.eup %2456  ;;  %v1301_v31 = vmul.f32 %v2455_v25, %v3216_v42  ;;  %v2368_v42 = vld [vmem:[#allocation11 + $0x8] sm:$0xff]  }
 0xf74   : > { %v1389_v33 = vmul.f32 %v2457_v27, %v3218_v44  ;;  %2204 = vmatpush3.bf16.msra.mxu1 %v2368_v42 }
 0xf75   : > { %2215 = vmatprep.subr.bf16.mxu1 %v2766_v0 }
 0xfd6   : > { %v1304_v26 = vpop.permute.xlu1 %1303 }
 0xfd7   : > { %v1306_v28 = vmul.f32 %v2455_v25, %v1304_v26  ;;  %v1392_v29 = vpop.permute.xlu0 %1391 }
 0xfd8   : > { %v1394_v30 = vmul.f32 %v2457_v27, %v1392_v29  ;;  %v2369_v29 = vld [vmem:[#allocation11] sm:$0xff]  }
 0xfd9   : > { %1308 = vrot.lane.b32.xlu1 %v1306_v28, %s2770_s29 }
 0xfda   : > { %1396 = vrot.lane.b32.xlu0 %v1394_v30, %s2770_s29  ;;  %v2370_v30 = vld [vmem:[#allocation9] sm:$0xff]  }
0x104b   : > { %v1309_v32 = vpop.permute.xlu1 %1308 }
0x104c   : > { %v3251_v34 = vadd.f32 %v1309_v32, %v1301_v31  ;;  %v1397_v35 = vpop.permute.xlu0 %1396 }
0x104d   : > { %v3253_v36 = vadd.f32 %v1397_v35, %v1389_v33  ;;  %v2371_v33 = vld [vmem:[#allocation11 + $0x8] sm:$0xff]  }
0x104e   : > { %2458 = vtanh.f32 %v3251_v34 }
0x104f   : > { %2460 = vtanh.f32 %v3253_v36 }
0x1058   : > { %v2459_v39 = vpop.eup %2458 }
0x1059   : > { %v2461_v41 = vpop.eup %2460  ;;  %1314 = vrot.lane.b32.xlu1 %v2459_v39, %s2770_s29 }
0x105a   : > { %1402 = vrot.lane.b32.xlu0 %v2461_v41, %s2770_s29 }
0x10cb   : > { %v1315_v43 = vpop.permute.xlu1 %1314 }
0x10cc   : > { %v3262_v44 = vmul.f32 %v2455_v25, %v1315_v43  ;;  %v1403_v45 = vpop.permute.xlu0 %1402 }
0x10cd   : > { %v1405_v46 = vmul.f32 %v2457_v27, %v1403_v45 }
0x10ce   : > { %1410 = vrot.lane.b32.xlu0 %v3262_v44, %s2772_s12 }
0x10cf   : > { %1407 = vrot.lane.b32.xlu1 %v1405_v46, %s2771_s9  ;;  %v1506_v48 = vpack.c.bf16 %v1405_v46, %v1405_v46 }
0x10d2   : > { %378 = vperm.xlu0 %2349, %v344_v47  }
0x10d3   : > { %1510 = vrot.lane.b32.xlu1 %v1506_v48, %s2771_s9  ;;  %v2502_v48 = vld [vmem:[#allocation6] ss:$0 sm:$0xff] }
0x1140   : > { %v1411_v49 = vpop.permute.xlu0 %1410 }
0x1141   : > { %v1408_v50 = vpop.permute.xlu1 %1407 }
0x1142   : > { %v1413_v52 = vsel %vm440_vm2, %v1408_v50, %v1411_v49  ;;  %v2503_v50 = vld [vmem:[#allocation8] ss:$0 sm:$0xff] }
0x1143   : > { %v1414_v53 = vpack.c.bf16 %v1413_v52, %v1413_v52 }
0x1145   : > { %2206 = vmatmul.mubr.msk.bf16.vlgmr.msra.gmra.mrb[20].mxu1 %vm531_vm3, %v1414_v53  ;;  %v1511_v54 = vpop.permute.xlu1 %1510 }
0x1146   : > { %2212 = vmatmul.mubr.msk.bf16.vlgmr.msra.gmra.mrb[24].mxu0 %vm440_vm2, %v1511_v54  ;;  %2219 = vmatprep.mubr.msk.bf16.mxu1 %vm2767_vm0, %v2766_v0 }
0x1147   : > { %2225 = vmatprep.mubr.msk.bf16.mxu0 %vm2767_vm0, %v2766_v0  ;;  %2216 = vmatpush3.bf16.msra.mxu1 %v2369_v29 }
0x1148   : > { %2224 = vmatpush3.bf16.msra.mxu0 %v2370_v30  ;;  %2217 = vmatprep.subr.bf16.mxu1 %v2766_v0 }
0x114b   : > { %2218 = vmatpush3.bf16.msra.mxu1 %v2371_v33 }
0x114c   : > { %2229 = vmatprep.subr.bf16.mxu1 %v2766_v0 }
0x1151   : > { %v379_v55 = vpop.permute.xlu0 %378 }
0x1152   : > { %v398_v56 = vmul.f32 %v3074_v4, %v379_v55 }
0x1154   : > { %v413_v57 = vadd.f32 %v3076_v5, %v398_v56 }
0x1156   : > { %422 = vst.msk [vmem:[#allocation2 + $0x30] sm:$0xff] %vm415_vm1, %v413_v57 }
0x115d   : > { %v1505_v62 = vld [vmem:[#allocation2 + $0x30] sm:$0xff] }
0x1218   : > { %v1468_v58 = vpop.f32.mrb[20].mxu1 }
0x1219   : > { %v1469_v60 = vadd.f32 %v3103_v40, %v1468_v58  ;;  %v2207_v61 = vpop.f32.mrb[21].mxu1  ;;  %v1555_v63 = vpop.f32.mrb[24].mxu0 }
0x121a   : > { %v1561_v1 = vadd.f32 %v1555_v63, %v1505_v62  ;;  %v1471_v2 = vpop.f32.mrb[22].mxu1  ;;  %v2213_v3 = vpop.f32.mrb[25].mxu0 }
0x121b   : > { %2462 = vtanh.f32 %v1469_v60  ;;  %v2208_v6 = vpop.f32.mrb[23].mxu1  ;;  %v1558_v7 = vpop.f32.mrb[26].mxu0  ;;  %v2063_v5 = vmul.f32 -1.442695, %v1469_v60 }
0x121c   : > { %2464 = vtanh.f32 %v1561_v1  ;;  %v2214_v9 = vpop.f32.mrb[27].mxu0  ;;  %v2067_v11 = vmul.f32 -1.442695, %v1561_v1 }
0x121d   : > { %2466 = vpow2.f32 %v2063_v5 }
0x121e   : > { %2468 = vpow2.f32 %v2067_v11 }
0x1225   : > { %v2463_v10 = vpop.eup %2462 }
0x1226   : > { %v2465_v4 = vpop.eup %2464  ;;  %1483 = vrot.lane.b32.xlu1 %v2463_v10, %s2769_s27 }
0x1227   : > { %1571 = vrot.lane.b32.xlu0 %v2465_v4, %s2769_s27  ;;  %v2467_v12 = vpop.eup %2466 }
0x1228   : > { %v2469_v13 = vpop.eup %2468  ;;  %v1477_v14 = vadd.f32 1.0, %v2467_v12 }
0x1229   : > { %v1565_v15 = vadd.f32 1.0, %v2469_v13 }
0x122a   : > { %2470 = vrcp.f32 %v1477_v14 }
0x122b   : > { %2472 = vrcp.f32 %v1565_v15 }
0x1234   : > { %v2471_v16 = vpop.eup %2470 }
0x1235   : > { %v2473_v18 = vpop.eup %2472  ;;  %v1481_v23 = vmul.f32 %v2471_v16, %v3251_v34 }
0x1236   : > { %v1569_v25 = vmul.f32 %v2473_v18, %v3253_v36 }
0x1298   : > { %v1484_v17 = vpop.permute.xlu1 %1483 }
0x1299   : > { %v1486_v20 = vmul.f32 %v2471_v16, %v1484_v17  ;;  %v1572_v21 = vpop.permute.xlu0 %1571 }
0x129a   : > { %v1574_v22 = vmul.f32 %v2473_v18, %v1572_v21 }
0x129b   : > { %1488 = vrot.lane.b32.xlu1 %v1486_v20, %s2770_s29 }
0x129c   : > { %1576 = vrot.lane.b32.xlu0 %v1574_v22, %s2770_s29 }
0x130d   : > { %v1489_v24 = vpop.permute.xlu1 %1488 }
0x130e   : > { %v3286_v26 = vadd.f32 %v1489_v24, %v1481_v23  ;;  %v1577_v27 = vpop.permute.xlu0 %1576  ;;  %v2372_v23 = vld [vmem:[#allocation11] sm:$0xff]  }
0x130f   : > { %v3288_v28 = vadd.f32 %v1577_v27, %v1569_v25  ;;  %v2373_v27 = vld [vmem:[#allocation11 + $0x8] sm:$0xff]  }
0x1310   : > { %2474 = vtanh.f32 %v3286_v26 }
0x1311   : > { %2476 = vtanh.f32 %v3288_v28 }
0x131a   : > { %v2475_v31 = vpop.eup %2474 }
0x131b   : > { %v2477_v32 = vpop.eup %2476  ;;  %1494 = vrot.lane.b32.xlu1 %v2475_v31, %s2770_s29 }
0x131c   : > { %1582 = vrot.lane.b32.xlu0 %v2477_v32, %s2770_s29 }
0x138d   : > { %v1495_v34 = vpop.permute.xlu1 %1494 }
0x138e   : > { %v3296_v35 = vmul.f32 %v2471_v16, %v1495_v34  ;;  %v1583_v36 = vpop.permute.xlu0 %1582 }
0x138f   : > { %v1585_v37 = vmul.f32 %v2473_v18, %v1583_v36  ;;  %v2504_v36 = vld [vmem:[#allocation12] ss:$0 sm:$0xff] }
0x1390   : > { %1590 = vrot.lane.b32.xlu0 %v3296_v35, %s2772_s12 }
0x1391   : > { %1587 = vrot.lane.b32.xlu1 %v1585_v37, %s2771_s9  ;;  %v1686_v39 = vpack.c.bf16 %v1585_v37, %v1585_v37 }
0x1394   : > { %383 = vperm.xlu0 %2349, %v345_v38  }
0x1395   : > { %1690 = vrot.lane.b32.xlu1 %v1686_v39, %s2771_s9 }
0x1402   : > { %v1591_v41 = vpop.permute.xlu0 %1590 }
0x1403   : > { %v1588_v42 = vpop.permute.xlu1 %1587 }
0x1404   : > { %v1593_v43 = vsel %vm440_vm2, %v1588_v42, %v1591_v41 }
0x1405   : > { %v1594_v45 = vpack.c.bf16 %v1593_v43, %v1593_v43 }
0x1407   : > { %2220 = vmatmul.mubr.msk.bf16.vlgmr.msra.gmra.mrb[24].mxu1 %vm531_vm3, %v1594_v45  ;;  %v1691_v46 = vpop.permute.xlu1 %1690 }
0x1408   : > { %2226 = vmatmul.mubr.msk.bf16.vlgmr.msra.gmra.mrb[28].mxu0 %vm440_vm2, %v1691_v46  ;;  %2233 = vmatprep.mubr.msk.bf16.mxu1 %vm2767_vm0, %v2766_v0 }
0x1409   : > { %2230 = vmatpush3.bf16.msra.mxu1 %v2372_v23 }
0x140a   : > { %2231 = vmatprep.subr.bf16.mxu1 %v2766_v0 }
0x140d   : > { %2232 = vmatpush3.bf16.msra.mxu1 %v2373_v27 }
0x1413   : > { %v384_v47 = vpop.permute.xlu0 %383 }
0x1414   : > { %v399_v49 = vmul.f32 %v2502_v48, %v384_v47 }
0x1416   : > { %v414_v52 = vadd.f32 %v2503_v50, %v399_v49 }
0x1418   : > { %423 = vst.msk [vmem:[#allocation2 + $0x38] sm:$0xff] %vm415_vm1, %v414_v52 }
0x141f   : > { %v1685_v56 = vld [vmem:[#allocation2 + $0x38] sm:$0xff] }
0x14da   : > { %v1648_v53 = vpop.f32.mrb[24].mxu1 }
0x14db   : > { %v1649_v54 = vadd.f32 %v3103_v40, %v1648_v53  ;;  %v2221_v55 = vpop.f32.mrb[25].mxu1  ;;  %v1735_v57 = vpop.f32.mrb[28].mxu0 }
0x14dc   : > { %v1741_v58 = vadd.f32 %v1735_v57, %v1685_v56  ;;  %v1651_v60 = vpop.f32.mrb[26].mxu1  ;;  %v2227_v61 = vpop.f32.mrb[29].mxu0 }
0x14dd   : > { %2478 = vtanh.f32 %v1649_v54  ;;  %v2222_v62 = vpop.f32.mrb[27].mxu1  ;;  %v1738_v63 = vpop.f32.mrb[30].mxu0  ;;  %v2071_v6 = vmul.f32 -1.442695, %v1649_v54 }
0x14de   : > { %2480 = vtanh.f32 %v1741_v58  ;;  %v2228_v1 = vpop.f32.mrb[31].mxu0  ;;  %v2075_v7 = vmul.f32 -1.442695, %v1741_v58 }
0x14df   : > { %2482 = vpow2.f32 %v2071_v6 }
0x14e0   : > { %2484 = vpow2.f32 %v2075_v7 }
0x14e7   : > { %v2479_v2 = vpop.eup %2478 }
0x14e8   : > { %v2481_v3 = vpop.eup %2480  ;;  %1663 = vrot.lane.b32.xlu1 %v2479_v2, %s2769_s27 }
0x14e9   : > { %1751 = vrot.lane.b32.xlu0 %v2481_v3, %s2769_s27  ;;  %v2483_v40 = vpop.eup %2482 }
0x14ea   : > { %v2485_v9 = vpop.eup %2484  ;;  %v1657_v10 = vadd.f32 1.0, %v2483_v40 }
0x14eb   : > { %v1745_v4 = vadd.f32 1.0, %v2485_v9 }
0x14ec   : > { %2486 = vrcp.f32 %v1657_v10 }
0x14ed   : > { %2488 = vrcp.f32 %v1745_v4 }
0x14f6   : > { %v2487_v5 = vpop.eup %2486 }
0x14f7   : > { %v2489_v12 = vpop.eup %2488  ;;  %v1661_v16 = vmul.f32 %v2487_v5, %v3286_v26 }
0x14f8   : > { %v1749_v18 = vmul.f32 %v2489_v12, %v3288_v28 }
0x155a   : > { %v1664_v11 = vpop.permute.xlu1 %1663 }
0x155b   : > { %v1666_v13 = vmul.f32 %v2487_v5, %v1664_v11  ;;  %v1752_v14 = vpop.permute.xlu0 %1751 }
0x155c   : > { %v1754_v15 = vmul.f32 %v2489_v12, %v1752_v14 }
0x155d   : > { %1668 = vrot.lane.b32.xlu1 %v1666_v13, %s2770_s29 }
0x155e   : > { %1756 = vrot.lane.b32.xlu0 %v1754_v15, %s2770_s29 }
0x15cf   : > { %v1669_v17 = vpop.permute.xlu1 %1668 }
0x15d0   : > { %v1671_v20 = vadd.f32 %v1669_v17, %v1661_v16  ;;  %v1757_v21 = vpop.permute.xlu0 %1756 }
0x15d1   : > { %v1759_v22 = vadd.f32 %v1757_v21, %v1749_v18 }
0x15d2   : > { %2490 = vtanh.f32 %v1671_v20 }
0x15d3   : > { %2492 = vtanh.f32 %v1759_v22 }
0x15dc   : > { %v2491_v24 = vpop.eup %2490 }
0x15dd   : > { %v2493_v25 = vpop.eup %2492  ;;  %1674 = vrot.lane.b32.xlu1 %v2491_v24, %s2770_s29 }
0x15de   : > { %1762 = vrot.lane.b32.xlu0 %v2493_v25, %s2770_s29 }
0x164f   : > { %v1675_v26 = vpop.permute.xlu1 %1674 }
0x1650   : > { %v1677_v29 = vmul.f32 %v2487_v5, %v1675_v26  ;;  %v1763_v28 = vpop.permute.xlu0 %1762 }
0x1651   : > { %v1765_v30 = vmul.f32 %v2489_v12, %v1763_v28 }
0x1652   : > { %1770 = vrot.lane.b32.xlu0 %v1677_v29, %s2772_s12 }
0x1653   : > { %1767 = vrot.lane.b32.xlu1 %v1765_v30, %s2771_s9 }
0x16c4   : > { %v1771_v31 = vpop.permute.xlu0 %1770 }
0x16c5   : > { %v1768_v32 = vpop.permute.xlu1 %1767 }
0x16c6   : > { %v1773_v0 = vsel %vm440_vm2, %v1768_v32, %v1771_v31 }
0x16c7   : > { %v1774_v33 = vpack.c.bf16 %v1773_v0, %v1773_v0 }
0x16c9   : > { %2234 = vmatmul.mubr.msk.bf16.vlgmr.msra.gmra.mrb[28].mxu1 %vm531_vm3, %v1774_v33 }
0x179c   : > { %v1828_v34 = vpop.f32.mrb[28].mxu1 }
0x179d   : > { %v1829_v37 = vadd.f32 %v2504_v36, %v1828_v34  ;;  %v2235_v38 = vpop.f32.mrb[29].mxu1 }
0x179e   : > { %v1831_v39 = vpop.f32.mrb[30].mxu1 }
0x179f   : > { %2494 = vtanh.f32 %v1829_v37  ;;  %v2236_v41 = vpop.f32.mrb[31].mxu1  ;;  %v2079_v43 = vmul.f32 -1.442695, %v1829_v37 }
0x17a1   : > { %2496 = vpow2.f32 %v2079_v43 }
0x17a9   : > { %v2495_v42 = vpop.eup %2494 }
0x17aa   : > { %1843 = vrot.lane.b32.xlu1 %v2495_v42, %s2769_s27 }
0x17ab   : > { %v2497_v45 = vpop.eup %2496 }
0x17ac   : > { %v1837_v46 = vadd.f32 1.0, %v2497_v45 }
0x17ae   : > { %2498 = vrcp.f32 %v1837_v46 }
0x17b8   : > { %v2499_v47 = vpop.eup %2498 }
0x17b9   : > { %v1841_v50 = vmul.f32 %v2499_v47, %v1671_v20 }
0x181c   : > { %v1844_v48 = vpop.permute.xlu1 %1843 }
0x181d   : > { %v1846_v49 = vmul.f32 %v2499_v47, %v1844_v48 }
0x181f   : > { %1848 = vrot.lane.b32.xlu0 %v1846_v49, %s2770_s29 }
0x1823   : > { %600 = vrot.lane.b32.xlu0 %v3122_v19, %s2771_s9 }
0x1827   : > { %959 = vrot.lane.b32.xlu0 %v3192_v59, %s2771_s9 }
0x182b   : > { %1319 = vrot.lane.b32.xlu0 %v3262_v44, %s2771_s9 }
0x182f   : > { %1679 = vrot.lane.b32.xlu0 %v1677_v29, %s2771_s9 }
0x1891   : > { %v1849_v52 = vpop.permute.xlu0 %1848 }
0x1892   : > { %v1851_v53 = vadd.f32 %v1849_v52, %v1841_v50 }
0x1894   : > { %2500 = vtanh.f32 %v1851_v53 }
0x1895   : > { %v601_v54 = vpop.permute.xlu0 %600 }
0x1896   : > { %603 = vst.msk [vmem:[%s335_s30] sm:$0xff] %vm440_vm2, %v601_v54 }
0x1899   : > { %v960_v55 = vpop.permute.xlu0 %959 }
0x189a   : > { %2040 = vst.msk [vmem:[%s335_s30 + $0x10] sm:$0xff] %vm440_vm2, %v960_v55 }
0x189d   : > { %v1320_v19 = vpop.permute.xlu0 %1319 }
0x189e   : > { %v2501_v56 = vpop.eup %2500  ;;  %2056 = vst.msk [vmem:[%s335_s30 + $0x20] sm:$0xff] %vm440_vm2, %v1320_v19 }
0x189f   : > { %1854 = vrot.lane.b32.xlu1 %v2501_v56, %s2770_s29 }
0x18a1   : > { %v1680_v59 = vpop.permute.xlu0 %1679 }
0x18a2   : > { %2072 = vst.msk [vmem:[%s335_s30 + $0x30] sm:$0xff] %vm440_vm2, %v1680_v59 }
0x18a3   : > { %779 = vrot.lane.b32.xlu1 %v3157_v8, %s2771_s9 }
0x18a7   : > { %1139 = vrot.lane.b32.xlu1 %v3227_v51, %s2771_s9 }
0x18ab   : > { %1499 = vrot.lane.b32.xlu1 %v3296_v35, %s2771_s9 }
0x1911   : > { %v1855_v44 = vpop.permute.xlu1 %1854 }
0x1912   : > { %v1857_v57 = vmul.f32 %v2499_v47, %v1855_v44 }
0x1914   : > { %1859 = vrot.lane.b32.xlu1 %v1857_v57, %s2771_s9 }
0x1915   : > { %v780_v58 = vpop.permute.xlu1 %779 }
0x1916   : > { %2032 = vst.msk [vmem:[%s335_s30 + $0x8] sm:$0xff] %vm440_vm2, %v780_v58 }
0x1919   : > { %v1140_v60 = vpop.permute.xlu1 %1139 }
0x191a   : > { %2048 = vst.msk [vmem:[%s335_s30 + $0x18] sm:$0xff] %vm440_vm2, %v1140_v60 }
0x191d   : > { %v1500_v61 = vpop.permute.xlu1 %1499 }
0x191e   : > { %2064 = vst.msk [vmem:[%s335_s30 + $0x28] sm:$0xff] %vm440_vm2, %v1500_v61 }
0x1986   : > { %v1860_v8 = vpop.permute.xlu1 %1859 }
0x1987   : > { %2080 = vst.msk [vmem:[%s335_s30 + $0x38] sm:$0xff] %vm440_vm2, %v1860_v8 }
0x1988   : > { %2688 = shalt.err (!%p2685_p5)
}
0x1989   : > { %s2689_s27 = scalar_lea.hbm %s3355_s10, 1024  ;;  %s2693_s12 = scalar_lea.hbm %s3406_s6, 2048 }
0x198a   : > { %p2690_p11 = scmp.ne.s32.totalorder %s3355_s10, %s2689_s27  ;;  %p2694_p2 = scmp.lt.u32.totalorder %s3355_s10, %s3406_s6 }
0x198b   : > { %p2695_p1 = scmp.lt.u32.totalorder %s2693_s12, %s2689_s27  ;;  %p2697_p8 = scmp.lt.u32.totalorder %s2689_s27, %s3355_s10 }
0x198c   : > { %p2691_p9 = pnand %p2690_p11, %p2992_p6 }
0x198d   : > { %p2696_p4 = por %p2695_p1, %p2694_p2 }
0x198e   : > { %p2692_p12 = pneg %p2691_p9 }
0x198f   : > { %p2698_p3 = por %p2697_p8, %p2696_p4 }
0x1991   : > { %p2699_p7 = pnand %p2698_p3, %p2692_p12 }
0x1993   : > { %2702 = shalt.err (!%p2699_p7)
}
0x1994   : > { %s2774_s26 = smov 128   ;;  %s2775_s11 = smov 256  }
0x1995   : > { %s2776_s20 = smov 8  }
0x1996   : > { %2259 = dma.vmem_to_hbm [thread:$0]  (%p2992_p6), %s3350_s14, 1024, %s3355_s10, %s1865_s19, %s2774_s26, %s2775_s11, %s2776_s20  }
0x1997 PF: > { %s1892_s25 = sand.u32 1, %s2741_s21   ;;  %p3428_p10 = scmp.ne.s32.totalorder %s3412_s28, 0 }
0x1998   : > { %p3429_p13 = scmp.ge.s32.totalorder %s2753_s24, 2  ;;  %s1893_s17 = scalar_lea.sflag [#allocation5], %s1892_s25 }
0x199a   : > { %p2282_p0 = pnand %p3429_p13, %p3428_p10 }
0x199c   : > { %2736 = dma.done.wait (!%p2282_p0), %s1893_s17, 1024  }
0x199d   : > { %2738 = vsyncadd (!%p2282_p0), %s1893_s17, 4294966272  ;;  %p22_p5 = scmp.ge.s32.totalorder %s2978_s18, 4   ;;  %s3430_s21 = smov %s2745_s22 }
0x199e   : > { %s3431_s22 = smov %s2749_s23  ;;  %s3432_s23 = smov %s2988_s13 }
0x199f   : > { %s3433_s24 = smov %s2978_s18  ;;  %24 = sbr.rel (!%p22_p5) target bundleno = 8 (0x8), region = 123 }
0x19a6   :  { %1898 = vsyncpa [#allocation4], 1 }
0x19a7   :  { %1900 = vsyncpa [#allocation4 + $0x1], 1 }
0x19a8   :  { %1901 = vsyncpa [#allocation7], 1 }
0x19a9   :  { %1902 = vsyncpa [#allocation10], 1 }
0x19aa   :  { %1903 = vsyncpa [#allocation13], 1 }
0x19ab   :  { %1904 = vsyncpa [#allocation5], 1 }
0x19ac   :  { %1906 = vsyncpa [#allocation5 + $0x1], 1 }

// kernel: granger_forward.5
= control target key start
LH: loop header
LB: loop body
LE: loop exit
PB: predicated region body
PF: predicated region fallthrough
CT: control target
= control target key end

     0   :  { %s6686_s0 = inlined_call_operand.hbm [shape: f32[8,32,2], index: 0, kind: input, shape index: {}]   ;;  %s6687_s1 = inlined_call_operand.hbm [shape: f32[2,128], index: 1, kind: input, shape index: {}]   ;;  %s6688_s2 = inlined_call_operand.hbm [shape: f32[1,128], index: 2, kind: input, shape index: {}]   ;;  %s6689_s3 = inlined_call_operand.hbm [shape: bf16[32,128], index: 3, kind: input, shape index: {}]   ;;  %s6690_s4 = inlined_call_operand.hbm [shape: bf16[32,128], index: 4, kind: input, shape index: {}]   ;;  %s6691_s5 = inlined_call_operand.hbm [shape: f32[1,128], index: 5, kind: input, shape index: {}]   ;;  %s6692_s6 = inlined_call_operand.hbm [shape: bf16[32,128], index: 6, kind: input, shape index: {}]   ;;  %s6693_s7 = inlined_call_operand.hbm [shape: f32[64,17], index: 7, kind: input, shape index: {}]   ;;  %s6694_s8 = inlined_call_operand.hbm [shape: f32[32,17], index: 8, kind: output, shape index: {}]  }
   0x1   :  { %6709 = sst [smem:[#allocation34_spill]] %s6687_s1 }
   0x2   :  { %6710 = sst [smem:[#allocation35_spill]] %s6694_s8 }
   0x3   :  { %13 = vsyncpa [#allocation5], 0 }
   0x4   :  { %15 = vsyncpa [#allocation5 + $0x1], 0 }
   0x5   :  { %16 = vsyncpa [#allocation8], 0 }
   0x6   :  { %17 = vsyncpa [#allocation11], 0 }
   0x7   :  { %18 = vsyncpa [#allocation14], 0 }
   0x8   :  { %19 = vsyncpa [#allocation17], 0 }
   0x9   :  { %20 = vsyncpa [#allocation6], 0 }
   0xa   :  { %22 = vsyncpa [#allocation6 + $0x1], 0  ;;  %s5482_s27 = smov 0   ;;  %s5484_s28 = smov 0  }
   0xb   :  { %s5486_s29 = smov 0   ;;  %s5488_s30 = smov 0  }
   0xc LB: > { %6711 = sst [smem:[#allocation28_spill]] %s5394_s27  ;;  %s5503_s9 = sadd.s32 4294967295, %s5406_s30   ;;  %s5406_s30 = sphi %s5488_s30, %s6743_s30   ;;  %s5402_s29 = sphi %s5486_s29, %s6747_s29   ;;  %s5398_s28 = sphi %s5484_s28, %s6746_s28   ;;  %s5394_s27 = sphi %s5482_s27, %s6745_s27  }
   0xd   : > { %6712 = sst [smem:[#allocation29_spill]] %s5503_s9  ;;  %s3975_s10 = sadd.s32 4294967294, %s5406_s30  }
   0xe   : > { %s5507_s11 = sadd.s32 1, %s5406_s30   ;;  %s35_s12 = sadd.s32 1, %s5402_s29 }
   0xf   : > { %6713 = sst [smem:[#allocation30_spill]] %s5507_s11  ;;  %s32_s13 = ssub.s32 %s5406_s30, %s5507_s11 }
  0x10   : > { %p42_p0 = scmp.ne.s32.totalorder %s5402_s29, %s5398_s28  ;;  %p33_p1 = scmp.eq.s32.totalorder %s32_s13, 0 }
  0x11   : > { %p43_p2 = scmp.eq.s32.totalorder %s5406_s30, 0  ;;  %p48_p3 = scmp.ne.s32.totalorder %s5398_s28, %s5394_s27 }
  0x12   : > { %p6695_p4 = scmp.eq.s32.totalorder %s5503_s9, 0  ;;  %p219_p7 = scmp.eq.s32.totalorder %s5503_s9, 1 }
  0x13   : > { %s5519_s14 = scalar_select %p33_p1, %s5402_s29, %s35_s12  }
  0x14   : > { %p5521_p5 = por %p43_p2, %p42_p0  ;;  %p5527_p6 = por %p6695_p4, %p48_p3 }
  0x15   : > { %6714 = sst [smem:[#allocation31_spill]] %s5519_s14  ;;  %p225_p8 = scmp.eq.s32.totalorder %s3975_s10, 1 }
  0x16   : > { %s6715_s15 = scalar_select %p5521_p5, 1, 0 }
  0x17   : > { %s6716_s16 = scalar_select %p5527_p6, 1, 0 }
  0x18   : > { %p3976_p9 = scmp.ge.s32.totalorder %s5406_s30, 1  ;;  %p232_p10 = scmp.lt.s32.totalorder %s5406_s30, 3 }
  0x19   : > { %p5534_p11 = por %p219_p7, %p42_p0  ;;  %p5538_p12 = por %p225_p8, %p48_p3 }
  0x1a   : > { %p5542_p13 = pnand %p3976_p9, %p232_p10  ;;  %s5408_s20 = smov [#allocation7]  }
  0x1b   : > { %s6717_s17 = scalar_select %p5534_p11, 1, 0 }
  0x1c   : > { %s6719_s18 = scalar_select %p5538_p12, 1, 0 }
  0x1d   : > { %6718 = sst [smem:[#allocation32_spill]] %s6717_s17  ;;  %p4407_p1 = pneg %p5542_p13 }
  0x1e   : > { %6720 = sst [smem:[#allocation33_spill]] %s6719_s18  ;;  %s245_s21 = sshll.u32 %s5408_s20, 4  ;;  %s246_s21 = int_to_ptr.vmem [resolvable:$true] %s245_s21 }
  0x1f   : > { %s6721_s19 = scalar_select %p5542_p13, 1, 0 }
  0x20   : > { %s5409_s22 = smov [#allocation10]   ;;  %p5550_p0 = pnand %p4407_p1, %p6695_p4 }
  0x21   : > { %s266_s23 = sshll.u32 %s5409_s22, 4  ;;  %s6723_s1 = sld [smem:[#allocation34_spill]]  ;;  %s5554_s23 = int_to_ptr.vmem [resolvable:$true] %s266_s23 }
  0x22   : > { %p5564_p3 = pneg %p5550_p0 }
  0x27   : > { %s5128_s10 = scalar_lea.hbm %s6723_s1, 32 }
  0x28   : > { %p5129_p2 = scmp.ne.s32.totalorder %s6723_s1, %s5128_s10  ;;  %p5135_p9 = scmp.lt.u32.totalorder %s5128_s10, %s6723_s1 }
  0x2a   : > { %p5131_p7 = pnand %p5564_p3, %p5129_p2 }
  0x2c   : > { %p5132_p8 = pneg %p5131_p7 }
  0x2e   : > { %p5137_p10 = pnand %p5135_p9, %p5132_p8 }
  0x30   : > { %5140 = shalt.err (!%p5137_p10)
}
  0x31   : > { %s5141_s25 = scalar_lea.vmem %s246_s21, 32  ;;  %p5149_p11 = scmp.lt.s32.totalorder %s246_s21, %s246_s21 }
  0x32   : > { %p5142_p1 = scmp.ne.s32.totalorder %s246_s21, %s5141_s25  ;;  %p5150_p6 = scmp.lt.s32.totalorder %s5141_s25, %s5141_s25 }
  0x34   : > { %p5144_p4 = pnand %p5142_p1, %p5564_p3  ;;  %p5151_p13 = por %p5150_p6, %p5149_p11 }
  0x36   : > { %p5145_p12 = pneg %p5144_p4 }
  0x38   : > { %p5152_p5 = pnand %p5151_p13, %p5145_p12 }
  0x3a   : > { %5155 = shalt.err (!%p5152_p5)
}
  0x3b   : > { %4410 = dma.hbm_to_vmem [thread:$0]  (!%p5550_p0), %s6723_s1, 32, %s246_s21, [#allocation8]  }
  0x3c   : > { %s5156_s13 = scalar_lea.hbm %s6689_s3, 256 }
  0x3d   : > { %p5157_p4 = scmp.ne.s32.totalorder %s6689_s3, %s5156_s13  ;;  %p5163_p5 = scmp.lt.u32.totalorder %s5156_s13, %s6689_s3 }
  0x3f   : > { %p5159_p2 = pnand %p5157_p4, %p5564_p3 }
  0x41   : > { %p5160_p6 = pneg %p5159_p2 }
  0x43   : > { %p5165_p11 = pnand %p5163_p5, %p5160_p6 }
  0x45   : > { %5168 = shalt.err (!%p5165_p11)
}
  0x46   : > { %s5169_s21 = scalar_lea.vmem %s5554_s23, 256  ;;  %p5177_p8 = scmp.lt.s32.totalorder %s5554_s23, %s5554_s23 }
  0x47   : > { %p5170_p12 = scmp.ne.s32.totalorder %s5554_s23, %s5169_s21  ;;  %p5178_p9 = scmp.lt.s32.totalorder %s5169_s21, %s5169_s21 }
  0x49   : > { %p5172_p13 = pnand %p5170_p12, %p5564_p3  ;;  %p5179_p10 = por %p5178_p9, %p5177_p8 }
  0x4b   : > { %p5173_p7 = pneg %p5172_p13 }
  0x4d   : > { %p5180_p1 = pnand %p5179_p10, %p5173_p7 }
  0x4f   : > { %5183 = shalt.err (!%p5180_p1)
}
  0x50   : > { %s5410_s11 = smov 64   ;;  %s5411_s18 = smov 4  }
  0x51   : > { %4416 = dma.hbm_to_vmem [thread:$0]  (!%p5550_p0), %s6689_s3, 256, %s5554_s23, [#allocation11], %s5410_s11, %s5410_s11, %s5411_s18  }
  0x52   : > { %s5412_s14 = smov [#allocation13]   ;;  %s5413_s13 = smov [#allocation9]  }
  0x53   : > { %s293_s10 = sshll.u32 %s5412_s14, 4  ;;  %s256_s22 = sshll.u32 %s5413_s13, 4  ;;  %s294_s10 = int_to_ptr.vmem [resolvable:$true] %s293_s10  ;;  %s257_s22 = int_to_ptr.vmem [resolvable:$true] %s256_s22 }
  0x54   : > { %s5184_s1 = scalar_lea.hbm %s6691_s5, 16 }
  0x55   : > { %p5185_p4 = scmp.ne.s32.totalorder %s6691_s5, %s5184_s1  ;;  %p5191_p5 = scmp.lt.u32.totalorder %s5184_s1, %s6691_s5 }
  0x57   : > { %p5187_p2 = pnand %p5185_p4, %p5564_p3 }
  0x59   : > { %p5188_p6 = pneg %p5187_p2 }
  0x5b   : > { %p5193_p11 = pnand %p5191_p5, %p5188_p6 }
  0x5d   : > { %5196 = shalt.err (!%p5193_p11)
}
  0x5e   : > { %s5197_s23 = scalar_lea.vmem %s294_s10, 16  ;;  %s5204_s26 = scalar_lea.vmem %s294_s10, 32 }
  0x5f   : > { %p5198_p12 = scmp.ne.s32.totalorder %s294_s10, %s5197_s23  ;;  %p5205_p8 = scmp.lt.s32.totalorder %s294_s10, %s294_s10 }
  0x60   : > { %p5206_p9 = scmp.lt.s32.totalorder %s5204_s26, %s5197_s23 }
  0x61   : > { %p5200_p13 = pnand %p5198_p12, %p5564_p3 }
  0x62   : > { %p5207_p10 = por %p5206_p9, %p5205_p8 }
  0x63   : > { %p5201_p7 = pneg %p5200_p13 }
  0x65   : > { %p5208_p1 = pnand %p5207_p10, %p5201_p7 }
  0x67   : > { %5211 = shalt.err (!%p5208_p1)
}
  0x68   : > { %4422 = dma.hbm_to_vmem [thread:$0]  (!%p5550_p0), %s6691_s5, 16, %s294_s10, [#allocation14]  }
  0x69   : > { %s5212_s17 = scalar_lea.hbm %s6688_s2, 16 }
  0x6a   : > { %p5213_p4 = scmp.ne.s32.totalorder %s6688_s2, %s5212_s17  ;;  %p5219_p5 = scmp.lt.u32.totalorder %s5212_s17, %s6688_s2 }
  0x6c   : > { %p5215_p2 = pnand %p5213_p4, %p5564_p3 }
  0x6e   : > { %p5216_p6 = pneg %p5215_p2 }
  0x70   : > { %p5221_p11 = pnand %p5219_p5, %p5216_p6 }
  0x72   : > { %5224 = shalt.err (!%p5221_p11)
}
  0x73   : > { %s5225_s21 = scalar_lea.vmem %s257_s22, 16  ;;  %s5232_s10 = scalar_lea.vmem %s257_s22, 32 }
  0x74   : > { %p5226_p12 = scmp.ne.s32.totalorder %s257_s22, %s5225_s21  ;;  %p5233_p8 = scmp.lt.s32.totalorder %s257_s22, %s257_s22 }
  0x75   : > { %p5234_p9 = scmp.lt.s32.totalorder %s5232_s10, %s5225_s21 }
  0x76   : > { %p5228_p13 = pnand %p5226_p12, %p5564_p3 }
  0x77   : > { %p5235_p10 = por %p5234_p9, %p5233_p8 }
  0x78   : > { %p5229_p7 = pneg %p5228_p13 }
  0x7a   : > { %p5236_p1 = pnand %p5235_p10, %p5229_p7 }
  0x7c   : > { %5239 = shalt.err (!%p5236_p1)
}
  0x7d   : > { %4413 = dma.hbm_to_vmem [thread:$0]  (!%p5550_p0), %s6688_s2, 16, %s257_s22, [#allocation8]  }
  0x7e   : > { %s5414_s8 = smov [#allocation12]   ;;  %s5415_s1 = smov [#allocation15]  }
  0x7f   : > { %s279_s27 = sshll.u32 %s5414_s8, 4  ;;  %s303_s9 = sshll.u32 %s5415_s1, 4  ;;  %s280_s27 = int_to_ptr.vmem [resolvable:$true] %s279_s27  ;;  %s304_s9 = int_to_ptr.vmem [resolvable:$true] %s303_s9 }
  0x80   : > { %s5240_s14 = scalar_lea.hbm %s6690_s4, 256 }
  0x81   : > { %p5241_p4 = scmp.ne.s32.totalorder %s6690_s4, %s5240_s14  ;;  %p5247_p5 = scmp.lt.u32.totalorder %s5240_s14, %s6690_s4 }
  0x83   : > { %p5243_p2 = pnand %p5241_p4, %p5564_p3 }
  0x85   : > { %p5244_p6 = pneg %p5243_p2 }
  0x87   : > { %p5249_p11 = pnand %p5247_p5, %p5244_p6 }
  0x89   : > { %5252 = shalt.err (!%p5249_p11)
}
  0x8a   : > { %s5253_s22 = scalar_lea.vmem %s280_s27, 256  ;;  %p5261_p8 = scmp.lt.s32.totalorder %s280_s27, %s280_s27 }
  0x8b   : > { %p5254_p12 = scmp.ne.s32.totalorder %s280_s27, %s5253_s22  ;;  %p5262_p9 = scmp.lt.s32.totalorder %s5253_s22, %s5253_s22 }
  0x8d   : > { %p5256_p13 = pnand %p5254_p12, %p5564_p3  ;;  %p5263_p10 = por %p5262_p9, %p5261_p8 }
  0x8f   : > { %p5257_p7 = pneg %p5256_p13 }
  0x91   : > { %p5264_p1 = pnand %p5263_p10, %p5257_p7 }
  0x93   : > { %5267 = shalt.err (!%p5264_p1)
}
  0x94   : > { %4419 = dma.hbm_to_vmem [thread:$0]  (!%p5550_p0), %s6690_s4, 256, %s280_s27, [#allocation11], %s5410_s11, %s5410_s11, %s5411_s18  }
  0x95   : > { %s5268_s17 = scalar_lea.hbm %s6692_s6, 256 }
  0x96   : > { %p5269_p4 = scmp.ne.s32.totalorder %s6692_s6, %s5268_s17  ;;  %p5275_p5 = scmp.lt.u32.totalorder %s5268_s17, %s6692_s6 }
  0x98   : > { %p5271_p2 = pnand %p5269_p4, %p5564_p3 }
  0x9a   : > { %p5272_p6 = pneg %p5271_p2 }
  0x9c   : > { %p5277_p11 = pnand %p5275_p5, %p5272_p6 }
  0x9e   : > { %5280 = shalt.err (!%p5277_p11)
}
  0x9f   : > { %s5281_s21 = scalar_lea.vmem %s304_s9, 256  ;;  %p5289_p8 = scmp.lt.s32.totalorder %s304_s9, %s304_s9 }
  0xa0   : > { %p5282_p12 = scmp.ne.s32.totalorder %s304_s9, %s5281_s21  ;;  %p5290_p9 = scmp.lt.s32.totalorder %s5281_s21, %s5281_s21 }
  0xa2   : > { %p5284_p13 = pnand %p5282_p12, %p5564_p3  ;;  %p5291_p10 = por %p5290_p9, %p5289_p8 }
  0xa4   : > { %p5285_p7 = pneg %p5284_p13 }
  0xa6   : > { %p5292_p1 = pnand %p5291_p10, %p5285_p7 }
  0xa8   : > { %5295 = shalt.err (!%p5292_p1)
}
  0xa9   : > { %4425 = dma.hbm_to_vmem [thread:$0]  (!%p5550_p0), %s6692_s6, 256, %s304_s9, [#allocation14], %s5410_s11, %s5410_s11, %s5411_s18  }
  0xaa   : > { %s5416_s22 = smov [#allocation16]   ;;  %s5296_s1 = scalar_lea.hbm %s6693_s7, 1024 }
  0xab   : > { %s316_s23 = sshll.u32 %s5416_s22, 4  ;;  %p5297_p4 = scmp.ne.s32.totalorder %s6693_s7, %s5296_s1  ;;  %s317_s23 = int_to_ptr.vmem [resolvable:$true] %s316_s23 }
  0xac   : > { %p5303_p5 = scmp.lt.u32.totalorder %s5296_s1, %s6693_s7 }
  0xad   : > { %p5299_p2 = pnand %p5297_p4, %p5564_p3 }
  0xaf   : > { %p5300_p6 = pneg %p5299_p2 }
  0xb1   : > { %p5305_p11 = pnand %p5303_p5, %p5300_p6 }
  0xb3   : > { %5308 = shalt.err (!%p5305_p11)
}
  0xb4   : > { %s5309_s11 = scalar_lea.vmem %s317_s23, 1024  ;;  %p5317_p8 = scmp.lt.s32.totalorder %s317_s23, %s317_s23 }
  0xb5   : > { %p5310_p12 = scmp.ne.s32.totalorder %s317_s23, %s5309_s11  ;;  %p5318_p9 = scmp.lt.s32.totalorder %s5309_s11, %s5309_s11 }
  0xb7   : > { %p5312_p13 = pnand %p5310_p12, %p5564_p3  ;;  %p5319_p10 = por %p5318_p9, %p5317_p8 }
  0xb9   : > { %p5313_p7 = pneg %p5312_p13 }
  0xbb   : > { %p5320_p1 = pnand %p5319_p10, %p5313_p7 }
  0xbd   : > { %5323 = shalt.err (!%p5320_p1)
}
  0xbe   : > { %s5417_s18 = smov 128   ;;  %s5418_s9 = smov 8  }
  0xbf   : > { %4428 = dma.hbm_to_vmem [thread:$0]  (!%p5550_p0), %s6693_s7, 1024, %s317_s23, [#allocation17], %s5417_s18, %s5417_s18, %s5418_s9  }
  0xc0   : > { %p3984_p4 = scmp.ge.s32.totalorder %s5406_s30, 2 }
  0xc2   : > { %326 = sbr.rel (%p3984_p4) target bundleno = 216 (0xd8), region = 44 }
  0xc9   : > { %s330_s20 = sand.u32 1, %s5402_s29   ;;  %s4115_s27 = sshll.u32 %s5406_s30, 8 }
  0xca   : > { %s3985_s24 = sshll.u32 %s330_s20, 7  ;;  %s340_s23 = scalar_lea.hbm %s6686_s0, %s4115_s27 }
  0xcb   : > { %p6725_p0 = scmp.ne.s32.totalorder %s6715_s15, 0  ;;  %s334_s8 = scalar_lea.vmem [#allocation4], %s3985_s24 }
  0xcc   : > { %s353_s1 = sshll.u32 %s334_s8, 4  ;;  %s5419_s12 = smov 512   ;;  %s354_s1 = int_to_ptr.vmem [resolvable:$true] %s353_s1 }
  0xcd   : > { %s4382_s26 = scalar_select %p6725_p0, [#allocation0], [#allocation21] }
  0xce   : > { %4383 = sst [smem:[#allocation20]] (%p6725_p0), %s5419_s12  ;;  %s5420_s14 = smov 256  }
  0xcf   : > { %s345_s17 = sld [smem:[%s4382_s26]]   ;;  %s5421_s13 = smov 2  }
  0xd0   : > { %4384 = sst [smem:[#allocation20 + $0x1]] (%p6725_p0), %s5420_s14  ;;  %s5422_s11 = smov 128  }
  0xd1   : > { %4385 = sst [smem:[#allocation20 + $0x2]] (%p6725_p0), %s5421_s13  ;;  %s5423_s9 = smov 8  }
  0xd2   : > { %4386 = sst [smem:[#allocation20 + $0x3]] (%p6725_p0), %s5422_s11  ;;  %s331_s21 = scalar_lea.sflag [#allocation5], %s330_s20 }
  0xd3   : > { %4387 = sst [smem:[#allocation20 + $0x4]] (%p6725_p0), %s5422_s11  ;;  %s5424_s27 = smov [#allocation19]  }
  0xd4   : > { %4388 = sst [smem:[#allocation20 + $0x5]] (%p6725_p0), %s5423_s9 }
  0xd5   : > { %s3988_s18 = sshll.u32 %s345_s17, 26 }
  0xd6   : > { %s3989_s25 = sadd.s32 134217728, %s3988_s18 }
  0xd7   : > { %4389 = dma.general (%p6725_p0), %s340_s23, 2048, %s354_s1, %s331_s21, %s5424_s27, [#allocation20], %s3989_s25, 0  }
  0xd8 PF: > { %p6726_p3 = scmp.ne.s32.totalorder %s6721_s19, 0 }
  0xd9   : > { %s5729_s24 = sand.u32 (!%p6726_p3), 1, %s5398_s28   ;;  %p6727_p2 = scmp.ne.s32.totalorder (!%p6726_p3), %s6716_s16, 0 }
  0xda   : > { %378 = sbr.rel (%p6726_p3) target bundleno = 11953 (0x2eb1), region = 52  ;;  %s3991_s10 = sshll.u32 (!%p6726_p3), %s5729_s24, 7 }
  0xdb   : > { %s381_s22 = scalar_lea.sflag (!%p6726_p3), [#allocation5], %s5729_s24  ;;  %s5733_s26 = scalar_lea.vmem (!%p6726_p3), [#allocation4], %s3991_s10 }
  0xe1   : > { %5369 = dma.done.wait (%p6727_p2), %s381_s22, 2048  }
  0xe2   : > { %5371 = vsyncadd (%p6727_p2), %s381_s22, 4294965248  ;;  %s6728_s15 = sld [smem:[#allocation29_spill]] }
  0xe8   : > { %p6729_p6 = scmp.eq.s32.totalorder %s6728_s15, 0 }
  0xea   : > { %5373 = dma.done.wait (%p6729_p6), [#allocation8], 48   ;;  %p6730_p5 = pmov %p6729_p6 }
  0xec   : > { %5375 = vsyncadd (%p6730_p5), [#allocation8], 4294967248  ;;  %p6731_p11 = pmov %p6730_p5 }
  0xed   : > { %p6732_p12 = pmov %p6730_p5 }
  0xee   : > { %5377 = dma.done.wait (%p6731_p11), [#allocation11], 512  }
  0xef   : > { %5379 = vsyncadd (%p6732_p12), [#allocation11], 4294966784  ;;  %p6733_p13 = pmov %p6730_p5 }
  0xf0   : > { %p6734_p7 = pmov %p6730_p5 }
  0xf1   : > { %5381 = dma.done.wait (%p6733_p13), [#allocation14], 272  }
  0xf2   : > { %5383 = vsyncadd (%p6734_p7), [#allocation14], 4294967024  ;;  %p6735_p8 = pmov %p6730_p5 }
  0xf3   : > { %p6736_p9 = pmov %p6730_p5 }
  0xf4   : > { %5385 = dma.done.wait (%p6735_p8), [#allocation17], 1024  }
  0xf5   : > { %5387 = vsyncadd (%p6736_p9), [#allocation17], 4294966272  ;;  %v5425_v0 = vmov 0.0   ;;  %vm5426_vm0 = vmmov 0   ;;  %v5427_v1 = vmov 0   ;;  %v4594_v2 = vld [vmem:[#allocation10] sm:$0xff]   ;;  %v545_v11 = vlaneseq }
  0xf6   : > { %4185 = vmatprep.subr.bf16.mxu1 %v5425_v0  ;;  %4189 = vmatprep.mubr.msk.bf16.mxu1 %vm5426_vm0, %v5425_v0  ;;  %v4595_v3 = vld [vmem:[#allocation10 + $0x8] sm:$0xff]   ;;  %v448_v5 = vld [vmem:[%s5733_s26] sm:$0xff]  ;;  %v463_v6 = vld [vmem:[%s5733_s26 + $0x78] sm:$0xff]  ;;  %v5428_v8 = vmov 0.0|0.0   ;;  %v5429_v9 = vmov 1   ;;  %s5430_s16 = smov 80  }
  0xf7   : > { %4509 = vset.pattern.permute.xlu1 %v5427_v1  ;;  %4508 = vset.pattern.permute.xlu0 %v5427_v1  ;;  %v462_v4 = vld [vmem:[%s5733_s26 + $0x70] sm:$0xff]  ;;  %v449_v7 = vld [vmem:[%s5733_s26 + $0x8] sm:$0xff]  ;;  %v546_v14 = vshrl.u32 %v545_v11, 7  ;;  %v464_v18 = vld [vmem:[#allocation7] sm:$0x3]  ;;  %s5431_s19 = smov 16  }
  0xf8   : > { %4201 = vmatprep.subr.bf16.mxu0 %v5425_v0  ;;  %4205 = vmatprep.mubr.msk.bf16.mxu0 %vm5426_vm0, %v5425_v0  ;;  %v5786_v32 = vld [vmem:[#allocation9] ss:$0 sm:$0xff]  ;;  %s5432_s20 = smov 96   ;;  %s5433_s23 = smov 48   ;;  %vm879_vm1 = vcmask 130048   ;;  %vm891_vm2 = vcmask 261248  }
  0xf9   : > { %4186 = vmatpush3.bf16.msra.mxu1 %v4594_v2  ;;  %537 = vperm.xlu1 %4509, %v462_v4   ;;  %v547_v15 = vsub.s32 0, %v546_v14  ;;  %v631_v17 = vsub.s32 1, %v546_v14  ;;  %vm721_vm3 = vcmask 261120   ;;  %vm3725_vm4 = vcmask 392192   ;;  %s6737_s8 = sld [smem:[#allocation32_spill]]  ;;  %s3999_s1 = sshll.u32 %s5729_s24, 4 }
  0xfa   : > { %4187 = vmatprep.subr.bf16.mxu1 %v5425_v0  ;;  %467 = vperm.xlu0 %4508, %v448_v5   ;;  %vm3736_vm5 = vcmask 523264   ;;  %s444_s17 = scalar_lea.vmem [#allocation18], %s3999_s1  ;;  %s4116_s14 = sshll.u32 %s6728_s15, 8  ;;  %vm3818_vm6 = vcmask 138240  }
  0xfb   : > { %v5776_v20 = vrot.slane %v464_v18, %v547_v15  ;;  %v5778_v21 = vrot.slane %v464_v18, %v631_v17  ;;  %s3835_s12 = sshll.u32 %s444_s17, 4  ;;  %s6738_s18 = sld [smem:[#allocation35_spill]]  ;;  %s6637_s12 = int_to_ptr.vmem [resolvable:$true] %s3835_s12 }
  0xfc   : > { %s3822_s25 = scalar_lea.sflag [#allocation6], %s5729_s24  ;;  %s5324_s21 = scalar_lea.vmem %s6637_s12, 256 }
  0xfd   : > { %4188 = vmatpush3.bf16.msra.mxu1 %v4595_v3  ;;  %542 = vperm.xlu1 %4509, %v463_v6   ;;  %p5325_p10 = scmp.ne.s32.totalorder %s6637_s12, %s5324_s21  ;;  %s5434_s27 = smov [#allocation18]  }
  0xfe   : > { %4193 = vmatprep.subr.bf16.mxu1 %v5425_v0  ;;  %472 = vperm.xlu0 %4508, %v449_v7   ;;  %s5328_s10 = sshll.u32 %s5434_s27, 4  ;;  %s5329_s10 = int_to_ptr.vmem [resolvable:$false] %s5328_s10 }
  0xff   : > { %p6739_p1 = scmp.ne.s32.totalorder %s6737_s8, 0  ;;  %s5330_s22 = scalar_lea.vmem %s5329_s10, 512 }
 0x100   : > { %4190 = vmatmul.mubr.bf16.vlgmr.msra.gmra.mrb[0].mxu1 %v5428_v8  ;;  %p5331_p2 = scmp.lt.s32.totalorder %s6637_s12, %s5329_s10  ;;  %p5332_p6 = scmp.lt.s32.totalorder %s5330_s22, %s5324_s21 }
 0x101   : > { %4197 = vmatprep.mubr.msk.bf16.mxu1 %vm5426_vm0, %v5425_v0  ;;  %4511 = vset.pattern.permute.xlu1 %v5429_v9  ;;  %s6642_s9 = scalar_lea.hbm %s6738_s18, %s4116_s14  ;;  %p5326_p0 = pnand %p5325_p10, %p6739_p1 }
 0x102   : > { %4510 = vset.pattern.permute.xlu0 %v5429_v9  ;;  %570 = vperm.xlu1 %4511, %v449_v7   ;;  %p5333_p5 = por %p5332_p6, %p5331_p2 }
 0x103   : > { %566 = vperm.xlu0 %4510, %v448_v5   ;;  %p5327_p3 = pneg %p5326_p0 }
 0x105   : > { %p5334_p11 = pnand %p5333_p5, %p5327_p3 }
 0x106   : > { %622 = vperm.xlu1 %4511, %v462_v4  }
 0x107   : > { %626 = vperm.xlu0 %4510, %v463_v6  }
 0x10a   : > { %4512 = vset.pattern.permute.xlu1 %v5427_v1 }
 0x10b   : > { %4513 = vset.pattern.permute.xlu0 %v5427_v1 }
 0x178   : > { %v538_v10 = vpop.permute.xlu1 %537 }
 0x179   : > { %v468_v12 = vpop.permute.xlu0 %467  ;;  %v563_v26 = vmul.f32 %v5776_v20, %v538_v10 }
 0x17a   : > { %v549_v24 = vmul.f32 %v5776_v20, %v468_v12 }
 0x17c   : > { %v543_v13 = vpop.permute.xlu1 %542 }
 0x17d   : > { %v473_v16 = vpop.permute.xlu0 %472  ;;  %v564_v34 = vmul.f32 %v5776_v20, %v543_v13 }
 0x17e   : > { %v550_v28 = vmul.f32 %v5776_v20, %v473_v16 }
 0x181   : > { %v571_v19 = vpop.permute.xlu1 %570 }
 0x182   : > { %v567_v22 = vpop.permute.xlu0 %566  ;;  %v634_v29 = vmul.f32 %v5778_v21, %v571_v19 }
 0x183   : > { %v633_v25 = vmul.f32 %v5778_v21, %v567_v22 }
 0x184   : > { %v650_v35 = vadd.f32 %v634_v29, %v550_v28 }
 0x185   : > { %v623_v23 = vpop.permute.xlu1 %622  ;;  %v649_v30 = vadd.f32 %v633_v25, %v549_v24 }
 0x186   : > { %v647_v27 = vmul.f32 %v5778_v21, %v623_v23  ;;  %v627_v31 = vpop.permute.xlu0 %626  ;;  %v5798_v43 = vadd.f32 %v5786_v32, %v650_v35 }
 0x187   : > { %v648_v36 = vmul.f32 %v5778_v21, %v627_v31  ;;  %v5791_v37 = vadd.f32 %v5786_v32, %v649_v30 }
 0x188   : > { %v663_v33 = vadd.f32 %v647_v27, %v563_v26 }
 0x189   : > { %v664_v42 = vadd.f32 %v648_v36, %v564_v34 }
 0x18a   : > { %v5794_v39 = vadd.f32 %v5786_v32, %v663_v33 }
 0x18b   : > { %v5803_v48 = vadd.f32 %v5786_v32, %v664_v42 }
 0x1d3   : > { %v759_v38 = vpop.f32.mrb[0].mxu1 }
 0x1d4   : > { %v768_v40 = vadd.f32 %v759_v38, %v5791_v37  ;;  %v4191_v41 = vpop.f32.mrb[1].mxu1  ;;  %v773_v45 = vadd.f32 %v759_v38, %v5794_v39  ;;  %v4596_v38 = vld [vmem:[#allocation10] sm:$0xff]  }
 0x1d5   : > { %v762_v44 = vpop.f32.mrb[2].mxu1  ;;  %4194 = vmatpush3.bf16.msra.mxu1 %v4596_v38 }
 0x1d6   : > { %4614 = vtanh.f32 %v768_v40  ;;  %v4192_v46 = vpop.f32.mrb[3].mxu1  ;;  %v769_v47 = vadd.f32 %v762_v44, %v5798_v43  ;;  %v774_v49 = vadd.f32 %v762_v44, %v5803_v48  ;;  %v4003_v54 = vmul.f32 -1.442695, %v768_v40  ;;  %4195 = vmatprep.subr.bf16.mxu1 %v5425_v0  ;;  %v4597_v40 = vld [vmem:[#allocation10 + $0x8] sm:$0xff]  }
 0x1d7   : > { %4616 = vtanh.f32 %v773_v45  ;;  %v4005_v55 = vmul.f32 -1.442695, %v773_v45 }
 0x1d8   : > { %4618 = vtanh.f32 %v769_v47  ;;  %v4004_v56 = vmul.f32 -1.442695, %v769_v47  ;;  %v4006_v57 = vmul.f32 -1.442695, %v774_v49 }
 0x1d9   : > { %4620 = vtanh.f32 %v774_v49  ;;  %4196 = vmatpush3.bf16.msra.mxu1 %v4597_v40  ;;  %v450_v49 = vld [vmem:[%s5733_s26 + $0x10] sm:$0xff] }
 0x1da   : > { %4622 = vpow2.f32 %v4003_v54  ;;  %4209 = vmatprep.subr.bf16.mxu1 %v5425_v0  ;;  %v461_v54 = vld [vmem:[%s5733_s26 + $0x68] sm:$0xff] }
 0x1db   : > { %4624 = vpow2.f32 %v4005_v55 }
 0x1dc   : > { %4626 = vpow2.f32 %v4004_v56 }
 0x1dd   : > { %4628 = vpow2.f32 %v4006_v57 }
 0x1e0   : > { %v4615_v50 = vpop.eup %4614 }
 0x1e1   : > { %793 = vrot.lane.b32.xlu1 %v4615_v50, %s5430_s16  ;;  %v4617_v51 = vpop.eup %4616 }
 0x1e2   : > { %v4619_v52 = vpop.eup %4618 }
 0x1e3   : > { %795 = vrot.lane.b32.xlu0 %v4619_v52, %s5430_s16  ;;  %v4621_v53 = vpop.eup %4620  ;;  %v460_v52 = vld [vmem:[%s5733_s26 + $0x60] sm:$0xff] }
 0x1e4   : > { %v4623_v58 = vpop.eup %4622 }
 0x1e5   : > { %841 = vrot.lane.b32.xlu1 %v4617_v51, %s5430_s16  ;;  %v781_v59 = vadd.f32 1.0, %v4623_v58  ;;  %v4625_v60 = vpop.eup %4624 }
 0x1e6   : > { %v4627_v61 = vpop.eup %4626  ;;  %v829_v62 = vadd.f32 1.0, %v4625_v60 }
 0x1e7   : > { %843 = vrot.lane.b32.xlu0 %v4621_v53, %s5430_s16  ;;  %4630 = vrcp.f32 %v781_v59  ;;  %v782_v63 = vadd.f32 1.0, %v4627_v61  ;;  %v4629_v2 = vpop.eup %4628  ;;  %v451_v53 = vld [vmem:[%s5733_s26 + $0x18] sm:$0xff] }
 0x1e8   : > { %4632 = vrcp.f32 %v829_v62  ;;  %v830_v3 = vadd.f32 1.0, %v4629_v2 }
 0x1e9   : > { %4634 = vrcp.f32 %v782_v63 }
 0x1ea   : > { %4636 = vrcp.f32 %v830_v3 }
 0x1f1   : > { %v4631_v4 = vpop.eup %4630 }
 0x1f2   : > { %v4633_v7 = vpop.eup %4632  ;;  %v789_v18 = vmul.f32 0.0, %v4631_v4 }
 0x1f3   : > { %v4635_v11 = vpop.eup %4634  ;;  %v837_v23 = vmul.f32 0.0, %v4633_v7 }
 0x1f4   : > { %v4637_v15 = vpop.eup %4636  ;;  %v790_v24 = vmul.f32 0.0, %v4635_v11 }
 0x1f5   : > { %v838_v29 = vmul.f32 0.0, %v4637_v15 }
 0x253   : > { %v794_v5 = vpop.permute.xlu1 %793 }
 0x254   : > { %v799_v6 = vmul.f32 %v4631_v4, %v794_v5 }
 0x255   : > { %v796_v12 = vpop.permute.xlu0 %795 }
 0x256   : > { %803 = vrot.lane.b32.xlu1 %v799_v6, %s5431_s19  ;;  %v800_v14 = vmul.f32 %v4635_v11, %v796_v12 }
 0x257   : > { %v842_v10 = vpop.permute.xlu1 %841 }
 0x258   : > { %v847_v13 = vmul.f32 %v4633_v7, %v842_v10  ;;  %805 = vrot.lane.b32.xlu0 %v800_v14, %s5431_s19 }
 0x259   : > { %v844_v16 = vpop.permute.xlu0 %843 }
 0x25a   : > { %851 = vrot.lane.b32.xlu1 %v847_v13, %s5431_s19  ;;  %v848_v17 = vmul.f32 %v4637_v15, %v844_v16 }
 0x25c   : > { %853 = vrot.lane.b32.xlu0 %v848_v17, %s5431_s19 }
 0x2c8   : > { %v804_v19 = vpop.permute.xlu1 %803 }
 0x2c9   : > { %v5814_v22 = vadd.f32 %v804_v19, %v789_v18 }
 0x2ca   : > { %v806_v26 = vpop.permute.xlu0 %805 }
 0x2cb   : > { %4638 = vtanh.f32 %v5814_v22  ;;  %v5819_v28 = vadd.f32 %v806_v26, %v790_v24 }
 0x2cc   : > { %v852_v25 = vpop.permute.xlu1 %851 }
 0x2cd   : > { %v5817_v27 = vadd.f32 %v852_v25, %v837_v23 }
 0x2ce   : > { %v854_v30 = vpop.permute.xlu0 %853 }
 0x2cf   : > { %4640 = vtanh.f32 %v5817_v27  ;;  %v5823_v31 = vadd.f32 %v854_v30, %v838_v29 }
 0x2d0   : > { %4642 = vtanh.f32 %v5819_v28 }
 0x2d1   : > { %4644 = vtanh.f32 %v5823_v31 }
 0x2d5   : > { %v4639_v33 = vpop.eup %4638 }
 0x2d6   : > { %815 = vrot.lane.b32.xlu1 %v4639_v33, %s5431_s19 }
 0x2d9   : > { %v4641_v34 = vpop.eup %4640 }
 0x2da   : > { %v4643_v35 = vpop.eup %4642  ;;  %863 = vrot.lane.b32.xlu1 %v4641_v34, %s5431_s19 }
 0x2db   : > { %817 = vrot.lane.b32.xlu0 %v4643_v35, %s5431_s19  ;;  %v4645_v36 = vpop.eup %4644 }
 0x2df   : > { %865 = vrot.lane.b32.xlu0 %v4645_v36, %s5431_s19 }
 0x348   : > { %v816_v41 = vpop.permute.xlu1 %815 }
 0x349   : > { %v821_v42 = vmul.f32 %v4631_v4, %v816_v41 }
 0x34b   : > { %873 = vrot.lane.b32.xlu1 %v821_v42, %s5432_s20 }
 0x34c   : > { %v864_v44 = vpop.permute.xlu1 %863 }
 0x34d   : > { %v818_v45 = vpop.permute.xlu0 %817  ;;  %v869_v46 = vmul.f32 %v4633_v7, %v864_v44 }
 0x34e   : > { %v822_v47 = vmul.f32 %v4635_v11, %v818_v45 }
 0x34f   : > { %884 = vrot.lane.b32.xlu1 %v869_v46, %s5433_s23 }
 0x350   : > { %875 = vrot.lane.b32.xlu0 %v822_v47, %s5432_s20 }
 0x351   : > { %v866_v50 = vpop.permute.xlu0 %865 }
 0x352   : > { %v870_v51 = vmul.f32 %v4637_v15, %v866_v50 }
 0x353   : > { %477 = vperm.xlu1 %4512, %v450_v49  }
 0x354   : > { %886 = vrot.lane.b32.xlu0 %v870_v51, %s5433_s23 }
 0x357   : > { %527 = vperm.xlu1 %4512, %v460_v52  }
 0x358   : > { %482 = vperm.xlu0 %4513, %v451_v53  }
 0x35b   : > { %532 = vperm.xlu1 %4512, %v461_v54  }
 0x35c   : > { %4514 = vset.pattern.permute.xlu0 %v5429_v9 }
 0x35d   : > { %574 = vperm.xlu0 %4514, %v450_v49  }
 0x35f   : > { %4515 = vset.pattern.permute.xlu1 %v5429_v9 }
 0x360   : > { %578 = vperm.xlu1 %4515, %v451_v53  }
 0x361   : > { %618 = vperm.xlu0 %4514, %v461_v54  }
 0x364   : > { %614 = vperm.xlu1 %4515, %v460_v52  }
 0x365   : > { %4517 = vset.pattern.permute.xlu0 %v5427_v1 }
 0x368   : > { %4516 = vset.pattern.permute.xlu1 %v5427_v1 }
 0x3bd   : > { %v874_v55 = vpop.permute.xlu1 %873 }
 0x3be   : > { %880 = vst.msk [vmem:[#allocation3] sm:$0xff] %vm879_vm1, %v874_v55 }
 0x3c1   : > { %v885_v56 = vpop.permute.xlu1 %884 }
 0x3c2   : > { %v876_v57 = vpop.permute.xlu0 %875  ;;  %892 = vst.msk [vmem:[#allocation3 + $0x70] sm:$0xff] %vm891_vm2, %v885_v56  ;;  %v894_v59 = vsel %vm879_vm1, %v874_v55, %v885_v56 }
 0x3c3   : > { %881 = vst.msk [vmem:[#allocation3 + $0x8] sm:$0xff] %vm879_vm1, %v876_v57 }
 0x3c6   : > { %v887_v58 = vpop.permute.xlu0 %886 }
 0x3c7   : > { %893 = vst.msk [vmem:[#allocation3 + $0x78] sm:$0xff] %vm891_vm2, %v887_v58  ;;  %v895_v60 = vsel %vm879_vm1, %v876_v57, %v887_v58 }
 0x3c8   : > { %v896_v61 = vpack.c.bf16 %v895_v60, %v894_v59 }
 0x3ca   : > { %4198 = vmatmul.mubr.msk.bf16.vlgmr.msra.gmra.mrb[4].mxu1 %vm721_vm3, %v896_v61 }
 0x3cb   : > { %4213 = vmatprep.mubr.msk.bf16.mxu1 %vm5426_vm0, %v5425_v0 }
 0x3d2   : > { %v478_v62 = vpop.permute.xlu1 %477 }
 0x3d3   : > { %v551_v7 = vmul.f32 %v5776_v20, %v478_v62 }
 0x3d6   : > { %v528_v63 = vpop.permute.xlu1 %527 }
 0x3d7   : > { %v483_v3 = vpop.permute.xlu0 %482  ;;  %v561_v11 = vmul.f32 %v5776_v20, %v528_v63 }
 0x3d8   : > { %v552_v13 = vmul.f32 %v5776_v20, %v483_v3 }
 0x3da   : > { %v533_v2 = vpop.permute.xlu1 %532 }
 0x3db   : > { %v562_v18 = vmul.f32 %v5776_v20, %v533_v2 }
 0x3dc   : > { %v575_v5 = vpop.permute.xlu0 %574 }
 0x3dd   : > { %v635_v10 = vmul.f32 %v5778_v21, %v575_v5 }
 0x3df   : > { %v579_v4 = vpop.permute.xlu1 %578  ;;  %v651_v15 = vadd.f32 %v635_v10, %v551_v7 }
 0x3e0   : > { %v636_v14 = vmul.f32 %v5778_v21, %v579_v4  ;;  %v619_v16 = vpop.permute.xlu0 %618 }
 0x3e1   : > { %v646_v23 = vmul.f32 %v5778_v21, %v619_v16  ;;  %v5862_v24 = vadd.f32 %v5786_v32, %v651_v15 }
 0x3e2   : > { %v652_v19 = vadd.f32 %v636_v14, %v552_v13 }
 0x3e3   : > { %v615_v6 = vpop.permute.xlu1 %614  ;;  %v662_v33 = vadd.f32 %v646_v23, %v562_v18 }
 0x3e4   : > { %v645_v12 = vmul.f32 %v5778_v21, %v615_v6  ;;  %v5869_v34 = vadd.f32 %v5786_v32, %v652_v19 }
 0x3e5   : > { %v5874_v41 = vadd.f32 %v5786_v32, %v662_v33 }
 0x3e6   : > { %v661_v17 = vadd.f32 %v645_v12, %v561_v11 }
 0x3e8   : > { %v5865_v26 = vadd.f32 %v5786_v32, %v661_v17 }
 0x49d   : > { %v950_v25 = vpop.f32.mrb[4].mxu1 }
 0x49e   : > { %v960_v29 = vadd.f32 %v950_v25, %v5862_v24  ;;  %v4199_v30 = vpop.f32.mrb[5].mxu1  ;;  %v965_v36 = vadd.f32 %v950_v25, %v5865_v26 }
 0x49f   : > { %v953_v35 = vpop.f32.mrb[6].mxu1 }
 0x4a0   : > { %4646 = vtanh.f32 %v960_v29  ;;  %v4200_v38 = vpop.f32.mrb[7].mxu1  ;;  %v961_v40 = vadd.f32 %v953_v35, %v5869_v34  ;;  %v966_v42 = vadd.f32 %v953_v35, %v5874_v41  ;;  %v4010_v49 = vmul.f32 -1.442695, %v960_v29 }
 0x4a1   : > { %4648 = vtanh.f32 %v965_v36  ;;  %v4012_v50 = vmul.f32 -1.442695, %v965_v36  ;;  %v4598_v36 = vld [vmem:[#allocation10] sm:$0xff]  }
 0x4a2   : > { %4650 = vtanh.f32 %v961_v40  ;;  %v4011_v51 = vmul.f32 -1.442695, %v961_v40  ;;  %v4013_v52 = vmul.f32 -1.442695, %v966_v42  ;;  %4202 = vmatpush3.bf16.msra.mxu0 %v4598_v36 }
 0x4a3   : > { %4652 = vtanh.f32 %v966_v42  ;;  %4203 = vmatprep.subr.bf16.mxu0 %v5425_v0 }
 0x4a4   : > { %4654 = vpow2.f32 %v4010_v49 }
 0x4a5   : > { %4656 = vpow2.f32 %v4012_v50 }
 0x4a6   : > { %4658 = vpow2.f32 %v4011_v51  ;;  %v458_v51 = vld [vmem:[%s5733_s26 + $0x50] sm:$0xff] }
 0x4a7   : > { %4660 = vpow2.f32 %v4013_v52  ;;  %v453_v52 = vld [vmem:[%s5733_s26 + $0x28] sm:$0xff] }
 0x4aa   : > { %v4647_v44 = vpop.eup %4646 }
 0x4ab   : > { %985 = vrot.lane.b32.xlu1 %v4647_v44, %s5430_s16  ;;  %v4649_v45 = vpop.eup %4648 }
 0x4ac   : > { %v4651_v46 = vpop.eup %4650 }
 0x4ad   : > { %987 = vrot.lane.b32.xlu0 %v4651_v46, %s5430_s16  ;;  %v4653_v47 = vpop.eup %4652 }
 0x4ae   : > { %v4655_v53 = vpop.eup %4654 }
 0x4af   : > { %1033 = vrot.lane.b32.xlu1 %v4649_v45, %s5430_s16  ;;  %v973_v54 = vadd.f32 1.0, %v4655_v53  ;;  %v4657_v55 = vpop.eup %4656  ;;  %v459_v53 = vld [vmem:[%s5733_s26 + $0x58] sm:$0xff] }
 0x4b0   : > { %v4659_v56 = vpop.eup %4658  ;;  %v1021_v57 = vadd.f32 1.0, %v4657_v55 }
 0x4b1   : > { %1035 = vrot.lane.b32.xlu0 %v4653_v47, %s5430_s16  ;;  %4662 = vrcp.f32 %v973_v54  ;;  %v974_v58 = vadd.f32 1.0, %v4659_v56  ;;  %v4661_v59 = vpop.eup %4660  ;;  %v452_v47 = vld [vmem:[%s5733_s26 + $0x20] sm:$0xff] }
 0x4b2   : > { %4664 = vrcp.f32 %v1021_v57  ;;  %v1022_v60 = vadd.f32 1.0, %v4661_v59 }
 0x4b3   : > { %4666 = vrcp.f32 %v974_v58 }
 0x4b4   : > { %4668 = vrcp.f32 %v1022_v60 }
 0x4bb   : > { %v4663_v61 = vpop.eup %4662 }
 0x4bc   : > { %v4665_v2 = vpop.eup %4664  ;;  %v981_v13 = vmul.f32 %v4663_v61, %v5814_v22 }
 0x4bd   : > { %v4667_v4 = vpop.eup %4666  ;;  %v1029_v16 = vmul.f32 %v4665_v2, %v5817_v27 }
 0x4be   : > { %v4669_v10 = vpop.eup %4668  ;;  %v982_v17 = vmul.f32 %v4667_v4, %v5819_v28 }
 0x4bf   : > { %v1030_v22 = vmul.f32 %v4669_v10, %v5823_v31  ;;  %v4599_v31 = vld [vmem:[#allocation10 + $0x8] sm:$0xff]  }
 0x4c0   : > { %4204 = vmatpush3.bf16.msra.mxu0 %v4599_v31 }
 0x4c1   : > { %4217 = vmatprep.subr.bf16.mxu0 %v5425_v0 }
 0x51d   : > { %v986_v62 = vpop.permute.xlu1 %985 }
 0x51e   : > { %v991_v63 = vmul.f32 %v4663_v61, %v986_v62 }
 0x51f   : > { %v988_v5 = vpop.permute.xlu0 %987 }
 0x520   : > { %995 = vrot.lane.b32.xlu1 %v991_v63, %s5431_s19  ;;  %v992_v7 = vmul.f32 %v4667_v4, %v988_v5 }
 0x521   : > { %v1034_v3 = vpop.permute.xlu1 %1033 }
 0x522   : > { %v1039_v6 = vmul.f32 %v4665_v2, %v1034_v3  ;;  %997 = vrot.lane.b32.xlu0 %v992_v7, %s5431_s19 }
 0x523   : > { %v1036_v11 = vpop.permute.xlu0 %1035 }
 0x524   : > { %1043 = vrot.lane.b32.xlu1 %v1039_v6, %s5431_s19  ;;  %v1040_v12 = vmul.f32 %v4669_v10, %v1036_v11 }
 0x526   : > { %1045 = vrot.lane.b32.xlu0 %v1040_v12, %s5431_s19 }
 0x592   : > { %v996_v14 = vpop.permute.xlu1 %995 }
 0x593   : > { %v5886_v15 = vadd.f32 %v996_v14, %v981_v13 }
 0x594   : > { %v998_v19 = vpop.permute.xlu0 %997 }
 0x595   : > { %4670 = vtanh.f32 %v5886_v15  ;;  %v5893_v25 = vadd.f32 %v998_v19, %v982_v17 }
 0x596   : > { %v1044_v18 = vpop.permute.xlu1 %1043 }
 0x597   : > { %v5891_v23 = vadd.f32 %v1044_v18, %v1029_v16 }
 0x598   : > { %v1046_v29 = vpop.permute.xlu0 %1045 }
 0x599   : > { %4672 = vtanh.f32 %v5891_v23  ;;  %v5898_v30 = vadd.f32 %v1046_v29, %v1030_v22 }
 0x59a   : > { %4674 = vtanh.f32 %v5893_v25 }
 0x59b   : > { %4676 = vtanh.f32 %v5898_v30 }
 0x59f   : > { %v4671_v27 = vpop.eup %4670 }
 0x5a0   : > { %1007 = vrot.lane.b32.xlu1 %v4671_v27, %s5431_s19 }
 0x5a3   : > { %v4673_v28 = vpop.eup %4672 }
 0x5a4   : > { %v4675_v33 = vpop.eup %4674  ;;  %1055 = vrot.lane.b32.xlu1 %v4673_v28, %s5431_s19 }
 0x5a5   : > { %1009 = vrot.lane.b32.xlu0 %v4675_v33, %s5431_s19  ;;  %v4677_v35 = vpop.eup %4676 }
 0x5a9   : > { %1057 = vrot.lane.b32.xlu0 %v4677_v35, %s5431_s19 }
 0x612   : > { %v1008_v38 = vpop.permute.xlu1 %1007 }
 0x613   : > { %v1013_v40 = vmul.f32 %v4663_v61, %v1008_v38 }
 0x615   : > { %1065 = vrot.lane.b32.xlu1 %v1013_v40, %s5432_s20 }
 0x616   : > { %v1056_v42 = vpop.permute.xlu1 %1055 }
 0x617   : > { %v1010_v44 = vpop.permute.xlu0 %1009  ;;  %v1061_v45 = vmul.f32 %v4665_v2, %v1056_v42 }
 0x618   : > { %v1014_v46 = vmul.f32 %v4667_v4, %v1010_v44 }
 0x619   : > { %1076 = vrot.lane.b32.xlu1 %v1061_v45, %s5433_s23 }
 0x61a   : > { %1067 = vrot.lane.b32.xlu0 %v1014_v46, %s5432_s20 }
 0x61b   : > { %v1058_v49 = vpop.permute.xlu0 %1057 }
 0x61c   : > { %v1062_v50 = vmul.f32 %v4669_v10, %v1058_v49 }
 0x61d   : > { %487 = vperm.xlu1 %4516, %v452_v47  }
 0x61e   : > { %1078 = vrot.lane.b32.xlu0 %v1062_v50, %s5433_s23 }
 0x621   : > { %517 = vperm.xlu1 %4516, %v458_v51  }
 0x622   : > { %492 = vperm.xlu0 %4517, %v453_v52  }
 0x625   : > { %522 = vperm.xlu1 %4516, %v459_v53  }
 0x626   : > { %4518 = vset.pattern.permute.xlu0 %v5429_v9 }
 0x627   : > { %582 = vperm.xlu0 %4518, %v452_v47  }
 0x629   : > { %4519 = vset.pattern.permute.xlu1 %v5429_v9 }
 0x62a   : > { %586 = vperm.xlu1 %4519, %v453_v52  }
 0x62b   : > { %610 = vperm.xlu0 %4518, %v459_v53  }
 0x62e   : > { %606 = vperm.xlu1 %4519, %v458_v51  }
 0x62f   : > { %4521 = vset.pattern.permute.xlu0 %v5427_v1 }
 0x632   : > { %4520 = vset.pattern.permute.xlu1 %v5427_v1 }
 0x687   : > { %v1066_v54 = vpop.permute.xlu1 %1065 }
 0x688   : > { %1072 = vst.msk [vmem:[#allocation3 + $0x10] sm:$0xff] %vm879_vm1, %v1066_v54 }
 0x68b   : > { %v1077_v55 = vpop.permute.xlu1 %1076 }
 0x68c   : > { %v1068_v56 = vpop.permute.xlu0 %1067  ;;  %1083 = vst.msk [vmem:[#allocation3 + $0x60] sm:$0xff] %vm891_vm2, %v1077_v55  ;;  %v1085_v58 = vsel %vm879_vm1, %v1066_v54, %v1077_v55 }
 0x68d   : > { %1073 = vst.msk [vmem:[#allocation3 + $0x18] sm:$0xff] %vm879_vm1, %v1068_v56 }
 0x690   : > { %v1079_v57 = vpop.permute.xlu0 %1078 }
 0x691   : > { %1084 = vst.msk [vmem:[#allocation3 + $0x68] sm:$0xff] %vm891_vm2, %v1079_v57  ;;  %v1086_v59 = vsel %vm879_vm1, %v1068_v56, %v1079_v57 }
 0x692   : > { %v1087_v60 = vpack.c.bf16 %v1086_v59, %v1085_v58 }
 0x694   : > { %4206 = vmatmul.mubr.msk.bf16.vlgmr.msra.gmra.mrb[0].mxu0 %vm721_vm3, %v1087_v60 }
 0x695   : > { %4221 = vmatprep.mubr.msk.bf16.mxu0 %vm5426_vm0, %v5425_v0 }
 0x69c   : > { %v488_v1 = vpop.permute.xlu1 %487 }
 0x69d   : > { %v553_v5 = vmul.f32 %v5776_v20, %v488_v1 }
 0x6a0   : > { %v518_v61 = vpop.permute.xlu1 %517 }
 0x6a1   : > { %v493_v63 = vpop.permute.xlu0 %492  ;;  %v559_v7 = vmul.f32 %v5776_v20, %v518_v61 }
 0x6a2   : > { %v554_v11 = vmul.f32 %v5776_v20, %v493_v63 }
 0x6a4   : > { %v523_v62 = vpop.permute.xlu1 %522 }
 0x6a5   : > { %v560_v17 = vmul.f32 %v5776_v20, %v523_v62 }
 0x6a6   : > { %v583_v3 = vpop.permute.xlu0 %582 }
 0x6a7   : > { %v637_v6 = vmul.f32 %v5778_v21, %v583_v3 }
 0x6a9   : > { %v587_v2 = vpop.permute.xlu1 %586  ;;  %v653_v13 = vadd.f32 %v637_v6, %v553_v5 }
 0x6aa   : > { %v638_v12 = vmul.f32 %v5778_v21, %v587_v2  ;;  %v611_v14 = vpop.permute.xlu0 %610 }
 0x6ab   : > { %v644_v19 = vmul.f32 %v5778_v21, %v611_v14  ;;  %v5937_v22 = vadd.f32 %v5786_v32, %v653_v13 }
 0x6ac   : > { %v654_v18 = vadd.f32 %v638_v12, %v554_v11 }
 0x6ad   : > { %v607_v4 = vpop.permute.xlu1 %606  ;;  %v660_v35 = vadd.f32 %v644_v19, %v560_v17 }
 0x6ae   : > { %v643_v10 = vmul.f32 %v5778_v21, %v607_v4  ;;  %v5944_v36 = vadd.f32 %v5786_v32, %v654_v18 }
 0x6af   : > { %v5949_v44 = vadd.f32 %v5786_v32, %v660_v35 }
 0x6b0   : > { %v659_v16 = vadd.f32 %v643_v10, %v559_v7 }
 0x6b2   : > { %v5940_v27 = vadd.f32 %v5786_v32, %v659_v16 }
 0x767   : > { %v1141_v29 = vpop.f32.mrb[0].mxu0 }
 0x768   : > { %v1151_v28 = vadd.f32 %v1141_v29, %v5937_v22  ;;  %v4207_v33 = vpop.f32.mrb[1].mxu0  ;;  %v1156_v38 = vadd.f32 %v1141_v29, %v5940_v27 }
 0x769   : > { %v1144_v31 = vpop.f32.mrb[2].mxu0 }
 0x76a   : > { %4678 = vtanh.f32 %v1151_v28  ;;  %v4208_v40 = vpop.f32.mrb[3].mxu0  ;;  %v1152_v42 = vadd.f32 %v1144_v31, %v5944_v36  ;;  %v1157_v45 = vadd.f32 %v1144_v31, %v5949_v44  ;;  %v4017_v51 = vmul.f32 -1.442695, %v1151_v28 }
 0x76b   : > { %4680 = vtanh.f32 %v1156_v38  ;;  %v4019_v52 = vmul.f32 -1.442695, %v1156_v38 }
 0x76c   : > { %4682 = vtanh.f32 %v1152_v42  ;;  %v4018_v53 = vmul.f32 -1.442695, %v1152_v42  ;;  %v4020_v54 = vmul.f32 -1.442695, %v1157_v45 }
 0x76d   : > { %4684 = vtanh.f32 %v1157_v45  ;;  %v4600_v45 = vld [vmem:[#allocation10] sm:$0xff]  }
 0x76e   : > { %4686 = vpow2.f32 %v4017_v51  ;;  %4210 = vmatpush3.bf16.msra.mxu1 %v4600_v45 }
 0x76f   : > { %4688 = vpow2.f32 %v4019_v52  ;;  %4211 = vmatprep.subr.bf16.mxu1 %v5425_v0 }
 0x770   : > { %4690 = vpow2.f32 %v4018_v53  ;;  %v454_v53 = vld [vmem:[%s5733_s26 + $0x30] sm:$0xff] }
 0x771   : > { %4692 = vpow2.f32 %v4020_v54 }
 0x774   : > { %v4679_v46 = vpop.eup %4678 }
 0x775   : > { %1176 = vrot.lane.b32.xlu1 %v4679_v46, %s5430_s16  ;;  %v4681_v47 = vpop.eup %4680 }
 0x776   : > { %v4683_v49 = vpop.eup %4682 }
 0x777   : > { %1178 = vrot.lane.b32.xlu0 %v4683_v49, %s5430_s16  ;;  %v4685_v50 = vpop.eup %4684 }
 0x778   : > { %v4687_v55 = vpop.eup %4686 }
 0x779   : > { %1224 = vrot.lane.b32.xlu1 %v4681_v47, %s5430_s16  ;;  %v1164_v56 = vadd.f32 1.0, %v4687_v55  ;;  %v4689_v57 = vpop.eup %4688 }
 0x77a   : > { %v4691_v58 = vpop.eup %4690  ;;  %v1212_v59 = vadd.f32 1.0, %v4689_v57  ;;  %v455_v57 = vld [vmem:[%s5733_s26 + $0x38] sm:$0xff] }
 0x77b   : > { %1226 = vrot.lane.b32.xlu0 %v4685_v50, %s5430_s16  ;;  %4694 = vrcp.f32 %v1164_v56  ;;  %v1165_v60 = vadd.f32 1.0, %v4691_v58  ;;  %v4693_v1 = vpop.eup %4692  ;;  %v456_v56 = vld [vmem:[%s5733_s26 + $0x40] sm:$0xff]  ;;  %v457_v58 = vld [vmem:[%s5733_s26 + $0x48] sm:$0xff] }
 0x77c   : > { %4696 = vrcp.f32 %v1212_v59  ;;  %v1213_v61 = vadd.f32 1.0, %v4693_v1 }
 0x77d   : > { %4698 = vrcp.f32 %v1165_v60 }
 0x77e   : > { %4700 = vrcp.f32 %v1213_v61 }
 0x785   : > { %v4695_v62 = vpop.eup %4694 }
 0x786   : > { %v4697_v3 = vpop.eup %4696  ;;  %v1172_v14 = vmul.f32 %v4695_v62, %v5886_v15 }
 0x787   : > { %v4699_v5 = vpop.eup %4698  ;;  %v1220_v18 = vmul.f32 %v4697_v3, %v5891_v23 }
 0x788   : > { %v4701_v11 = vpop.eup %4700  ;;  %v1173_v19 = vmul.f32 %v4699_v5, %v5893_v25 }
 0x789   : > { %v1221_v15 = vmul.f32 %v4701_v11, %v5898_v30  ;;  %v4601_v30 = vld [vmem:[#allocation10 + $0x8] sm:$0xff]  }
 0x78a   : > { %4212 = vmatpush3.bf16.msra.mxu1 %v4601_v30 }
 0x78b   : > { %4225 = vmatprep.subr.bf16.mxu1 %v5425_v0 }
 0x7e7   : > { %v1177_v63 = vpop.permute.xlu1 %1176 }
 0x7e8   : > { %v1182_v2 = vmul.f32 %v4695_v62, %v1177_v63 }
 0x7e9   : > { %v1179_v6 = vpop.permute.xlu0 %1178 }
 0x7ea   : > { %1186 = vrot.lane.b32.xlu1 %v1182_v2, %s5431_s19  ;;  %v1183_v10 = vmul.f32 %v4699_v5, %v1179_v6 }
 0x7eb   : > { %v1225_v4 = vpop.permute.xlu1 %1224 }
 0x7ec   : > { %v1230_v7 = vmul.f32 %v4697_v3, %v1225_v4  ;;  %1188 = vrot.lane.b32.xlu0 %v1183_v10, %s5431_s19 }
 0x7ed   : > { %v1227_v12 = vpop.permute.xlu0 %1226 }
 0x7ee   : > { %1234 = vrot.lane.b32.xlu1 %v1230_v7, %s5431_s19  ;;  %v1231_v13 = vmul.f32 %v4701_v11, %v1227_v12 }
 0x7f0   : > { %1236 = vrot.lane.b32.xlu0 %v1231_v13, %s5431_s19 }
 0x85c   : > { %v1187_v16 = vpop.permute.xlu1 %1186 }
 0x85d   : > { %v5961_v17 = vadd.f32 %v1187_v16, %v1172_v14 }
 0x85e   : > { %v1189_v28 = vpop.permute.xlu0 %1188 }
 0x85f   : > { %4702 = vtanh.f32 %v5961_v17  ;;  %v5968_v35 = vadd.f32 %v1189_v28, %v1173_v19 }
 0x860   : > { %v1235_v29 = vpop.permute.xlu1 %1234 }
 0x861   : > { %v5966_v33 = vadd.f32 %v1235_v29, %v1220_v18 }
 0x862   : > { %v1237_v31 = vpop.permute.xlu0 %1236 }
 0x863   : > { %4704 = vtanh.f32 %v5966_v33  ;;  %v5973_v38 = vadd.f32 %v1237_v31, %v1221_v15 }
 0x864   : > { %4706 = vtanh.f32 %v5968_v35 }
 0x865   : > { %4708 = vtanh.f32 %v5973_v38 }
 0x869   : > { %v4703_v23 = vpop.eup %4702 }
 0x86a   : > { %1198 = vrot.lane.b32.xlu1 %v4703_v23, %s5431_s19 }
 0x86d   : > { %v4705_v25 = vpop.eup %4704 }
 0x86e   : > { %v4707_v40 = vpop.eup %4706  ;;  %1246 = vrot.lane.b32.xlu1 %v4705_v25, %s5431_s19 }
 0x86f   : > { %1200 = vrot.lane.b32.xlu0 %v4707_v40, %s5431_s19  ;;  %v4709_v42 = vpop.eup %4708 }
 0x873   : > { %1248 = vrot.lane.b32.xlu0 %v4709_v42, %s5431_s19 }
 0x8dc   : > { %v1199_v46 = vpop.permute.xlu1 %1198 }
 0x8dd   : > { %v1204_v47 = vmul.f32 %v4695_v62, %v1199_v46 }
 0x8df   : > { %1256 = vrot.lane.b32.xlu1 %v1204_v47, %s5432_s20 }
 0x8e0   : > { %v1247_v49 = vpop.permute.xlu1 %1246 }
 0x8e1   : > { %v1201_v50 = vpop.permute.xlu0 %1200  ;;  %v1252_v51 = vmul.f32 %v4697_v3, %v1247_v49 }
 0x8e2   : > { %v1205_v52 = vmul.f32 %v4699_v5, %v1201_v50 }
 0x8e3   : > { %1267 = vrot.lane.b32.xlu1 %v1252_v51, %s5433_s23 }
 0x8e4   : > { %1258 = vrot.lane.b32.xlu0 %v1205_v52, %s5432_s20 }
 0x8e5   : > { %v1249_v54 = vpop.permute.xlu0 %1248 }
 0x8e6   : > { %v1253_v55 = vmul.f32 %v4701_v11, %v1249_v54 }
 0x8e7   : > { %497 = vperm.xlu1 %4520, %v454_v53  }
 0x8e8   : > { %1269 = vrot.lane.b32.xlu0 %v1253_v55, %s5433_s23 }
 0x8eb   : > { %507 = vperm.xlu1 %4520, %v456_v56  }
 0x8ec   : > { %502 = vperm.xlu0 %4521, %v455_v57  }
 0x8ef   : > { %512 = vperm.xlu1 %4520, %v457_v58  }
 0x8f0   : > { %4522 = vset.pattern.permute.xlu0 %v5429_v9 }
 0x8f1   : > { %590 = vperm.xlu0 %4522, %v454_v53  }
 0x8f3   : > { %4523 = vset.pattern.permute.xlu1 %v5429_v9 }
 0x8f4   : > { %594 = vperm.xlu1 %4523, %v455_v57  }
 0x8f5   : > { %602 = vperm.xlu0 %4522, %v457_v58  }
 0x8f8   : > { %598 = vperm.xlu1 %4523, %v456_v56  }
 0x951   : > { %v1257_v59 = vpop.permute.xlu1 %1256 }
 0x952   : > { %1263 = vst.msk [vmem:[#allocation3 + $0x20] sm:$0xff] %vm879_vm1, %v1257_v59 }
 0x955   : > { %v1268_v60 = vpop.permute.xlu1 %1267 }
 0x956   : > { %v1259_v1 = vpop.permute.xlu0 %1258  ;;  %1274 = vst.msk [vmem:[#allocation3 + $0x50] sm:$0xff] %vm891_vm2, %v1268_v60  ;;  %v1276_v62 = vsel %vm879_vm1, %v1257_v59, %v1268_v60 }
 0x957   : > { %1264 = vst.msk [vmem:[#allocation3 + $0x28] sm:$0xff] %vm879_vm1, %v1259_v1 }
 0x95a   : > { %v1270_v61 = vpop.permute.xlu0 %1269 }
 0x95b   : > { %1275 = vst.msk [vmem:[#allocation3 + $0x58] sm:$0xff] %vm891_vm2, %v1270_v61  ;;  %v1277_v63 = vsel %vm879_vm1, %v1259_v1, %v1270_v61 }
 0x95c   : > { %v1278_v9 = vpack.c.bf16 %v1277_v63, %v1276_v62 }
 0x95e   : > { %4214 = vmatmul.mubr.msk.bf16.vlgmr.msra.gmra.mrb[8].mxu1 %vm721_vm3, %v1278_v9 }
 0x95f   : > { %4229 = vmatprep.mubr.msk.bf16.mxu1 %vm5426_vm0, %v5425_v0 }
 0x966   : > { %v498_v2 = vpop.permute.xlu1 %497 }
 0x967   : > { %v555_v11 = vmul.f32 %v5776_v20, %v498_v2 }
 0x96a   : > { %v508_v3 = vpop.permute.xlu1 %507 }
 0x96b   : > { %v503_v5 = vpop.permute.xlu0 %502  ;;  %v557_v13 = vmul.f32 %v5776_v20, %v508_v3 }
 0x96c   : > { %v556_v16 = vmul.f32 %v5776_v20, %v503_v5 }
 0x96e   : > { %v513_v4 = vpop.permute.xlu1 %512 }
 0x96f   : > { %v558_v15 = vmul.f32 %v5776_v20, %v513_v4 }
 0x970   : > { %v591_v7 = vpop.permute.xlu0 %590 }
 0x971   : > { %v639_v12 = vmul.f32 %v5778_v21, %v591_v7 }
 0x973   : > { %v595_v6 = vpop.permute.xlu1 %594  ;;  %v655_v19 = vadd.f32 %v639_v12, %v555_v11 }
 0x974   : > { %v640_v18 = vmul.f32 %v5778_v21, %v595_v6  ;;  %v603_v29 = vpop.permute.xlu0 %602 }
 0x975   : > { %v642_v23 = vmul.f32 %v5778_v21, %v603_v29  ;;  %v6010_v25 = vadd.f32 %v5786_v32, %v655_v19 }
 0x976   : > { %v656_v31 = vadd.f32 %v640_v18, %v556_v16 }
 0x977   : > { %v599_v10 = vpop.permute.xlu1 %598  ;;  %v658_v46 = vadd.f32 %v642_v23, %v558_v15 }
 0x978   : > { %v641_v14 = vmul.f32 %v5778_v21, %v599_v10  ;;  %v6017_v47 = vadd.f32 %v5786_v32, %v656_v31 }
 0x979   : > { %v6022_v51 = vadd.f32 %v5786_v32, %v658_v46 }
 0x97a   : > { %v657_v28 = vadd.f32 %v641_v14, %v557_v13 }
 0x97c   : > { %v6013_v42 = vadd.f32 %v5786_v32, %v657_v28 }
 0xa31   : > { %v1332_v40 = vpop.f32.mrb[8].mxu1 }
 0xa32   : > { %v1342_v45 = vadd.f32 %v1332_v40, %v6010_v25  ;;  %v4215_v30 = vpop.f32.mrb[9].mxu1  ;;  %v1347_v20 = vadd.f32 %v1332_v40, %v6013_v42 }
 0xa33   : > { %v1335_v49 = vpop.f32.mrb[10].mxu1 }
 0xa34   : > { %4710 = vtanh.f32 %v1342_v45  ;;  %v4216_v50 = vpop.f32.mrb[11].mxu1  ;;  %v1343_v21 = vadd.f32 %v1335_v49, %v6017_v47  ;;  %v1348_v52 = vadd.f32 %v1335_v49, %v6022_v51  ;;  %v4024_v57 = vmul.f32 -1.442695, %v1342_v45 }
 0xa35   : > { %4712 = vtanh.f32 %v1347_v20  ;;  %v4026_v32 = vmul.f32 -1.442695, %v1347_v20 }
 0xa36   : > { %4714 = vtanh.f32 %v1343_v21  ;;  %v4025_v58 = vmul.f32 -1.442695, %v1343_v21  ;;  %v4027_v59 = vmul.f32 -1.442695, %v1348_v52 }
 0xa37   : > { %4716 = vtanh.f32 %v1348_v52  ;;  %v4602_v52 = vld [vmem:[#allocation10] sm:$0xff]  }
 0xa38   : > { %4718 = vpow2.f32 %v4024_v57  ;;  %4218 = vmatpush3.bf16.msra.mxu0 %v4602_v52 }
 0xa39   : > { %4720 = vpow2.f32 %v4026_v32  ;;  %4219 = vmatprep.subr.bf16.mxu0 %v5425_v0 }
 0xa3a   : > { %4722 = vpow2.f32 %v4025_v58 }
 0xa3b   : > { %4724 = vpow2.f32 %v4027_v59 }
 0xa3e   : > { %v4711_v53 = vpop.eup %4710 }
 0xa3f   : > { %1367 = vrot.lane.b32.xlu1 %v4711_v53, %s5430_s16  ;;  %v4713_v54 = vpop.eup %4712 }
 0xa40   : > { %v4715_v55 = vpop.eup %4714 }
 0xa41   : > { %1369 = vrot.lane.b32.xlu0 %v4715_v55, %s5430_s16  ;;  %v4717_v56 = vpop.eup %4716 }
 0xa42   : > { %v4719_v60 = vpop.eup %4718 }
 0xa43   : > { %1415 = vrot.lane.b32.xlu1 %v4713_v54, %s5430_s16  ;;  %v1355_v1 = vadd.f32 1.0, %v4719_v60  ;;  %v4721_v61 = vpop.eup %4720 }
 0xa44   : > { %v4723_v62 = vpop.eup %4722  ;;  %v1403_v63 = vadd.f32 1.0, %v4721_v61 }
 0xa45   : > { %1417 = vrot.lane.b32.xlu0 %v4717_v56, %s5430_s16  ;;  %4726 = vrcp.f32 %v1355_v1  ;;  %v1356_v9 = vadd.f32 1.0, %v4723_v62  ;;  %v4725_v2 = vpop.eup %4724 }
 0xa46   : > { %4728 = vrcp.f32 %v1403_v63  ;;  %v1404_v3 = vadd.f32 1.0, %v4725_v2 }
 0xa47   : > { %4730 = vrcp.f32 %v1356_v9 }
 0xa48   : > { %4732 = vrcp.f32 %v1404_v3 }
 0xa4f   : > { %v4727_v4 = vpop.eup %4726 }
 0xa50   : > { %v4729_v7 = vpop.eup %4728  ;;  %v1363_v29 = vmul.f32 %v4727_v4, %v5961_v17 }
 0xa51   : > { %v4731_v11 = vpop.eup %4730  ;;  %v1411_v31 = vmul.f32 %v4729_v7, %v5966_v33 }
 0xa52   : > { %v4733_v16 = vpop.eup %4732  ;;  %v1364_v23 = vmul.f32 %v4731_v11, %v5968_v35 }
 0xa53   : > { %v1412_v17 = vmul.f32 %v4733_v16, %v5973_v38  ;;  %v4603_v38 = vld [vmem:[#allocation10 + $0x8] sm:$0xff]  }
 0xa54   : > { %4220 = vmatpush3.bf16.msra.mxu0 %v4603_v38 }
 0xa55   : > { %4233 = vmatprep.subr.bf16.mxu0 %v5425_v0 }
 0xab1   : > { %v1368_v5 = vpop.permute.xlu1 %1367 }
 0xab2   : > { %v1373_v6 = vmul.f32 %v4727_v4, %v1368_v5 }
 0xab3   : > { %v1370_v12 = vpop.permute.xlu0 %1369 }
 0xab4   : > { %1377 = vrot.lane.b32.xlu1 %v1373_v6, %s5431_s19  ;;  %v1374_v14 = vmul.f32 %v4731_v11, %v1370_v12 }
 0xab5   : > { %v1416_v10 = vpop.permute.xlu1 %1415 }
 0xab6   : > { %v1421_v13 = vmul.f32 %v4729_v7, %v1416_v10  ;;  %1379 = vrot.lane.b32.xlu0 %v1374_v14, %s5431_s19 }
 0xab7   : > { %v1418_v18 = vpop.permute.xlu0 %1417 }
 0xab8   : > { %1425 = vrot.lane.b32.xlu1 %v1421_v13, %s5431_s19  ;;  %v1422_v19 = vmul.f32 %v4733_v16, %v1418_v18 }
 0xaba   : > { %1427 = vrot.lane.b32.xlu0 %v1422_v19, %s5431_s19 }
 0xb26   : > { %v1378_v28 = vpop.permute.xlu1 %1377 }
 0xb27   : > { %v6034_v15 = vadd.f32 %v1378_v28, %v1363_v29 }
 0xb28   : > { %v1380_v45 = vpop.permute.xlu0 %1379 }
 0xb29   : > { %4734 = vtanh.f32 %v6034_v15  ;;  %v6041_v46 = vadd.f32 %v1380_v45, %v1364_v23 }
 0xb2a   : > { %v1426_v40 = vpop.permute.xlu1 %1425 }
 0xb2b   : > { %v6039_v30 = vadd.f32 %v1426_v40, %v1411_v31 }
 0xb2c   : > { %v1428_v49 = vpop.permute.xlu0 %1427 }
 0xb2d   : > { %4736 = vtanh.f32 %v6039_v30  ;;  %v6046_v20 = vadd.f32 %v1428_v49, %v1412_v17 }
 0xb2e   : > { %4738 = vtanh.f32 %v6041_v46 }
 0xb2f   : > { %4740 = vtanh.f32 %v6046_v20 }
 0xb33   : > { %v4735_v33 = vpop.eup %4734 }
 0xb34   : > { %1389 = vrot.lane.b32.xlu1 %v4735_v33, %s5431_s19 }
 0xb37   : > { %v4737_v35 = vpop.eup %4736 }
 0xb38   : > { %v4739_v50 = vpop.eup %4738  ;;  %1437 = vrot.lane.b32.xlu1 %v4737_v35, %s5431_s19 }
 0xb39   : > { %1391 = vrot.lane.b32.xlu0 %v4739_v50, %s5431_s19  ;;  %v4741_v21 = vpop.eup %4740 }
 0xb3d   : > { %1439 = vrot.lane.b32.xlu0 %v4741_v21, %s5431_s19 }
 0xba6   : > { %v1390_v53 = vpop.permute.xlu1 %1389 }
 0xba7   : > { %v1395_v54 = vmul.f32 %v4727_v4, %v1390_v53 }
 0xba9   : > { %1447 = vrot.lane.b32.xlu1 %v1395_v54, %s5432_s20 }
 0xbaa   : > { %v1438_v55 = vpop.permute.xlu1 %1437 }
 0xbab   : > { %v1392_v56 = vpop.permute.xlu0 %1391  ;;  %v1443_v57 = vmul.f32 %v4729_v7, %v1438_v55 }
 0xbac   : > { %v1396_v32 = vmul.f32 %v4731_v11, %v1392_v56 }
 0xbad   : > { %1458 = vrot.lane.b32.xlu1 %v1443_v57, %s5433_s23 }
 0xbae   : > { %1449 = vrot.lane.b32.xlu0 %v1396_v32, %s5432_s20 }
 0xbaf   : > { %v1440_v58 = vpop.permute.xlu0 %1439 }
 0xbb0   : > { %v1444_v59 = vmul.f32 %v4733_v16, %v1440_v58 }
 0xbb2   : > { %1460 = vrot.lane.b32.xlu0 %v1444_v59, %s5433_s23 }
 0xc1b   : > { %v1448_v60 = vpop.permute.xlu1 %1447 }
 0xc1c   : > { %1454 = vst.msk [vmem:[#allocation3 + $0x30] sm:$0xff] %vm879_vm1, %v1448_v60 }
 0xc1f   : > { %v1459_v1 = vpop.permute.xlu1 %1458 }
 0xc20   : > { %v1450_v61 = vpop.permute.xlu0 %1449  ;;  %1465 = vst.msk [vmem:[#allocation3 + $0x40] sm:$0xff] %vm891_vm2, %v1459_v1  ;;  %v1467_v63 = vsel %vm879_vm1, %v1448_v60, %v1459_v1 }
 0xc21   : > { %1455 = vst.msk [vmem:[#allocation3 + $0x38] sm:$0xff] %vm879_vm1, %v1450_v61 }
 0xc24   : > { %v1461_v62 = vpop.permute.xlu0 %1460 }
 0xc25   : > { %1466 = vst.msk [vmem:[#allocation3 + $0x48] sm:$0xff] %vm891_vm2, %v1461_v62  ;;  %v1468_v9 = vsel %vm879_vm1, %v1450_v61, %v1461_v62 }
 0xc26   : > { %v1469_v2 = vpack.c.bf16 %v1468_v9, %v1467_v63 }
 0xc28   : > { %4222 = vmatmul.mubr.msk.bf16.vlgmr.msra.gmra.mrb[4].mxu0 %vm721_vm3, %v1469_v2 }
 0xc29   : > { %4237 = vmatprep.mubr.msk.bf16.mxu0 %vm5426_vm0, %v5425_v0 }
 0xcfb   : > { %v1523_v3 = vpop.f32.mrb[4].mxu0 }
 0xcfc   : > { %v1532_v4 = vadd.f32 %v1523_v3, %v6013_v42  ;;  %v4223_v5 = vpop.f32.mrb[5].mxu0  ;;  %v1536_v7 = vadd.f32 %v1523_v3, %v6010_v25 }
 0xcfd   : > { %v1526_v6 = vpop.f32.mrb[6].mxu0 }
 0xcfe   : > { %4742 = vtanh.f32 %v1532_v4  ;;  %v4224_v10 = vpop.f32.mrb[7].mxu0  ;;  %v1533_v11 = vadd.f32 %v1526_v6, %v6022_v51  ;;  %v1537_v12 = vadd.f32 %v1526_v6, %v6017_v47  ;;  %v4031_v25 = vmul.f32 -1.442695, %v1532_v4  ;;  %v4604_v6 = vld [vmem:[#allocation10] sm:$0xff]  }
 0xcff   : > { %4744 = vtanh.f32 %v1536_v7  ;;  %v4033_v51 = vmul.f32 -1.442695, %v1536_v7  ;;  %4226 = vmatpush3.bf16.msra.mxu1 %v4604_v6 }
 0xd00   : > { %4746 = vtanh.f32 %v1533_v11  ;;  %v4032_v18 = vmul.f32 -1.442695, %v1533_v11  ;;  %v4034_v47 = vmul.f32 -1.442695, %v1537_v12  ;;  %4227 = vmatprep.subr.bf16.mxu1 %v5425_v0 }
 0xd01   : > { %4748 = vtanh.f32 %v1537_v12 }
 0xd02   : > { %4750 = vpow2.f32 %v4031_v25 }
 0xd03   : > { %4752 = vpow2.f32 %v4033_v51 }
 0xd04   : > { %4754 = vpow2.f32 %v4032_v18 }
 0xd05   : > { %4756 = vpow2.f32 %v4034_v47 }
 0xd08   : > { %v4743_v13 = vpop.eup %4742 }
 0xd09   : > { %1556 = vrot.lane.b32.xlu1 %v4743_v13, %s5430_s16  ;;  %v4745_v14 = vpop.eup %4744 }
 0xd0a   : > { %v4747_v16 = vpop.eup %4746 }
 0xd0b   : > { %1558 = vrot.lane.b32.xlu0 %v4747_v16, %s5430_s16  ;;  %v4749_v42 = vpop.eup %4748 }
 0xd0c   : > { %v4751_v19 = vpop.eup %4750 }
 0xd0d   : > { %1604 = vrot.lane.b32.xlu1 %v4745_v14, %s5430_s16  ;;  %v1544_v29 = vadd.f32 1.0, %v4751_v19  ;;  %v4753_v28 = vpop.eup %4752 }
 0xd0e   : > { %v4755_v31 = vpop.eup %4754  ;;  %v1592_v23 = vadd.f32 1.0, %v4753_v28 }
 0xd0f   : > { %1606 = vrot.lane.b32.xlu0 %v4749_v42, %s5430_s16  ;;  %4758 = vrcp.f32 %v1544_v29  ;;  %v1545_v40 = vadd.f32 1.0, %v4755_v31  ;;  %v4757_v45 = vpop.eup %4756 }
 0xd10   : > { %4760 = vrcp.f32 %v1592_v23  ;;  %v1593_v17 = vadd.f32 1.0, %v4757_v45 }
 0xd11   : > { %4762 = vrcp.f32 %v1545_v40 }
 0xd12   : > { %4764 = vrcp.f32 %v1593_v17 }
 0xd19   : > { %v4759_v49 = vpop.eup %4758 }
 0xd1a   : > { %v4761_v50 = vpop.eup %4760  ;;  %v1552_v32 = vmul.f32 %v4759_v49, %v6034_v15 }
 0xd1b   : > { %v4763_v52 = vpop.eup %4762  ;;  %v1600_v60 = vmul.f32 %v4761_v50, %v6039_v30 }
 0xd1c   : > { %v4765_v55 = vpop.eup %4764  ;;  %v1553_v1 = vmul.f32 %v4763_v52, %v6041_v46 }
 0xd1d   : > { %v1601_v15 = vmul.f32 %v4765_v55, %v6046_v20  ;;  %v4605_v20 = vld [vmem:[#allocation10 + $0x8] sm:$0xff]  }
 0xd1e   : > { %4228 = vmatpush3.bf16.msra.mxu1 %v4605_v20 }
 0xd1f   : > { %4241 = vmatprep.subr.bf16.mxu1 %v5425_v0 }
 0xd7b   : > { %v1557_v33 = vpop.permute.xlu1 %1556 }
 0xd7c   : > { %v1562_v35 = vmul.f32 %v4759_v49, %v1557_v33 }
 0xd7d   : > { %v1559_v38 = vpop.permute.xlu0 %1558 }
 0xd7e   : > { %1566 = vrot.lane.b32.xlu1 %v1562_v35, %s5431_s19  ;;  %v1563_v54 = vmul.f32 %v4763_v52, %v1559_v38 }
 0xd7f   : > { %v1605_v21 = vpop.permute.xlu1 %1604 }
 0xd80   : > { %v1610_v53 = vmul.f32 %v4761_v50, %v1605_v21  ;;  %1568 = vrot.lane.b32.xlu0 %v1563_v54, %s5431_s19 }
 0xd81   : > { %v1607_v56 = vpop.permute.xlu0 %1606 }
 0xd82   : > { %1614 = vrot.lane.b32.xlu1 %v1610_v53, %s5431_s19  ;;  %v1611_v57 = vmul.f32 %v4765_v55, %v1607_v56 }
 0xd84   : > { %1616 = vrot.lane.b32.xlu0 %v1611_v57, %s5431_s19 }
 0xdf0   : > { %v1567_v58 = vpop.permute.xlu1 %1566 }
 0xdf1   : > { %v6081_v59 = vadd.f32 %v1567_v58, %v1552_v32 }
 0xdf2   : > { %v1569_v62 = vpop.permute.xlu0 %1568 }
 0xdf3   : > { %4766 = vtanh.f32 %v6081_v59  ;;  %v6088_v9 = vadd.f32 %v1569_v62, %v1553_v1 }
 0xdf4   : > { %v1615_v61 = vpop.permute.xlu1 %1614 }
 0xdf5   : > { %v6086_v63 = vadd.f32 %v1615_v61, %v1600_v60 }
 0xdf6   : > { %v1617_v2 = vpop.permute.xlu0 %1616 }
 0xdf7   : > { %4768 = vtanh.f32 %v6086_v63  ;;  %v6093_v3 = vadd.f32 %v1617_v2, %v1601_v15 }
 0xdf8   : > { %4770 = vtanh.f32 %v6088_v9 }
 0xdf9   : > { %4772 = vtanh.f32 %v6093_v3 }
 0xdfd   : > { %v4767_v30 = vpop.eup %4766 }
 0xdfe   : > { %1578 = vrot.lane.b32.xlu1 %v4767_v30, %s5431_s19 }
 0xe01   : > { %v4769_v46 = vpop.eup %4768 }
 0xe02   : > { %v4771_v4 = vpop.eup %4770  ;;  %1626 = vrot.lane.b32.xlu1 %v4769_v46, %s5431_s19 }
 0xe03   : > { %1580 = vrot.lane.b32.xlu0 %v4771_v4, %s5431_s19  ;;  %v4773_v5 = vpop.eup %4772 }
 0xe07   : > { %1628 = vrot.lane.b32.xlu0 %v4773_v5, %s5431_s19 }
 0xe70   : > { %v1579_v7 = vpop.permute.xlu1 %1578 }
 0xe71   : > { %v1584_v10 = vmul.f32 %v4759_v49, %v1579_v7 }
 0xe73   : > { %1636 = vrot.lane.b32.xlu1 %v1584_v10, %s5432_s20 }
 0xe74   : > { %v1627_v11 = vpop.permute.xlu1 %1626 }
 0xe75   : > { %v1581_v12 = vpop.permute.xlu0 %1580  ;;  %v1632_v13 = vmul.f32 %v4761_v50, %v1627_v11 }
 0xe76   : > { %v1585_v14 = vmul.f32 %v4763_v52, %v1581_v12 }
 0xe77   : > { %1646 = vrot.lane.b32.xlu1 %v1632_v13, %s5433_s23 }
 0xe78   : > { %1638 = vrot.lane.b32.xlu0 %v1585_v14, %s5432_s20 }
 0xe79   : > { %v1629_v16 = vpop.permute.xlu0 %1628 }
 0xe7a   : > { %v1633_v42 = vmul.f32 %v4765_v55, %v1629_v16 }
 0xe7c   : > { %1648 = vrot.lane.b32.xlu0 %v1633_v42, %s5433_s23 }
 0xee5   : > { %v1637_v25 = vpop.permute.xlu1 %1636 }
 0xee6   : > { %1642 = vst.msk [vmem:[#allocation3 + $0x40] sm:$0xff] %vm879_vm1, %v1637_v25 }
 0xee9   : > { %v1647_v51 = vpop.permute.xlu1 %1646 }
 0xeea   : > { %v1639_v18 = vpop.permute.xlu0 %1638  ;;  %1652 = vst.msk [vmem:[#allocation3 + $0x30] sm:$0xff] %vm891_vm2, %v1647_v51  ;;  %v1654_v19 = vsel %vm879_vm1, %v1637_v25, %v1647_v51 }
 0xeeb   : > { %1643 = vst.msk [vmem:[#allocation3 + $0x48] sm:$0xff] %vm879_vm1, %v1639_v18 }
 0xeee   : > { %v1649_v47 = vpop.permute.xlu0 %1648 }
 0xeef   : > { %1653 = vst.msk [vmem:[#allocation3 + $0x38] sm:$0xff] %vm891_vm2, %v1649_v47  ;;  %v1655_v29 = vsel %vm879_vm1, %v1639_v18, %v1649_v47 }
 0xef0   : > { %v1656_v28 = vpack.c.bf16 %v1655_v29, %v1654_v19 }
 0xef2   : > { %4230 = vmatmul.mubr.msk.bf16.vlgmr.msra.gmra.mrb[12].mxu1 %vm721_vm3, %v1656_v28  ;;  %v4606_v28 = vld [vmem:[#allocation10] sm:$0xff]  }
 0xef3   : > { %4245 = vmatprep.mubr.msk.bf16.mxu1 %vm5426_vm0, %v5425_v0  ;;  %4234 = vmatpush3.bf16.msra.mxu0 %v4606_v28 }
 0xef4   : > { %4235 = vmatprep.subr.bf16.mxu0 %v5425_v0 }
 0xfc5   : > { %v1710_v31 = vpop.f32.mrb[12].mxu1 }
 0xfc6   : > { %v1719_v23 = vadd.f32 %v1710_v31, %v5940_v27  ;;  %v4231_v40 = vpop.f32.mrb[13].mxu1  ;;  %v1723_v17 = vadd.f32 %v1710_v31, %v5937_v22 }
 0xfc7   : > { %v1713_v45 = vpop.f32.mrb[14].mxu1 }
 0xfc8   : > { %4774 = vtanh.f32 %v1719_v23  ;;  %v4232_v49 = vpop.f32.mrb[15].mxu1  ;;  %v1720_v33 = vadd.f32 %v1713_v45, %v5949_v44  ;;  %v1724_v35 = vadd.f32 %v1713_v45, %v5944_v36  ;;  %v4038_v22 = vmul.f32 -1.442695, %v1719_v23 }
 0xfc9   : > { %4776 = vtanh.f32 %v1723_v17  ;;  %v4040_v44 = vmul.f32 -1.442695, %v1723_v17 }
 0xfca   : > { %4778 = vtanh.f32 %v1720_v33  ;;  %v4039_v38 = vmul.f32 -1.442695, %v1720_v33  ;;  %v4041_v36 = vmul.f32 -1.442695, %v1724_v35 }
 0xfcb   : > { %4780 = vtanh.f32 %v1724_v35 }
 0xfcc   : > { %4782 = vpow2.f32 %v4038_v22 }
 0xfcd   : > { %4784 = vpow2.f32 %v4040_v44 }
 0xfce   : > { %4786 = vpow2.f32 %v4039_v38 }
 0xfcf   : > { %4788 = vpow2.f32 %v4041_v36 }
 0xfd2   : > { %v4775_v50 = vpop.eup %4774 }
 0xfd3   : > { %1743 = vrot.lane.b32.xlu1 %v4775_v50, %s5430_s16  ;;  %v4777_v21 = vpop.eup %4776 }
 0xfd4   : > { %v4779_v52 = vpop.eup %4778 }
 0xfd5   : > { %1745 = vrot.lane.b32.xlu0 %v4779_v52, %s5430_s16  ;;  %v4781_v27 = vpop.eup %4780 }
 0xfd6   : > { %v4783_v53 = vpop.eup %4782 }
 0xfd7   : > { %1791 = vrot.lane.b32.xlu1 %v4777_v21, %s5430_s16  ;;  %v1731_v54 = vadd.f32 1.0, %v4783_v53  ;;  %v4785_v55 = vpop.eup %4784 }
 0xfd8   : > { %v4787_v56 = vpop.eup %4786  ;;  %v1779_v57 = vadd.f32 1.0, %v4785_v55 }
 0xfd9   : > { %1793 = vrot.lane.b32.xlu0 %v4781_v27, %s5430_s16  ;;  %4790 = vrcp.f32 %v1731_v54  ;;  %v1732_v32 = vadd.f32 1.0, %v4787_v56  ;;  %v4789_v58 = vpop.eup %4788 }
 0xfda   : > { %4792 = vrcp.f32 %v1779_v57  ;;  %v1780_v60 = vadd.f32 1.0, %v4789_v58 }
 0xfdb   : > { %4794 = vrcp.f32 %v1732_v32 }
 0xfdc   : > { %4796 = vrcp.f32 %v1780_v60 }
 0xfe3   : > { %v4791_v1 = vpop.eup %4790 }
 0xfe4   : > { %v4793_v15 = vpop.eup %4792  ;;  %v1739_v10 = vmul.f32 %v4791_v1, %v6081_v59 }
 0xfe5   : > { %v4795_v30 = vpop.eup %4794  ;;  %v1787_v13 = vmul.f32 %v4793_v15, %v6086_v63 }
 0xfe6   : > { %v4797_v6 = vpop.eup %4796  ;;  %v1740_v14 = vmul.f32 %v4795_v30, %v6088_v9 }
 0xfe7   : > { %v1788_v59 = vmul.f32 %v4797_v6, %v6093_v3  ;;  %v4607_v3 = vld [vmem:[#allocation10 + $0x8] sm:$0xff]  }
 0xfe8   : > { %4236 = vmatpush3.bf16.msra.mxu0 %v4607_v3 }
0x1045   : > { %v1744_v61 = vpop.permute.xlu1 %1743 }
0x1046   : > { %v1749_v62 = vmul.f32 %v4791_v1, %v1744_v61 }
0x1047   : > { %v1746_v46 = vpop.permute.xlu0 %1745 }
0x1048   : > { %1753 = vrot.lane.b32.xlu1 %v1749_v62, %s5431_s19  ;;  %v1750_v5 = vmul.f32 %v4795_v30, %v1746_v46 }
0x1049   : > { %v1792_v2 = vpop.permute.xlu1 %1791 }
0x104a   : > { %v1797_v4 = vmul.f32 %v4793_v15, %v1792_v2  ;;  %1755 = vrot.lane.b32.xlu0 %v1750_v5, %s5431_s19 }
0x104b   : > { %v1794_v20 = vpop.permute.xlu0 %1793 }
0x104c   : > { %1801 = vrot.lane.b32.xlu1 %v1797_v4, %s5431_s19  ;;  %v1798_v7 = vmul.f32 %v4797_v6, %v1794_v20 }
0x104e   : > { %1803 = vrot.lane.b32.xlu0 %v1798_v7, %s5431_s19 }
0x10ba   : > { %v1754_v11 = vpop.permute.xlu1 %1753 }
0x10bb   : > { %v6128_v12 = vadd.f32 %v1754_v11, %v1739_v10 }
0x10bc   : > { %v1756_v42 = vpop.permute.xlu0 %1755 }
0x10bd   : > { %4798 = vtanh.f32 %v6128_v12  ;;  %v6135_v51 = vadd.f32 %v1756_v42, %v1740_v14 }
0x10be   : > { %v1802_v16 = vpop.permute.xlu1 %1801 }
0x10bf   : > { %v6133_v25 = vadd.f32 %v1802_v16, %v1787_v13 }
0x10c0   : > { %v1804_v18 = vpop.permute.xlu0 %1803 }
0x10c1   : > { %4800 = vtanh.f32 %v6133_v25  ;;  %v6140_v47 = vadd.f32 %v1804_v18, %v1788_v59 }
0x10c2   : > { %4802 = vtanh.f32 %v6135_v51 }
0x10c3   : > { %4804 = vtanh.f32 %v6140_v47 }
0x10c7   : > { %v4799_v63 = vpop.eup %4798 }
0x10c8   : > { %1765 = vrot.lane.b32.xlu1 %v4799_v63, %s5431_s19 }
0x10cb   : > { %v4801_v9 = vpop.eup %4800 }
0x10cc   : > { %v4803_v19 = vpop.eup %4802  ;;  %1813 = vrot.lane.b32.xlu1 %v4801_v9, %s5431_s19 }
0x10cd   : > { %1767 = vrot.lane.b32.xlu0 %v4803_v19, %s5431_s19  ;;  %v4805_v29 = vpop.eup %4804 }
0x10d1   : > { %1815 = vrot.lane.b32.xlu0 %v4805_v29, %s5431_s19 }
0x113a   : > { %v1766_v31 = vpop.permute.xlu1 %1765 }
0x113b   : > { %v1771_v23 = vmul.f32 %v4791_v1, %v1766_v31 }
0x113d   : > { %1823 = vrot.lane.b32.xlu1 %v1771_v23, %s5432_s20 }
0x113e   : > { %v1814_v40 = vpop.permute.xlu1 %1813 }
0x113f   : > { %v1768_v45 = vpop.permute.xlu0 %1767  ;;  %v1819_v17 = vmul.f32 %v4793_v15, %v1814_v40 }
0x1140   : > { %v1772_v49 = vmul.f32 %v4795_v30, %v1768_v45 }
0x1141   : > { %1833 = vrot.lane.b32.xlu1 %v1819_v17, %s5433_s23 }
0x1142   : > { %1825 = vrot.lane.b32.xlu0 %v1772_v49, %s5432_s20 }
0x1143   : > { %v1816_v33 = vpop.permute.xlu0 %1815 }
0x1144   : > { %v1820_v35 = vmul.f32 %v4797_v6, %v1816_v33 }
0x1146   : > { %1835 = vrot.lane.b32.xlu0 %v1820_v35, %s5433_s23 }
0x11af   : > { %v1824_v50 = vpop.permute.xlu1 %1823 }
0x11b0   : > { %1829 = vst.msk [vmem:[#allocation3 + $0x50] sm:$0xff] %vm879_vm1, %v1824_v50 }
0x11b3   : > { %v1834_v21 = vpop.permute.xlu1 %1833 }
0x11b4   : > { %v1826_v52 = vpop.permute.xlu0 %1825  ;;  %1839 = vst.msk [vmem:[#allocation3 + $0x20] sm:$0xff] %vm891_vm2, %v1834_v21  ;;  %v1841_v22 = vsel %vm879_vm1, %v1824_v50, %v1834_v21 }
0x11b5   : > { %1830 = vst.msk [vmem:[#allocation3 + $0x58] sm:$0xff] %vm879_vm1, %v1826_v52 }
0x11b8   : > { %v1836_v27 = vpop.permute.xlu0 %1835 }
0x11b9   : > { %1840 = vst.msk [vmem:[#allocation3 + $0x28] sm:$0xff] %vm891_vm2, %v1836_v27  ;;  %v1842_v44 = vsel %vm879_vm1, %v1826_v52, %v1836_v27  ;;  %v4608_v52 = vld [vmem:[#allocation10] sm:$0xff]  }
0x11ba   : > { %v1843_v38 = vpack.c.bf16 %v1842_v44, %v1841_v22  ;;  %4242 = vmatpush3.bf16.msra.mxu1 %v4608_v52 }
0x11bb   : > { %4243 = vmatprep.subr.bf16.mxu1 %v5425_v0 }
0x11bc   : > { %4238 = vmatmul.mubr.msk.bf16.vlgmr.msra.gmra.mrb[8].mxu0 %vm721_vm3, %v1843_v38 }
0x128f   : > { %v1897_v36 = vpop.f32.mrb[8].mxu0 }
0x1290   : > { %v1906_v53 = vadd.f32 %v1897_v36, %v5865_v26  ;;  %v4239_v54 = vpop.f32.mrb[9].mxu0  ;;  %v1910_v56 = vadd.f32 %v1897_v36, %v5862_v24 }
0x1291   : > { %v1900_v55 = vpop.f32.mrb[10].mxu0 }
0x1292   : > { %4806 = vtanh.f32 %v1906_v53  ;;  %v4240_v57 = vpop.f32.mrb[11].mxu0  ;;  %v1907_v32 = vadd.f32 %v1900_v55, %v5874_v41  ;;  %v1911_v58 = vadd.f32 %v1900_v55, %v5869_v34  ;;  %v4045_v24 = vmul.f32 -1.442695, %v1906_v53 }
0x1293   : > { %4808 = vtanh.f32 %v1910_v56  ;;  %v4047_v41 = vmul.f32 -1.442695, %v1910_v56 }
0x1294   : > { %4810 = vtanh.f32 %v1907_v32  ;;  %v4046_v62 = vmul.f32 -1.442695, %v1907_v32  ;;  %v4048_v34 = vmul.f32 -1.442695, %v1911_v58 }
0x1295   : > { %4812 = vtanh.f32 %v1911_v58 }
0x1296   : > { %4814 = vpow2.f32 %v4045_v24 }
0x1297   : > { %4816 = vpow2.f32 %v4047_v41 }
0x1298   : > { %4818 = vpow2.f32 %v4046_v62 }
0x1299   : > { %4820 = vpow2.f32 %v4048_v34 }
0x129c   : > { %v4807_v60 = vpop.eup %4806 }
0x129d   : > { %1930 = vrot.lane.b32.xlu1 %v4807_v60, %s5430_s16  ;;  %v4809_v1 = vpop.eup %4808 }
0x129e   : > { %v4811_v61 = vpop.eup %4810 }
0x129f   : > { %1932 = vrot.lane.b32.xlu0 %v4811_v61, %s5430_s16  ;;  %v4813_v26 = vpop.eup %4812 }
0x12a0   : > { %v4815_v15 = vpop.eup %4814 }
0x12a1   : > { %1978 = vrot.lane.b32.xlu1 %v4809_v1, %s5430_s16  ;;  %v1918_v2 = vadd.f32 1.0, %v4815_v15  ;;  %v4817_v30 = vpop.eup %4816 }
0x12a2   : > { %v4819_v46 = vpop.eup %4818  ;;  %v1966_v4 = vadd.f32 1.0, %v4817_v30 }
0x12a3   : > { %1980 = vrot.lane.b32.xlu0 %v4813_v26, %s5430_s16  ;;  %4822 = vrcp.f32 %v1918_v2  ;;  %v1919_v5 = vadd.f32 1.0, %v4819_v46  ;;  %v4821_v6 = vpop.eup %4820 }
0x12a4   : > { %4824 = vrcp.f32 %v1966_v4  ;;  %v1967_v20 = vadd.f32 1.0, %v4821_v6 }
0x12a5   : > { %4826 = vrcp.f32 %v1919_v5 }
0x12a6   : > { %4828 = vrcp.f32 %v1967_v20 }
0x12ad   : > { %v4823_v7 = vpop.eup %4822 }
0x12ae   : > { %v4825_v13 = vpop.eup %4824  ;;  %v1926_v29 = vmul.f32 %v4823_v7, %v6128_v12 }
0x12af   : > { %v4827_v16 = vpop.eup %4826  ;;  %v1974_v31 = vmul.f32 %v4825_v13, %v6133_v25 }
0x12b0   : > { %v4829_v63 = vpop.eup %4828  ;;  %v1927_v23 = vmul.f32 %v4827_v16, %v6135_v51 }
0x12b1   : > { %v1975_v12 = vmul.f32 %v4829_v63, %v6140_v47  ;;  %v4609_v47 = vld [vmem:[#allocation10 + $0x8] sm:$0xff]  }
0x12b2   : > { %4244 = vmatpush3.bf16.msra.mxu1 %v4609_v47 }
0x12b3   : > { %4269 = vmatprep.subr.bf16.mxu1 %v5425_v0 }
0x130f   : > { %v1931_v10 = vpop.permute.xlu1 %1930 }
0x1310   : > { %v1936_v11 = vmul.f32 %v4823_v7, %v1931_v10 }
0x1311   : > { %v1933_v42 = vpop.permute.xlu0 %1932 }
0x1312   : > { %1940 = vrot.lane.b32.xlu1 %v1936_v11, %s5431_s19  ;;  %v1937_v18 = vmul.f32 %v4827_v16, %v1933_v42 }
0x1313   : > { %v1979_v14 = vpop.permute.xlu1 %1978 }
0x1314   : > { %v1984_v59 = vmul.f32 %v4825_v13, %v1979_v14  ;;  %1942 = vrot.lane.b32.xlu0 %v1937_v18, %s5431_s19 }
0x1315   : > { %v1981_v9 = vpop.permute.xlu0 %1980 }
0x1316   : > { %1988 = vrot.lane.b32.xlu1 %v1984_v59, %s5431_s19  ;;  %v1985_v19 = vmul.f32 %v4829_v63, %v1981_v9 }
0x1318   : > { %1990 = vrot.lane.b32.xlu0 %v1985_v19, %s5431_s19 }
0x1384   : > { %v1941_v28 = vpop.permute.xlu1 %1940 }
0x1385   : > { %v6172_v3 = vadd.f32 %v1941_v28, %v1926_v29 }
0x1386   : > { %v1943_v45 = vpop.permute.xlu0 %1942 }
0x1387   : > { %4830 = vtanh.f32 %v6172_v3  ;;  %v6179_v49 = vadd.f32 %v1943_v45, %v1927_v23 }
0x1388   : > { %v1989_v40 = vpop.permute.xlu1 %1988 }
0x1389   : > { %v6177_v17 = vadd.f32 %v1989_v40, %v1974_v31 }
0x138a   : > { %v1991_v33 = vpop.permute.xlu0 %1990 }
0x138b   : > { %4832 = vtanh.f32 %v6177_v17  ;;  %v6184_v35 = vadd.f32 %v1991_v33, %v1975_v12 }
0x138c   : > { %4834 = vtanh.f32 %v6179_v49 }
0x138d   : > { %4836 = vtanh.f32 %v6184_v35 }
0x1391   : > { %v4831_v25 = vpop.eup %4830 }
0x1392   : > { %1952 = vrot.lane.b32.xlu1 %v4831_v25, %s5431_s19 }
0x1395   : > { %v4833_v51 = vpop.eup %4832 }
0x1396   : > { %v4835_v50 = vpop.eup %4834  ;;  %2000 = vrot.lane.b32.xlu1 %v4833_v51, %s5431_s19 }
0x1397   : > { %1954 = vrot.lane.b32.xlu0 %v4835_v50, %s5431_s19  ;;  %v4837_v21 = vpop.eup %4836 }
0x139b   : > { %2002 = vrot.lane.b32.xlu0 %v4837_v21, %s5431_s19 }
0x1404   : > { %v1953_v27 = vpop.permute.xlu1 %1952 }
0x1405   : > { %v1958_v22 = vmul.f32 %v4823_v7, %v1953_v27 }
0x1407   : > { %2010 = vrot.lane.b32.xlu1 %v1958_v22, %s5432_s20 }
0x1408   : > { %v2001_v44 = vpop.permute.xlu1 %2000 }
0x1409   : > { %v1955_v38 = vpop.permute.xlu0 %1954  ;;  %v2006_v36 = vmul.f32 %v4825_v13, %v2001_v44 }
0x140a   : > { %v1959_v53 = vmul.f32 %v4827_v16, %v1955_v38 }
0x140b   : > { %2020 = vrot.lane.b32.xlu1 %v2006_v36, %s5433_s23 }
0x140c   : > { %2012 = vrot.lane.b32.xlu0 %v1959_v53, %s5432_s20 }
0x140d   : > { %v2003_v54 = vpop.permute.xlu0 %2002 }
0x140e   : > { %v2007_v55 = vmul.f32 %v4829_v63, %v2003_v54  ;;  %v4610_v54 = vld [vmem:[#allocation12] sm:$0xff]  }
0x140f   : > { %4249 = vmatprep.subr.bf16.mxu0 %v4610_v54 }
0x1410   : > { %2022 = vrot.lane.b32.xlu0 %v2007_v55, %s5433_s23  ;;  %4250 = vmatpush3.bf16.msra.mxu0 %v4610_v54 }
0x1479   : > { %v2011_v56 = vpop.permute.xlu1 %2010 }
0x147a   : > { %2016 = vst.msk [vmem:[#allocation3 + $0x60] sm:$0xff] %vm879_vm1, %v2011_v56 }
0x147d   : > { %v2021_v57 = vpop.permute.xlu1 %2020 }
0x147e   : > { %v2013_v32 = vpop.permute.xlu0 %2012  ;;  %2026 = vst.msk [vmem:[#allocation3 + $0x10] sm:$0xff] %vm891_vm2, %v2021_v57  ;;  %v2028_v60 = vsel %vm879_vm1, %v2011_v56, %v2021_v57  ;;  %v6226_v56 = vld [vmem:[#allocation15] sm:$0xff]  }
0x147f   : > { %2017 = vst.msk [vmem:[#allocation3 + $0x68] sm:$0xff] %vm879_vm1, %v2013_v32 }
0x1482   : > { %v2023_v58 = vpop.permute.xlu0 %2022 }
0x1483   : > { %2027 = vst.msk [vmem:[#allocation3 + $0x18] sm:$0xff] %vm891_vm2, %v2023_v58  ;;  %v2029_v1 = vsel %vm879_vm1, %v2013_v32, %v2023_v58 }
0x1484   : > { %v2030_v61 = vpack.c.bf16 %v2029_v1, %v2028_v60  ;;  %v6232_v60 = vld [vmem:[#allocation15 + $0x8] sm:$0xff]  }
0x1486   : > { %4246 = vmatmul.mubr.msk.bf16.vlgmr.msra.gmra.mrb[16].mxu1 %vm721_vm3, %v2030_v61 }
0x1487   : > { %4273 = vmatprep.mubr.msk.bf16.mxu1 %vm5426_vm0, %v5425_v0  ;;  %4270 = vmatpush3.bf16.msra.mxu1 %v6226_v56 }
0x1488   : > { %4271 = vmatprep.subr.bf16.mxu1 %v5425_v0 }
0x148b   : > { %4272 = vmatpush3.bf16.msra.mxu1 %v6232_v60 }
0x148c   : > { %4277 = vmatprep.subr.bf16.mxu1 %v5425_v0 }
0x148e   : > { %4274 = vmatmul.mubr.bf16.vlgmr.msra.gmra.mrb[20].mxu1 %v5428_v8 }
0x148f   : > { %4278 = vmatpush3.bf16.msra.mxu1 %v6226_v56  ;;  %4281 = vmatprep.mubr.msk.bf16.mxu1 %vm5426_vm0, %v5425_v0 }
0x1490   : > { %4279 = vmatprep.subr.bf16.mxu1 %v5425_v0 }
0x1493   : > { %4280 = vmatpush3.bf16.msra.mxu1 %v6232_v60 }
0x1494   : > { %4285 = vmatprep.subr.bf16.mxu1 %v5425_v0 }
0x1559   : > { %v2084_v26 = vpop.f32.mrb[16].mxu1 }
0x155a   : > { %v2097_v24 = vadd.f32 %v2084_v26, %v5791_v37  ;;  %v4247_v41 = vpop.f32.mrb[17].mxu1  ;;  %v2093_v15 = vadd.f32 %v2084_v26, %v5794_v39 }
0x155b   : > { %v2087_v62 = vpop.f32.mrb[18].mxu1 }
0x155c   : > { %v4248_v34 = vpop.f32.mrb[19].mxu1  ;;  %4838 = vtanh.f32 %v2097_v24  ;;  %v2098_v2 = vadd.f32 %v2087_v62, %v5798_v43  ;;  %v2094_v30 = vadd.f32 %v2087_v62, %v5803_v48  ;;  %v4054_v39 = vmul.f32 -1.442695, %v2097_v24 }
0x155d   : > { %4840 = vtanh.f32 %v2093_v15  ;;  %v4052_v6 = vmul.f32 -1.442695, %v2093_v15  ;;  %v2218_v15 = vld [vmem:[#allocation3 + $0x18] sm:$0xff] }
0x155e   : > { %4842 = vtanh.f32 %v2098_v2  ;;  %v4055_v43 = vmul.f32 -1.442695, %v2098_v2  ;;  %v4053_v48 = vmul.f32 -1.442695, %v2094_v30 }
0x155f   : > { %4844 = vtanh.f32 %v2094_v30 }
0x1560   : > { %4846 = vpow2.f32 %v4054_v39  ;;  %v2219_v39 = vld [vmem:[#allocation3 + $0x20] sm:$0xff] }
0x1561   : > { %4848 = vpow2.f32 %v4052_v6 }
0x1562   : > { %4850 = vpow2.f32 %v4055_v43  ;;  %v2222_v43 = vld [vmem:[#allocation3 + $0x38] sm:$0xff] }
0x1563   : > { %4852 = vpow2.f32 %v4053_v48  ;;  %v2224_v48 = vld [vmem:[#allocation3 + $0x48] sm:$0xff] }
0x1566   : > { %v4839_v46 = vpop.eup %4838 }
0x1567   : > { %2165 = vrot.lane.b32.xlu1 %v4839_v46, %s5430_s16  ;;  %v4841_v4 = vpop.eup %4840  ;;  %v2220_v46 = vld [vmem:[#allocation3 + $0x28] sm:$0xff] }
0x1568   : > { %v4843_v37 = vpop.eup %4842  ;;  %v2233_v6 = vpack.c.bf16 %v2220_v46, %v2219_v39 }
0x1569   : > { %2167 = vrot.lane.b32.xlu0 %v4843_v37, %s5430_s16  ;;  %v4845_v5 = vpop.eup %4844  ;;  %v2217_v37 = vld [vmem:[#allocation3 + $0x10] sm:$0xff] }
0x156a   : > { %v4847_v20 = vpop.eup %4846 }
0x156b   : > { %2117 = vrot.lane.b32.xlu1 %v4841_v4, %s5430_s16  ;;  %v2153_v7 = vadd.f32 1.0, %v4847_v20  ;;  %v4849_v10 = vpop.eup %4848  ;;  %v2221_v20 = vld [vmem:[#allocation3 + $0x30] sm:$0xff] }
0x156c   : > { %v4851_v11 = vpop.eup %4850  ;;  %v2105_v13 = vadd.f32 1.0, %v4849_v10  ;;  %v2223_v10 = vld [vmem:[#allocation3 + $0x40] sm:$0xff] }
0x156d   : > { %2119 = vrot.lane.b32.xlu0 %v4845_v5, %s5430_s16  ;;  %4854 = vrcp.f32 %v2153_v7  ;;  %v2154_v14 = vadd.f32 1.0, %v4851_v11  ;;  %v4853_v16 = vpop.eup %4852  ;;  %v2232_v5 = vpack.c.bf16 %v2218_v15, %v2217_v37  ;;  %v2234_v7 = vpack.c.bf16 %v2222_v43, %v2221_v20 }
0x156e   : > { %4856 = vrcp.f32 %v2105_v13  ;;  %v2106_v42 = vadd.f32 1.0, %v4853_v16  ;;  %v2235_v11 = vpack.c.bf16 %v2224_v48, %v2223_v10  ;;  %v2226_v13 = vld [vmem:[#allocation3 + $0x58] sm:$0xff]  ;;  %v2225_v16 = vld [vmem:[#allocation3 + $0x50] sm:$0xff] }
0x156f   : > { %4858 = vrcp.f32 %v2154_v14  ;;  %v2228_v14 = vld [vmem:[#allocation3 + $0x68] sm:$0xff] }
0x1570   : > { %4860 = vrcp.f32 %v2106_v42  ;;  %v2236_v42 = vpack.c.bf16 %v2226_v13, %v2225_v16 }
0x1577   : > { %v4855_v59 = vpop.eup %4854 }
0x1578   : > { %v4857_v9 = vpop.eup %4856  ;;  %v2161_v33 = vmul.f32 %v4855_v59, %v6177_v17 }
0x1579   : > { %v4859_v28 = vpop.eup %4858  ;;  %v2113_v50 = vmul.f32 %v4857_v9, %v6172_v3 }
0x157a   : > { %v4861_v40 = vpop.eup %4860  ;;  %v2162_v52 = vmul.f32 %v4859_v28, %v6184_v35 }
0x157b   : > { %v2114_v44 = vmul.f32 %v4861_v40, %v6179_v49  ;;  %v4611_v49 = vld [vmem:[#allocation12 + $0x8] sm:$0xff]  }
0x157c   : > { %4251 = vmatprep.subr.bf16.mxu0 %v4611_v49 }
0x157d   : > { %4252 = vmatpush3.bf16.msra.mxu0 %v4611_v49 }
0x157e   : > { %4301 = vmatprep.subr.bf16.mxu0 %v5425_v0 }
0x15d9   : > { %v2166_v18 = vpop.permute.xlu1 %2165 }
0x15da   : > { %v2171_v63 = vmul.f32 %v4855_v59, %v2166_v18 }
0x15db   : > { %v2168_v31 = vpop.permute.xlu0 %2167 }
0x15dc   : > { %2175 = vrot.lane.b32.xlu1 %v2171_v63, %s5431_s19  ;;  %v2172_v23 = vmul.f32 %v4859_v28, %v2168_v31 }
0x15dd   : > { %v2118_v19 = vpop.permute.xlu1 %2117 }
0x15de   : > { %v2123_v29 = vmul.f32 %v4857_v9, %v2118_v19  ;;  %2177 = vrot.lane.b32.xlu0 %v2172_v23, %s5431_s19 }
0x15df   : > { %v2120_v45 = vpop.permute.xlu0 %2119 }
0x15e0   : > { %2127 = vrot.lane.b32.xlu1 %v2123_v29, %s5431_s19  ;;  %v2124_v12 = vmul.f32 %v4861_v40, %v2120_v45  ;;  %v2449_v29 = vpop.f32.mrb[20].mxu1 }
0x15e2   : > { %2129 = vrot.lane.b32.xlu0 %v2124_v12, %s5431_s19 }
0x164e   : > { %v2176_v25 = vpop.permute.xlu1 %2175 }
0x164f   : > { %v2181_v51 = vadd.f32 %v2176_v25, %v2161_v33 }
0x1650   : > { %v2178_v27 = vpop.permute.xlu0 %2177 }
0x1651   : > { %4862 = vtanh.f32 %v2181_v51  ;;  %v2182_v22 = vadd.f32 %v2178_v27, %v2162_v52 }
0x1652   : > { %v2128_v21 = vpop.permute.xlu1 %2127 }
0x1653   : > { %v2133_v47 = vadd.f32 %v2128_v21, %v2113_v50 }
0x1654   : > { %v2130_v38 = vpop.permute.xlu0 %2129 }
0x1655   : > { %4864 = vtanh.f32 %v2133_v47  ;;  %v2134_v36 = vadd.f32 %v2130_v38, %v2114_v44 }
0x1656   : > { %4866 = vtanh.f32 %v2182_v22 }
0x1657   : > { %4868 = vtanh.f32 %v2134_v36 }
0x165b   : > { %v4863_v53 = vpop.eup %4862 }
0x165c   : > { %2187 = vrot.lane.b32.xlu1 %v4863_v53, %s5431_s19 }
0x165f   : > { %v4865_v17 = vpop.eup %4864 }
0x1660   : > { %2139 = vrot.lane.b32.xlu1 %v4865_v17, %s5431_s19  ;;  %v4867_v3 = vpop.eup %4866 }
0x1661   : > { %2189 = vrot.lane.b32.xlu0 %v4867_v3, %s5431_s19  ;;  %v4869_v35 = vpop.eup %4868 }
0x1665   : > { %2141 = vrot.lane.b32.xlu0 %v4869_v35, %s5431_s19 }
0x16ce   : > { %v2188_v55 = vpop.permute.xlu1 %2187 }
0x16cf   : > { %v2193_v57 = vmul.f32 %v4855_v59, %v2188_v55  ;;  %v2227_v59 = vld [vmem:[#allocation3 + $0x60] sm:$0xff] }
0x16d0   : > { %v2237_v18 = vpack.c.bf16 %v2228_v14, %v2227_v59 }
0x16d1   : > { %2207 = vrot.lane.b32.xlu1 %v2193_v57, %s5433_s23 }
0x16d2   : > { %v2140_v32 = vpop.permute.xlu1 %2139 }
0x16d3   : > { %v2145_v58 = vmul.f32 %v4857_v9, %v2140_v32  ;;  %v2190_v1 = vpop.permute.xlu0 %2189 }
0x16d4   : > { %v2194_v61 = vmul.f32 %v4859_v28, %v2190_v1  ;;  %v4275_v28 = vpop.f32.mrb[21].mxu1 }
0x16d5   : > { %2197 = vrot.lane.b32.xlu1 %v2145_v58, %s5432_s20  ;;  %v2452_v31 = vpop.f32.mrb[22].mxu1 }
0x16d6   : > { %2209 = vrot.lane.b32.xlu0 %v2194_v61, %s5433_s23  ;;  %v4276_v23 = vpop.f32.mrb[23].mxu1 }
0x16d7   : > { %v2142_v26 = vpop.permute.xlu0 %2141 }
0x16d8   : > { %v2146_v24 = vmul.f32 %v4861_v40, %v2142_v26  ;;  %v4056_v40 = vld [vmem:[#allocation13] ss:$0 sm:$0xff] }
0x16da   : > { %2199 = vrot.lane.b32.xlu0 %v2146_v24, %s5432_s20 }
0x1743   : > { %v6246_v41 = vpop.permute.xlu1 %2207 }
0x1744   : > { %2213 = vst.msk [vmem:[#allocation3] sm:$0xff] %vm891_vm2, %v6246_v41 }
0x1747   : > { %v6250_v8 = vpop.permute.xlu1 %2197 }
0x1748   : > { %2203 = vst.msk [vmem:[#allocation3 + $0x70] sm:$0xff] %vm879_vm1, %v6250_v8  ;;  %v6254_v62 = vpop.permute.xlu0 %2209 }
0x1749   : > { %2214 = vst.msk [vmem:[#allocation3 + $0x8] sm:$0xff] %vm891_vm2, %v6254_v62 }
0x174b   : > { %v2215_v2 = vld [vmem:[#allocation3] sm:$0xff] }
0x174c   : > { %v6258_v34 = vpop.permute.xlu0 %2199 }
0x174d   : > { %2204 = vst.msk [vmem:[#allocation3 + $0x78] sm:$0xff] %vm879_vm1, %v6258_v34 }
0x174f   : > { %v2229_v9 = vld [vmem:[#allocation3 + $0x70] sm:$0xff] }
0x1750   : > { %v2216_v30 = vld [vmem:[#allocation3 + $0x8] sm:$0xff] }
0x1751   : > { %v2231_v4 = vpack.c.bf16 %v2216_v30, %v2215_v2 }
0x1753   : > { %4253 = vmatprep.mubr.msk.bf16.mxu0 %vm721_vm3, %v2231_v4 }
0x1754   : > { %4254 = vmatmul.mubr.msk.bf16.vlgmr.msra.gmra.mrb[12].mxu0 %vm721_vm3, %v2232_v5  ;;  %v2230_v63 = vld [vmem:[#allocation3 + $0x78] sm:$0xff] }
0x1755   : > { %4257 = vmatprep.mubr.msk.bf16.mxu0 %vm721_vm3, %v2233_v6  ;;  %4302 = vmatpush3.bf16.msra.mxu0 %v6226_v56  ;;  %v2238_v19 = vpack.c.bf16 %v2230_v63, %v2229_v9 }
0x1756   : > { %4303 = vmatprep.subr.bf16.mxu0 %v5425_v0 }
0x1759   : > { %4304 = vmatpush3.bf16.msra.mxu0 %v6232_v60 }
0x175a   : > { %4317 = vmatprep.subr.bf16.mxu0 %v5425_v0 }
0x175c   : > { %4258 = vmatmul.mubr.msk.bf16.gmra.mrb[16].mxu0 %vm721_vm3, %v2234_v7 }
0x175d   : > { %4261 = vmatprep.mubr.msk.bf16.mxu0 %vm721_vm3, %v2235_v11 }
0x1764   : > { %4262 = vmatmul.mubr.msk.bf16.gmra.mrb[20].mxu0 %vm721_vm3, %v2236_v42 }
0x1765   : > { %4265 = vmatprep.mubr.msk.bf16.mxu0 %vm721_vm3, %v2237_v18 }
0x176c   : > { %4266 = vmatmul.mubr.msk.bf16.gmra.mrb[24].mxu0 %vm721_vm3, %v2238_v19 }
0x176d   : > { %4305 = vmatprep.mubr.msk.bf16.mxu0 %vm5426_vm0, %v5425_v0 }
0x1827   : > { %v4255_v45 = vpop.f32.mrb[12].mxu0 }
0x1828   : > { %v6276_v12 = vadd.f32 %v4255_v45, %v4056_v40  ;;  %v2320_v33 = vpop.f32.mrb[13].mxu0 }
0x1829   : > { %v6278_v25 = vadd.f32 %v4056_v40, %v2320_v33  ;;  %v4256_v51 = vpop.f32.mrb[14].mxu0 }
0x182a   : > { %v6280_v50 = vadd.f32 %v4256_v51, %v4056_v40  ;;  %v2323_v21 = vpop.f32.mrb[15].mxu0 }
0x182b   : > { %v6282_v52 = vadd.f32 %v4056_v40, %v2323_v21  ;;  %v2458_v47 = vadd.f32 %v2449_v29, %v6278_v25 }
0x182d   : > { %4870 = vtanh.f32 %v2458_v47  ;;  %v2459_v27 = vadd.f32 %v2452_v31, %v6282_v52  ;;  %v4069_v7 = vmul.f32 -1.442695, %v2458_v47 }
0x182f   : > { %v4259_v22 = vpop.f32.mrb[16].mxu0  ;;  %4872 = vtanh.f32 %v2459_v27  ;;  %v4070_v10 = vmul.f32 -1.442695, %v2459_v27 }
0x1830   : > { %v6286_v44 = vadd.f32 %v4259_v22, %v4056_v40  ;;  %v2336_v38 = vpop.f32.mrb[17].mxu0 }
0x1831   : > { %v6288_v36 = vadd.f32 %v4056_v40, %v2336_v38  ;;  %v4260_v53 = vpop.f32.mrb[18].mxu0 }
0x1832   : > { %v6290_v17 = vadd.f32 %v4260_v53, %v4056_v40  ;;  %v2339_v3 = vpop.f32.mrb[19].mxu0 }
0x1833   : > { %v6292_v35 = vadd.f32 %v4056_v40, %v2339_v3 }
0x1837   : > { %v4871_v54 = vpop.eup %4870  ;;  %v4263_v55 = vpop.f32.mrb[20].mxu0 }
0x1838   : > { %v6294_v49 = vadd.f32 %v4263_v55, %v4056_v40  ;;  %2482 = vrot.lane.b32.xlu1 %v4871_v54, %s5430_s16  ;;  %v2352_v57 = vpop.f32.mrb[21].mxu0 }
0x1839   : > { %v6297_v32 = vadd.f32 %v4056_v40, %v2352_v57  ;;  %v4264_v58 = vpop.f32.mrb[22].mxu0  ;;  %v4873_v1 = vpop.eup %4872 }
0x183a   : > { %v6299_v61 = vadd.f32 %v4264_v58, %v4056_v40  ;;  %v2355_v26 = vpop.f32.mrb[23].mxu0  ;;  %2484 = vrot.lane.b32.xlu0 %v4873_v1, %s5430_s16 }
0x183b   : > { %v6302_v24 = vadd.f32 %v4056_v40, %v2355_v26 }
0x183f   : > { %v4267_v15 = vpop.f32.mrb[24].mxu0 }
0x1840   : > { %v6304_v2 = vadd.f32 %v4267_v15, %v4056_v40  ;;  %v2368_v30 = vpop.f32.mrb[25].mxu0 }
0x1841   : > { %v6306_v46 = vadd.f32 %v4056_v40, %v2368_v30  ;;  %v4268_v4 = vpop.f32.mrb[26].mxu0 }
0x1842   : > { %v2462_v37 = vadd.f32 %v2449_v29, %v6304_v2  ;;  %v6309_v5 = vadd.f32 %v4268_v4, %v4056_v40  ;;  %v2371_v39 = vpop.f32.mrb[27].mxu0 }
0x1843   : > { %v6311_v6 = vadd.f32 %v4056_v40, %v2371_v39 }
0x1844   : > { %4874 = vtanh.f32 %v2462_v37  ;;  %v2463_v43 = vadd.f32 %v2452_v31, %v6309_v5  ;;  %v4071_v42 = vmul.f32 -1.442695, %v2462_v37 }
0x1846   : > { %4876 = vtanh.f32 %v2463_v43  ;;  %v4072_v59 = vmul.f32 -1.442695, %v2463_v43 }
0x1847   : > { %4878 = vpow2.f32 %v4069_v7 }
0x1848   : > { %4880 = vpow2.f32 %v4070_v10 }
0x184e   : > { %v4875_v48 = vpop.eup %4874 }
0x184f   : > { %2530 = vrot.lane.b32.xlu1 %v4875_v48, %s5430_s16 }
0x1850   : > { %v4877_v20 = vpop.eup %4876 }
0x1851   : > { %2532 = vrot.lane.b32.xlu0 %v4877_v20, %s5430_s16  ;;  %v4879_v11 = vpop.eup %4878 }
0x1852   : > { %v4881_v13 = vpop.eup %4880  ;;  %v2470_v14 = vadd.f32 1.0, %v4879_v11 }
0x1853   : > { %v2471_v16 = vadd.f32 1.0, %v4881_v13 }
0x1854   : > { %4882 = vrcp.f32 %v2470_v14 }
0x1855   : > { %4884 = vrcp.f32 %v2471_v16 }
0x1856   : > { %4886 = vpow2.f32 %v4071_v42 }
0x1857   : > { %4888 = vpow2.f32 %v4072_v59 }
0x185e   : > { %v4883_v18 = vpop.eup %4882 }
0x185f   : > { %v4885_v19 = vpop.eup %4884  ;;  %v2478_v38 = vmul.f32 0.0, %v4883_v18 }
0x1860   : > { %v4887_v31 = vpop.eup %4886  ;;  %v2479_v54 = vmul.f32 0.0, %v4885_v19 }
0x1861   : > { %v4889_v23 = vpop.eup %4888  ;;  %v2518_v40 = vadd.f32 1.0, %v4887_v31 }
0x1862   : > { %v2519_v45 = vadd.f32 1.0, %v4889_v23 }
0x1863   : > { %4890 = vrcp.f32 %v2518_v40 }
0x1864   : > { %4892 = vrcp.f32 %v2519_v45 }
0x186d   : > { %v4891_v33 = vpop.eup %4890 }
0x186e   : > { %v4893_v47 = vpop.eup %4892  ;;  %v2526_v26 = vmul.f32 0.0, %v4891_v33 }
0x186f   : > { %v2527_v4 = vmul.f32 0.0, %v4893_v47 }
0x18aa   : > { %v2483_v63 = vpop.permute.xlu1 %2482 }
0x18ab   : > { %v2488_v9 = vmul.f32 %v4883_v18, %v2483_v63 }
0x18ac   : > { %v2485_v29 = vpop.permute.xlu0 %2484 }
0x18ad   : > { %2492 = vrot.lane.b32.xlu1 %v2488_v9, %s5431_s19  ;;  %v2489_v28 = vmul.f32 %v4885_v19, %v2485_v29 }
0x18af   : > { %2494 = vrot.lane.b32.xlu0 %v2489_v28, %s5431_s19 }
0x18c1   : > { %v2531_v51 = vpop.permute.xlu1 %2530 }
0x18c2   : > { %v2536_v21 = vmul.f32 %v4891_v33, %v2531_v51 }
0x18c3   : > { %v2533_v27 = vpop.permute.xlu0 %2532 }
0x18c4   : > { %2540 = vrot.lane.b32.xlu1 %v2536_v21, %s5431_s19  ;;  %v2537_v22 = vmul.f32 %v4893_v47, %v2533_v27 }
0x18c6   : > { %2542 = vrot.lane.b32.xlu0 %v2537_v22, %s5431_s19 }
0x191f   : > { %v2493_v53 = vpop.permute.xlu1 %2492 }
0x1920   : > { %v6320_v3 = vadd.f32 %v2493_v53, %v2478_v38 }
0x1921   : > { %v2495_v55 = vpop.permute.xlu0 %2494 }
0x1922   : > { %4894 = vtanh.f32 %v6320_v3  ;;  %v6323_v57 = vadd.f32 %v2495_v55, %v2479_v54 }
0x1924   : > { %4896 = vtanh.f32 %v6323_v57 }
0x192c   : > { %v4895_v58 = vpop.eup %4894 }
0x192d   : > { %2504 = vrot.lane.b32.xlu1 %v4895_v58, %s5431_s19 }
0x192e   : > { %v4897_v1 = vpop.eup %4896 }
0x192f   : > { %2506 = vrot.lane.b32.xlu0 %v4897_v1, %s5431_s19 }
0x1936   : > { %v2541_v15 = vpop.permute.xlu1 %2540 }
0x1937   : > { %v6328_v30 = vadd.f32 %v2541_v15, %v2526_v26 }
0x1938   : > { %v2543_v37 = vpop.permute.xlu0 %2542 }
0x1939   : > { %4898 = vtanh.f32 %v6328_v30  ;;  %v6331_v39 = vadd.f32 %v2543_v37, %v2527_v4 }
0x193b   : > { %4900 = vtanh.f32 %v6331_v39 }
0x1943   : > { %v4899_v43 = vpop.eup %4898 }
0x1944   : > { %2552 = vrot.lane.b32.xlu1 %v4899_v43, %s5431_s19 }
0x1945   : > { %v4901_v48 = vpop.eup %4900 }
0x1946   : > { %2554 = vrot.lane.b32.xlu0 %v4901_v48, %s5431_s19 }
0x199f   : > { %v2505_v20 = vpop.permute.xlu1 %2504 }
0x19a0   : > { %v2510_v10 = vmul.f32 %v4883_v18, %v2505_v20 }
0x19a1   : > { %v2507_v7 = vpop.permute.xlu0 %2506 }
0x19a2   : > { %v2511_v11 = vmul.f32 %v4885_v19, %v2507_v7 }
0x19a4   : > { %v4524_v13 = vpack.i.bf16 %v2511_v11, %v2510_v10 }
0x19a6   : > { %4525 = vrot.lane.b32.xlu1 %v4524_v13, %s5432_s20 }
0x19b6   : > { %v2553_v14 = vpop.permute.xlu1 %2552 }
0x19b7   : > { %v2558_v42 = vmul.f32 %v4891_v33, %v2553_v14 }
0x19b8   : > { %v2555_v16 = vpop.permute.xlu0 %2554 }
0x19b9   : > { %v2559_v59 = vmul.f32 %v4893_v47, %v2555_v16 }
0x19bb   : > { %v4529_v63 = vpack.i.bf16 %v2559_v59, %v2558_v42 }
0x19bd   : > { %4530 = vrot.lane.b32.xlu0 %v4529_v63, %s5433_s23 }
0x1a18   : > { %v4526_v9 = vpop.permute.xlu1 %4525 }
0x1a19   : > { %v4528_v28 = vunpack.i.h.bf16 %v4526_v9  ;;  %v4527_v31 = vunpack.i.l.bf16 %v4526_v9 }
0x1a2f   : > { %v4531_v29 = vpop.permute.xlu0 %4530 }
0x1a30   : > { %v4533_v23 = vunpack.i.h.bf16 %v4531_v29  ;;  %v4532_v40 = vunpack.i.l.bf16 %v4531_v29 }
0x1a32   : > { %v2577_v45 = vsel %vm879_vm1, %v4528_v28, %v4533_v23  ;;  %v2576_v18 = vsel %vm879_vm1, %v4527_v31, %v4532_v40 }
0x1a33   : > { %v2578_v19 = vpack.c.bf16 %v2577_v45, %v2576_v18 }
0x1a35   : > { %4282 = vmatmul.mubr.msk.bf16.vlgmr.msra.gmra.mrb[24].mxu1 %vm721_vm3, %v2578_v19 }
0x1a36   : > { %4286 = vmatpush3.bf16.msra.mxu1 %v6226_v56  ;;  %4289 = vmatprep.mubr.msk.bf16.mxu1 %vm5426_vm0, %v5425_v0 }
0x1a37   : > { %4287 = vmatprep.subr.bf16.mxu1 %v5425_v0 }
0x1a3a   : > { %4288 = vmatpush3.bf16.msra.mxu1 %v6232_v60 }
0x1a3b   : > { %4293 = vmatprep.subr.bf16.mxu1 %v5425_v0 }
0x1b08   : > { %v2616_v33 = vpop.f32.mrb[24].mxu1 }
0x1b09   : > { %v2625_v51 = vadd.f32 %v2616_v33, %v6276_v12  ;;  %v4283_v21 = vpop.f32.mrb[25].mxu1  ;;  %v2629_v27 = vadd.f32 %v2616_v33, %v6306_v46 }
0x1b0a   : > { %v2619_v47 = vpop.f32.mrb[26].mxu1 }
0x1b0b   : > { %4902 = vtanh.f32 %v2625_v51  ;;  %v4284_v22 = vpop.f32.mrb[27].mxu1  ;;  %v2626_v38 = vadd.f32 %v2619_v47, %v6280_v50  ;;  %v2630_v53 = vadd.f32 %v2619_v47, %v6311_v6  ;;  %v4074_v26 = vmul.f32 -1.442695, %v2625_v51 }
0x1b0c   : > { %4904 = vtanh.f32 %v2629_v27  ;;  %v4076_v15 = vmul.f32 -1.442695, %v2629_v27 }
0x1b0d   : > { %4906 = vtanh.f32 %v2626_v38  ;;  %v4075_v4 = vmul.f32 -1.442695, %v2626_v38  ;;  %v4077_v37 = vmul.f32 -1.442695, %v2630_v53 }
0x1b0e   : > { %4908 = vtanh.f32 %v2630_v53 }
0x1b0f   : > { %4910 = vpow2.f32 %v4074_v26 }
0x1b10   : > { %4912 = vpow2.f32 %v4076_v15 }
0x1b11   : > { %4914 = vpow2.f32 %v4075_v4 }
0x1b12   : > { %4916 = vpow2.f32 %v4077_v37 }
0x1b15   : > { %v4903_v54 = vpop.eup %4902 }
0x1b16   : > { %2649 = vrot.lane.b32.xlu1 %v4903_v54, %s5430_s16  ;;  %v4905_v55 = vpop.eup %4904 }
0x1b17   : > { %v4907_v58 = vpop.eup %4906 }
0x1b18   : > { %2651 = vrot.lane.b32.xlu0 %v4907_v58, %s5430_s16  ;;  %v4909_v1 = vpop.eup %4908 }
0x1b19   : > { %v4911_v43 = vpop.eup %4910 }
0x1b1a   : > { %2697 = vrot.lane.b32.xlu1 %v4905_v55, %s5430_s16  ;;  %v2637_v48 = vadd.f32 1.0, %v4911_v43  ;;  %v4913_v20 = vpop.eup %4912 }
0x1b1b   : > { %v4915_v7 = vpop.eup %4914  ;;  %v2685_v10 = vadd.f32 1.0, %v4913_v20 }
0x1b1c   : > { %2699 = vrot.lane.b32.xlu0 %v4909_v1, %s5430_s16  ;;  %4918 = vrcp.f32 %v2637_v48  ;;  %v2638_v11 = vadd.f32 1.0, %v4915_v7  ;;  %v4917_v13 = vpop.eup %4916 }
0x1b1d   : > { %4920 = vrcp.f32 %v2685_v10  ;;  %v2686_v14 = vadd.f32 1.0, %v4917_v13 }
0x1b1e   : > { %4922 = vrcp.f32 %v2638_v11 }
0x1b1f   : > { %4924 = vrcp.f32 %v2686_v14 }
0x1b26   : > { %v4919_v16 = vpop.eup %4918 }
0x1b27   : > { %v4921_v63 = vpop.eup %4920  ;;  %v2645_v19 = vmul.f32 %v4919_v16, %v6320_v3 }
0x1b28   : > { %v4923_v29 = vpop.eup %4922  ;;  %v2693_v21 = vmul.f32 %v4921_v63, %v6328_v30 }
0x1b29   : > { %v4925_v40 = vpop.eup %4924  ;;  %v2646_v47 = vmul.f32 %v4923_v29, %v6323_v57 }
0x1b2a   : > { %v2694_v3 = vmul.f32 %v4925_v40, %v6331_v39 }
0x1b88   : > { %v2650_v42 = vpop.permute.xlu1 %2649 }
0x1b89   : > { %v2655_v59 = vmul.f32 %v4919_v16, %v2650_v42 }
0x1b8a   : > { %v2652_v28 = vpop.permute.xlu0 %2651 }
0x1b8b   : > { %2659 = vrot.lane.b32.xlu1 %v2655_v59, %s5431_s19  ;;  %v2656_v23 = vmul.f32 %v4923_v29, %v2652_v28 }
0x1b8c   : > { %v2698_v9 = vpop.permute.xlu1 %2697 }
0x1b8d   : > { %v2703_v31 = vmul.f32 %v4921_v63, %v2698_v9  ;;  %2661 = vrot.lane.b32.xlu0 %v2656_v23, %s5431_s19 }
0x1b8e   : > { %v2700_v45 = vpop.permute.xlu0 %2699 }
0x1b8f   : > { %2707 = vrot.lane.b32.xlu1 %v2703_v31, %s5431_s19  ;;  %v2704_v18 = vmul.f32 %v4925_v40, %v2700_v45 }
0x1b91   : > { %2709 = vrot.lane.b32.xlu0 %v2704_v18, %s5431_s19 }
0x1bfd   : > { %v2660_v33 = vpop.permute.xlu1 %2659 }
0x1bfe   : > { %v6360_v51 = vadd.f32 %v2660_v33, %v2645_v19 }
0x1bff   : > { %v2662_v22 = vpop.permute.xlu0 %2661 }
0x1c00   : > { %4926 = vtanh.f32 %v6360_v51  ;;  %v6367_v53 = vadd.f32 %v2662_v22, %v2646_v47 }
0x1c01   : > { %v2708_v27 = vpop.permute.xlu1 %2707 }
0x1c02   : > { %v6365_v38 = vadd.f32 %v2708_v27, %v2693_v21 }
0x1c03   : > { %v2710_v54 = vpop.permute.xlu0 %2709 }
0x1c04   : > { %4928 = vtanh.f32 %v6365_v38  ;;  %v6372_v55 = vadd.f32 %v2710_v54, %v2694_v3 }
0x1c05   : > { %4930 = vtanh.f32 %v6367_v53 }
0x1c06   : > { %4932 = vtanh.f32 %v6372_v55 }
0x1c0a   : > { %v4927_v30 = vpop.eup %4926 }
0x1c0b   : > { %2671 = vrot.lane.b32.xlu1 %v4927_v30, %s5431_s19 }
0x1c0e   : > { %v4929_v57 = vpop.eup %4928 }
0x1c0f   : > { %v4931_v58 = vpop.eup %4930  ;;  %2719 = vrot.lane.b32.xlu1 %v4929_v57, %s5431_s19 }
0x1c10   : > { %2673 = vrot.lane.b32.xlu0 %v4931_v58, %s5431_s19  ;;  %v4933_v1 = vpop.eup %4932 }
0x1c14   : > { %2721 = vrot.lane.b32.xlu0 %v4933_v1, %s5431_s19 }
0x1c7d   : > { %v2672_v26 = vpop.permute.xlu1 %2671 }
0x1c7e   : > { %v2677_v39 = vmul.f32 %v4919_v16, %v2672_v26 }
0x1c81   : > { %v2720_v37 = vpop.permute.xlu1 %2719 }
0x1c82   : > { %v2674_v15 = vpop.permute.xlu0 %2673  ;;  %v2725_v20 = vmul.f32 %v4921_v63, %v2720_v37 }
0x1c83   : > { %v2678_v4 = vmul.f32 %v4923_v29, %v2674_v15 }
0x1c85   : > { %v4534_v43 = vpack.i.bf16 %v2678_v4, %v2677_v39 }
0x1c86   : > { %v2722_v48 = vpop.permute.xlu0 %2721 }
0x1c87   : > { %v2726_v7 = vmul.f32 %v4925_v40, %v2722_v48  ;;  %4535 = vrot.lane.b32.xlu1 %v4534_v43, %s5432_s20 }
0x1c89   : > { %v4539_v10 = vpack.i.bf16 %v2726_v7, %v2725_v20 }
0x1c8b   : > { %4540 = vrot.lane.b32.xlu0 %v4539_v10, %s5433_s23 }
0x1cf9   : > { %v4536_v11 = vpop.permute.xlu1 %4535 }
0x1cfa   : > { %v4538_v14 = vunpack.i.h.bf16 %v4536_v11  ;;  %v4537_v42 = vunpack.i.l.bf16 %v4536_v11 }
0x1cfd   : > { %v4541_v13 = vpop.permute.xlu0 %4540 }
0x1cfe   : > { %v4543_v59 = vunpack.i.h.bf16 %v4541_v13  ;;  %v4542_v9 = vunpack.i.l.bf16 %v4541_v13 }
0x1d00   : > { %v2743_v28 = vsel %vm879_vm1, %v4537_v42, %v4542_v9  ;;  %v2744_v16 = vsel %vm879_vm1, %v4538_v14, %v4543_v59 }
0x1d01   : > { %v2745_v29 = vpack.c.bf16 %v2744_v16, %v2743_v28 }
0x1d03   : > { %4290 = vmatmul.mubr.msk.bf16.vlgmr.msra.gmra.mrb[28].mxu1 %vm721_vm3, %v2745_v29 }
0x1d04   : > { %4294 = vmatpush3.bf16.msra.mxu1 %v6226_v56  ;;  %4297 = vmatprep.mubr.msk.bf16.mxu1 %vm5426_vm0, %v5425_v0 }
0x1d05   : > { %4295 = vmatprep.subr.bf16.mxu1 %v5425_v0 }
0x1d08   : > { %4296 = vmatpush3.bf16.msra.mxu1 %v6232_v60 }
0x1d09   : > { %4309 = vmatprep.subr.bf16.mxu1 %v5425_v0 }
0x1dd6   : > { %v2783_v63 = vpop.f32.mrb[28].mxu1 }
0x1dd7   : > { %v2792_v31 = vadd.f32 %v2783_v63, %v6288_v36  ;;  %v4291_v23 = vpop.f32.mrb[29].mxu1  ;;  %v2796_v45 = vadd.f32 %v2783_v63, %v6294_v49 }
0x1dd8   : > { %v2786_v40 = vpop.f32.mrb[30].mxu1 }
0x1dd9   : > { %4934 = vtanh.f32 %v2792_v31  ;;  %v4292_v18 = vpop.f32.mrb[31].mxu1  ;;  %v2793_v19 = vadd.f32 %v2786_v40, %v6292_v35  ;;  %v2797_v33 = vadd.f32 %v2786_v40, %v6299_v61  ;;  %v4079_v3 = vmul.f32 -1.442695, %v2792_v31 }
0x1dda   : > { %4936 = vtanh.f32 %v2796_v45  ;;  %v4081_v54 = vmul.f32 -1.442695, %v2796_v45 }
0x1ddb   : > { %4938 = vtanh.f32 %v2793_v19  ;;  %v4080_v30 = vmul.f32 -1.442695, %v2793_v19  ;;  %v4082_v57 = vmul.f32 -1.442695, %v2797_v33 }
0x1ddc   : > { %4940 = vtanh.f32 %v2797_v33 }
0x1ddd   : > { %4942 = vpow2.f32 %v4079_v3 }
0x1dde   : > { %4944 = vpow2.f32 %v4081_v54 }
0x1ddf   : > { %4946 = vpow2.f32 %v4080_v30 }
0x1de0   : > { %4948 = vpow2.f32 %v4082_v57 }
0x1de3   : > { %v4935_v21 = vpop.eup %4934 }
0x1de4   : > { %2816 = vrot.lane.b32.xlu1 %v4935_v21, %s5430_s16  ;;  %v4937_v47 = vpop.eup %4936 }
0x1de5   : > { %v4939_v27 = vpop.eup %4938 }
0x1de6   : > { %2818 = vrot.lane.b32.xlu0 %v4939_v27, %s5430_s16  ;;  %v4941_v22 = vpop.eup %4940 }
0x1de7   : > { %v4943_v58 = vpop.eup %4942 }
0x1de8   : > { %2864 = vrot.lane.b32.xlu1 %v4937_v47, %s5430_s16  ;;  %v2804_v1 = vadd.f32 1.0, %v4943_v58  ;;  %v4945_v26 = vpop.eup %4944 }
0x1de9   : > { %v4947_v15 = vpop.eup %4946  ;;  %v2852_v39 = vadd.f32 1.0, %v4945_v26 }
0x1dea   : > { %2866 = vrot.lane.b32.xlu0 %v4941_v22, %s5430_s16  ;;  %4950 = vrcp.f32 %v2804_v1  ;;  %v2805_v4 = vadd.f32 1.0, %v4947_v15  ;;  %v4949_v37 = vpop.eup %4948 }
0x1deb   : > { %4952 = vrcp.f32 %v2852_v39  ;;  %v2853_v43 = vadd.f32 1.0, %v4949_v37 }
0x1dec   : > { %4954 = vrcp.f32 %v2805_v4 }
0x1ded   : > { %4956 = vrcp.f32 %v2853_v43 }
0x1df4   : > { %v4951_v48 = vpop.eup %4950 }
0x1df5   : > { %v4953_v10 = vpop.eup %4952  ;;  %v2812_v29 = vmul.f32 %v4951_v48, %v6360_v51 }
0x1df6   : > { %v4955_v13 = vpop.eup %4954  ;;  %v2860_v23 = vmul.f32 %v4953_v10, %v6365_v38 }
0x1df7   : > { %v4957_v9 = vpop.eup %4956  ;;  %v2813_v40 = vmul.f32 %v4955_v13, %v6367_v53 }
0x1df8   : > { %v2861_v51 = vmul.f32 %v4957_v9, %v6372_v55 }
0x1e56   : > { %v2817_v20 = vpop.permute.xlu1 %2816 }
0x1e57   : > { %v2822_v7 = vmul.f32 %v4951_v48, %v2817_v20 }
0x1e58   : > { %v2819_v14 = vpop.permute.xlu0 %2818 }
0x1e59   : > { %2826 = vrot.lane.b32.xlu1 %v2822_v7, %s5431_s19  ;;  %v2823_v59 = vmul.f32 %v4955_v13, %v2819_v14 }
0x1e5a   : > { %v2865_v11 = vpop.permute.xlu1 %2864 }
0x1e5b   : > { %v2870_v42 = vmul.f32 %v4953_v10, %v2865_v11  ;;  %2828 = vrot.lane.b32.xlu0 %v2823_v59, %s5431_s19 }
0x1e5c   : > { %v2867_v28 = vpop.permute.xlu0 %2866 }
0x1e5d   : > { %2874 = vrot.lane.b32.xlu1 %v2870_v42, %s5431_s19  ;;  %v2871_v16 = vmul.f32 %v4957_v9, %v2867_v28 }
0x1e5f   : > { %2876 = vrot.lane.b32.xlu0 %v2871_v16, %s5431_s19 }
0x1ecb   : > { %v2827_v63 = vpop.permute.xlu1 %2826 }
0x1ecc   : > { %v6403_v31 = vadd.f32 %v2827_v63, %v2812_v29 }
0x1ecd   : > { %v2829_v18 = vpop.permute.xlu0 %2828 }
0x1ece   : > { %4958 = vtanh.f32 %v6403_v31  ;;  %v6410_v33 = vadd.f32 %v2829_v18, %v2813_v40 }
0x1ecf   : > { %v2875_v45 = vpop.permute.xlu1 %2874 }
0x1ed0   : > { %v6408_v19 = vadd.f32 %v2875_v45, %v2860_v23 }
0x1ed1   : > { %v2877_v21 = vpop.permute.xlu0 %2876 }
0x1ed2   : > { %4960 = vtanh.f32 %v6408_v19  ;;  %v6415_v47 = vadd.f32 %v2877_v21, %v2861_v51 }
0x1ed3   : > { %4962 = vtanh.f32 %v6410_v33 }
0x1ed4   : > { %4964 = vtanh.f32 %v6415_v47 }
0x1ed8   : > { %v4959_v38 = vpop.eup %4958 }
0x1ed9   : > { %2838 = vrot.lane.b32.xlu1 %v4959_v38, %s5431_s19 }
0x1edc   : > { %v4961_v53 = vpop.eup %4960 }
0x1edd   : > { %v4963_v27 = vpop.eup %4962  ;;  %2886 = vrot.lane.b32.xlu1 %v4961_v53, %s5431_s19 }
0x1ede   : > { %2840 = vrot.lane.b32.xlu0 %v4963_v27, %s5431_s19  ;;  %v4965_v22 = vpop.eup %4964 }
0x1ee2   : > { %2888 = vrot.lane.b32.xlu0 %v4965_v22, %s5431_s19 }
0x1f4b   : > { %v2839_v3 = vpop.permute.xlu1 %2838 }
0x1f4c   : > { %v2844_v55 = vmul.f32 %v4951_v48, %v2839_v3 }
0x1f4f   : > { %v2887_v57 = vpop.permute.xlu1 %2886 }
0x1f50   : > { %v2841_v54 = vpop.permute.xlu0 %2840  ;;  %v2892_v26 = vmul.f32 %v4953_v10, %v2887_v57 }
0x1f51   : > { %v2845_v30 = vmul.f32 %v4955_v13, %v2841_v54 }
0x1f53   : > { %v4544_v58 = vpack.i.bf16 %v2845_v30, %v2844_v55 }
0x1f54   : > { %v2889_v1 = vpop.permute.xlu0 %2888 }
0x1f55   : > { %v2893_v15 = vmul.f32 %v4957_v9, %v2889_v1  ;;  %4545 = vrot.lane.b32.xlu1 %v4544_v58, %s5432_s20 }
0x1f57   : > { %v4549_v39 = vpack.i.bf16 %v2893_v15, %v2892_v26 }
0x1f59   : > { %4550 = vrot.lane.b32.xlu0 %v4549_v39, %s5433_s23 }
0x1fc7   : > { %v4546_v4 = vpop.permute.xlu1 %4545 }
0x1fc8   : > { %v4548_v43 = vunpack.i.h.bf16 %v4546_v4  ;;  %v4547_v20 = vunpack.i.l.bf16 %v4546_v4 }
0x1fcb   : > { %v4551_v37 = vpop.permute.xlu0 %4550 }
0x1fcc   : > { %v4553_v7 = vunpack.i.h.bf16 %v4551_v37  ;;  %v4552_v11 = vunpack.i.l.bf16 %v4551_v37 }
0x1fce   : > { %v2911_v14 = vsel %vm879_vm1, %v4548_v43, %v4553_v7  ;;  %v2910_v48 = vsel %vm879_vm1, %v4547_v20, %v4552_v11 }
0x1fcf   : > { %v2912_v13 = vpack.c.bf16 %v2911_v14, %v2910_v48 }
0x1fd1   : > { %4298 = vmatmul.mubr.msk.bf16.vlgmr.msra.gmra.mrb[32].mxu1 %vm721_vm3, %v2912_v13 }
0x1fd2   : > { %4310 = vmatpush3.bf16.msra.mxu1 %v6226_v56  ;;  %4313 = vmatprep.mubr.msk.bf16.mxu1 %vm5426_vm0, %v5425_v0 }
0x1fd3   : > { %4311 = vmatprep.subr.bf16.mxu1 %v5425_v0 }
0x1fd6   : > { %4312 = vmatpush3.bf16.msra.mxu1 %v6232_v60 }
0x1fd7   : > { %4325 = vmatprep.subr.bf16.mxu1 %v5425_v0 }
0x20a4   : > { %v2950_v10 = vpop.f32.mrb[32].mxu1 }
0x20a5   : > { %v2959_v42 = vadd.f32 %v2950_v10, %v6286_v44  ;;  %v4299_v59 = vpop.f32.mrb[33].mxu1  ;;  %v2963_v28 = vadd.f32 %v2950_v10, %v6297_v32 }
0x20a6   : > { %v2953_v9 = vpop.f32.mrb[34].mxu1 }
0x20a7   : > { %4966 = vtanh.f32 %v2959_v42  ;;  %v4300_v16 = vpop.f32.mrb[35].mxu1  ;;  %v2960_v56 = vadd.f32 %v2953_v9, %v6290_v17  ;;  %v2964_v29 = vadd.f32 %v2953_v9, %v6302_v24  ;;  %v4084_v45 = vmul.f32 -1.442695, %v2959_v42 }
0x20a8   : > { %4968 = vtanh.f32 %v2963_v28  ;;  %v4086_v18 = vmul.f32 -1.442695, %v2963_v28 }
0x20a9   : > { %4970 = vtanh.f32 %v2960_v56  ;;  %v4085_v51 = vmul.f32 -1.442695, %v2960_v56  ;;  %v4087_v21 = vmul.f32 -1.442695, %v2964_v29 }
0x20aa   : > { %4972 = vtanh.f32 %v2964_v29 }
0x20ab   : > { %4974 = vpow2.f32 %v4084_v45 }
0x20ac   : > { %4976 = vpow2.f32 %v4086_v18 }
0x20ad   : > { %4978 = vpow2.f32 %v4085_v51 }
0x20ae   : > { %4980 = vpow2.f32 %v4087_v21 }
0x20b1   : > { %v4967_v63 = vpop.eup %4966 }
0x20b2   : > { %2983 = vrot.lane.b32.xlu1 %v4967_v63, %s5430_s16  ;;  %v4969_v60 = vpop.eup %4968 }
0x20b3   : > { %v4971_v23 = vpop.eup %4970 }
0x20b4   : > { %2985 = vrot.lane.b32.xlu0 %v4971_v23, %s5430_s16  ;;  %v4973_v40 = vpop.eup %4972 }
0x20b5   : > { %v4975_v38 = vpop.eup %4974 }
0x20b6   : > { %3031 = vrot.lane.b32.xlu1 %v4969_v60, %s5430_s16  ;;  %v2971_v53 = vadd.f32 1.0, %v4975_v38  ;;  %v4977_v27 = vpop.eup %4976 }
0x20b7   : > { %v4979_v22 = vpop.eup %4978  ;;  %v3019_v3 = vadd.f32 1.0, %v4977_v27 }
0x20b8   : > { %3033 = vrot.lane.b32.xlu0 %v4973_v40, %s5430_s16  ;;  %4982 = vrcp.f32 %v2971_v53  ;;  %v2972_v54 = vadd.f32 1.0, %v4979_v22  ;;  %v4981_v55 = vpop.eup %4980 }
0x20b9   : > { %4984 = vrcp.f32 %v3019_v3  ;;  %v3020_v30 = vadd.f32 1.0, %v4981_v55 }
0x20ba   : > { %4986 = vrcp.f32 %v2972_v54 }
0x20bb   : > { %4988 = vrcp.f32 %v3020_v30 }
0x20c2   : > { %v4983_v57 = vpop.eup %4982 }
0x20c3   : > { %v4985_v26 = vpop.eup %4984  ;;  %v2979_v14 = vmul.f32 %v4983_v57, %v6403_v31 }
0x20c4   : > { %v4987_v39 = vpop.eup %4986  ;;  %v3027_v10 = vmul.f32 %v4985_v26, %v6408_v19 }
0x20c5   : > { %v4989_v20 = vpop.eup %4988  ;;  %v2980_v42 = vmul.f32 %v4987_v39, %v6410_v33 }
0x20c6   : > { %v3028_v31 = vmul.f32 %v4989_v20, %v6415_v47 }
0x2124   : > { %v2984_v58 = vpop.permute.xlu1 %2983 }
0x2125   : > { %v2989_v1 = vmul.f32 %v4983_v57, %v2984_v58 }
0x2126   : > { %v2986_v4 = vpop.permute.xlu0 %2985 }
0x2127   : > { %2993 = vrot.lane.b32.xlu1 %v2989_v1, %s5431_s19  ;;  %v2990_v43 = vmul.f32 %v4987_v39, %v2986_v4 }
0x2128   : > { %v3032_v15 = vpop.permute.xlu1 %3031 }
0x2129   : > { %v3037_v37 = vmul.f32 %v4985_v26, %v3032_v15  ;;  %2995 = vrot.lane.b32.xlu0 %v2990_v43, %s5431_s19 }
0x212a   : > { %v3034_v7 = vpop.permute.xlu0 %3033 }
0x212b   : > { %3041 = vrot.lane.b32.xlu1 %v3037_v37, %s5431_s19  ;;  %v3038_v11 = vmul.f32 %v4989_v20, %v3034_v7 }
0x212d   : > { %3043 = vrot.lane.b32.xlu0 %v3038_v11, %s5431_s19 }
0x2199   : > { %v2994_v48 = vpop.permute.xlu1 %2993 }
0x219a   : > { %v6446_v13 = vadd.f32 %v2994_v48, %v2979_v14 }
0x219b   : > { %v2996_v9 = vpop.permute.xlu0 %2995 }
0x219c   : > { %4990 = vtanh.f32 %v6446_v13  ;;  %v6453_v16 = vadd.f32 %v2996_v9, %v2980_v42 }
0x219d   : > { %v3042_v59 = vpop.permute.xlu1 %3041 }
0x219e   : > { %v6451_v28 = vadd.f32 %v3042_v59, %v3027_v10 }
0x219f   : > { %v3044_v56 = vpop.permute.xlu0 %3043 }
0x21a0   : > { %4992 = vtanh.f32 %v6451_v28  ;;  %v6458_v29 = vadd.f32 %v3044_v56, %v3028_v31 }
0x21a1   : > { %4994 = vtanh.f32 %v6453_v16 }
0x21a2   : > { %4996 = vtanh.f32 %v6458_v29 }
0x21a6   : > { %v4991_v19 = vpop.eup %4990 }
0x21a7   : > { %3005 = vrot.lane.b32.xlu1 %v4991_v19, %s5431_s19 }
0x21aa   : > { %v4993_v33 = vpop.eup %4992 }
0x21ab   : > { %v4995_v63 = vpop.eup %4994  ;;  %3053 = vrot.lane.b32.xlu1 %v4993_v33, %s5431_s19 }
0x21ac   : > { %3007 = vrot.lane.b32.xlu0 %v4995_v63, %s5431_s19  ;;  %v4997_v60 = vpop.eup %4996 }
0x21b0   : > { %3055 = vrot.lane.b32.xlu0 %v4997_v60, %s5431_s19 }
0x2219   : > { %v3006_v23 = vpop.permute.xlu1 %3005 }
0x221a   : > { %v3011_v47 = vmul.f32 %v4983_v57, %v3006_v23 }
0x221d   : > { %v3054_v18 = vpop.permute.xlu1 %3053 }
0x221e   : > { %v3008_v40 = vpop.permute.xlu0 %3007  ;;  %v3059_v38 = vmul.f32 %v4985_v26, %v3054_v18  ;;  %v6470_v26 = vld [vmem:[#allocation15] sm:$0xff]  }
0x221f   : > { %v3012_v45 = vmul.f32 %v4987_v39, %v3008_v40  ;;  %v6476_v39 = vld [vmem:[#allocation15 + $0x8] sm:$0xff]  }
0x2221   : > { %v4554_v51 = vpack.i.bf16 %v3012_v45, %v3011_v47 }
0x2222   : > { %v3056_v21 = vpop.permute.xlu0 %3055 }
0x2223   : > { %v3060_v53 = vmul.f32 %v4989_v20, %v3056_v21  ;;  %4555 = vrot.lane.b32.xlu1 %v4554_v51, %s5432_s20 }
0x2225   : > { %v4559_v27 = vpack.i.bf16 %v3060_v53, %v3059_v38 }
0x2227   : > { %4560 = vrot.lane.b32.xlu0 %v4559_v27, %s5433_s23 }
0x2295   : > { %v4556_v22 = vpop.permute.xlu1 %4555 }
0x2296   : > { %v4558_v54 = vunpack.i.h.bf16 %v4556_v22  ;;  %v4557_v55 = vunpack.i.l.bf16 %v4556_v22 }
0x2299   : > { %v4561_v3 = vpop.permute.xlu0 %4560 }
0x229a   : > { %v4563_v30 = vunpack.i.h.bf16 %v4561_v3  ;;  %v4562_v58 = vunpack.i.l.bf16 %v4561_v3 }
0x229c   : > { %v3077_v1 = vsel %vm879_vm1, %v4557_v55, %v4562_v58  ;;  %v3078_v57 = vsel %vm879_vm1, %v4558_v54, %v4563_v30 }
0x229d   : > { %v3079_v15 = vpack.c.bf16 %v3078_v57, %v3077_v1 }
0x229f   : > { %4306 = vmatmul.mubr.msk.bf16.vlgmr.msra.gmra.mrb[28].mxu0 %vm721_vm3, %v3079_v15 }
0x22a0   : > { %4318 = vmatpush3.bf16.msra.mxu0 %v6470_v26  ;;  %4321 = vmatprep.mubr.msk.bf16.mxu0 %vm5426_vm0, %v5425_v0 }
0x22a1   : > { %4319 = vmatprep.subr.bf16.mxu0 %v5425_v0 }
0x22a4   : > { %4320 = vmatpush3.bf16.msra.mxu0 %v6476_v39 }
0x2372   : > { %v3117_v4 = vpop.f32.mrb[28].mxu0 }
0x2373   : > { %v3124_v37 = vadd.f32 %v3117_v4, %v6297_v32  ;;  %v4307_v43 = vpop.f32.mrb[29].mxu0  ;;  %v3126_v7 = vadd.f32 %v3117_v4, %v6286_v44 }
0x2374   : > { %v3120_v20 = vpop.f32.mrb[30].mxu0 }
0x2375   : > { %4998 = vtanh.f32 %v3124_v37  ;;  %v4308_v11 = vpop.f32.mrb[31].mxu0  ;;  %v3125_v14 = vadd.f32 %v3120_v20, %v6302_v24  ;;  %v3127_v48 = vadd.f32 %v3120_v20, %v6290_v17  ;;  %v4089_v44 = vmul.f32 -1.442695, %v3124_v37 }
0x2376   : > { %5000 = vtanh.f32 %v3126_v7  ;;  %v4091_v24 = vmul.f32 -1.442695, %v3126_v7 }
0x2377   : > { %5002 = vtanh.f32 %v3125_v14  ;;  %v4090_v9 = vmul.f32 -1.442695, %v3125_v14  ;;  %v4092_v17 = vmul.f32 -1.442695, %v3127_v48 }
0x2378   : > { %5004 = vtanh.f32 %v3127_v48 }
0x2379   : > { %5006 = vpow2.f32 %v4089_v44 }
0x237a   : > { %5008 = vpow2.f32 %v4091_v24 }
0x237b   : > { %5010 = vpow2.f32 %v4090_v9 }
0x237c   : > { %5012 = vpow2.f32 %v4092_v17 }
0x237f   : > { %v4999_v10 = vpop.eup %4998 }
0x2380   : > { %3146 = vrot.lane.b32.xlu1 %v4999_v10, %s5430_s16  ;;  %v5001_v42 = vpop.eup %5000 }
0x2381   : > { %v5003_v59 = vpop.eup %5002 }
0x2382   : > { %3148 = vrot.lane.b32.xlu0 %v5003_v59, %s5430_s16  ;;  %v5005_v32 = vpop.eup %5004 }
0x2383   : > { %v5007_v31 = vpop.eup %5006 }
0x2384   : > { %3194 = vrot.lane.b32.xlu1 %v5001_v42, %s5430_s16  ;;  %v3134_v56 = vadd.f32 1.0, %v5007_v31  ;;  %v5009_v19 = vpop.eup %5008 }
0x2385   : > { %v5011_v33 = vpop.eup %5010  ;;  %v3182_v63 = vadd.f32 1.0, %v5009_v19 }
0x2386   : > { %3196 = vrot.lane.b32.xlu0 %v5005_v32, %s5430_s16  ;;  %5014 = vrcp.f32 %v3134_v56  ;;  %v3135_v60 = vadd.f32 1.0, %v5011_v33  ;;  %v5013_v23 = vpop.eup %5012 }
0x2387   : > { %5016 = vrcp.f32 %v3182_v63  ;;  %v3183_v40 = vadd.f32 1.0, %v5013_v23 }
0x2388   : > { %5018 = vrcp.f32 %v3135_v60 }
0x2389   : > { %5020 = vrcp.f32 %v3183_v40 }
0x2390   : > { %v5015_v47 = vpop.eup %5014 }
0x2391   : > { %v5017_v51 = vpop.eup %5016  ;;  %v3142_v30 = vmul.f32 %v5015_v47, %v6446_v13 }
0x2392   : > { %v5019_v38 = vpop.eup %5018  ;;  %v3190_v57 = vmul.f32 %v5017_v51, %v6451_v28 }
0x2393   : > { %v5021_v3 = vpop.eup %5020  ;;  %v3143_v15 = vmul.f32 %v5019_v38, %v6453_v16 }
0x2394   : > { %v3191_v13 = vmul.f32 %v5021_v3, %v6458_v29 }
0x23f2   : > { %v3147_v45 = vpop.permute.xlu1 %3146 }
0x23f3   : > { %v3152_v18 = vmul.f32 %v5015_v47, %v3147_v45 }
0x23f4   : > { %v3149_v53 = vpop.permute.xlu0 %3148 }
0x23f5   : > { %3156 = vrot.lane.b32.xlu1 %v3152_v18, %s5431_s19  ;;  %v3153_v22 = vmul.f32 %v5019_v38, %v3149_v53 }
0x23f6   : > { %v3195_v21 = vpop.permute.xlu1 %3194 }
0x23f7   : > { %v3200_v27 = vmul.f32 %v5017_v51, %v3195_v21  ;;  %3158 = vrot.lane.b32.xlu0 %v3153_v22, %s5431_s19 }
0x23f8   : > { %v3197_v54 = vpop.permute.xlu0 %3196 }
0x23f9   : > { %3204 = vrot.lane.b32.xlu1 %v3200_v27, %s5431_s19  ;;  %v3201_v55 = vmul.f32 %v5021_v3, %v3197_v54 }
0x23fb   : > { %3206 = vrot.lane.b32.xlu0 %v3201_v55, %s5431_s19 }
0x2467   : > { %v3157_v58 = vpop.permute.xlu1 %3156 }
0x2468   : > { %v6492_v1 = vadd.f32 %v3157_v58, %v3142_v30 }
0x2469   : > { %v3159_v37 = vpop.permute.xlu0 %3158 }
0x246a   : > { %5022 = vtanh.f32 %v6492_v1  ;;  %v6499_v20 = vadd.f32 %v3159_v37, %v3143_v15 }
0x246b   : > { %v3205_v4 = vpop.permute.xlu1 %3204 }
0x246c   : > { %v6497_v43 = vadd.f32 %v3205_v4, %v3190_v57 }
0x246d   : > { %v3207_v7 = vpop.permute.xlu0 %3206 }
0x246e   : > { %5024 = vtanh.f32 %v6497_v43  ;;  %v6504_v11 = vadd.f32 %v3207_v7, %v3191_v13 }
0x246f   : > { %5026 = vtanh.f32 %v6499_v20 }
0x2470   : > { %5028 = vtanh.f32 %v6504_v11 }
0x2474   : > { %v5023_v28 = vpop.eup %5022 }
0x2475   : > { %3168 = vrot.lane.b32.xlu1 %v5023_v28, %s5431_s19 }
0x2478   : > { %v5025_v16 = vpop.eup %5024 }
0x2479   : > { %v5027_v14 = vpop.eup %5026  ;;  %3216 = vrot.lane.b32.xlu1 %v5025_v16, %s5431_s19 }
0x247a   : > { %3170 = vrot.lane.b32.xlu0 %v5027_v14, %s5431_s19  ;;  %v5029_v48 = vpop.eup %5028 }
0x247e   : > { %3218 = vrot.lane.b32.xlu0 %v5029_v48, %s5431_s19 }
0x24e7   : > { %v3169_v10 = vpop.permute.xlu1 %3168 }
0x24e8   : > { %v3174_v29 = vmul.f32 %v5015_v47, %v3169_v10 }
0x24eb   : > { %v3217_v32 = vpop.permute.xlu1 %3216 }
0x24ec   : > { %v3171_v42 = vpop.permute.xlu0 %3170  ;;  %v3222_v9 = vmul.f32 %v5017_v51, %v3217_v32 }
0x24ed   : > { %v3175_v59 = vmul.f32 %v5019_v38, %v3171_v42 }
0x24ef   : > { %v4564_v44 = vpack.i.bf16 %v3175_v59, %v3174_v29 }
0x24f0   : > { %v3219_v24 = vpop.permute.xlu0 %3218 }
0x24f1   : > { %v3223_v17 = vmul.f32 %v5021_v3, %v3219_v24  ;;  %4565 = vrot.lane.b32.xlu1 %v4564_v44, %s5432_s20 }
0x24f3   : > { %v4569_v31 = vpack.i.bf16 %v3223_v17, %v3222_v9 }
0x24f5   : > { %4570 = vrot.lane.b32.xlu0 %v4569_v31, %s5433_s23 }
0x2563   : > { %v4566_v56 = vpop.permute.xlu1 %4565 }
0x2564   : > { %v4568_v33 = vunpack.i.h.bf16 %v4566_v56  ;;  %v4567_v63 = vunpack.i.l.bf16 %v4566_v56 }
0x2567   : > { %v4571_v19 = vpop.permute.xlu0 %4570 }
0x2568   : > { %v4573_v60 = vunpack.i.h.bf16 %v4571_v19  ;;  %v4572_v23 = vunpack.i.l.bf16 %v4571_v19 }
0x256a   : > { %v3241_v40 = vsel %vm879_vm1, %v4568_v33, %v4573_v60  ;;  %v3240_v47 = vsel %vm879_vm1, %v4567_v63, %v4572_v23 }
0x256b   : > { %v3242_v45 = vpack.c.bf16 %v3241_v40, %v3240_v47 }
0x256d   : > { %4314 = vmatmul.mubr.msk.bf16.vlgmr.msra.gmra.mrb[36].mxu1 %vm721_vm3, %v3242_v45 }
0x256e   : > { %4326 = vmatpush3.bf16.msra.mxu1 %v6470_v26  ;;  %4329 = vmatprep.mubr.msk.bf16.mxu1 %vm5426_vm0, %v5425_v0 }
0x256f   : > { %4327 = vmatprep.subr.bf16.mxu1 %v5425_v0 }
0x2572   : > { %4328 = vmatpush3.bf16.msra.mxu1 %v6476_v39 }
0x2640   : > { %v3280_v18 = vpop.f32.mrb[36].mxu1 }
0x2641   : > { %v3287_v51 = vadd.f32 %v3280_v18, %v6294_v49  ;;  %v4315_v21 = vpop.f32.mrb[37].mxu1  ;;  %v3289_v53 = vadd.f32 %v3280_v18, %v6288_v36 }
0x2642   : > { %v3283_v38 = vpop.f32.mrb[38].mxu1 }
0x2643   : > { %5030 = vtanh.f32 %v3287_v51  ;;  %v4316_v27 = vpop.f32.mrb[39].mxu1  ;;  %v3288_v22 = vadd.f32 %v3283_v38, %v6299_v61  ;;  %v3290_v26 = vadd.f32 %v3283_v38, %v6292_v35  ;;  %v4094_v36 = vmul.f32 -1.442695, %v3287_v51 }
0x2644   : > { %5032 = vtanh.f32 %v3289_v53  ;;  %v4096_v61 = vmul.f32 -1.442695, %v3289_v53 }
0x2645   : > { %5034 = vtanh.f32 %v3288_v22  ;;  %v4095_v54 = vmul.f32 -1.442695, %v3288_v22  ;;  %v4097_v35 = vmul.f32 -1.442695, %v3290_v26 }
0x2646   : > { %5036 = vtanh.f32 %v3290_v26 }
0x2647   : > { %5038 = vpow2.f32 %v4094_v36 }
0x2648   : > { %5040 = vpow2.f32 %v4096_v61 }
0x2649   : > { %5042 = vpow2.f32 %v4095_v54 }
0x264a   : > { %5044 = vpow2.f32 %v4097_v35 }
0x264d   : > { %v5031_v3 = vpop.eup %5030 }
0x264e   : > { %3309 = vrot.lane.b32.xlu1 %v5031_v3, %s5430_s16  ;;  %v5033_v0 = vpop.eup %5032 }
0x264f   : > { %v5035_v39 = vpop.eup %5034 }
0x2650   : > { %3311 = vrot.lane.b32.xlu0 %v5035_v39, %s5430_s16  ;;  %v5037_v49 = vpop.eup %5036 }
0x2651   : > { %v5039_v55 = vpop.eup %5038 }
0x2652   : > { %3357 = vrot.lane.b32.xlu1 %v5033_v0, %s5430_s16  ;;  %v3297_v30 = vadd.f32 1.0, %v5039_v55  ;;  %v5041_v58 = vpop.eup %5040 }
0x2653   : > { %v5043_v57 = vpop.eup %5042  ;;  %v3345_v15 = vadd.f32 1.0, %v5041_v58 }
0x2654   : > { %3359 = vrot.lane.b32.xlu0 %v5037_v49, %s5430_s16  ;;  %5046 = vrcp.f32 %v3297_v30  ;;  %v3298_v4 = vadd.f32 1.0, %v5043_v57  ;;  %v5045_v37 = vpop.eup %5044 }
0x2655   : > { %5048 = vrcp.f32 %v3345_v15  ;;  %v3346_v13 = vadd.f32 1.0, %v5045_v37 }
0x2656   : > { %5050 = vrcp.f32 %v3298_v4 }
0x2657   : > { %5052 = vrcp.f32 %v3346_v13 }
0x265e   : > { %v5047_v7 = vpop.eup %5046 }
0x265f   : > { %v5049_v14 = vpop.eup %5048  ;;  %v3305_v9 = vmul.f32 %v5047_v7, %v6492_v1 }
0x2660   : > { %v5051_v10 = vpop.eup %5050  ;;  %v3353_v56 = vmul.f32 %v5049_v14, %v6497_v43 }
0x2661   : > { %v5053_v32 = vpop.eup %5052  ;;  %v3306_v19 = vmul.f32 %v5051_v10, %v6499_v20 }
0x2662   : > { %v3354_v1 = vmul.f32 %v5053_v32, %v6504_v11 }
0x26c0   : > { %v3310_v28 = vpop.permute.xlu1 %3309 }
0x26c1   : > { %v3315_v16 = vmul.f32 %v5047_v7, %v3310_v28 }
0x26c2   : > { %v3312_v42 = vpop.permute.xlu0 %3311 }
0x26c3   : > { %3319 = vrot.lane.b32.xlu1 %v3315_v16, %s5431_s19  ;;  %v3316_v59 = vmul.f32 %v5051_v10, %v3312_v42 }
0x26c4   : > { %v3358_v48 = vpop.permute.xlu1 %3357 }
0x26c5   : > { %v3363_v29 = vmul.f32 %v5049_v14, %v3358_v48  ;;  %3321 = vrot.lane.b32.xlu0 %v3316_v59, %s5431_s19 }
0x26c6   : > { %v3360_v44 = vpop.permute.xlu0 %3359 }
0x26c7   : > { %3367 = vrot.lane.b32.xlu1 %v3363_v29, %s5431_s19  ;;  %v3364_v24 = vmul.f32 %v5053_v32, %v3360_v44 }
0x26c9   : > { %3369 = vrot.lane.b32.xlu0 %v3364_v24, %s5431_s19 }
0x2735   : > { %v3320_v17 = vpop.permute.xlu1 %3319 }
0x2736   : > { %v6534_v31 = vadd.f32 %v3320_v17, %v3305_v9 }
0x2737   : > { %v3322_v63 = vpop.permute.xlu0 %3321 }
0x2738   : > { %5054 = vtanh.f32 %v6534_v31  ;;  %v6541_v23 = vadd.f32 %v3322_v63, %v3306_v19 }
0x2739   : > { %v3368_v33 = vpop.permute.xlu1 %3367 }
0x273a   : > { %v6539_v60 = vadd.f32 %v3368_v33, %v3353_v56 }
0x273b   : > { %v3370_v40 = vpop.permute.xlu0 %3369 }
0x273c   : > { %5056 = vtanh.f32 %v6539_v60  ;;  %v6546_v47 = vadd.f32 %v3370_v40, %v3354_v1 }
0x273d   : > { %5058 = vtanh.f32 %v6541_v23 }
0x273e   : > { %5060 = vtanh.f32 %v6546_v47 }
0x2742   : > { %v5055_v43 = vpop.eup %5054 }
0x2743   : > { %3331 = vrot.lane.b32.xlu1 %v5055_v43, %s5431_s19 }
0x2746   : > { %v5057_v20 = vpop.eup %5056 }
0x2747   : > { %v5059_v45 = vpop.eup %5058  ;;  %3379 = vrot.lane.b32.xlu1 %v5057_v20, %s5431_s19 }
0x2748   : > { %3333 = vrot.lane.b32.xlu0 %v5059_v45, %s5431_s19  ;;  %v5061_v18 = vpop.eup %5060 }
0x274c   : > { %3381 = vrot.lane.b32.xlu0 %v5061_v18, %s5431_s19 }
0x27b5   : > { %v3332_v51 = vpop.permute.xlu1 %3331 }
0x27b6   : > { %v3337_v11 = vmul.f32 %v5047_v7, %v3332_v51 }
0x27b9   : > { %v3380_v53 = vpop.permute.xlu1 %3379 }
0x27ba   : > { %v3334_v21 = vpop.permute.xlu0 %3333  ;;  %v3385_v26 = vmul.f32 %v5049_v14, %v3380_v53 }
0x27bb   : > { %v3338_v38 = vmul.f32 %v5051_v10, %v3334_v21 }
0x27bd   : > { %v4574_v27 = vpack.i.bf16 %v3338_v38, %v3337_v11 }
0x27be   : > { %v3382_v22 = vpop.permute.xlu0 %3381 }
0x27bf   : > { %v3386_v3 = vmul.f32 %v5053_v32, %v3382_v22  ;;  %4575 = vrot.lane.b32.xlu1 %v4574_v27, %s5432_s20 }
0x27c1   : > { %v4579_v0 = vpack.i.bf16 %v3386_v3, %v3385_v26 }
0x27c3   : > { %4580 = vrot.lane.b32.xlu0 %v4579_v0, %s5433_s23 }
0x2831   : > { %v4576_v39 = vpop.permute.xlu1 %4575 }
0x2832   : > { %v4578_v36 = vunpack.i.h.bf16 %v4576_v39  ;;  %v4577_v61 = vunpack.i.l.bf16 %v4576_v39 }
0x2835   : > { %v4581_v49 = vpop.permute.xlu0 %4580 }
0x2836   : > { %v4583_v54 = vunpack.i.h.bf16 %v4581_v49  ;;  %v4582_v35 = vunpack.i.l.bf16 %v4581_v49 }
0x2838   : > { %v3404_v55 = vsel %vm879_vm1, %v4578_v36, %v4583_v54  ;;  %v3403_v30 = vsel %vm879_vm1, %v4577_v61, %v4582_v35 }
0x2839   : > { %v3405_v58 = vpack.c.bf16 %v3404_v55, %v3403_v30 }
0x283b   : > { %4322 = vmatmul.mubr.msk.bf16.vlgmr.msra.gmra.mrb[32].mxu0 %vm721_vm3, %v3405_v58 }
0x290e   : > { %v3443_v57 = vpop.f32.mrb[32].mxu0 }
0x290f   : > { %v3450_v15 = vadd.f32 %v3443_v57, %v6306_v46  ;;  %v4323_v4 = vpop.f32.mrb[33].mxu0  ;;  %v3452_v13 = vadd.f32 %v3443_v57, %v6276_v12 }
0x2910   : > { %v3446_v37 = vpop.f32.mrb[34].mxu0 }
0x2911   : > { %5062 = vtanh.f32 %v3450_v15  ;;  %v4324_v7 = vpop.f32.mrb[35].mxu0  ;;  %v3451_v28 = vadd.f32 %v3446_v37, %v6311_v6  ;;  %v3453_v16 = vadd.f32 %v3446_v37, %v6280_v50  ;;  %v4099_v12 = vmul.f32 -1.442695, %v3450_v15 }
0x2912   : > { %5064 = vtanh.f32 %v3452_v13  ;;  %v4101_v6 = vmul.f32 -1.442695, %v3452_v13 }
0x2913   : > { %5066 = vtanh.f32 %v3451_v28  ;;  %v4100_v42 = vmul.f32 -1.442695, %v3451_v28  ;;  %v4102_v50 = vmul.f32 -1.442695, %v3453_v16 }
0x2914   : > { %5068 = vtanh.f32 %v3453_v16 }
0x2915   : > { %5070 = vpow2.f32 %v4099_v12 }
0x2916   : > { %5072 = vpow2.f32 %v4101_v6 }
0x2917   : > { %5074 = vpow2.f32 %v4100_v42 }
0x2918   : > { %5076 = vpow2.f32 %v4102_v50 }
0x291b   : > { %v5063_v14 = vpop.eup %5062 }
0x291c   : > { %3472 = vrot.lane.b32.xlu1 %v5063_v14, %s5430_s16  ;;  %v5065_v48 = vpop.eup %5064 }
0x291d   : > { %v5067_v10 = vpop.eup %5066 }
0x291e   : > { %3474 = vrot.lane.b32.xlu0 %v5067_v10, %s5430_s16  ;;  %v5069_v46 = vpop.eup %5068 }
0x291f   : > { %v5071_v29 = vpop.eup %5070 }
0x2920   : > { %3520 = vrot.lane.b32.xlu1 %v5065_v48, %s5430_s16  ;;  %v3460_v59 = vadd.f32 1.0, %v5071_v29  ;;  %v5073_v32 = vpop.eup %5072 }
0x2921   : > { %v5075_v44 = vpop.eup %5074  ;;  %v3508_v24 = vadd.f32 1.0, %v5073_v32 }
0x2922   : > { %3522 = vrot.lane.b32.xlu0 %v5069_v46, %s5430_s16  ;;  %5078 = vrcp.f32 %v3460_v59  ;;  %v3461_v9 = vadd.f32 1.0, %v5075_v44  ;;  %v5077_v17 = vpop.eup %5076 }
0x2923   : > { %5080 = vrcp.f32 %v3508_v24  ;;  %v3509_v56 = vadd.f32 1.0, %v5077_v17 }
0x2924   : > { %5082 = vrcp.f32 %v3461_v9 }
0x2925   : > { %5084 = vrcp.f32 %v3509_v56 }
0x292c   : > { %v5079_v19 = vpop.eup %5078 }
0x292d   : > { %v5081_v1 = vpop.eup %5080  ;;  %v3468_v38 = vmul.f32 %v5079_v19, %v6534_v31 }
0x292e   : > { %v5083_v43 = vpop.eup %5082  ;;  %v3516_v22 = vmul.f32 %v5081_v1, %v6539_v60 }
0x292f   : > { %v5085_v51 = vpop.eup %5084  ;;  %v3469_v26 = vmul.f32 %v5083_v43, %v6541_v23 }
0x2930   : > { %v3517_v31 = vmul.f32 %v5085_v51, %v6546_v47 }
0x298e   : > { %v3473_v33 = vpop.permute.xlu1 %3472 }
0x298f   : > { %v3478_v63 = vmul.f32 %v5079_v19, %v3473_v33 }
0x2990   : > { %v3475_v20 = vpop.permute.xlu0 %3474 }
0x2991   : > { %3482 = vrot.lane.b32.xlu1 %v3478_v63, %s5431_s19  ;;  %v3479_v18 = vmul.f32 %v5083_v43, %v3475_v20 }
0x2992   : > { %v3521_v40 = vpop.permute.xlu1 %3520 }
0x2993   : > { %v3526_v45 = vmul.f32 %v5081_v1, %v3521_v40  ;;  %3484 = vrot.lane.b32.xlu0 %v3479_v18, %s5431_s19 }
0x2994   : > { %v3523_v21 = vpop.permute.xlu0 %3522 }
0x2995   : > { %3530 = vrot.lane.b32.xlu1 %v3526_v45, %s5431_s19  ;;  %v3527_v11 = vmul.f32 %v5085_v51, %v3523_v21 }
0x2997   : > { %3532 = vrot.lane.b32.xlu0 %v3527_v11, %s5431_s19 }
0x2a03   : > { %v3483_v53 = vpop.permute.xlu1 %3482 }
0x2a04   : > { %v6571_v27 = vadd.f32 %v3483_v53, %v3468_v38 }
0x2a05   : > { %v3485_v0 = vpop.permute.xlu0 %3484 }
0x2a06   : > { %5086 = vtanh.f32 %v6571_v27  ;;  %v6578_v49 = vadd.f32 %v3485_v0, %v3469_v26 }
0x2a07   : > { %v3531_v3 = vpop.permute.xlu1 %3530 }
0x2a08   : > { %v6576_v39 = vadd.f32 %v3531_v3, %v3516_v22 }
0x2a09   : > { %v3533_v36 = vpop.permute.xlu0 %3532 }
0x2a0a   : > { %5088 = vtanh.f32 %v6576_v39  ;;  %v6583_v61 = vadd.f32 %v3533_v36, %v3517_v31 }
0x2a0b   : > { %5090 = vtanh.f32 %v6578_v49 }
0x2a0c   : > { %5092 = vtanh.f32 %v6583_v61 }
0x2a10   : > { %v5087_v60 = vpop.eup %5086 }
0x2a11   : > { %3494 = vrot.lane.b32.xlu1 %v5087_v60, %s5431_s19 }
0x2a14   : > { %v5089_v23 = vpop.eup %5088 }
0x2a15   : > { %v5091_v54 = vpop.eup %5090  ;;  %3542 = vrot.lane.b32.xlu1 %v5089_v23, %s5431_s19 }
0x2a16   : > { %3496 = vrot.lane.b32.xlu0 %v5091_v54, %s5431_s19  ;;  %v5093_v35 = vpop.eup %5092 }
0x2a1a   : > { %3544 = vrot.lane.b32.xlu0 %v5093_v35, %s5431_s19 }
0x2a83   : > { %v3495_v55 = vpop.permute.xlu1 %3494 }
0x2a84   : > { %v3500_v47 = vmul.f32 %v5079_v19, %v3495_v55 }
0x2a87   : > { %v3543_v57 = vpop.permute.xlu1 %3542 }
0x2a88   : > { %v3497_v30 = vpop.permute.xlu0 %3496  ;;  %v3548_v37 = vmul.f32 %v5081_v1, %v3543_v57 }
0x2a89   : > { %v3501_v58 = vmul.f32 %v5083_v43, %v3497_v30 }
0x2a8b   : > { %v4584_v15 = vpack.i.bf16 %v3501_v58, %v3500_v47 }
0x2a8c   : > { %v3545_v4 = vpop.permute.xlu0 %3544 }
0x2a8d   : > { %v3549_v13 = vmul.f32 %v5085_v51, %v3545_v4  ;;  %4585 = vrot.lane.b32.xlu1 %v4584_v15, %s5432_s20 }
0x2a8f   : > { %v4589_v7 = vpack.i.bf16 %v3549_v13, %v3548_v37 }
0x2a91   : > { %4590 = vrot.lane.b32.xlu0 %v4589_v7, %s5433_s23 }
0x2aff   : > { %v4586_v28 = vpop.permute.xlu1 %4585 }
0x2b00   : > { %v4588_v14 = vunpack.i.h.bf16 %v4586_v28  ;;  %v4587_v48 = vunpack.i.l.bf16 %v4586_v28 }
0x2b03   : > { %v4591_v16 = vpop.permute.xlu0 %4590 }
0x2b04   : > { %v4593_v10 = vunpack.i.h.bf16 %v4591_v16  ;;  %v4592_v46 = vunpack.i.l.bf16 %v4591_v16  ;;  %v3729_v16 = vld [vmem:[#allocation16 + $0x8] sm:$0xff] }
0x2b06   : > { %v3567_v12 = vsel %vm879_vm1, %v4588_v14, %v4593_v10  ;;  %v3566_v6 = vsel %vm879_vm1, %v4587_v48, %v4592_v46  ;;  %v3730_v14 = vld [vmem:[#allocation16 + $0x10] sm:$0xff]  ;;  %v3731_v10 = vld [vmem:[#allocation16 + $0x18] sm:$0xff] }
0x2b07   : > { %v3568_v42 = vpack.c.bf16 %v3567_v12, %v3566_v6  ;;  %v3732_v12 = vld [vmem:[#allocation16 + $0x20] sm:$0xff] }
0x2b09   : > { %4330 = vmatmul.mubr.msk.bf16.vlgmr.msra.gmra.mrb[40].mxu1 %vm721_vm3, %v3568_v42 }
0x2bdc   : > { %v3606_v50 = vpop.f32.mrb[40].mxu1 }
0x2bdd   : > { %v3615_v29 = vadd.f32 %v3606_v50, %v6278_v25  ;;  %v4331_v59 = vpop.f32.mrb[41].mxu1  ;;  %v3613_v24 = vadd.f32 %v3606_v50, %v6304_v2  ;;  %v3735_v50 = vld [vmem:[#allocation16 + $0x38] sm:$0xff] }
0x2bde   : > { %v3609_v32 = vpop.f32.mrb[42].mxu1 }
0x2bdf   : > { %v4332_v44 = vpop.f32.mrb[43].mxu1  ;;  %5094 = vtanh.f32 %v3615_v29  ;;  %v3616_v9 = vadd.f32 %v3609_v32, %v6282_v52  ;;  %v3614_v17 = vadd.f32 %v3609_v32, %v6309_v5  ;;  %v4106_v2 = vmul.f32 -1.442695, %v3615_v29 }
0x2be0   : > { %5096 = vtanh.f32 %v3613_v24  ;;  %v4104_v63 = vmul.f32 -1.442695, %v3613_v24 }
0x2be1   : > { %5098 = vtanh.f32 %v3616_v9  ;;  %v4107_v52 = vmul.f32 -1.442695, %v3616_v9  ;;  %v4105_v5 = vmul.f32 -1.442695, %v3614_v17 }
0x2be2   : > { %5100 = vtanh.f32 %v3614_v17 }
0x2be3   : > { %5102 = vpow2.f32 %v4106_v2 }
0x2be4   : > { %5104 = vpow2.f32 %v4104_v63 }
0x2be5   : > { %5106 = vpow2.f32 %v4107_v52 }
0x2be6   : > { %5108 = vpow2.f32 %v4105_v5 }
0x2be9   : > { %v5095_v56 = vpop.eup %5094 }
0x2bea   : > { %3683 = vrot.lane.b32.xlu1 %v5095_v56, %s5430_s16  ;;  %v5097_v19 = vpop.eup %5096 }
0x2beb   : > { %v5099_v25 = vpop.eup %5098 }
0x2bec   : > { %3685 = vrot.lane.b32.xlu0 %v5099_v25, %s5430_s16  ;;  %v5101_v33 = vpop.eup %5100  ;;  %v3721_v25 = vsel %vm879_vm1, %v6250_v8, %v6246_v41 }
0x2bed   : > { %v5103_v1 = vpop.eup %5102 }
0x2bee   : > { %3635 = vrot.lane.b32.xlu1 %v5097_v19, %s5430_s16  ;;  %v3671_v40 = vadd.f32 1.0, %v5103_v1  ;;  %v5105_v43 = vpop.eup %5104  ;;  %v3722_v1 = vsel %vm879_vm1, %v6258_v34, %v6254_v62 }
0x2bef   : > { %v5107_v20 = vpop.eup %5106  ;;  %v3623_v45 = vadd.f32 1.0, %v5105_v43 }
0x2bf0   : > { %3637 = vrot.lane.b32.xlu0 %v5101_v33, %s5430_s16  ;;  %5110 = vrcp.f32 %v3671_v40  ;;  %v3672_v18 = vadd.f32 1.0, %v5107_v20  ;;  %v5109_v51 = vpop.eup %5108 }
0x2bf1   : > { %5112 = vrcp.f32 %v3623_v45  ;;  %v3624_v21 = vadd.f32 1.0, %v5109_v51 }
0x2bf2   : > { %5114 = vrcp.f32 %v3672_v18 }
0x2bf3   : > { %5116 = vrcp.f32 %v3624_v21 }
0x2bfa   : > { %v5111_v11 = vpop.eup %5110 }
0x2bfb   : > { %v6604_v22 = vpop.eup %5112  ;;  %v3679_v35 = vmul.f32 %v5111_v11, %v6576_v39  ;;  %v3728_v39 = vld [vmem:[#allocation16] sm:$0xff] }
0x2bfc   : > { %v5115_v0 = vpop.eup %5114  ;;  %v3631_v47 = vmul.f32 %v6604_v22, %v6571_v27  ;;  %v4352_v48 = vpack.c.bf16 %v3729_v16, %v3728_v39  ;;  %v4356_v27 = vpack.c.bf16 %v3731_v10, %v3730_v14 }
0x2bfd   : > { %v6609_v60 = vpop.eup %5116  ;;  %v3680_v57 = vmul.f32 %v5115_v0, %v6583_v61  ;;  %v3733_v61 = vld [vmem:[#allocation16 + $0x28] sm:$0xff] }
0x2bfe   : > { %v3632_v13 = vmul.f32 %v6609_v60, %v6578_v49  ;;  %4353 = vmatprep.subr.bf16.mxu0 %v4352_v48  ;;  %v4360_v6 = vpack.c.bf16 %v3733_v61, %v3732_v12  ;;  %v3734_v49 = vld [vmem:[#allocation16 + $0x30] sm:$0xff] }
0x2bff   : > { %4355 = vmatpush3.bf16.msra.mxu0 %v4352_v48  ;;  %v4364_v59 = vpack.c.bf16 %v3735_v50, %v3734_v49 }
0x2c00   : > { %4357 = vmatprep.subr.bf16.mxu0 %v4356_v27 }
0x2c03   : > { %4359 = vmatpush3.bf16.msra.mxu0 %v4356_v27 }
0x2c04   : > { %4361 = vmatprep.subr.bf16.mxu0 %v4360_v6 }
0x2c07   : > { %4363 = vmatpush3.bf16.msra.mxu0 %v4360_v6 }
0x2c08   : > { %4365 = vmatprep.subr.bf16.mxu0 %v4364_v59 }
0x2c0b   : > { %4367 = vmatpush3.bf16.msra.mxu0 %v4364_v59 }
0x2c5c   : > { %v3684_v38 = vpop.permute.xlu1 %3683 }
0x2c5d   : > { %v3689_v53 = vmul.f32 %v5111_v11, %v3684_v38 }
0x2c5e   : > { %v3686_v31 = vpop.permute.xlu0 %3685 }
0x2c5f   : > { %3693 = vrot.lane.b32.xlu1 %v3689_v53, %s5431_s19  ;;  %v3690_v36 = vmul.f32 %v5115_v0, %v3686_v31 }
0x2c60   : > { %v3636_v26 = vpop.permute.xlu1 %3635 }
0x2c61   : > { %v3641_v3 = vmul.f32 %v6604_v22, %v3636_v26  ;;  %3695 = vrot.lane.b32.xlu0 %v3690_v36, %s5431_s19 }
0x2c62   : > { %v3638_v23 = vpop.permute.xlu0 %3637 }
0x2c63   : > { %3645 = vrot.lane.b32.xlu1 %v3641_v3, %s5431_s19  ;;  %v3642_v54 = vmul.f32 %v6609_v60, %v3638_v23 }
0x2c65   : > { %3647 = vrot.lane.b32.xlu0 %v3642_v54, %s5431_s19 }
0x2cd1   : > { %v3694_v55 = vpop.permute.xlu1 %3693 }
0x2cd2   : > { %v3699_v30 = vadd.f32 %v3694_v55, %v3679_v35 }
0x2cd3   : > { %v3696_v4 = vpop.permute.xlu0 %3695 }
0x2cd4   : > { %5118 = vtanh.f32 %v3699_v30  ;;  %v3700_v37 = vadd.f32 %v3696_v4, %v3680_v57 }
0x2cd5   : > { %v3646_v58 = vpop.permute.xlu1 %3645 }
0x2cd6   : > { %v3651_v15 = vadd.f32 %v3646_v58, %v3631_v47 }
0x2cd7   : > { %v3648_v7 = vpop.permute.xlu0 %3647 }
0x2cd8   : > { %5120 = vtanh.f32 %v3651_v15  ;;  %v3652_v28 = vadd.f32 %v3648_v7, %v3632_v13 }
0x2cd9   : > { %5122 = vtanh.f32 %v3700_v37 }
0x2cda   : > { %5124 = vtanh.f32 %v3652_v28 }
0x2cde   : > { %v5119_v46 = vpop.eup %5118 }
0x2cdf   : > { %3705 = vrot.lane.b32.xlu1 %v5119_v46, %s5431_s19 }
0x2ce2   : > { %v5121_v42 = vpop.eup %5120 }
0x2ce3   : > { %3657 = vrot.lane.b32.xlu1 %v5121_v42, %s5431_s19  ;;  %v5123_v29 = vpop.eup %5122 }
0x2ce4   : > { %3707 = vrot.lane.b32.xlu0 %v5123_v29, %s5431_s19  ;;  %v5125_v32 = vpop.eup %5124 }
0x2ce8   : > { %3659 = vrot.lane.b32.xlu0 %v5125_v32, %s5431_s19 }
0x2d51   : > { %v3706_v44 = vpop.permute.xlu1 %3705 }
0x2d52   : > { %v3711_v24 = vmul.f32 %v5111_v11, %v3706_v44 }
0x2d54   : > { %3715 = vrot.lane.b32.xlu1 %v3711_v24, %s5430_s16 }
0x2d55   : > { %v3658_v56 = vpop.permute.xlu1 %3657 }
0x2d56   : > { %v3708_v9 = vpop.permute.xlu0 %3707  ;;  %v3663_v19 = vmul.f32 %v6604_v22, %v3658_v56 }
0x2d57   : > { %v3712_v17 = vmul.f32 %v5115_v0, %v3708_v9 }
0x2d58   : > { %v3723_v2 = vsel %vm721_vm3, %v3721_v25, %v3663_v19 }
0x2d59   : > { %3717 = vrot.lane.b32.xlu0 %v3712_v17, %s5430_s16 }
0x2d5a   : > { %v3660_v33 = vpop.permute.xlu0 %3659 }
0x2d5b   : > { %v3664_v5 = vmul.f32 %v6609_v60, %v3660_v33 }
0x2d5d   : > { %v3724_v40 = vsel %vm721_vm3, %v3722_v1, %v3664_v5 }
0x2dc6   : > { %v3716_v63 = vpop.permute.xlu1 %3715 }
0x2dc7   : > { %v3726_v52 = vsel %vm3725_vm4, %v3723_v2, %v3716_v63 }
0x2dc8   : > { %4349 = vmatprep.mubr.msk.f32.mxu0 %vm3736_vm5, %v3726_v52 }
0x2dcb   : > { %v3718_v43 = vpop.permute.xlu0 %3717 }
0x2dcc   : > { %v3727_v20 = vsel %vm3725_vm4, %v3724_v40, %v3718_v43 }
0x2dcd   : > { %4350 = vmatmul.mubr.msk.f32.vlgmr.msra.gmra.mrb[36].mxu0 %vm3736_vm5, %v3727_v20 }
0x2ea0   : > { %v4351_v41 = vpop.f32.mrb[36].mxu0 }
0x2ea1   : > { %3820 = vst.msk [vmem:[%s444_s17 + $0x8] sm:$0xff] %vm3818_vm6, %v4351_v41  ;;  %v3809_v8 = vpop.f32.mrb[37].mxu0 }
0x2ea2   : > { %3819 = vst.msk [vmem:[%s444_s17] sm:$0xff] %vm3818_vm6, %v3809_v8 }
0x2ea3   : > { %5337 = shalt.err (!%p5334_p11)
}
0x2ea4   : > { %s5338_s26 = scalar_lea.hbm %s6642_s9, 256  ;;  %s5342_s19 = scalar_lea.hbm %s6738_s18, 512 }
0x2ea5   : > { %p5339_p12 = scmp.ne.s32.totalorder %s6642_s9, %s5338_s26  ;;  %p5343_p8 = scmp.lt.u32.totalorder %s6642_s9, %s6738_s18 }
0x2ea6   : > { %p5344_p9 = scmp.lt.u32.totalorder %s5342_s19, %s5338_s26  ;;  %p5346_p0 = scmp.lt.u32.totalorder %s5338_s26, %s6642_s9 }
0x2ea7   : > { %p5340_p13 = pnand %p5339_p12, %p6739_p1 }
0x2ea8   : > { %p5345_p10 = por %p5344_p9, %p5343_p8 }
0x2ea9   : > { %p5341_p7 = pneg %p5340_p13 }
0x2eaa   : > { %p5347_p3 = por %p5346_p0, %p5345_p10 }
0x2eac   : > { %p5348_p2 = pnand %p5347_p3, %p5341_p7 }
0x2eae   : > { %5351 = shalt.err (!%p5348_p2)
}
0x2eaf   : > { %s5435_s1 = smov 128   ;;  %s5436_s17 = smov 8  }
0x2eb0   : > { %4405 = dma.vmem_to_hbm [thread:$0]  (%p6739_p1), %s6637_s12, 256, %s6642_s9, %s3822_s25, %s5435_s1, %s5435_s1, %s5436_s17  }
0x2eb1 PF: > { %s6740_s14 = sld [smem:[#allocation28_spill]]  ;;  %s6741_s13 = sld [smem:[#allocation33_spill]] }
0x2eb7   : > { %s3850_s11 = sand.u32 1, %s6740_s14   ;;  %p6742_p6 = scmp.ne.s32.totalorder %s6741_s13, 0 }
0x2eb8   : > { %s3851_s21 = scalar_lea.sflag [#allocation6], %s3850_s11 }
0x2eb9   : > { %p4430_p5 = pnand %p3984_p4, %p6742_p6 }
0x2ebb   : > { %5389 = dma.done.wait (!%p4430_p5), %s3851_s21, 256  }
0x2ebc   : > { %5391 = vsyncadd (!%p4430_p5), %s3851_s21, 4294967040  ;;  %s6743_s30 = sld [smem:[#allocation30_spill]]  ;;  %s6744_s10 = sld [smem:[#allocation31_spill]] }
0x2ebd   : > { %s6745_s27 = smov %s5398_s28  ;;  %s6746_s28 = smov %s5402_s29 }
0x2ec2   : > { %p25_p11 = scmp.ge.s32.totalorder %s6743_s30, 4   ;;  %s6747_s29 = smov %s6744_s10 }
0x2ec4   :  { %27 = sbr.rel (!%p25_p11) target bundleno = 12 (0xc), region = 144 }
0x2ecb   :  { %3856 = vsyncpa [#allocation5], 1 }
0x2ecc   :  { %3858 = vsyncpa [#allocation5 + $0x1], 1 }
0x2ecd   :  { %3859 = vsyncpa [#allocation8], 1 }
0x2ece   :  { %3860 = vsyncpa [#allocation11], 1 }
0x2ecf   :  { %3861 = vsyncpa [#allocation14], 1 }
0x2ed0   :  { %3862 = vsyncpa [#allocation17], 1 }
0x2ed1   :  { %3863 = vsyncpa [#allocation6], 1 }
0x2ed2   :  { %3865 = vsyncpa [#allocation6 + $0x1], 1 }

</bundles_post_ra>
